<compile_context>
chip_gen: v7x
topology: tpu7x:2x2x1
jax: 0.10.0
libtpu: 0.0.40
codegen_flags: <defaults>
</compile_context>

<pallas_src>
import itertools
import math

import jax
import jax.numpy as jnp
from jax import lax
from jax.experimental import pallas as pl
from jax.experimental.pallas import tpu as pltpu

LANES = 128  # TPU vreg lane width; all channel / feature dims are padded to this.


# ------------------------------ fused kernel --------------------------------

def _make_fused_kernel(H, W, C_in, P1, Q1, W2v, P2, Q2):
    """Builds the fused forward kernel for one batch element (one grid step)."""
    K = 5  # conv kernel size (stride 1, padding 2)

    def kernel(x_ref, w1_ref, b1_ref, w2_ref, b2_ref,
               wf1_ref, bf1_ref, wf2_ref, bf2_ref, wf3_ref, bf3_ref,
               o_ref,
               xpad_ref, h1_ref, ymax_ref, c2in_ref, h2_ref):
        f32 = jnp.float32

        # ---- stage 0: spatially zero-pad the input inside the kernel --------
        xpad_ref[...] = jnp.zeros((H + 4, W + 4, C_in), f32)
        xpad_ref[2:2 + H, 2:2 + W, :] = x_ref[...]

        # ---- conv1 (5x5, SAME) + bias + relu: 25 in-kernel im2col taps ------
        acc1 = jnp.zeros((H * W, LANES), f32)
        for t, (kh, kw) in enumerate(itertools.product(range(K), range(K))):
            tap = xpad_ref[kh:kh + H, kw:kw + W, :].reshape(H * W, C_in)
            acc1 = acc1 + jnp.dot(tap, w1_ref[t], preferred_element_type=f32)
        h1_ref[...] = jnp.maximum(acc1 + b1_ref[...], 0.0).reshape(H, W, LANES)

        # ---- pool1: MaxPool(3, stride 2), fused into conv2's input buffer ---
        # (a) max over 3 rows (H), stride 2
        for yo in range(P1):
            r = 2 * yo
            ymax_ref[yo:yo + 1, :, :] = jnp.maximum(
                jnp.maximum(h1_ref[r:r + 1, :, :], h1_ref[r + 1:r + 2, :, :]),
                h1_ref[r + 2:r + 3, :, :])
        # (b) max over 3 cols (W), stride 2, written into the interior of the
        #     zero-padded conv2 input (conv2 SAME padding comes for free).
        c2in_ref[...] = jnp.zeros((P1 + 4, W2v + 4, LANES), f32)
        for xo in range(Q1):
            c = 2 * xo
            c2in_ref[2:2 + P1, 2 + xo:3 + xo, :] = jnp.maximum(
                jnp.maximum(ymax_ref[:, c:c + 1, :], ymax_ref[:, c + 1:c + 2, :]),
                ymax_ref[:, c + 2:c + 3, :])

        # dropout(p=0.5) is the identity at inference time.
        # TODO(synk): training-mode dropout mask (p=0.5) not implemented.

        # ---- conv2 (5x5, SAME) + bias + relu on a lane-friendly W2v grid ----
        acc2 = jnp.zeros((P1 * W2v, LANES), f32)
        for t, (kh, kw) in enumerate(itertools.product(range(K), range(K))):
            tap = c2in_ref[kh:kh + P1, kw:kw + W2v, :].reshape(P1 * W2v, LANES)
            acc2 = acc2 + jnp.dot(tap, w2_ref[t], preferred_element_type=f32)
        h2_ref[...] = jnp.maximum(acc2 + b2_ref[...], 0.0)

        # ---- pool2 + NCHW flatten + fc1, fused (pooled tensor never stored) -
        fc1_acc = bf1_ref[...]                                  # (1, 128)
        for yo in range(P2):
            for xo in range(Q2):
                s = yo * Q2 + xo
                base = (2 * yo) * W2v + 2 * xo
                pv = h2_ref[base:base + 1, :]
                for dy in range(3):
                    for dx in range(3):
                        if dy == 0 and dx == 0:
                            continue
                        r = base + dy * W2v + dx
                        pv = jnp.maximum(pv, h2_ref[r:r + 1, :])
                fc1_acc = fc1_acc + jnp.dot(pv, wf1_ref[s],
                                            preferred_element_type=f32)

        # ---- fc1 relu -> fc2 relu -> fc_logits ------------------------------
        h = jnp.maximum(fc1_acc, 0.0)
        h = jnp.maximum(
            jnp.dot(h, wf2_ref[...], preferred_element_type=f32) + bf2_ref[...],
            0.0)
        o_ref[0] = (jnp.dot(h, wf3_ref[...], preferred_element_type=f32)
                    + bf3_ref[...])

    return kernel


# ------------------------------- wrapper -------------------------------------

def _pad_last(a, n):
    return jnp.pad(a, [(0, 0)] * (a.ndim - 1) + [(0, n - a.shape[-1])])


def conv_model_forward(params, x_nchw):
    """Forward pass matching ConvolutionalModel.forward (inference mode)."""
    N, C_in, H, W = x_nchw.shape
    C1 = params["conv1_w"].shape[-1]
    C2 = params["conv2_w"].shape[-1]
    F1 = params["fc1_w"].shape[-1]
    F2 = params["fc2_w"].shape[-1]
    NC = params["fc3_w"].shape[-1]

    P1 = (H - 3) // 2 + 1           # pool1 output height
    Q1 = (W - 3) // 2 + 1           # pool1 output width
    P2 = (P1 - 3) // 2 + 1          # pool2 output height
    Q2 = (Q1 - 3) // 2 + 1          # pool2 output width
    W2v = -(-Q1 // 8) * 8           # conv2 virtual grid width (8-aligned)

    assert W % 8 == 0, "input width must be a multiple of 8"
    assert max(C1, C2, F1, F2, NC) <= LANES
    assert params["fc1_w"].shape[0] == C2 * P2 * Q2

    x = jnp.transpose(x_nchw, (0, 2, 3, 1)).astype(jnp.float32)   # NCHW -> NHWC

    # ---- pack weights lane-dense (feature dims zero-padded to 128) ----------
    w1p = _pad_last(params["conv1_w"].reshape(25, C_in, C1), LANES)
    b1p = _pad_last(params["conv1_b"], LANES).reshape(1, LANES)
    w2p = _pad_last(
        jnp.pad(params["conv2_w"].reshape(25, C1, C2),
                ((0, 0), (0, LANES - C1), (0, 0))), LANES)
    b2p = _pad_last(params["conv2_b"], LANES).reshape(1, LANES)
    # fc1 weights regrouped to match torch's NCHW flatten order (c, y, x):
    #   wf1p[s, c, f] = fc1_w[c * (P2*Q2) + s, f]
    wf1 = jnp.transpose(params["fc1_w"].reshape(C2, P2 * Q2, F1), (1, 0, 2))
    wf1p = _pad_last(jnp.pad(wf1, ((0, 0), (0, LANES - C2), (0, 0))), LANES)
    bf1p = _pad_last(params["fc1_b"], LANES).reshape(1, LANES)
    wf2p = _pad_last(jnp.pad(params["fc2_w"], ((0, LANES - F1), (0, 0))), LANES)
    bf2p = _pad_last(params["fc2_b"], LANES).reshape(1, LANES)
    wf3p = _pad_last(jnp.pad(params["fc3_w"], ((0, LANES - F2), (0, 0))), LANES)
    bf3p = _pad_last(params["fc3_b"], LANES).reshape(1, LANES)

    kernel = _make_fused_kernel(H, W, C_in, P1, Q1, W2v, P2, Q2)

    def whole(shape):
        return pl.BlockSpec(shape, lambda n, _r=len(shape): (0,) * _r)

    out = pl.pallas_call(
        kernel,
        out_shape=jax.ShapeDtypeStruct((N, 1, LANES), jnp.float32),
        grid=(N,),
        in_specs=[
            pl.BlockSpec((None, H, W, C_in), lambda n: (n, 0, 0, 0)),
            whole((25, C_in, LANES)),
            whole((1, LANES)),
            whole((25, LANES, LANES)),
            whole((1, LANES)),
            whole((P2 * Q2, LANES, LANES)),
            whole((1, LANES)),
            whole((LANES, LANES)),
            whole((1, LANES)),
            whole((LANES, LANES)),
            whole((1, LANES)),
        ],
        out_specs=pl.BlockSpec((1, 1, LANES), lambda n: (n, 0, 0)),
        scratch_shapes=[
            pltpu.VMEM((H + 4, W + 4, C_in), jnp.float32),      # padded input
            pltpu.VMEM((H, W, LANES), jnp.float32),             # conv1+relu out
            pltpu.VMEM((P1, W, LANES), jnp.float32),            # pool1 row-max
            pltpu.VMEM((P1 + 4, W2v + 4, LANES), jnp.float32),  # conv2 padded in
            pltpu.VMEM((P1 * W2v, LANES), jnp.float32),         # conv2+relu out
        ],
        compiler_params=pltpu.CompilerParams(
            dimension_semantics=("parallel",)),
    )(x, w1p, b1p, w2p, b2p, wf1p, bf1p, wf2p, bf2p, wf3p, bf3p)

    return out.reshape(N, LANES)[:, :NC]


# ----------------------------- parameters / ref -------------------------------

def init_params(key, conv1_width, conv2_width, in_channels, fc1_width,
                class_count, fc1_input_size):
    ks = jax.random.split(key, 10)

    def u(k, shape, fan_in):
        bound = 1.0 / math.sqrt(fan_in)
        return jax.random.uniform(k, shape, jnp.float32, -bound, bound)

    return {
        # conv weights in HWIO layout (kh, kw, Cin, Cout); fc weights (in, out)
        "conv1_w": u(ks[0], (5, 5, in_channels, conv1_width), 5 * 5 * in_channels),
        "conv1_b": u(ks[1], (conv1_width,), 5 * 5 * in_channels),
        "conv2_w": u(ks[2], (5, 5, conv1_width, conv2_width), 5 * 5 * conv1_width),
        "conv2_b": u(ks[3], (conv2_width,), 5 * 5 * conv1_width),
        "fc1_w": u(ks[4], (fc1_input_size, fc1_width), fc1_input_size),
        "fc1_b": u(ks[5], (fc1_width,), fc1_input_size),
        "fc2_w": u(ks[6], (fc1_width, fc1_width // 2), fc1_width),
        "fc2_b": u(ks[7], (fc1_width // 2,), fc1_width),
        "fc3_w": u(ks[8], (fc1_width // 2, class_count), fc1_width // 2),
        "fc3_b": u(ks[9], (class_count,), fc1_width // 2),
    }


def conv_model_reference(params, x_nchw):
    """Pure-JAX reference for correctness checking."""
    x = jnp.transpose(x_nchw, (0, 2, 3, 1))
    prec = lax.Precision.HIGHEST

    def conv_relu(x, w, b):
        y = lax.conv_general_dilated(
            x, w, (1, 1), "SAME",
            dimension_numbers=("NHWC", "HWIO", "NHWC"), precision=prec)
        return jnp.maximum(y + b, 0.0)

    def pool(x):
        return lax.reduce_window(x, -jnp.inf, lax.max,
                                 (1, 3, 3, 1), (1, 2, 2, 1), "VALID")

    h = pool(conv_relu(x, params["conv1_w"], params["conv1_b"]))
    h = pool(conv_relu(h, params["conv2_w"], params["conv2_b"]))
    h = jnp.transpose(h, (0, 3, 1, 2)).reshape(h.shape[0], -1)
    h = jnp.maximum(jnp.dot(h, params["fc1_w"], precision=prec) + params["fc1_b"], 0.0)
    h = jnp.maximum(jnp.dot(h, params["fc2_w"], precision=prec) + params["fc2_b"], 0.0)
    return jnp.dot(h, params["fc3_w"], precision=prec) + params["fc3_b"]


# ---------------------------------- main --------------------------------------

if __name__ == "__main__":
    # Small synthetic configuration of ConvolutionalModel.
    input_shape = (16, 16)
    in_channels = 4
    conv1_width, conv2_width = 8, 16
    fc1_width, class_count = 32, 10
    batch = 2

    # fc1_input_size exactly as computed in the PyTorch __init__.
    fw = math.floor((input_shape[0] - 3) / 2 + 1)
    fw = math.floor((fw - 3) / 2 + 1)
    fh = math.floor((input_shape[1] - 3) / 2 + 1)
    fh = math.floor((fh - 3) / 2 + 1)
    fc1_input_size = int(fw * fh * conv2_width)

    key = jax.random.PRNGKey(0)
    pkey, xkey = jax.random.split(key)
    params = init_params(pkey, conv1_width, conv2_width, in_channels,
                         fc1_width, class_count, fc1_input_size)
    x = jax.random.normal(xkey, (batch, in_channels, *input_shape), jnp.float32)

    logits = jax.jit(conv_model_forward)(params, x)
    logits = jax.block_until_ready(logits)
    assert logits.shape == (batch, class_count), logits.shape

    ref = conv_model_reference(params, x)
    err = float(jnp.max(jnp.abs(logits - ref)))
    assert jnp.allclose(logits, ref, atol=1e-2, rtol=1e-2), f"max abs err {err}"

    print("KERNEL_OK")
</pallas_src>

<mosaic_0001>
module attributes {stable_mosaic.version = 11 : i64} {
  func.func @kernel(%arg0: i32, %arg1: memref<1x16x16x4xf32, #tpu.memory_space<vmem>>, %arg2: memref<25x4x128xf32, #tpu.memory_space<vmem>>, %arg3: memref<1x128xf32, #tpu.memory_space<vmem>>, %arg4: memref<25x128x128xf32, #tpu.memory_space<vmem>>, %arg5: memref<1x128xf32, #tpu.memory_space<vmem>>, %arg6: memref<9x128x128xf32, #tpu.memory_space<vmem>>, %arg7: memref<1x128xf32, #tpu.memory_space<vmem>>, %arg8: memref<128x128xf32, #tpu.memory_space<vmem>>, %arg9: memref<1x128xf32, #tpu.memory_space<vmem>>, %arg10: memref<128x128xf32, #tpu.memory_space<vmem>>, %arg11: memref<1x128xf32, #tpu.memory_space<vmem>>, %arg12: memref<1x1x128xf32, #tpu.memory_space<vmem>>, %arg13: memref<20x20x4xf32, #tpu.memory_space<vmem>>, %arg14: memref<16x16x128xf32, #tpu.memory_space<vmem>>, %arg15: memref<7x16x128xf32, #tpu.memory_space<vmem>>, %arg16: memref<11x12x128xf32, #tpu.memory_space<vmem>>, %arg17: memref<56x128xf32, #tpu.memory_space<vmem>>) attributes {dimension_semantics = [#tpu.dimension_semantics<parallel>], iteration_bounds = array<i64: 2>, scalar_prefetch = 0 : i64, scratch_operands = 5 : i64, tpu.core_type = #tpu.core_type<tc>, window_params = [{transform_indices = @transform_0, window_bounds = array<i64: 1, 16, 16, 4>}, {pipeline_mode = #tpu.pipeline_mode<synchronous>, transform_indices = @transform_1, window_bounds = array<i64: 25, 4, 128>}, {pipeline_mode = #tpu.pipeline_mode<synchronous>, transform_indices = @transform_2, window_bounds = array<i64: 1, 128>}, {pipeline_mode = #tpu.pipeline_mode<synchronous>, transform_indices = @transform_3, window_bounds = array<i64: 25, 128, 128>}, {pipeline_mode = #tpu.pipeline_mode<synchronous>, transform_indices = @transform_4, window_bounds = array<i64: 1, 128>}, {pipeline_mode = #tpu.pipeline_mode<synchronous>, transform_indices = @transform_5, window_bounds = array<i64: 9, 128, 128>}, {pipeline_mode = #tpu.pipeline_mode<synchronous>, transform_indices = @transform_6, window_bounds = array<i64: 1, 128>}, {pipeline_mode = #tpu.pipeline_mode<synchronous>, transform_indices = @transform_7, window_bounds = array<i64: 128, 128>}, {pipeline_mode = #tpu.pipeline_mode<synchronous>, transform_indices = @transform_8, window_bounds = array<i64: 1, 128>}, {pipeline_mode = #tpu.pipeline_mode<synchronous>, transform_indices = @transform_9, window_bounds = array<i64: 128, 128>}, {pipeline_mode = #tpu.pipeline_mode<synchronous>, transform_indices = @transform_10, window_bounds = array<i64: 1, 128>}, {transform_indices = @transform_11, window_bounds = array<i64: 1, 1, 128>}]} {
    %cst = arith.constant 0.000000e+00 : f32
    %0 = vector.broadcast %cst : f32 to vector<20x20x4xf32>
    %c0 = arith.constant 0 : index
    %c0_0 = arith.constant 0 : index
    %c0_1 = arith.constant 0 : index
    %1 = vector.load %arg13[%c0, %c0_0, %c0_1] : memref<20x20x4xf32, #tpu.memory_space<vmem>>, vector<20x20x4xf32>
    tpu.vector_store %arg13[%c0, %c0_0, %c0_1], %0 {strides = array<i32>} : memref<20x20x4xf32, #tpu.memory_space<vmem>>, vector<20x20x4xf32>,
    %c0_2 = arith.constant 0 : index
    %c0_3 = arith.constant 0 : index
    %c0_4 = arith.constant 0 : index
    %c0_5 = arith.constant 0 : index
    %2 = vector.load %arg1[%c0_2, %c0_3, %c0_4, %c0_5] : memref<1x16x16x4xf32, #tpu.memory_space<vmem>>, vector<1x16x16x4xf32>
    %3 = vector.shape_cast %2 : vector<1x16x16x4xf32> to vector<16x16x4xf32>
    %c2 = arith.constant 2 : index
    %c2_6 = arith.constant 2 : index
    %c0_7 = arith.constant 0 : index
    %4 = vector.load %arg13[%c2, %c2_6, %c0_7] : memref<20x20x4xf32, #tpu.memory_space<vmem>>, vector<16x16x4xf32>
    tpu.vector_store %arg13[%c2, %c2_6, %c0_7], %3 {strides = array<i32>} : memref<20x20x4xf32, #tpu.memory_space<vmem>>, vector<16x16x4xf32>,
    %cst_8 = arith.constant 0.000000e+00 : f32
    %5 = vector.broadcast %cst_8 : f32 to vector<256x128xf32>
    %c0_9 = arith.constant 0 : index
    %c0_10 = arith.constant 0 : index
    %c0_11 = arith.constant 0 : index
    %6 = vector.load %arg13[%c0_9, %c0_10, %c0_11] : memref<20x20x4xf32, #tpu.memory_space<vmem>>, vector<16x16x4xf32>
    %7 = vector.shape_cast %6 : vector<16x16x4xf32> to vector<256x4xf32>
    %c0_12 = arith.constant 0 : index
    %c0_13 = arith.constant 0 : index
    %c0_14 = arith.constant 0 : index
    %8 = vector.load %arg2[%c0_12, %c0_13, %c0_14] : memref<25x4x128xf32, #tpu.memory_space<vmem>>, vector<1x4x128xf32>
    %9 = vector.shape_cast %8 : vector<1x4x128xf32> to vector<4x128xf32>
    %cst_15 = arith.constant dense<0.000000e+00> : vector<256x128xf32>
    %10 = tpu.matmul %7, %9, %cst_15 {dimension_numbers = #tpu.dot_dimension_numbers<[1], [0], [0], [1], [0, 0, 1, 1], [], []>} : vector<256x4xf32>, vector<4x128xf32>, vector<256x128xf32> -> vector<256x128xf32>
    %11 = arith.addf %5, %10 : vector<256x128xf32>
    %c0_16 = arith.constant 0 : index
    %c1 = arith.constant 1 : index
    %c0_17 = arith.constant 0 : index
    %12 = vector.load %arg13[%c0_16, %c1, %c0_17] : memref<20x20x4xf32, #tpu.memory_space<vmem>>, vector<16x16x4xf32>
    %13 = vector.shape_cast %12 : vector<16x16x4xf32> to vector<256x4xf32>
    %c1_18 = arith.constant 1 : index
    %c0_19 = arith.constant 0 : index
    %c0_20 = arith.constant 0 : index
    %14 = vector.load %arg2[%c1_18, %c0_19, %c0_20] : memref<25x4x128xf32, #tpu.memory_space<vmem>>, vector<1x4x128xf32>
    %15 = vector.shape_cast %14 : vector<1x4x128xf32> to vector<4x128xf32>
    %cst_21 = arith.constant dense<0.000000e+00> : vector<256x128xf32>
    %16 = tpu.matmul %13, %15, %cst_21 {dimension_numbers = #tpu.dot_dimension_numbers<[1], [0], [0], [1], [0, 0, 1, 1], [], []>} : vector<256x4xf32>, vector<4x128xf32>, vector<256x128xf32> -> vector<256x128xf32>
    %17 = arith.addf %11, %16 : vector<256x128xf32>
    %c0_22 = arith.constant 0 : index
    %c2_23 = arith.constant 2 : index
    %c0_24 = arith.constant 0 : index
    %18 = vector.load %arg13[%c0_22, %c2_23, %c0_24] : memref<20x20x4xf32, #tpu.memory_space<vmem>>, vector<16x16x4xf32>
    %19 = vector.shape_cast %18 : vector<16x16x4xf32> to vector<256x4xf32>
    %c2_25 = arith.constant 2 : index
    %c0_26 = arith.constant 0 : index
    %c0_27 = arith.constant 0 : index
    %20 = vector.load %arg2[%c2_25, %c0_26, %c0_27] : memref<25x4x128xf32, #tpu.memory_space<vmem>>, vector<1x4x128xf32>
    %21 = vector.shape_cast %20 : vector<1x4x128xf32> to vector<4x128xf32>
    %cst_28 = arith.constant dense<0.000000e+00> : vector<256x128xf32>
    %22 = tpu.matmul %19, %21, %cst_28 {dimension_numbers = #tpu.dot_dimension_numbers<[1], [0], [0], [1], [0, 0, 1, 1], [], []>} : vector<256x4xf32>, vector<4x128xf32>, vector<256x128xf32> -> vector<256x128xf32>
    %23 = arith.addf %17, %22 : vector<256x128xf32>
    %c0_29 = arith.constant 0 : index
    %c3 = arith.constant 3 : index
    %c0_30 = arith.constant 0 : index
    %24 = vector.load %arg13[%c0_29, %c3, %c0_30] : memref<20x20x4xf32, #tpu.memory_space<vmem>>, vector<16x16x4xf32>
    %25 = vector.shape_cast %24 : vector<16x16x4xf32> to vector<256x4xf32>
    %c3_31 = arith.constant 3 : index
    %c0_32 = arith.constant 0 : index
    %c0_33 = arith.constant 0 : index
    %26 = vector.load %arg2[%c3_31, %c0_32, %c0_33] : memref<25x4x128xf32, #tpu.memory_space<vmem>>, vector<1x4x128xf32>
    %27 = vector.shape_cast %26 : vector<1x4x128xf32> to vector<4x128xf32>
    %cst_34 = arith.constant dense<0.000000e+00> : vector<256x128xf32>
    %28 = tpu.matmul %25, %27, %cst_34 {dimension_numbers = #tpu.dot_dimension_numbers<[1], [0], [0], [1], [0, 0, 1, 1], [], []>} : vector<256x4xf32>, vector<4x128xf32>, vector<256x128xf32> -> vector<256x128xf32>
    %29 = arith.addf %23, %28 : vector<256x128xf32>
    %c0_35 = arith.constant 0 : index
    %c4 = arith.constant 4 : index
    %c0_36 = arith.constant 0 : index
    %30 = vector.load %arg13[%c0_35, %c4, %c0_36] : memref<20x20x4xf32, #tpu.memory_space<vmem>>, vector<16x16x4xf32>
    %31 = vector.shape_cast %30 : vector<16x16x4xf32> to vector<256x4xf32>
    %c4_37 = arith.constant 4 : index
    %c0_38 = arith.constant 0 : index
    %c0_39 = arith.constant 0 : index
    %32 = vector.load %arg2[%c4_37, %c0_38, %c0_39] : memref<25x4x128xf32, #tpu.memory_space<vmem>>, vector<1x4x128xf32>
    %33 = vector.shape_cast %32 : vector<1x4x128xf32> to vector<4x128xf32>
    %cst_40 = arith.constant dense<0.000000e+00> : vector<256x128xf32>
    %34 = tpu.matmul %31, %33, %cst_40 {dimension_numbers = #tpu.dot_dimension_numbers<[1], [0], [0], [1], [0, 0, 1, 1], [], []>} : vector<256x4xf32>, vector<4x128xf32>, vector<256x128xf32> -> vector<256x128xf32>
    %35 = arith.addf %29, %34 : vector<256x128xf32>
    %c1_41 = arith.constant 1 : index
    %c0_42 = arith.constant 0 : index
    %c0_43 = arith.constant 0 : index
    %36 = vector.load %arg13[%c1_41, %c0_42, %c0_43] : memref<20x20x4xf32, #tpu.memory_space<vmem>>, vector<16x16x4xf32>
    %37 = vector.shape_cast %36 : vector<16x16x4xf32> to vector<256x4xf32>
    %c5 = arith.constant 5 : index
    %c0_44 = arith.constant 0 : index
    %c0_45 = arith.constant 0 : index
    %38 = vector.load %arg2[%c5, %c0_44, %c0_45] : memref<25x4x128xf32, #tpu.memory_space<vmem>>, vector<1x4x128xf32>
    %39 = vector.shape_cast %38 : vector<1x4x128xf32> to vector<4x128xf32>
    %cst_46 = arith.constant dense<0.000000e+00> : vector<256x128xf32>
    %40 = tpu.matmul %37, %39, %cst_46 {dimension_numbers = #tpu.dot_dimension_numbers<[1], [0], [0], [1], [0, 0, 1, 1], [], []>} : vector<256x4xf32>, vector<4x128xf32>, vector<256x128xf32> -> vector<256x128xf32>
    %41 = arith.addf %35, %40 : vector<256x128xf32>
    %c1_47 = arith.constant 1 : index
    %c1_48 = arith.constant 1 : index
    %c0_49 = arith.constant 0 : index
    %42 = vector.load %arg13[%c1_47, %c1_48, %c0_49] : memref<20x20x4xf32, #tpu.memory_space<vmem>>, vector<16x16x4xf32>
    %43 = vector.shape_cast %42 : vector<16x16x4xf32> to vector<256x4xf32>
    %c6 = arith.constant 6 : index
    %c0_50 = arith.constant 0 : index
    %c0_51 = arith.constant 0 : index
    %44 = vector.load %arg2[%c6, %c0_50, %c0_51] : memref<25x4x128xf32, #tpu.memory_space<vmem>>, vector<1x4x128xf32>
    %45 = vector.shape_cast %44 : vector<1x4x128xf32> to vector<4x128xf32>
    %cst_52 = arith.constant dense<0.000000e+00> : vector<256x128xf32>
    %46 = tpu.matmul %43, %45, %cst_52 {dimension_numbers = #tpu.dot_dimension_numbers<[1], [0], [0], [1], [0, 0, 1, 1], [], []>} : vector<256x4xf32>, vector<4x128xf32>, vector<256x128xf32> -> vector<256x128xf32>
    %47 = arith.addf %41, %46 : vector<256x128xf32>
    %c1_53 = arith.constant 1 : index
    %c2_54 = arith.constant 2 : index
    %c0_55 = arith.constant 0 : index
    %48 = vector.load %arg13[%c1_53, %c2_54, %c0_55] : memref<20x20x4xf32, #tpu.memory_space<vmem>>, vector<16x16x4xf32>
    %49 = vector.shape_cast %48 : vector<16x16x4xf32> to vector<256x4xf32>
    %c7 = arith.constant 7 : index
    %c0_56 = arith.constant 0 : index
    %c0_57 = arith.constant 0 : index
    %50 = vector.load %arg2[%c7, %c0_56, %c0_57] : memref<25x4x128xf32, #tpu.memory_space<vmem>>, vector<1x4x128xf32>
    %51 = vector.shape_cast %50 : vector<1x4x128xf32> to vector<4x128xf32>
    %cst_58 = arith.constant dense<0.000000e+00> : vector<256x128xf32>
    %52 = tpu.matmul %49, %51, %cst_58 {dimension_numbers = #tpu.dot_dimension_numbers<[1], [0], [0], [1], [0, 0, 1, 1], [], []>} : vector<256x4xf32>, vector<4x128xf32>, vector<256x128xf32> -> vector<256x128xf32>
    %53 = arith.addf %47, %52 : vector<256x128xf32>
    %c1_59 = arith.constant 1 : index
    %c3_60 = arith.constant 3 : index
    %c0_61 = arith.constant 0 : index
    %54 = vector.load %arg13[%c1_59, %c3_60, %c0_61] : memref<20x20x4xf32, #tpu.memory_space<vmem>>, vector<16x16x4xf32>
    %55 = vector.shape_cast %54 : vector<16x16x4xf32> to vector<256x4xf32>
    %c8 = arith.constant 8 : index
    %c0_62 = arith.constant 0 : index
    %c0_63 = arith.constant 0 : index
    %56 = vector.load %arg2[%c8, %c0_62, %c0_63] : memref<25x4x128xf32, #tpu.memory_space<vmem>>, vector<1x4x128xf32>
    %57 = vector.shape_cast %56 : vector<1x4x128xf32> to vector<4x128xf32>
    %cst_64 = arith.constant dense<0.000000e+00> : vector<256x128xf32>
    %58 = tpu.matmul %55, %57, %cst_64 {dimension_numbers = #tpu.dot_dimension_numbers<[1], [0], [0], [1], [0, 0, 1, 1], [], []>} : vector<256x4xf32>, vector<4x128xf32>, vector<256x128xf32> -> vector<256x128xf32>
    %59 = arith.addf %53, %58 : vector<256x128xf32>
    %c1_65 = arith.constant 1 : index
    %c4_66 = arith.constant 4 : index
    %c0_67 = arith.constant 0 : index
    %60 = vector.load %arg13[%c1_65, %c4_66, %c0_67] : memref<20x20x4xf32, #tpu.memory_space<vmem>>, vector<16x16x4xf32>
    %61 = vector.shape_cast %60 : vector<16x16x4xf32> to vector<256x4xf32>
    %c9 = arith.constant 9 : index
    %c0_68 = arith.constant 0 : index
    %c0_69 = arith.constant 0 : index
    %62 = vector.load %arg2[%c9, %c0_68, %c0_69] : memref<25x4x128xf32, #tpu.memory_space<vmem>>, vector<1x4x128xf32>
    %63 = vector.shape_cast %62 : vector<1x4x128xf32> to vector<4x128xf32>
    %cst_70 = arith.constant dense<0.000000e+00> : vector<256x128xf32>
    %64 = tpu.matmul %61, %63, %cst_70 {dimension_numbers = #tpu.dot_dimension_numbers<[1], [0], [0], [1], [0, 0, 1, 1], [], []>} : vector<256x4xf32>, vector<4x128xf32>, vector<256x128xf32> -> vector<256x128xf32>
    %65 = arith.addf %59, %64 : vector<256x128xf32>
    %c2_71 = arith.constant 2 : index
    %c0_72 = arith.constant 0 : index
    %c0_73 = arith.constant 0 : index
    %66 = vector.load %arg13[%c2_71, %c0_72, %c0_73] : memref<20x20x4xf32, #tpu.memory_space<vmem>>, vector<16x16x4xf32>
    %67 = vector.shape_cast %66 : vector<16x16x4xf32> to vector<256x4xf32>
    %c10 = arith.constant 10 : index
    %c0_74 = arith.constant 0 : index
    %c0_75 = arith.constant 0 : index
    %68 = vector.load %arg2[%c10, %c0_74, %c0_75] : memref<25x4x128xf32, #tpu.memory_space<vmem>>, vector<1x4x128xf32>
    %69 = vector.shape_cast %68 : vector<1x4x128xf32> to vector<4x128xf32>
    %cst_76 = arith.constant dense<0.000000e+00> : vector<256x128xf32>
    %70 = tpu.matmul %67, %69, %cst_76 {dimension_numbers = #tpu.dot_dimension_numbers<[1], [0], [0], [1], [0, 0, 1, 1], [], []>} : vector<256x4xf32>, vector<4x128xf32>, vector<256x128xf32> -> vector<256x128xf32>
    %71 = arith.addf %65, %70 : vector<256x128xf32>
    %c2_77 = arith.constant 2 : index
    %c1_78 = arith.constant 1 : index
    %c0_79 = arith.constant 0 : index
    %72 = vector.load %arg13[%c2_77, %c1_78, %c0_79] : memref<20x20x4xf32, #tpu.memory_space<vmem>>, vector<16x16x4xf32>
    %73 = vector.shape_cast %72 : vector<16x16x4xf32> to vector<256x4xf32>
    %c11 = arith.constant 11 : index
    %c0_80 = arith.constant 0 : index
    %c0_81 = arith.constant 0 : index
    %74 = vector.load %arg2[%c11, %c0_80, %c0_81] : memref<25x4x128xf32, #tpu.memory_space<vmem>>, vector<1x4x128xf32>
    %75 = vector.shape_cast %74 : vector<1x4x128xf32> to vector<4x128xf32>
    %cst_82 = arith.constant dense<0.000000e+00> : vector<256x128xf32>
    %76 = tpu.matmul %73, %75, %cst_82 {dimension_numbers = #tpu.dot_dimension_numbers<[1], [0], [0], [1], [0, 0, 1, 1], [], []>} : vector<256x4xf32>, vector<4x128xf32>, vector<256x128xf32> -> vector<256x128xf32>
    %77 = arith.addf %71, %76 : vector<256x128xf32>
    %c2_83 = arith.constant 2 : index
    %c2_84 = arith.constant 2 : index
    %c0_85 = arith.constant 0 : index
    %78 = vector.load %arg13[%c2_83, %c2_84, %c0_85] : memref<20x20x4xf32, #tpu.memory_space<vmem>>, vector<16x16x4xf32>
    %79 = vector.shape_cast %78 : vector<16x16x4xf32> to vector<256x4xf32>
    %c12 = arith.constant 12 : index
    %c0_86 = arith.constant 0 : index
    %c0_87 = arith.constant 0 : index
    %80 = vector.load %arg2[%c12, %c0_86, %c0_87] : memref<25x4x128xf32, #tpu.memory_space<vmem>>, vector<1x4x128xf32>
    %81 = vector.shape_cast %80 : vector<1x4x128xf32> to vector<4x128xf32>
    %cst_88 = arith.constant dense<0.000000e+00> : vector<256x128xf32>
    %82 = tpu.matmul %79, %81, %cst_88 {dimension_numbers = #tpu.dot_dimension_numbers<[1], [0], [0], [1], [0, 0, 1, 1], [], []>} : vector<256x4xf32>, vector<4x128xf32>, vector<256x128xf32> -> vector<256x128xf32>
    %83 = arith.addf %77, %82 : vector<256x128xf32>
    %c2_89 = arith.constant 2 : index
    %c3_90 = arith.constant 3 : index
    %c0_91 = arith.constant 0 : index
    %84 = vector.load %arg13[%c2_89, %c3_90, %c0_91] : memref<20x20x4xf32, #tpu.memory_space<vmem>>, vector<16x16x4xf32>
    %85 = vector.shape_cast %84 : vector<16x16x4xf32> to vector<256x4xf32>
    %c13 = arith.constant 13 : index
    %c0_92 = arith.constant 0 : index
    %c0_93 = arith.constant 0 : index
    %86 = vector.load %arg2[%c13, %c0_92, %c0_93] : memref<25x4x128xf32, #tpu.memory_space<vmem>>, vector<1x4x128xf32>
    %87 = vector.shape_cast %86 : vector<1x4x128xf32> to vector<4x128xf32>
    %cst_94 = arith.constant dense<0.000000e+00> : vector<256x128xf32>
    %88 = tpu.matmul %85, %87, %cst_94 {dimension_numbers = #tpu.dot_dimension_numbers<[1], [0], [0], [1], [0, 0, 1, 1], [], []>} : vector<256x4xf32>, vector<4x128xf32>, vector<256x128xf32> -> vector<256x128xf32>
    %89 = arith.addf %83, %88 : vector<256x128xf32>
    %c2_95 = arith.constant 2 : index
    %c4_96 = arith.constant 4 : index
    %c0_97 = arith.constant 0 : index
    %90 = vector.load %arg13[%c2_95, %c4_96, %c0_97] : memref<20x20x4xf32, #tpu.memory_space<vmem>>, vector<16x16x4xf32>
    %91 = vector.shape_cast %90 : vector<16x16x4xf32> to vector<256x4xf32>
    %c14 = arith.constant 14 : index
    %c0_98 = arith.constant 0 : index
    %c0_99 = arith.constant 0 : index
    %92 = vector.load %arg2[%c14, %c0_98, %c0_99] : memref<25x4x128xf32, #tpu.memory_space<vmem>>, vector<1x4x128xf32>
    %93 = vector.shape_cast %92 : vector<1x4x128xf32> to vector<4x128xf32>
    %cst_100 = arith.constant dense<0.000000e+00> : vector<256x128xf32>
    %94 = tpu.matmul %91, %93, %cst_100 {dimension_numbers = #tpu.dot_dimension_numbers<[1], [0], [0], [1], [0, 0, 1, 1], [], []>} : vector<256x4xf32>, vector<4x128xf32>, vector<256x128xf32> -> vector<256x128xf32>
    %95 = arith.addf %89, %94 : vector<256x128xf32>
    %c3_101 = arith.constant 3 : index
    %c0_102 = arith.constant 0 : index
    %c0_103 = arith.constant 0 : index
    %96 = vector.load %arg13[%c3_101, %c0_102, %c0_103] : memref<20x20x4xf32, #tpu.memory_space<vmem>>, vector<16x16x4xf32>
    %97 = vector.shape_cast %96 : vector<16x16x4xf32> to vector<256x4xf32>
    %c15 = arith.constant 15 : index
    %c0_104 = arith.constant 0 : index
    %c0_105 = arith.constant 0 : index
    %98 = vector.load %arg2[%c15, %c0_104, %c0_105] : memref<25x4x128xf32, #tpu.memory_space<vmem>>, vector<1x4x128xf32>
    %99 = vector.shape_cast %98 : vector<1x4x128xf32> to vector<4x128xf32>
    %cst_106 = arith.constant dense<0.000000e+00> : vector<256x128xf32>
    %100 = tpu.matmul %97, %99, %cst_106 {dimension_numbers = #tpu.dot_dimension_numbers<[1], [0], [0], [1], [0, 0, 1, 1], [], []>} : vector<256x4xf32>, vector<4x128xf32>, vector<256x128xf32> -> vector<256x128xf32>
    %101 = arith.addf %95, %100 : vector<256x128xf32>
    %c3_107 = arith.constant 3 : index
    %c1_108 = arith.constant 1 : index
    %c0_109 = arith.constant 0 : index
    %102 = vector.load %arg13[%c3_107, %c1_108, %c0_109] : memref<20x20x4xf32, #tpu.memory_space<vmem>>, vector<16x16x4xf32>
    %103 = vector.shape_cast %102 : vector<16x16x4xf32> to vector<256x4xf32>
    %c16 = arith.constant 16 : index
    %c0_110 = arith.constant 0 : index
    %c0_111 = arith.constant 0 : index
    %104 = vector.load %arg2[%c16, %c0_110, %c0_111] : memref<25x4x128xf32, #tpu.memory_space<vmem>>, vector<1x4x128xf32>
    %105 = vector.shape_cast %104 : vector<1x4x128xf32> to vector<4x128xf32>
    %cst_112 = arith.constant dense<0.000000e+00> : vector<256x128xf32>
    %106 = tpu.matmul %103, %105, %cst_112 {dimension_numbers = #tpu.dot_dimension_numbers<[1], [0], [0], [1], [0, 0, 1, 1], [], []>} : vector<256x4xf32>, vector<4x128xf32>, vector<256x128xf32> -> vector<256x128xf32>
    %107 = arith.addf %101, %106 : vector<256x128xf32>
    %c3_113 = arith.constant 3 : index
    %c2_114 = arith.constant 2 : index
    %c0_115 = arith.constant 0 : index
    %108 = vector.load %arg13[%c3_113, %c2_114, %c0_115] : memref<20x20x4xf32, #tpu.memory_space<vmem>>, vector<16x16x4xf32>
    %109 = vector.shape_cast %108 : vector<16x16x4xf32> to vector<256x4xf32>
    %c17 = arith.constant 17 : index
    %c0_116 = arith.constant 0 : index
    %c0_117 = arith.constant 0 : index
    %110 = vector.load %arg2[%c17, %c0_116, %c0_117] : memref<25x4x128xf32, #tpu.memory_space<vmem>>, vector<1x4x128xf32>
    %111 = vector.shape_cast %110 : vector<1x4x128xf32> to vector<4x128xf32>
    %cst_118 = arith.constant dense<0.000000e+00> : vector<256x128xf32>
    %112 = tpu.matmul %109, %111, %cst_118 {dimension_numbers = #tpu.dot_dimension_numbers<[1], [0], [0], [1], [0, 0, 1, 1], [], []>} : vector<256x4xf32>, vector<4x128xf32>, vector<256x128xf32> -> vector<256x128xf32>
    %113 = arith.addf %107, %112 : vector<256x128xf32>
    %c3_119 = arith.constant 3 : index
    %c3_120 = arith.constant 3 : index
    %c0_121 = arith.constant 0 : index
    %114 = vector.load %arg13[%c3_119, %c3_120, %c0_121] : memref<20x20x4xf32, #tpu.memory_space<vmem>>, vector<16x16x4xf32>
    %115 = vector.shape_cast %114 : vector<16x16x4xf32> to vector<256x4xf32>
    %c18 = arith.constant 18 : index
    %c0_122 = arith.constant 0 : index
    %c0_123 = arith.constant 0 : index
    %116 = vector.load %arg2[%c18, %c0_122, %c0_123] : memref<25x4x128xf32, #tpu.memory_space<vmem>>, vector<1x4x128xf32>
    %117 = vector.shape_cast %116 : vector<1x4x128xf32> to vector<4x128xf32>
    %cst_124 = arith.constant dense<0.000000e+00> : vector<256x128xf32>
    %118 = tpu.matmul %115, %117, %cst_124 {dimension_numbers = #tpu.dot_dimension_numbers<[1], [0], [0], [1], [0, 0, 1, 1], [], []>} : vector<256x4xf32>, vector<4x128xf32>, vector<256x128xf32> -> vector<256x128xf32>
    %119 = arith.addf %113, %118 : vector<256x128xf32>
    %c3_125 = arith.constant 3 : index
    %c4_126 = arith.constant 4 : index
    %c0_127 = arith.constant 0 : index
    %120 = vector.load %arg13[%c3_125, %c4_126, %c0_127] : memref<20x20x4xf32, #tpu.memory_space<vmem>>, vector<16x16x4xf32>
    %121 = vector.shape_cast %120 : vector<16x16x4xf32> to vector<256x4xf32>
    %c19 = arith.constant 19 : index
    %c0_128 = arith.constant 0 : index
    %c0_129 = arith.constant 0 : index
    %122 = vector.load %arg2[%c19, %c0_128, %c0_129] : memref<25x4x128xf32, #tpu.memory_space<vmem>>, vector<1x4x128xf32>
    %123 = vector.shape_cast %122 : vector<1x4x128xf32> to vector<4x128xf32>
    %cst_130 = arith.constant dense<0.000000e+00> : vector<256x128xf32>
    %124 = tpu.matmul %121, %123, %cst_130 {dimension_numbers = #tpu.dot_dimension_numbers<[1], [0], [0], [1], [0, 0, 1, 1], [], []>} : vector<256x4xf32>, vector<4x128xf32>, vector<256x128xf32> -> vector<256x128xf32>
    %125 = arith.addf %119, %124 : vector<256x128xf32>
    %c4_131 = arith.constant 4 : index
    %c0_132 = arith.constant 0 : index
    %c0_133 = arith.constant 0 : index
    %126 = vector.load %arg13[%c4_131, %c0_132, %c0_133] : memref<20x20x4xf32, #tpu.memory_space<vmem>>, vector<16x16x4xf32>
    %127 = vector.shape_cast %126 : vector<16x16x4xf32> to vector<256x4xf32>
    %c20 = arith.constant 20 : index
    %c0_134 = arith.constant 0 : index
    %c0_135 = arith.constant 0 : index
    %128 = vector.load %arg2[%c20, %c0_134, %c0_135] : memref<25x4x128xf32, #tpu.memory_space<vmem>>, vector<1x4x128xf32>
    %129 = vector.shape_cast %128 : vector<1x4x128xf32> to vector<4x128xf32>
    %cst_136 = arith.constant dense<0.000000e+00> : vector<256x128xf32>
    %130 = tpu.matmul %127, %129, %cst_136 {dimension_numbers = #tpu.dot_dimension_numbers<[1], [0], [0], [1], [0, 0, 1, 1], [], []>} : vector<256x4xf32>, vector<4x128xf32>, vector<256x128xf32> -> vector<256x128xf32>
    %131 = arith.addf %125, %130 : vector<256x128xf32>
    %c4_137 = arith.constant 4 : index
    %c1_138 = arith.constant 1 : index
    %c0_139 = arith.constant 0 : index
    %132 = vector.load %arg13[%c4_137, %c1_138, %c0_139] : memref<20x20x4xf32, #tpu.memory_space<vmem>>, vector<16x16x4xf32>
    %133 = vector.shape_cast %132 : vector<16x16x4xf32> to vector<256x4xf32>
    %c21 = arith.constant 21 : index
    %c0_140 = arith.constant 0 : index
    %c0_141 = arith.constant 0 : index
    %134 = vector.load %arg2[%c21, %c0_140, %c0_141] : memref<25x4x128xf32, #tpu.memory_space<vmem>>, vector<1x4x128xf32>
    %135 = vector.shape_cast %134 : vector<1x4x128xf32> to vector<4x128xf32>
    %cst_142 = arith.constant dense<0.000000e+00> : vector<256x128xf32>
    %136 = tpu.matmul %133, %135, %cst_142 {dimension_numbers = #tpu.dot_dimension_numbers<[1], [0], [0], [1], [0, 0, 1, 1], [], []>} : vector<256x4xf32>, vector<4x128xf32>, vector<256x128xf32> -> vector<256x128xf32>
    %137 = arith.addf %131, %136 : vector<256x128xf32>
    %c4_143 = arith.constant 4 : index
    %c2_144 = arith.constant 2 : index
    %c0_145 = arith.constant 0 : index
    %138 = vector.load %arg13[%c4_143, %c2_144, %c0_145] : memref<20x20x4xf32, #tpu.memory_space<vmem>>, vector<16x16x4xf32>
    %139 = vector.shape_cast %138 : vector<16x16x4xf32> to vector<256x4xf32>
    %c22 = arith.constant 22 : index
    %c0_146 = arith.constant 0 : index
    %c0_147 = arith.constant 0 : index
    %140 = vector.load %arg2[%c22, %c0_146, %c0_147] : memref<25x4x128xf32, #tpu.memory_space<vmem>>, vector<1x4x128xf32>
    %141 = vector.shape_cast %140 : vector<1x4x128xf32> to vector<4x128xf32>
    %cst_148 = arith.constant dense<0.000000e+00> : vector<256x128xf32>
    %142 = tpu.matmul %139, %141, %cst_148 {dimension_numbers = #tpu.dot_dimension_numbers<[1], [0], [0], [1], [0, 0, 1, 1], [], []>} : vector<256x4xf32>, vector<4x128xf32>, vector<256x128xf32> -> vector<256x128xf32>
    %143 = arith.addf %137, %142 : vector<256x128xf32>
    %c4_149 = arith.constant 4 : index
    %c3_150 = arith.constant 3 : index
    %c0_151 = arith.constant 0 : index
    %144 = vector.load %arg13[%c4_149, %c3_150, %c0_151] : memref<20x20x4xf32, #tpu.memory_space<vmem>>, vector<16x16x4xf32>
    %145 = vector.shape_cast %144 : vector<16x16x4xf32> to vector<256x4xf32>
    %c23 = arith.constant 23 : index
    %c0_152 = arith.constant 0 : index
    %c0_153 = arith.constant 0 : index
    %146 = vector.load %arg2[%c23, %c0_152, %c0_153] : memref<25x4x128xf32, #tpu.memory_space<vmem>>, vector<1x4x128xf32>
    %147 = vector.shape_cast %146 : vector<1x4x128xf32> to vector<4x128xf32>
    %cst_154 = arith.constant dense<0.000000e+00> : vector<256x128xf32>
    %148 = tpu.matmul %145, %147, %cst_154 {dimension_numbers = #tpu.dot_dimension_numbers<[1], [0], [0], [1], [0, 0, 1, 1], [], []>} : vector<256x4xf32>, vector<4x128xf32>, vector<256x128xf32> -> vector<256x128xf32>
    %149 = arith.addf %143, %148 : vector<256x128xf32>
    %c4_155 = arith.constant 4 : index
    %c4_156 = arith.constant 4 : index
    %c0_157 = arith.constant 0 : index
    %150 = vector.load %arg13[%c4_155, %c4_156, %c0_157] : memref<20x20x4xf32, #tpu.memory_space<vmem>>, vector<16x16x4xf32>
    %151 = vector.shape_cast %150 : vector<16x16x4xf32> to vector<256x4xf32>
    %c24 = arith.constant 24 : index
    %c0_158 = arith.constant 0 : index
    %c0_159 = arith.constant 0 : index
    %152 = vector.load %arg2[%c24, %c0_158, %c0_159] : memref<25x4x128xf32, #tpu.memory_space<vmem>>, vector<1x4x128xf32>
    %153 = vector.shape_cast %152 : vector<1x4x128xf32> to vector<4x128xf32>
    %cst_160 = arith.constant dense<0.000000e+00> : vector<256x128xf32>
    %154 = tpu.matmul %151, %153, %cst_160 {dimension_numbers = #tpu.dot_dimension_numbers<[1], [0], [0], [1], [0, 0, 1, 1], [], []>} : vector<256x4xf32>, vector<4x128xf32>, vector<256x128xf32> -> vector<256x128xf32>
    %155 = arith.addf %149, %154 : vector<256x128xf32>
    %c0_161 = arith.constant 0 : index
    %c0_162 = arith.constant 0 : index
    %156 = vector.load %arg3[%c0_161, %c0_162] : memref<1x128xf32, #tpu.memory_space<vmem>>, vector<1x128xf32>
    %157 = vector.broadcast %156 : vector<1x128xf32> to vector<256x128xf32>
    %158 = arith.addf %155, %157 : vector<256x128xf32>
    %cst_163 = arith.constant 0.000000e+00 : f32
    %159 = vector.broadcast %cst_163 : f32 to vector<256x128xf32>
    %160 = arith.maximumf %158, %159 : vector<256x128xf32>
    %161 = vector.shape_cast %160 : vector<256x128xf32> to vector<16x16x128xf32>
    %c0_164 = arith.constant 0 : index
    %c0_165 = arith.constant 0 : index
    %c0_166 = arith.constant 0 : index
    %162 = vector.load %arg14[%c0_164, %c0_165, %c0_166] : memref<16x16x128xf32, #tpu.memory_space<vmem>>, vector<16x16x128xf32>
    tpu.vector_store %arg14[%c0_164, %c0_165, %c0_166], %161 {strides = array<i32>} : memref<16x16x128xf32, #tpu.memory_space<vmem>>, vector<16x16x128xf32>,
    %c0_167 = arith.constant 0 : index
    %c0_168 = arith.constant 0 : index
    %c0_169 = arith.constant 0 : index
    %163 = vector.load %arg14[%c0_167, %c0_168, %c0_169] : memref<16x16x128xf32, #tpu.memory_space<vmem>>, vector<1x16x128xf32>
    %c1_170 = arith.constant 1 : index
    %c0_171 = arith.constant 0 : index
    %c0_172 = arith.constant 0 : index
    %164 = vector.load %arg14[%c1_170, %c0_171, %c0_172] : memref<16x16x128xf32, #tpu.memory_space<vmem>>, vector<1x16x128xf32>
    %165 = arith.maximumf %163, %164 : vector<1x16x128xf32>
    %c2_173 = arith.constant 2 : index
    %c0_174 = arith.constant 0 : index
    %c0_175 = arith.constant 0 : index
    %166 = vector.load %arg14[%c2_173, %c0_174, %c0_175] : memref<16x16x128xf32, #tpu.memory_space<vmem>>, vector<1x16x128xf32>
    %167 = arith.maximumf %165, %166 : vector<1x16x128xf32>
    %c0_176 = arith.constant 0 : index
    %c0_177 = arith.constant 0 : index
    %c0_178 = arith.constant 0 : index
    %168 = vector.load %arg15[%c0_176, %c0_177, %c0_178] : memref<7x16x128xf32, #tpu.memory_space<vmem>>, vector<1x16x128xf32>
    tpu.vector_store %arg15[%c0_176, %c0_177, %c0_178], %167 {strides = array<i32>} : memref<7x16x128xf32, #tpu.memory_space<vmem>>, vector<1x16x128xf32>,
    %c2_179 = arith.constant 2 : index
    %c0_180 = arith.constant 0 : index
    %c0_181 = arith.constant 0 : index
    %169 = vector.load %arg14[%c2_179, %c0_180, %c0_181] : memref<16x16x128xf32, #tpu.memory_space<vmem>>, vector<1x16x128xf32>
    %c3_182 = arith.constant 3 : index
    %c0_183 = arith.constant 0 : index
    %c0_184 = arith.constant 0 : index
    %170 = vector.load %arg14[%c3_182, %c0_183, %c0_184] : memref<16x16x128xf32, #tpu.memory_space<vmem>>, vector<1x16x128xf32>
    %171 = arith.maximumf %169, %170 : vector<1x16x128xf32>
    %c4_185 = arith.constant 4 : index
    %c0_186 = arith.constant 0 : index
    %c0_187 = arith.constant 0 : index
    %172 = vector.load %arg14[%c4_185, %c0_186, %c0_187] : memref<16x16x128xf32, #tpu.memory_space<vmem>>, vector<1x16x128xf32>
    %173 = arith.maximumf %171, %172 : vector<1x16x128xf32>
    %c1_188 = arith.constant 1 : index
    %c0_189 = arith.constant 0 : index
    %c0_190 = arith.constant 0 : index
    %174 = vector.load %arg15[%c1_188, %c0_189, %c0_190] : memref<7x16x128xf32, #tpu.memory_space<vmem>>, vector<1x16x128xf32>
    tpu.vector_store %arg15[%c1_188, %c0_189, %c0_190], %173 {strides = array<i32>} : memref<7x16x128xf32, #tpu.memory_space<vmem>>, vector<1x16x128xf32>,
    %c4_191 = arith.constant 4 : index
    %c0_192 = arith.constant 0 : index
    %c0_193 = arith.constant 0 : index
    %175 = vector.load %arg14[%c4_191, %c0_192, %c0_193] : memref<16x16x128xf32, #tpu.memory_space<vmem>>, vector<1x16x128xf32>
    %c5_194 = arith.constant 5 : index
    %c0_195 = arith.constant 0 : index
    %c0_196 = arith.constant 0 : index
    %176 = vector.load %arg14[%c5_194, %c0_195, %c0_196] : memref<16x16x128xf32, #tpu.memory_space<vmem>>, vector<1x16x128xf32>
    %177 = arith.maximumf %175, %176 : vector<1x16x128xf32>
    %c6_197 = arith.constant 6 : index
    %c0_198 = arith.constant 0 : index
    %c0_199 = arith.constant 0 : index
    %178 = vector.load %arg14[%c6_197, %c0_198, %c0_199] : memref<16x16x128xf32, #tpu.memory_space<vmem>>, vector<1x16x128xf32>
    %179 = arith.maximumf %177, %178 : vector<1x16x128xf32>
    %c2_200 = arith.constant 2 : index
    %c0_201 = arith.constant 0 : index
    %c0_202 = arith.constant 0 : index
    %180 = vector.load %arg15[%c2_200, %c0_201, %c0_202] : memref<7x16x128xf32, #tpu.memory_space<vmem>>, vector<1x16x128xf32>
    tpu.vector_store %arg15[%c2_200, %c0_201, %c0_202], %179 {strides = array<i32>} : memref<7x16x128xf32, #tpu.memory_space<vmem>>, vector<1x16x128xf32>,
    %c6_203 = arith.constant 6 : index
    %c0_204 = arith.constant 0 : index
    %c0_205 = arith.constant 0 : index
    %181 = vector.load %arg14[%c6_203, %c0_204, %c0_205] : memref<16x16x128xf32, #tpu.memory_space<vmem>>, vector<1x16x128xf32>
    %c7_206 = arith.constant 7 : index
    %c0_207 = arith.constant 0 : index
    %c0_208 = arith.constant 0 : index
    %182 = vector.load %arg14[%c7_206, %c0_207, %c0_208] : memref<16x16x128xf32, #tpu.memory_space<vmem>>, vector<1x16x128xf32>
    %183 = arith.maximumf %181, %182 : vector<1x16x128xf32>
    %c8_209 = arith.constant 8 : index
    %c0_210 = arith.constant 0 : index
    %c0_211 = arith.constant 0 : index
    %184 = vector.load %arg14[%c8_209, %c0_210, %c0_211] : memref<16x16x128xf32, #tpu.memory_space<vmem>>, vector<1x16x128xf32>
    %185 = arith.maximumf %183, %184 : vector<1x16x128xf32>
    %c3_212 = arith.constant 3 : index
    %c0_213 = arith.constant 0 : index
    %c0_214 = arith.constant 0 : index
    %186 = vector.load %arg15[%c3_212, %c0_213, %c0_214] : memref<7x16x128xf32, #tpu.memory_space<vmem>>, vector<1x16x128xf32>
    tpu.vector_store %arg15[%c3_212, %c0_213, %c0_214], %185 {strides = array<i32>} : memref<7x16x128xf32, #tpu.memory_space<vmem>>, vector<1x16x128xf32>,
    %c8_215 = arith.constant 8 : index
    %c0_216 = arith.constant 0 : index
    %c0_217 = arith.constant 0 : index
    %187 = vector.load %arg14[%c8_215, %c0_216, %c0_217] : memref<16x16x128xf32, #tpu.memory_space<vmem>>, vector<1x16x128xf32>
    %c9_218 = arith.constant 9 : index
    %c0_219 = arith.constant 0 : index
    %c0_220 = arith.constant 0 : index
    %188 = vector.load %arg14[%c9_218, %c0_219, %c0_220] : memref<16x16x128xf32, #tpu.memory_space<vmem>>, vector<1x16x128xf32>
    %189 = arith.maximumf %187, %188 : vector<1x16x128xf32>
    %c10_221 = arith.constant 10 : index
    %c0_222 = arith.constant 0 : index
    %c0_223 = arith.constant 0 : index
    %190 = vector.load %arg14[%c10_221, %c0_222, %c0_223] : memref<16x16x128xf32, #tpu.memory_space<vmem>>, vector<1x16x128xf32>
    %191 = arith.maximumf %189, %190 : vector<1x16x128xf32>
    %c4_224 = arith.constant 4 : index
    %c0_225 = arith.constant 0 : index
    %c0_226 = arith.constant 0 : index
    %192 = vector.load %arg15[%c4_224, %c0_225, %c0_226] : memref<7x16x128xf32, #tpu.memory_space<vmem>>, vector<1x16x128xf32>
    tpu.vector_store %arg15[%c4_224, %c0_225, %c0_226], %191 {strides = array<i32>} : memref<7x16x128xf32, #tpu.memory_space<vmem>>, vector<1x16x128xf32>,
    %c10_227 = arith.constant 10 : index
    %c0_228 = arith.constant 0 : index
    %c0_229 = arith.constant 0 : index
    %193 = vector.load %arg14[%c10_227, %c0_228, %c0_229] : memref<16x16x128xf32, #tpu.memory_space<vmem>>, vector<1x16x128xf32>
    %c11_230 = arith.constant 11 : index
    %c0_231 = arith.constant 0 : index
    %c0_232 = arith.constant 0 : index
    %194 = vector.load %arg14[%c11_230, %c0_231, %c0_232] : memref<16x16x128xf32, #tpu.memory_space<vmem>>, vector<1x16x128xf32>
    %195 = arith.maximumf %193, %194 : vector<1x16x128xf32>
    %c12_233 = arith.constant 12 : index
    %c0_234 = arith.constant 0 : index
    %c0_235 = arith.constant 0 : index
    %196 = vector.load %arg14[%c12_233, %c0_234, %c0_235] : memref<16x16x128xf32, #tpu.memory_space<vmem>>, vector<1x16x128xf32>
    %197 = arith.maximumf %195, %196 : vector<1x16x128xf32>
    %c5_236 = arith.constant 5 : index
    %c0_237 = arith.constant 0 : index
    %c0_238 = arith.constant 0 : index
    %198 = vector.load %arg15[%c5_236, %c0_237, %c0_238] : memref<7x16x128xf32, #tpu.memory_space<vmem>>, vector<1x16x128xf32>
    tpu.vector_store %arg15[%c5_236, %c0_237, %c0_238], %197 {strides = array<i32>} : memref<7x16x128xf32, #tpu.memory_space<vmem>>, vector<1x16x128xf32>,
    %c12_239 = arith.constant 12 : index
    %c0_240 = arith.constant 0 : index
    %c0_241 = arith.constant 0 : index
    %199 = vector.load %arg14[%c12_239, %c0_240, %c0_241] : memref<16x16x128xf32, #tpu.memory_space<vmem>>, vector<1x16x128xf32>
    %c13_242 = arith.constant 13 : index
    %c0_243 = arith.constant 0 : index
    %c0_244 = arith.constant 0 : index
    %200 = vector.load %arg14[%c13_242, %c0_243, %c0_244] : memref<16x16x128xf32, #tpu.memory_space<vmem>>, vector<1x16x128xf32>
    %201 = arith.maximumf %199, %200 : vector<1x16x128xf32>
    %c14_245 = arith.constant 14 : index
    %c0_246 = arith.constant 0 : index
    %c0_247 = arith.constant 0 : index
    %202 = vector.load %arg14[%c14_245, %c0_246, %c0_247] : memref<16x16x128xf32, #tpu.memory_space<vmem>>, vector<1x16x128xf32>
    %203 = arith.maximumf %201, %202 : vector<1x16x128xf32>
    %c6_248 = arith.constant 6 : index
    %c0_249 = arith.constant 0 : index
    %c0_250 = arith.constant 0 : index
    %204 = vector.load %arg15[%c6_248, %c0_249, %c0_250] : memref<7x16x128xf32, #tpu.memory_space<vmem>>, vector<1x16x128xf32>
    tpu.vector_store %arg15[%c6_248, %c0_249, %c0_250], %203 {strides = array<i32>} : memref<7x16x128xf32, #tpu.memory_space<vmem>>, vector<1x16x128xf32>,
    %cst_251 = arith.constant 0.000000e+00 : f32
    %205 = vector.broadcast %cst_251 : f32 to vector<11x12x128xf32>
    %c0_252 = arith.constant 0 : index
    %c0_253 = arith.constant 0 : index
    %c0_254 = arith.constant 0 : index
    %206 = vector.load %arg16[%c0_252, %c0_253, %c0_254] : memref<11x12x128xf32, #tpu.memory_space<vmem>>, vector<11x12x128xf32>
    tpu.vector_store %arg16[%c0_252, %c0_253, %c0_254], %205 {strides = array<i32>} : memref<11x12x128xf32, #tpu.memory_space<vmem>>, vector<11x12x128xf32>,
    %c0_255 = arith.constant 0 : index
    %c0_256 = arith.constant 0 : index
    %c0_257 = arith.constant 0 : index
    %207 = vector.load %arg15[%c0_255, %c0_256, %c0_257] : memref<7x16x128xf32, #tpu.memory_space<vmem>>, vector<7x1x128xf32>
    %c0_258 = arith.constant 0 : index
    %c1_259 = arith.constant 1 : index
    %c0_260 = arith.constant 0 : index
    %208 = vector.load %arg15[%c0_258, %c1_259, %c0_260] : memref<7x16x128xf32, #tpu.memory_space<vmem>>, vector<7x1x128xf32>
    %209 = arith.maximumf %207, %208 : vector<7x1x128xf32>
    %c0_261 = arith.constant 0 : index
    %c2_262 = arith.constant 2 : index
    %c0_263 = arith.constant 0 : index
    %210 = vector.load %arg15[%c0_261, %c2_262, %c0_263] : memref<7x16x128xf32, #tpu.memory_space<vmem>>, vector<7x1x128xf32>
    %211 = arith.maximumf %209, %210 : vector<7x1x128xf32>
    %c2_264 = arith.constant 2 : index
    %c2_265 = arith.constant 2 : index
    %c0_266 = arith.constant 0 : index
    %212 = vector.load %arg16[%c2_264, %c2_265, %c0_266] : memref<11x12x128xf32, #tpu.memory_space<vmem>>, vector<7x1x128xf32>
    tpu.vector_store %arg16[%c2_264, %c2_265, %c0_266], %211 {strides = array<i32>} : memref<11x12x128xf32, #tpu.memory_space<vmem>>, vector<7x1x128xf32>,
    %c0_267 = arith.constant 0 : index
    %c2_268 = arith.constant 2 : index
    %c0_269 = arith.constant 0 : index
    %213 = vector.load %arg15[%c0_267, %c2_268, %c0_269] : memref<7x16x128xf32, #tpu.memory_space<vmem>>, vector<7x1x128xf32>
    %c0_270 = arith.constant 0 : index
    %c3_271 = arith.constant 3 : index
    %c0_272 = arith.constant 0 : index
    %214 = vector.load %arg15[%c0_270, %c3_271, %c0_272] : memref<7x16x128xf32, #tpu.memory_space<vmem>>, vector<7x1x128xf32>
    %215 = arith.maximumf %213, %214 : vector<7x1x128xf32>
    %c0_273 = arith.constant 0 : index
    %c4_274 = arith.constant 4 : index
    %c0_275 = arith.constant 0 : index
    %216 = vector.load %arg15[%c0_273, %c4_274, %c0_275] : memref<7x16x128xf32, #tpu.memory_space<vmem>>, vector<7x1x128xf32>
    %217 = arith.maximumf %215, %216 : vector<7x1x128xf32>
    %c2_276 = arith.constant 2 : index
    %c3_277 = arith.constant 3 : index
    %c0_278 = arith.constant 0 : index
    %218 = vector.load %arg16[%c2_276, %c3_277, %c0_278] : memref<11x12x128xf32, #tpu.memory_space<vmem>>, vector<7x1x128xf32>
    tpu.vector_store %arg16[%c2_276, %c3_277, %c0_278], %217 {strides = array<i32>} : memref<11x12x128xf32, #tpu.memory_space<vmem>>, vector<7x1x128xf32>,
    %c0_279 = arith.constant 0 : index
    %c4_280 = arith.constant 4 : index
    %c0_281 = arith.constant 0 : index
    %219 = vector.load %arg15[%c0_279, %c4_280, %c0_281] : memref<7x16x128xf32, #tpu.memory_space<vmem>>, vector<7x1x128xf32>
    %c0_282 = arith.constant 0 : index
    %c5_283 = arith.constant 5 : index
    %c0_284 = arith.constant 0 : index
    %220 = vector.load %arg15[%c0_282, %c5_283, %c0_284] : memref<7x16x128xf32, #tpu.memory_space<vmem>>, vector<7x1x128xf32>
    %221 = arith.maximumf %219, %220 : vector<7x1x128xf32>
    %c0_285 = arith.constant 0 : index
    %c6_286 = arith.constant 6 : index
    %c0_287 = arith.constant 0 : index
    %222 = vector.load %arg15[%c0_285, %c6_286, %c0_287] : memref<7x16x128xf32, #tpu.memory_space<vmem>>, vector<7x1x128xf32>
    %223 = arith.maximumf %221, %222 : vector<7x1x128xf32>
    %c2_288 = arith.constant 2 : index
    %c4_289 = arith.constant 4 : index
    %c0_290 = arith.constant 0 : index
    %224 = vector.load %arg16[%c2_288, %c4_289, %c0_290] : memref<11x12x128xf32, #tpu.memory_space<vmem>>, vector<7x1x128xf32>
    tpu.vector_store %arg16[%c2_288, %c4_289, %c0_290], %223 {strides = array<i32>} : memref<11x12x128xf32, #tpu.memory_space<vmem>>, vector<7x1x128xf32>,
    %c0_291 = arith.constant 0 : index
    %c6_292 = arith.constant 6 : index
    %c0_293 = arith.constant 0 : index
    %225 = vector.load %arg15[%c0_291, %c6_292, %c0_293] : memref<7x16x128xf32, #tpu.memory_space<vmem>>, vector<7x1x128xf32>
    %c0_294 = arith.constant 0 : index
    %c7_295 = arith.constant 7 : index
    %c0_296 = arith.constant 0 : index
    %226 = vector.load %arg15[%c0_294, %c7_295, %c0_296] : memref<7x16x128xf32, #tpu.memory_space<vmem>>, vector<7x1x128xf32>
    %227 = arith.maximumf %225, %226 : vector<7x1x128xf32>
    %c0_297 = arith.constant 0 : index
    %c8_298 = arith.constant 8 : index
    %c0_299 = arith.constant 0 : index
    %228 = vector.load %arg15[%c0_297, %c8_298, %c0_299] : memref<7x16x128xf32, #tpu.memory_space<vmem>>, vector<7x1x128xf32>
    %229 = arith.maximumf %227, %228 : vector<7x1x128xf32>
    %c2_300 = arith.constant 2 : index
    %c5_301 = arith.constant 5 : index
    %c0_302 = arith.constant 0 : index
    %230 = vector.load %arg16[%c2_300, %c5_301, %c0_302] : memref<11x12x128xf32, #tpu.memory_space<vmem>>, vector<7x1x128xf32>
    tpu.vector_store %arg16[%c2_300, %c5_301, %c0_302], %229 {strides = array<i32>} : memref<11x12x128xf32, #tpu.memory_space<vmem>>, vector<7x1x128xf32>,
    %c0_303 = arith.constant 0 : index
    %c8_304 = arith.constant 8 : index
    %c0_305 = arith.constant 0 : index
    %231 = vector.load %arg15[%c0_303, %c8_304, %c0_305] : memref<7x16x128xf32, #tpu.memory_space<vmem>>, vector<7x1x128xf32>
    %c0_306 = arith.constant 0 : index
    %c9_307 = arith.constant 9 : index
    %c0_308 = arith.constant 0 : index
    %232 = vector.load %arg15[%c0_306, %c9_307, %c0_308] : memref<7x16x128xf32, #tpu.memory_space<vmem>>, vector<7x1x128xf32>
    %233 = arith.maximumf %231, %232 : vector<7x1x128xf32>
    %c0_309 = arith.constant 0 : index
    %c10_310 = arith.constant 10 : index
    %c0_311 = arith.constant 0 : index
    %234 = vector.load %arg15[%c0_309, %c10_310, %c0_311] : memref<7x16x128xf32, #tpu.memory_space<vmem>>, vector<7x1x128xf32>
    %235 = arith.maximumf %233, %234 : vector<7x1x128xf32>
    %c2_312 = arith.constant 2 : index
    %c6_313 = arith.constant 6 : index
    %c0_314 = arith.constant 0 : index
    %236 = vector.load %arg16[%c2_312, %c6_313, %c0_314] : memref<11x12x128xf32, #tpu.memory_space<vmem>>, vector<7x1x128xf32>
    tpu.vector_store %arg16[%c2_312, %c6_313, %c0_314], %235 {strides = array<i32>} : memref<11x12x128xf32, #tpu.memory_space<vmem>>, vector<7x1x128xf32>,
    %c0_315 = arith.constant 0 : index
    %c10_316 = arith.constant 10 : index
    %c0_317 = arith.constant 0 : index
    %237 = vector.load %arg15[%c0_315, %c10_316, %c0_317] : memref<7x16x128xf32, #tpu.memory_space<vmem>>, vector<7x1x128xf32>
    %c0_318 = arith.constant 0 : index
    %c11_319 = arith.constant 11 : index
    %c0_320 = arith.constant 0 : index
    %238 = vector.load %arg15[%c0_318, %c11_319, %c0_320] : memref<7x16x128xf32, #tpu.memory_space<vmem>>, vector<7x1x128xf32>
    %239 = arith.maximumf %237, %238 : vector<7x1x128xf32>
    %c0_321 = arith.constant 0 : index
    %c12_322 = arith.constant 12 : index
    %c0_323 = arith.constant 0 : index
    %240 = vector.load %arg15[%c0_321, %c12_322, %c0_323] : memref<7x16x128xf32, #tpu.memory_space<vmem>>, vector<7x1x128xf32>
    %241 = arith.maximumf %239, %240 : vector<7x1x128xf32>
    %c2_324 = arith.constant 2 : index
    %c7_325 = arith.constant 7 : index
    %c0_326 = arith.constant 0 : index
    %242 = vector.load %arg16[%c2_324, %c7_325, %c0_326] : memref<11x12x128xf32, #tpu.memory_space<vmem>>, vector<7x1x128xf32>
    tpu.vector_store %arg16[%c2_324, %c7_325, %c0_326], %241 {strides = array<i32>} : memref<11x12x128xf32, #tpu.memory_space<vmem>>, vector<7x1x128xf32>,
    %c0_327 = arith.constant 0 : index
    %c12_328 = arith.constant 12 : index
    %c0_329 = arith.constant 0 : index
    %243 = vector.load %arg15[%c0_327, %c12_328, %c0_329] : memref<7x16x128xf32, #tpu.memory_space<vmem>>, vector<7x1x128xf32>
    %c0_330 = arith.constant 0 : index
    %c13_331 = arith.constant 13 : index
    %c0_332 = arith.constant 0 : index
    %244 = vector.load %arg15[%c0_330, %c13_331, %c0_332] : memref<7x16x128xf32, #tpu.memory_space<vmem>>, vector<7x1x128xf32>
    %245 = arith.maximumf %243, %244 : vector<7x1x128xf32>
    %c0_333 = arith.constant 0 : index
    %c14_334 = arith.constant 14 : index
    %c0_335 = arith.constant 0 : index
    %246 = vector.load %arg15[%c0_333, %c14_334, %c0_335] : memref<7x16x128xf32, #tpu.memory_space<vmem>>, vector<7x1x128xf32>
    %247 = arith.maximumf %245, %246 : vector<7x1x128xf32>
    %c2_336 = arith.constant 2 : index
    %c8_337 = arith.constant 8 : index
    %c0_338 = arith.constant 0 : index
    %248 = vector.load %arg16[%c2_336, %c8_337, %c0_338] : memref<11x12x128xf32, #tpu.memory_space<vmem>>, vector<7x1x128xf32>
    tpu.vector_store %arg16[%c2_336, %c8_337, %c0_338], %247 {strides = array<i32>} : memref<11x12x128xf32, #tpu.memory_space<vmem>>, vector<7x1x128xf32>,
    %cst_339 = arith.constant 0.000000e+00 : f32
    %249 = vector.broadcast %cst_339 : f32 to vector<56x128xf32>
    %c0_340 = arith.constant 0 : index
    %c0_341 = arith.constant 0 : index
    %c0_342 = arith.constant 0 : index
    %250 = vector.load %arg16[%c0_340, %c0_341, %c0_342] : memref<11x12x128xf32, #tpu.memory_space<vmem>>, vector<7x8x128xf32>
    %251 = vector.shape_cast %250 : vector<7x8x128xf32> to vector<56x128xf32>
    %c0_343 = arith.constant 0 : index
    %c0_344 = arith.constant 0 : index
    %c0_345 = arith.constant 0 : index
    %252 = vector.load %arg4[%c0_343, %c0_344, %c0_345] : memref<25x128x128xf32, #tpu.memory_space<vmem>>, vector<1x128x128xf32>
    %253 = vector.shape_cast %252 : vector<1x128x128xf32> to vector<128x128xf32>
    %cst_346 = arith.constant dense<0.000000e+00> : vector<56x128xf32>
    %254 = tpu.matmul %251, %253, %cst_346 {dimension_numbers = #tpu.dot_dimension_numbers<[1], [0], [0], [1], [0, 0, 1, 1], [], []>} : vector<56x128xf32>, vector<128x128xf32>, vector<56x128xf32> -> vector<56x128xf32>
    %255 = arith.addf %249, %254 : vector<56x128xf32>
    %c0_347 = arith.constant 0 : index
    %c1_348 = arith.constant 1 : index
    %c0_349 = arith.constant 0 : index
    %256 = vector.load %arg16[%c0_347, %c1_348, %c0_349] : memref<11x12x128xf32, #tpu.memory_space<vmem>>, vector<7x8x128xf32>
    %257 = vector.shape_cast %256 : vector<7x8x128xf32> to vector<56x128xf32>
    %c1_350 = arith.constant 1 : index
    %c0_351 = arith.constant 0 : index
    %c0_352 = arith.constant 0 : index
    %258 = vector.load %arg4[%c1_350, %c0_351, %c0_352] : memref<25x128x128xf32, #tpu.memory_space<vmem>>, vector<1x128x128xf32>
    %259 = vector.shape_cast %258 : vector<1x128x128xf32> to vector<128x128xf32>
    %cst_353 = arith.constant dense<0.000000e+00> : vector<56x128xf32>
    %260 = tpu.matmul %257, %259, %cst_353 {dimension_numbers = #tpu.dot_dimension_numbers<[1], [0], [0], [1], [0, 0, 1, 1], [], []>} : vector<56x128xf32>, vector<128x128xf32>, vector<56x128xf32> -> vector<56x128xf32>
    %261 = arith.addf %255, %260 : vector<56x128xf32>
    %c0_354 = arith.constant 0 : index
    %c2_355 = arith.constant 2 : index
    %c0_356 = arith.constant 0 : index
    %262 = vector.load %arg16[%c0_354, %c2_355, %c0_356] : memref<11x12x128xf32, #tpu.memory_space<vmem>>, vector<7x8x128xf32>
    %263 = vector.shape_cast %262 : vector<7x8x128xf32> to vector<56x128xf32>
    %c2_357 = arith.constant 2 : index
    %c0_358 = arith.constant 0 : index
    %c0_359 = arith.constant 0 : index
    %264 = vector.load %arg4[%c2_357, %c0_358, %c0_359] : memref<25x128x128xf32, #tpu.memory_space<vmem>>, vector<1x128x128xf32>
    %265 = vector.shape_cast %264 : vector<1x128x128xf32> to vector<128x128xf32>
    %cst_360 = arith.constant dense<0.000000e+00> : vector<56x128xf32>
    %266 = tpu.matmul %263, %265, %cst_360 {dimension_numbers = #tpu.dot_dimension_numbers<[1], [0], [0], [1], [0, 0, 1, 1], [], []>} : vector<56x128xf32>, vector<128x128xf32>, vector<56x128xf32> -> vector<56x128xf32>
    %267 = arith.addf %261, %266 : vector<56x128xf32>
    %c0_361 = arith.constant 0 : index
    %c3_362 = arith.constant 3 : index
    %c0_363 = arith.constant 0 : index
    %268 = vector.load %arg16[%c0_361, %c3_362, %c0_363] : memref<11x12x128xf32, #tpu.memory_space<vmem>>, vector<7x8x128xf32>
    %269 = vector.shape_cast %268 : vector<7x8x128xf32> to vector<56x128xf32>
    %c3_364 = arith.constant 3 : index
    %c0_365 = arith.constant 0 : index
    %c0_366 = arith.constant 0 : index
    %270 = vector.load %arg4[%c3_364, %c0_365, %c0_366] : memref<25x128x128xf32, #tpu.memory_space<vmem>>, vector<1x128x128xf32>
    %271 = vector.shape_cast %270 : vector<1x128x128xf32> to vector<128x128xf32>
    %cst_367 = arith.constant dense<0.000000e+00> : vector<56x128xf32>
    %272 = tpu.matmul %269, %271, %cst_367 {dimension_numbers = #tpu.dot_dimension_numbers<[1], [0], [0], [1], [0, 0, 1, 1], [], []>} : vector<56x128xf32>, vector<128x128xf32>, vector<56x128xf32> -> vector<56x128xf32>
    %273 = arith.addf %267, %272 : vector<56x128xf32>
    %c0_368 = arith.constant 0 : index
    %c4_369 = arith.constant 4 : index
    %c0_370 = arith.constant 0 : index
    %274 = vector.load %arg16[%c0_368, %c4_369, %c0_370] : memref<11x12x128xf32, #tpu.memory_space<vmem>>, vector<7x8x128xf32>
    %275 = vector.shape_cast %274 : vector<7x8x128xf32> to vector<56x128xf32>
    %c4_371 = arith.constant 4 : index
    %c0_372 = arith.constant 0 : index
    %c0_373 = arith.constant 0 : index
    %276 = vector.load %arg4[%c4_371, %c0_372, %c0_373] : memref<25x128x128xf32, #tpu.memory_space<vmem>>, vector<1x128x128xf32>
    %277 = vector.shape_cast %276 : vector<1x128x128xf32> to vector<128x128xf32>
    %cst_374 = arith.constant dense<0.000000e+00> : vector<56x128xf32>
    %278 = tpu.matmul %275, %277, %cst_374 {dimension_numbers = #tpu.dot_dimension_numbers<[1], [0], [0], [1], [0, 0, 1, 1], [], []>} : vector<56x128xf32>, vector<128x128xf32>, vector<56x128xf32> -> vector<56x128xf32>
    %279 = arith.addf %273, %278 : vector<56x128xf32>
    %c1_375 = arith.constant 1 : index
    %c0_376 = arith.constant 0 : index
    %c0_377 = arith.constant 0 : index
    %280 = vector.load %arg16[%c1_375, %c0_376, %c0_377] : memref<11x12x128xf32, #tpu.memory_space<vmem>>, vector<7x8x128xf32>
    %281 = vector.shape_cast %280 : vector<7x8x128xf32> to vector<56x128xf32>
    %c5_378 = arith.constant 5 : index
    %c0_379 = arith.constant 0 : index
    %c0_380 = arith.constant 0 : index
    %282 = vector.load %arg4[%c5_378, %c0_379, %c0_380] : memref<25x128x128xf32, #tpu.memory_space<vmem>>, vector<1x128x128xf32>
    %283 = vector.shape_cast %282 : vector<1x128x128xf32> to vector<128x128xf32>
    %cst_381 = arith.constant dense<0.000000e+00> : vector<56x128xf32>
    %284 = tpu.matmul %281, %283, %cst_381 {dimension_numbers = #tpu.dot_dimension_numbers<[1], [0], [0], [1], [0, 0, 1, 1], [], []>} : vector<56x128xf32>, vector<128x128xf32>, vector<56x128xf32> -> vector<56x128xf32>
    %285 = arith.addf %279, %284 : vector<56x128xf32>
    %c1_382 = arith.constant 1 : index
    %c1_383 = arith.constant 1 : index
    %c0_384 = arith.constant 0 : index
    %286 = vector.load %arg16[%c1_382, %c1_383, %c0_384] : memref<11x12x128xf32, #tpu.memory_space<vmem>>, vector<7x8x128xf32>
    %287 = vector.shape_cast %286 : vector<7x8x128xf32> to vector<56x128xf32>
    %c6_385 = arith.constant 6 : index
    %c0_386 = arith.constant 0 : index
    %c0_387 = arith.constant 0 : index
    %288 = vector.load %arg4[%c6_385, %c0_386, %c0_387] : memref<25x128x128xf32, #tpu.memory_space<vmem>>, vector<1x128x128xf32>
    %289 = vector.shape_cast %288 : vector<1x128x128xf32> to vector<128x128xf32>
    %cst_388 = arith.constant dense<0.000000e+00> : vector<56x128xf32>
    %290 = tpu.matmul %287, %289, %cst_388 {dimension_numbers = #tpu.dot_dimension_numbers<[1], [0], [0], [1], [0, 0, 1, 1], [], []>} : vector<56x128xf32>, vector<128x128xf32>, vector<56x128xf32> -> vector<56x128xf32>
    %291 = arith.addf %285, %290 : vector<56x128xf32>
    %c1_389 = arith.constant 1 : index
    %c2_390 = arith.constant 2 : index
    %c0_391 = arith.constant 0 : index
    %292 = vector.load %arg16[%c1_389, %c2_390, %c0_391] : memref<11x12x128xf32, #tpu.memory_space<vmem>>, vector<7x8x128xf32>
    %293 = vector.shape_cast %292 : vector<7x8x128xf32> to vector<56x128xf32>
    %c7_392 = arith.constant 7 : index
    %c0_393 = arith.constant 0 : index
    %c0_394 = arith.constant 0 : index
    %294 = vector.load %arg4[%c7_392, %c0_393, %c0_394] : memref<25x128x128xf32, #tpu.memory_space<vmem>>, vector<1x128x128xf32>
    %295 = vector.shape_cast %294 : vector<1x128x128xf32> to vector<128x128xf32>
    %cst_395 = arith.constant dense<0.000000e+00> : vector<56x128xf32>
    %296 = tpu.matmul %293, %295, %cst_395 {dimension_numbers = #tpu.dot_dimension_numbers<[1], [0], [0], [1], [0, 0, 1, 1], [], []>} : vector<56x128xf32>, vector<128x128xf32>, vector<56x128xf32> -> vector<56x128xf32>
    %297 = arith.addf %291, %296 : vector<56x128xf32>
    %c1_396 = arith.constant 1 : index
    %c3_397 = arith.constant 3 : index
    %c0_398 = arith.constant 0 : index
    %298 = vector.load %arg16[%c1_396, %c3_397, %c0_398] : memref<11x12x128xf32, #tpu.memory_space<vmem>>, vector<7x8x128xf32>
    %299 = vector.shape_cast %298 : vector<7x8x128xf32> to vector<56x128xf32>
    %c8_399 = arith.constant 8 : index
    %c0_400 = arith.constant 0 : index
    %c0_401 = arith.constant 0 : index
    %300 = vector.load %arg4[%c8_399, %c0_400, %c0_401] : memref<25x128x128xf32, #tpu.memory_space<vmem>>, vector<1x128x128xf32>
    %301 = vector.shape_cast %300 : vector<1x128x128xf32> to vector<128x128xf32>
    %cst_402 = arith.constant dense<0.000000e+00> : vector<56x128xf32>
    %302 = tpu.matmul %299, %301, %cst_402 {dimension_numbers = #tpu.dot_dimension_numbers<[1], [0], [0], [1], [0, 0, 1, 1], [], []>} : vector<56x128xf32>, vector<128x128xf32>, vector<56x128xf32> -> vector<56x128xf32>
    %303 = arith.addf %297, %302 : vector<56x128xf32>
    %c1_403 = arith.constant 1 : index
    %c4_404 = arith.constant 4 : index
    %c0_405 = arith.constant 0 : index
    %304 = vector.load %arg16[%c1_403, %c4_404, %c0_405] : memref<11x12x128xf32, #tpu.memory_space<vmem>>, vector<7x8x128xf32>
    %305 = vector.shape_cast %304 : vector<7x8x128xf32> to vector<56x128xf32>
    %c9_406 = arith.constant 9 : index
    %c0_407 = arith.constant 0 : index
    %c0_408 = arith.constant 0 : index
    %306 = vector.load %arg4[%c9_406, %c0_407, %c0_408] : memref<25x128x128xf32, #tpu.memory_space<vmem>>, vector<1x128x128xf32>
    %307 = vector.shape_cast %306 : vector<1x128x128xf32> to vector<128x128xf32>
    %cst_409 = arith.constant dense<0.000000e+00> : vector<56x128xf32>
    %308 = tpu.matmul %305, %307, %cst_409 {dimension_numbers = #tpu.dot_dimension_numbers<[1], [0], [0], [1], [0, 0, 1, 1], [], []>} : vector<56x128xf32>, vector<128x128xf32>, vector<56x128xf32> -> vector<56x128xf32>
    %309 = arith.addf %303, %308 : vector<56x128xf32>
    %c2_410 = arith.constant 2 : index
    %c0_411 = arith.constant 0 : index
    %c0_412 = arith.constant 0 : index
    %310 = vector.load %arg16[%c2_410, %c0_411, %c0_412] : memref<11x12x128xf32, #tpu.memory_space<vmem>>, vector<7x8x128xf32>
    %311 = vector.shape_cast %310 : vector<7x8x128xf32> to vector<56x128xf32>
    %c10_413 = arith.constant 10 : index
    %c0_414 = arith.constant 0 : index
    %c0_415 = arith.constant 0 : index
    %312 = vector.load %arg4[%c10_413, %c0_414, %c0_415] : memref<25x128x128xf32, #tpu.memory_space<vmem>>, vector<1x128x128xf32>
    %313 = vector.shape_cast %312 : vector<1x128x128xf32> to vector<128x128xf32>
    %cst_416 = arith.constant dense<0.000000e+00> : vector<56x128xf32>
    %314 = tpu.matmul %311, %313, %cst_416 {dimension_numbers = #tpu.dot_dimension_numbers<[1], [0], [0], [1], [0, 0, 1, 1], [], []>} : vector<56x128xf32>, vector<128x128xf32>, vector<56x128xf32> -> vector<56x128xf32>
    %315 = arith.addf %309, %314 : vector<56x128xf32>
    %c2_417 = arith.constant 2 : index
    %c1_418 = arith.constant 1 : index
    %c0_419 = arith.constant 0 : index
    %316 = vector.load %arg16[%c2_417, %c1_418, %c0_419] : memref<11x12x128xf32, #tpu.memory_space<vmem>>, vector<7x8x128xf32>
    %317 = vector.shape_cast %316 : vector<7x8x128xf32> to vector<56x128xf32>
    %c11_420 = arith.constant 11 : index
    %c0_421 = arith.constant 0 : index
    %c0_422 = arith.constant 0 : index
    %318 = vector.load %arg4[%c11_420, %c0_421, %c0_422] : memref<25x128x128xf32, #tpu.memory_space<vmem>>, vector<1x128x128xf32>
    %319 = vector.shape_cast %318 : vector<1x128x128xf32> to vector<128x128xf32>
    %cst_423 = arith.constant dense<0.000000e+00> : vector<56x128xf32>
    %320 = tpu.matmul %317, %319, %cst_423 {dimension_numbers = #tpu.dot_dimension_numbers<[1], [0], [0], [1], [0, 0, 1, 1], [], []>} : vector<56x128xf32>, vector<128x128xf32>, vector<56x128xf32> -> vector<56x128xf32>
    %321 = arith.addf %315, %320 : vector<56x128xf32>
    %c2_424 = arith.constant 2 : index
    %c2_425 = arith.constant 2 : index
    %c0_426 = arith.constant 0 : index
    %322 = vector.load %arg16[%c2_424, %c2_425, %c0_426] : memref<11x12x128xf32, #tpu.memory_space<vmem>>, vector<7x8x128xf32>
    %323 = vector.shape_cast %322 : vector<7x8x128xf32> to vector<56x128xf32>
    %c12_427 = arith.constant 12 : index
    %c0_428 = arith.constant 0 : index
    %c0_429 = arith.constant 0 : index
    %324 = vector.load %arg4[%c12_427, %c0_428, %c0_429] : memref<25x128x128xf32, #tpu.memory_space<vmem>>, vector<1x128x128xf32>
    %325 = vector.shape_cast %324 : vector<1x128x128xf32> to vector<128x128xf32>
    %cst_430 = arith.constant dense<0.000000e+00> : vector<56x128xf32>
    %326 = tpu.matmul %323, %325, %cst_430 {dimension_numbers = #tpu.dot_dimension_numbers<[1], [0], [0], [1], [0, 0, 1, 1], [], []>} : vector<56x128xf32>, vector<128x128xf32>, vector<56x128xf32> -> vector<56x128xf32>
    %327 = arith.addf %321, %326 : vector<56x128xf32>
    %c2_431 = arith.constant 2 : index
    %c3_432 = arith.constant 3 : index
    %c0_433 = arith.constant 0 : index
    %328 = vector.load %arg16[%c2_431, %c3_432, %c0_433] : memref<11x12x128xf32, #tpu.memory_space<vmem>>, vector<7x8x128xf32>
    %329 = vector.shape_cast %328 : vector<7x8x128xf32> to vector<56x128xf32>
    %c13_434 = arith.constant 13 : index
    %c0_435 = arith.constant 0 : index
    %c0_436 = arith.constant 0 : index
    %330 = vector.load %arg4[%c13_434, %c0_435, %c0_436] : memref<25x128x128xf32, #tpu.memory_space<vmem>>, vector<1x128x128xf32>
    %331 = vector.shape_cast %330 : vector<1x128x128xf32> to vector<128x128xf32>
    %cst_437 = arith.constant dense<0.000000e+00> : vector<56x128xf32>
    %332 = tpu.matmul %329, %331, %cst_437 {dimension_numbers = #tpu.dot_dimension_numbers<[1], [0], [0], [1], [0, 0, 1, 1], [], []>} : vector<56x128xf32>, vector<128x128xf32>, vector<56x128xf32> -> vector<56x128xf32>
    %333 = arith.addf %327, %332 : vector<56x128xf32>
    %c2_438 = arith.constant 2 : index
    %c4_439 = arith.constant 4 : index
    %c0_440 = arith.constant 0 : index
    %334 = vector.load %arg16[%c2_438, %c4_439, %c0_440] : memref<11x12x128xf32, #tpu.memory_space<vmem>>, vector<7x8x128xf32>
    %335 = vector.shape_cast %334 : vector<7x8x128xf32> to vector<56x128xf32>
    %c14_441 = arith.constant 14 : index
    %c0_442 = arith.constant 0 : index
    %c0_443 = arith.constant 0 : index
    %336 = vector.load %arg4[%c14_441, %c0_442, %c0_443] : memref<25x128x128xf32, #tpu.memory_space<vmem>>, vector<1x128x128xf32>
    %337 = vector.shape_cast %336 : vector<1x128x128xf32> to vector<128x128xf32>
    %cst_444 = arith.constant dense<0.000000e+00> : vector<56x128xf32>
    %338 = tpu.matmul %335, %337, %cst_444 {dimension_numbers = #tpu.dot_dimension_numbers<[1], [0], [0], [1], [0, 0, 1, 1], [], []>} : vector<56x128xf32>, vector<128x128xf32>, vector<56x128xf32> -> vector<56x128xf32>
    %339 = arith.addf %333, %338 : vector<56x128xf32>
    %c3_445 = arith.constant 3 : index
    %c0_446 = arith.constant 0 : index
    %c0_447 = arith.constant 0 : index
    %340 = vector.load %arg16[%c3_445, %c0_446, %c0_447] : memref<11x12x128xf32, #tpu.memory_space<vmem>>, vector<7x8x128xf32>
    %341 = vector.shape_cast %340 : vector<7x8x128xf32> to vector<56x128xf32>
    %c15_448 = arith.constant 15 : index
    %c0_449 = arith.constant 0 : index
    %c0_450 = arith.constant 0 : index
    %342 = vector.load %arg4[%c15_448, %c0_449, %c0_450] : memref<25x128x128xf32, #tpu.memory_space<vmem>>, vector<1x128x128xf32>
    %343 = vector.shape_cast %342 : vector<1x128x128xf32> to vector<128x128xf32>
    %cst_451 = arith.constant dense<0.000000e+00> : vector<56x128xf32>
    %344 = tpu.matmul %341, %343, %cst_451 {dimension_numbers = #tpu.dot_dimension_numbers<[1], [0], [0], [1], [0, 0, 1, 1], [], []>} : vector<56x128xf32>, vector<128x128xf32>, vector<56x128xf32> -> vector<56x128xf32>
    %345 = arith.addf %339, %344 : vector<56x128xf32>
    %c3_452 = arith.constant 3 : index
    %c1_453 = arith.constant 1 : index
    %c0_454 = arith.constant 0 : index
    %346 = vector.load %arg16[%c3_452, %c1_453, %c0_454] : memref<11x12x128xf32, #tpu.memory_space<vmem>>, vector<7x8x128xf32>
    %347 = vector.shape_cast %346 : vector<7x8x128xf32> to vector<56x128xf32>
    %c16_455 = arith.constant 16 : index
    %c0_456 = arith.constant 0 : index
    %c0_457 = arith.constant 0 : index
    %348 = vector.load %arg4[%c16_455, %c0_456, %c0_457] : memref<25x128x128xf32, #tpu.memory_space<vmem>>, vector<1x128x128xf32>
    %349 = vector.shape_cast %348 : vector<1x128x128xf32> to vector<128x128xf32>
    %cst_458 = arith.constant dense<0.000000e+00> : vector<56x128xf32>
    %350 = tpu.matmul %347, %349, %cst_458 {dimension_numbers = #tpu.dot_dimension_numbers<[1], [0], [0], [1], [0, 0, 1, 1], [], []>} : vector<56x128xf32>, vector<128x128xf32>, vector<56x128xf32> -> vector<56x128xf32>
    %351 = arith.addf %345, %350 : vector<56x128xf32>
    %c3_459 = arith.constant 3 : index
    %c2_460 = arith.constant 2 : index
    %c0_461 = arith.constant 0 : index
    %352 = vector.load %arg16[%c3_459, %c2_460, %c0_461] : memref<11x12x128xf32, #tpu.memory_space<vmem>>, vector<7x8x128xf32>
    %353 = vector.shape_cast %352 : vector<7x8x128xf32> to vector<56x128xf32>
    %c17_462 = arith.constant 17 : index
    %c0_463 = arith.constant 0 : index
    %c0_464 = arith.constant 0 : index
    %354 = vector.load %arg4[%c17_462, %c0_463, %c0_464] : memref<25x128x128xf32, #tpu.memory_space<vmem>>, vector<1x128x128xf32>
    %355 = vector.shape_cast %354 : vector<1x128x128xf32> to vector<128x128xf32>
    %cst_465 = arith.constant dense<0.000000e+00> : vector<56x128xf32>
    %356 = tpu.matmul %353, %355, %cst_465 {dimension_numbers = #tpu.dot_dimension_numbers<[1], [0], [0], [1], [0, 0, 1, 1], [], []>} : vector<56x128xf32>, vector<128x128xf32>, vector<56x128xf32> -> vector<56x128xf32>
    %357 = arith.addf %351, %356 : vector<56x128xf32>
    %c3_466 = arith.constant 3 : index
    %c3_467 = arith.constant 3 : index
    %c0_468 = arith.constant 0 : index
    %358 = vector.load %arg16[%c3_466, %c3_467, %c0_468] : memref<11x12x128xf32, #tpu.memory_space<vmem>>, vector<7x8x128xf32>
    %359 = vector.shape_cast %358 : vector<7x8x128xf32> to vector<56x128xf32>
    %c18_469 = arith.constant 18 : index
    %c0_470 = arith.constant 0 : index
    %c0_471 = arith.constant 0 : index
    %360 = vector.load %arg4[%c18_469, %c0_470, %c0_471] : memref<25x128x128xf32, #tpu.memory_space<vmem>>, vector<1x128x128xf32>
    %361 = vector.shape_cast %360 : vector<1x128x128xf32> to vector<128x128xf32>
    %cst_472 = arith.constant dense<0.000000e+00> : vector<56x128xf32>
    %362 = tpu.matmul %359, %361, %cst_472 {dimension_numbers = #tpu.dot_dimension_numbers<[1], [0], [0], [1], [0, 0, 1, 1], [], []>} : vector<56x128xf32>, vector<128x128xf32>, vector<56x128xf32> -> vector<56x128xf32>
    %363 = arith.addf %357, %362 : vector<56x128xf32>
    %c3_473 = arith.constant 3 : index
    %c4_474 = arith.constant 4 : index
    %c0_475 = arith.constant 0 : index
    %364 = vector.load %arg16[%c3_473, %c4_474, %c0_475] : memref<11x12x128xf32, #tpu.memory_space<vmem>>, vector<7x8x128xf32>
    %365 = vector.shape_cast %364 : vector<7x8x128xf32> to vector<56x128xf32>
    %c19_476 = arith.constant 19 : index
    %c0_477 = arith.constant 0 : index
    %c0_478 = arith.constant 0 : index
    %366 = vector.load %arg4[%c19_476, %c0_477, %c0_478] : memref<25x128x128xf32, #tpu.memory_space<vmem>>, vector<1x128x128xf32>
    %367 = vector.shape_cast %366 : vector<1x128x128xf32> to vector<128x128xf32>
    %cst_479 = arith.constant dense<0.000000e+00> : vector<56x128xf32>
    %368 = tpu.matmul %365, %367, %cst_479 {dimension_numbers = #tpu.dot_dimension_numbers<[1], [0], [0], [1], [0, 0, 1, 1], [], []>} : vector<56x128xf32>, vector<128x128xf32>, vector<56x128xf32> -> vector<56x128xf32>
    %369 = arith.addf %363, %368 : vector<56x128xf32>
    %c4_480 = arith.constant 4 : index
    %c0_481 = arith.constant 0 : index
    %c0_482 = arith.constant 0 : index
    %370 = vector.load %arg16[%c4_480, %c0_481, %c0_482] : memref<11x12x128xf32, #tpu.memory_space<vmem>>, vector<7x8x128xf32>
    %371 = vector.shape_cast %370 : vector<7x8x128xf32> to vector<56x128xf32>
    %c20_483 = arith.constant 20 : index
    %c0_484 = arith.constant 0 : index
    %c0_485 = arith.constant 0 : index
    %372 = vector.load %arg4[%c20_483, %c0_484, %c0_485] : memref<25x128x128xf32, #tpu.memory_space<vmem>>, vector<1x128x128xf32>
    %373 = vector.shape_cast %372 : vector<1x128x128xf32> to vector<128x128xf32>
    %cst_486 = arith.constant dense<0.000000e+00> : vector<56x128xf32>
    %374 = tpu.matmul %371, %373, %cst_486 {dimension_numbers = #tpu.dot_dimension_numbers<[1], [0], [0], [1], [0, 0, 1, 1], [], []>} : vector<56x128xf32>, vector<128x128xf32>, vector<56x128xf32> -> vector<56x128xf32>
    %375 = arith.addf %369, %374 : vector<56x128xf32>
    %c4_487 = arith.constant 4 : index
    %c1_488 = arith.constant 1 : index
    %c0_489 = arith.constant 0 : index
    %376 = vector.load %arg16[%c4_487, %c1_488, %c0_489] : memref<11x12x128xf32, #tpu.memory_space<vmem>>, vector<7x8x128xf32>
    %377 = vector.shape_cast %376 : vector<7x8x128xf32> to vector<56x128xf32>
    %c21_490 = arith.constant 21 : index
    %c0_491 = arith.constant 0 : index
    %c0_492 = arith.constant 0 : index
    %378 = vector.load %arg4[%c21_490, %c0_491, %c0_492] : memref<25x128x128xf32, #tpu.memory_space<vmem>>, vector<1x128x128xf32>
    %379 = vector.shape_cast %378 : vector<1x128x128xf32> to vector<128x128xf32>
    %cst_493 = arith.constant dense<0.000000e+00> : vector<56x128xf32>
    %380 = tpu.matmul %377, %379, %cst_493 {dimension_numbers = #tpu.dot_dimension_numbers<[1], [0], [0], [1], [0, 0, 1, 1], [], []>} : vector<56x128xf32>, vector<128x128xf32>, vector<56x128xf32> -> vector<56x128xf32>
    %381 = arith.addf %375, %380 : vector<56x128xf32>
    %c4_494 = arith.constant 4 : index
    %c2_495 = arith.constant 2 : index
    %c0_496 = arith.constant 0 : index
    %382 = vector.load %arg16[%c4_494, %c2_495, %c0_496] : memref<11x12x128xf32, #tpu.memory_space<vmem>>, vector<7x8x128xf32>
    %383 = vector.shape_cast %382 : vector<7x8x128xf32> to vector<56x128xf32>
    %c22_497 = arith.constant 22 : index
    %c0_498 = arith.constant 0 : index
    %c0_499 = arith.constant 0 : index
    %384 = vector.load %arg4[%c22_497, %c0_498, %c0_499] : memref<25x128x128xf32, #tpu.memory_space<vmem>>, vector<1x128x128xf32>
    %385 = vector.shape_cast %384 : vector<1x128x128xf32> to vector<128x128xf32>
    %cst_500 = arith.constant dense<0.000000e+00> : vector<56x128xf32>
    %386 = tpu.matmul %383, %385, %cst_500 {dimension_numbers = #tpu.dot_dimension_numbers<[1], [0], [0], [1], [0, 0, 1, 1], [], []>} : vector<56x128xf32>, vector<128x128xf32>, vector<56x128xf32> -> vector<56x128xf32>
    %387 = arith.addf %381, %386 : vector<56x128xf32>
    %c4_501 = arith.constant 4 : index
    %c3_502 = arith.constant 3 : index
    %c0_503 = arith.constant 0 : index
    %388 = vector.load %arg16[%c4_501, %c3_502, %c0_503] : memref<11x12x128xf32, #tpu.memory_space<vmem>>, vector<7x8x128xf32>
    %389 = vector.shape_cast %388 : vector<7x8x128xf32> to vector<56x128xf32>
    %c23_504 = arith.constant 23 : index
    %c0_505 = arith.constant 0 : index
    %c0_506 = arith.constant 0 : index
    %390 = vector.load %arg4[%c23_504, %c0_505, %c0_506] : memref<25x128x128xf32, #tpu.memory_space<vmem>>, vector<1x128x128xf32>
    %391 = vector.shape_cast %390 : vector<1x128x128xf32> to vector<128x128xf32>
    %cst_507 = arith.constant dense<0.000000e+00> : vector<56x128xf32>
    %392 = tpu.matmul %389, %391, %cst_507 {dimension_numbers = #tpu.dot_dimension_numbers<[1], [0], [0], [1], [0, 0, 1, 1], [], []>} : vector<56x128xf32>, vector<128x128xf32>, vector<56x128xf32> -> vector<56x128xf32>
    %393 = arith.addf %387, %392 : vector<56x128xf32>
    %c4_508 = arith.constant 4 : index
    %c4_509 = arith.constant 4 : index
    %c0_510 = arith.constant 0 : index
    %394 = vector.load %arg16[%c4_508, %c4_509, %c0_510] : memref<11x12x128xf32, #tpu.memory_space<vmem>>, vector<7x8x128xf32>
    %395 = vector.shape_cast %394 : vector<7x8x128xf32> to vector<56x128xf32>
    %c24_511 = arith.constant 24 : index
    %c0_512 = arith.constant 0 : index
    %c0_513 = arith.constant 0 : index
    %396 = vector.load %arg4[%c24_511, %c0_512, %c0_513] : memref<25x128x128xf32, #tpu.memory_space<vmem>>, vector<1x128x128xf32>
    %397 = vector.shape_cast %396 : vector<1x128x128xf32> to vector<128x128xf32>
    %cst_514 = arith.constant dense<0.000000e+00> : vector<56x128xf32>
    %398 = tpu.matmul %395, %397, %cst_514 {dimension_numbers = #tpu.dot_dimension_numbers<[1], [0], [0], [1], [0, 0, 1, 1], [], []>} : vector<56x128xf32>, vector<128x128xf32>, vector<56x128xf32> -> vector<56x128xf32>
    %399 = arith.addf %393, %398 : vector<56x128xf32>
    %c0_515 = arith.constant 0 : index
    %c0_516 = arith.constant 0 : index
    %400 = vector.load %arg5[%c0_515, %c0_516] : memref<1x128xf32, #tpu.memory_space<vmem>>, vector<1x128xf32>
    %401 = vector.broadcast %400 : vector<1x128xf32> to vector<56x128xf32>
    %402 = arith.addf %399, %401 : vector<56x128xf32>
    %cst_517 = arith.constant 0.000000e+00 : f32
    %403 = vector.broadcast %cst_517 : f32 to vector<56x128xf32>
    %404 = arith.maximumf %402, %403 : vector<56x128xf32>
    %c0_518 = arith.constant 0 : index
    %c0_519 = arith.constant 0 : index
    %405 = vector.load %arg17[%c0_518, %c0_519] : memref<56x128xf32, #tpu.memory_space<vmem>>, vector<56x128xf32>
    tpu.vector_store %arg17[%c0_518, %c0_519], %404 {strides = array<i32>} : memref<56x128xf32, #tpu.memory_space<vmem>>, vector<56x128xf32>,
    %c0_520 = arith.constant 0 : index
    %c0_521 = arith.constant 0 : index
    %406 = vector.load %arg7[%c0_520, %c0_521] : memref<1x128xf32, #tpu.memory_space<vmem>>, vector<1x128xf32>
    %c0_522 = arith.constant 0 : index
    %c0_523 = arith.constant 0 : index
    %407 = vector.load %arg17[%c0_522, %c0_523] : memref<56x128xf32, #tpu.memory_space<vmem>>, vector<1x128xf32>
    %c1_524 = arith.constant 1 : index
    %c0_525 = arith.constant 0 : index
    %408 = vector.load %arg17[%c1_524, %c0_525] : memref<56x128xf32, #tpu.memory_space<vmem>>, vector<1x128xf32>
    %409 = arith.maximumf %407, %408 : vector<1x128xf32>
    %c2_526 = arith.constant 2 : index
    %c0_527 = arith.constant 0 : index
    %410 = vector.load %arg17[%c2_526, %c0_527] : memref<56x128xf32, #tpu.memory_space<vmem>>, vector<1x128xf32>
    %411 = arith.maximumf %409, %410 : vector<1x128xf32>
    %c8_528 = arith.constant 8 : index
    %c0_529 = arith.constant 0 : index
    %412 = vector.load %arg17[%c8_528, %c0_529] : memref<56x128xf32, #tpu.memory_space<vmem>>, vector<1x128xf32>
    %413 = arith.maximumf %411, %412 : vector<1x128xf32>
    %c9_530 = arith.constant 9 : index
    %c0_531 = arith.constant 0 : index
    %414 = vector.load %arg17[%c9_530, %c0_531] : memref<56x128xf32, #tpu.memory_space<vmem>>, vector<1x128xf32>
    %415 = arith.maximumf %413, %414 : vector<1x128xf32>
    %c10_532 = arith.constant 10 : index
    %c0_533 = arith.constant 0 : index
    %416 = vector.load %arg17[%c10_532, %c0_533] : memref<56x128xf32, #tpu.memory_space<vmem>>, vector<1x128xf32>
    %417 = arith.maximumf %415, %416 : vector<1x128xf32>
    %c16_534 = arith.constant 16 : index
    %c0_535 = arith.constant 0 : index
    %418 = vector.load %arg17[%c16_534, %c0_535] : memref<56x128xf32, #tpu.memory_space<vmem>>, vector<1x128xf32>
    %419 = arith.maximumf %417, %418 : vector<1x128xf32>
    %c17_536 = arith.constant 17 : index
    %c0_537 = arith.constant 0 : index
    %420 = vector.load %arg17[%c17_536, %c0_537] : memref<56x128xf32, #tpu.memory_space<vmem>>, vector<1x128xf32>
    %421 = arith.maximumf %419, %420 : vector<1x128xf32>
    %c18_538 = arith.constant 18 : index
    %c0_539 = arith.constant 0 : index
    %422 = vector.load %arg17[%c18_538, %c0_539] : memref<56x128xf32, #tpu.memory_space<vmem>>, vector<1x128xf32>
    %423 = arith.maximumf %421, %422 : vector<1x128xf32>
    %c0_540 = arith.constant 0 : index
    %c0_541 = arith.constant 0 : index
    %c0_542 = arith.constant 0 : index
    %424 = vector.load %arg6[%c0_540, %c0_541, %c0_542] : memref<9x128x128xf32, #tpu.memory_space<vmem>>, vector<1x128x128xf32>
    %425 = vector.shape_cast %424 : vector<1x128x128xf32> to vector<128x128xf32>
    %cst_543 = arith.constant dense<0.000000e+00> : vector<1x128xf32>
    %426 = tpu.matmul %423, %425, %cst_543 {dimension_numbers = #tpu.dot_dimension_numbers<[1], [0], [0], [1], [0, 0, 1, 1], [], []>} : vector<1x128xf32>, vector<128x128xf32>, vector<1x128xf32> -> vector<1x128xf32>
    %427 = arith.addf %406, %426 : vector<1x128xf32>
    %c2_544 = arith.constant 2 : index
    %c0_545 = arith.constant 0 : index
    %428 = vector.load %arg17[%c2_544, %c0_545] : memref<56x128xf32, #tpu.memory_space<vmem>>, vector<1x128xf32>
    %c3_546 = arith.constant 3 : index
    %c0_547 = arith.constant 0 : index
    %429 = vector.load %arg17[%c3_546, %c0_547] : memref<56x128xf32, #tpu.memory_space<vmem>>, vector<1x128xf32>
    %430 = arith.maximumf %428, %429 : vector<1x128xf32>
    %c4_548 = arith.constant 4 : index
    %c0_549 = arith.constant 0 : index
    %431 = vector.load %arg17[%c4_548, %c0_549] : memref<56x128xf32, #tpu.memory_space<vmem>>, vector<1x128xf32>
    %432 = arith.maximumf %430, %431 : vector<1x128xf32>
    %c10_550 = arith.constant 10 : index
    %c0_551 = arith.constant 0 : index
    %433 = vector.load %arg17[%c10_550, %c0_551] : memref<56x128xf32, #tpu.memory_space<vmem>>, vector<1x128xf32>
    %434 = arith.maximumf %432, %433 : vector<1x128xf32>
    %c11_552 = arith.constant 11 : index
    %c0_553 = arith.constant 0 : index
    %435 = vector.load %arg17[%c11_552, %c0_553] : memref<56x128xf32, #tpu.memory_space<vmem>>, vector<1x128xf32>
    %436 = arith.maximumf %434, %435 : vector<1x128xf32>
    %c12_554 = arith.constant 12 : index
    %c0_555 = arith.constant 0 : index
    %437 = vector.load %arg17[%c12_554, %c0_555] : memref<56x128xf32, #tpu.memory_space<vmem>>, vector<1x128xf32>
    %438 = arith.maximumf %436, %437 : vector<1x128xf32>
    %c18_556 = arith.constant 18 : index
    %c0_557 = arith.constant 0 : index
    %439 = vector.load %arg17[%c18_556, %c0_557] : memref<56x128xf32, #tpu.memory_space<vmem>>, vector<1x128xf32>
    %440 = arith.maximumf %438, %439 : vector<1x128xf32>
    %c19_558 = arith.constant 19 : index
    %c0_559 = arith.constant 0 : index
    %441 = vector.load %arg17[%c19_558, %c0_559] : memref<56x128xf32, #tpu.memory_space<vmem>>, vector<1x128xf32>
    %442 = arith.maximumf %440, %441 : vector<1x128xf32>
    %c20_560 = arith.constant 20 : index
    %c0_561 = arith.constant 0 : index
    %443 = vector.load %arg17[%c20_560, %c0_561] : memref<56x128xf32, #tpu.memory_space<vmem>>, vector<1x128xf32>
    %444 = arith.maximumf %442, %443 : vector<1x128xf32>
    %c1_562 = arith.constant 1 : index
    %c0_563 = arith.constant 0 : index
    %c0_564 = arith.constant 0 : index
    %445 = vector.load %arg6[%c1_562, %c0_563, %c0_564] : memref<9x128x128xf32, #tpu.memory_space<vmem>>, vector<1x128x128xf32>
    %446 = vector.shape_cast %445 : vector<1x128x128xf32> to vector<128x128xf32>
    %cst_565 = arith.constant dense<0.000000e+00> : vector<1x128xf32>
    %447 = tpu.matmul %444, %446, %cst_565 {dimension_numbers = #tpu.dot_dimension_numbers<[1], [0], [0], [1], [0, 0, 1, 1], [], []>} : vector<1x128xf32>, vector<128x128xf32>, vector<1x128xf32> -> vector<1x128xf32>
    %448 = arith.addf %427, %447 : vector<1x128xf32>
    %c4_566 = arith.constant 4 : index
    %c0_567 = arith.constant 0 : index
    %449 = vector.load %arg17[%c4_566, %c0_567] : memref<56x128xf32, #tpu.memory_space<vmem>>, vector<1x128xf32>
    %c5_568 = arith.constant 5 : index
    %c0_569 = arith.constant 0 : index
    %450 = vector.load %arg17[%c5_568, %c0_569] : memref<56x128xf32, #tpu.memory_space<vmem>>, vector<1x128xf32>
    %451 = arith.maximumf %449, %450 : vector<1x128xf32>
    %c6_570 = arith.constant 6 : index
    %c0_571 = arith.constant 0 : index
    %452 = vector.load %arg17[%c6_570, %c0_571] : memref<56x128xf32, #tpu.memory_space<vmem>>, vector<1x128xf32>
    %453 = arith.maximumf %451, %452 : vector<1x128xf32>
    %c12_572 = arith.constant 12 : index
    %c0_573 = arith.constant 0 : index
    %454 = vector.load %arg17[%c12_572, %c0_573] : memref<56x128xf32, #tpu.memory_space<vmem>>, vector<1x128xf32>
    %455 = arith.maximumf %453, %454 : vector<1x128xf32>
    %c13_574 = arith.constant 13 : index
    %c0_575 = arith.constant 0 : index
    %456 = vector.load %arg17[%c13_574, %c0_575] : memref<56x128xf32, #tpu.memory_space<vmem>>, vector<1x128xf32>
    %457 = arith.maximumf %455, %456 : vector<1x128xf32>
    %c14_576 = arith.constant 14 : index
    %c0_577 = arith.constant 0 : index
    %458 = vector.load %arg17[%c14_576, %c0_577] : memref<56x128xf32, #tpu.memory_space<vmem>>, vector<1x128xf32>
    %459 = arith.maximumf %457, %458 : vector<1x128xf32>
    %c20_578 = arith.constant 20 : index
    %c0_579 = arith.constant 0 : index
    %460 = vector.load %arg17[%c20_578, %c0_579] : memref<56x128xf32, #tpu.memory_space<vmem>>, vector<1x128xf32>
    %461 = arith.maximumf %459, %460 : vector<1x128xf32>
    %c21_580 = arith.constant 21 : index
    %c0_581 = arith.constant 0 : index
    %462 = vector.load %arg17[%c21_580, %c0_581] : memref<56x128xf32, #tpu.memory_space<vmem>>, vector<1x128xf32>
    %463 = arith.maximumf %461, %462 : vector<1x128xf32>
    %c22_582 = arith.constant 22 : index
    %c0_583 = arith.constant 0 : index
    %464 = vector.load %arg17[%c22_582, %c0_583] : memref<56x128xf32, #tpu.memory_space<vmem>>, vector<1x128xf32>
    %465 = arith.maximumf %463, %464 : vector<1x128xf32>
    %c2_584 = arith.constant 2 : index
    %c0_585 = arith.constant 0 : index
    %c0_586 = arith.constant 0 : index
    %466 = vector.load %arg6[%c2_584, %c0_585, %c0_586] : memref<9x128x128xf32, #tpu.memory_space<vmem>>, vector<1x128x128xf32>
    %467 = vector.shape_cast %466 : vector<1x128x128xf32> to vector<128x128xf32>
    %cst_587 = arith.constant dense<0.000000e+00> : vector<1x128xf32>
    %468 = tpu.matmul %465, %467, %cst_587 {dimension_numbers = #tpu.dot_dimension_numbers<[1], [0], [0], [1], [0, 0, 1, 1], [], []>} : vector<1x128xf32>, vector<128x128xf32>, vector<1x128xf32> -> vector<1x128xf32>
    %469 = arith.addf %448, %468 : vector<1x128xf32>
    %c16_588 = arith.constant 16 : index
    %c0_589 = arith.constant 0 : index
    %470 = vector.load %arg17[%c16_588, %c0_589] : memref<56x128xf32, #tpu.memory_space<vmem>>, vector<1x128xf32>
    %c17_590 = arith.constant 17 : index
    %c0_591 = arith.constant 0 : index
    %471 = vector.load %arg17[%c17_590, %c0_591] : memref<56x128xf32, #tpu.memory_space<vmem>>, vector<1x128xf32>
    %472 = arith.maximumf %470, %471 : vector<1x128xf32>
    %c18_592 = arith.constant 18 : index
    %c0_593 = arith.constant 0 : index
    %473 = vector.load %arg17[%c18_592, %c0_593] : memref<56x128xf32, #tpu.memory_space<vmem>>, vector<1x128xf32>
    %474 = arith.maximumf %472, %473 : vector<1x128xf32>
    %c24_594 = arith.constant 24 : index
    %c0_595 = arith.constant 0 : index
    %475 = vector.load %arg17[%c24_594, %c0_595] : memref<56x128xf32, #tpu.memory_space<vmem>>, vector<1x128xf32>
    %476 = arith.maximumf %474, %475 : vector<1x128xf32>
    %c25 = arith.constant 25 : index
    %c0_596 = arith.constant 0 : index
    %477 = vector.load %arg17[%c25, %c0_596] : memref<56x128xf32, #tpu.memory_space<vmem>>, vector<1x128xf32>
    %478 = arith.maximumf %476, %477 : vector<1x128xf32>
    %c26 = arith.constant 26 : index
    %c0_597 = arith.constant 0 : index
    %479 = vector.load %arg17[%c26, %c0_597] : memref<56x128xf32, #tpu.memory_space<vmem>>, vector<1x128xf32>
    %480 = arith.maximumf %478, %479 : vector<1x128xf32>
    %c32 = arith.constant 32 : index
    %c0_598 = arith.constant 0 : index
    %481 = vector.load %arg17[%c32, %c0_598] : memref<56x128xf32, #tpu.memory_space<vmem>>, vector<1x128xf32>
    %482 = arith.maximumf %480, %481 : vector<1x128xf32>
    %c33 = arith.constant 33 : index
    %c0_599 = arith.constant 0 : index
    %483 = vector.load %arg17[%c33, %c0_599] : memref<56x128xf32, #tpu.memory_space<vmem>>, vector<1x128xf32>
    %484 = arith.maximumf %482, %483 : vector<1x128xf32>
    %c34 = arith.constant 34 : index
    %c0_600 = arith.constant 0 : index
    %485 = vector.load %arg17[%c34, %c0_600] : memref<56x128xf32, #tpu.memory_space<vmem>>, vector<1x128xf32>
    %486 = arith.maximumf %484, %485 : vector<1x128xf32>
    %c3_601 = arith.constant 3 : index
    %c0_602 = arith.constant 0 : index
    %c0_603 = arith.constant 0 : index
    %487 = vector.load %arg6[%c3_601, %c0_602, %c0_603] : memref<9x128x128xf32, #tpu.memory_space<vmem>>, vector<1x128x128xf32>
    %488 = vector.shape_cast %487 : vector<1x128x128xf32> to vector<128x128xf32>
    %cst_604 = arith.constant dense<0.000000e+00> : vector<1x128xf32>
    %489 = tpu.matmul %486, %488, %cst_604 {dimension_numbers = #tpu.dot_dimension_numbers<[1], [0], [0], [1], [0, 0, 1, 1], [], []>} : vector<1x128xf32>, vector<128x128xf32>, vector<1x128xf32> -> vector<1x128xf32>
    %490 = arith.addf %469, %489 : vector<1x128xf32>
    %c18_605 = arith.constant 18 : index
    %c0_606 = arith.constant 0 : index
    %491 = vector.load %arg17[%c18_605, %c0_606] : memref<56x128xf32, #tpu.memory_space<vmem>>, vector<1x128xf32>
    %c19_607 = arith.constant 19 : index
    %c0_608 = arith.constant 0 : index
    %492 = vector.load %arg17[%c19_607, %c0_608] : memref<56x128xf32, #tpu.memory_space<vmem>>, vector<1x128xf32>
    %493 = arith.maximumf %491, %492 : vector<1x128xf32>
    %c20_609 = arith.constant 20 : index
    %c0_610 = arith.constant 0 : index
    %494 = vector.load %arg17[%c20_609, %c0_610] : memref<56x128xf32, #tpu.memory_space<vmem>>, vector<1x128xf32>
    %495 = arith.maximumf %493, %494 : vector<1x128xf32>
    %c26_611 = arith.constant 26 : index
    %c0_612 = arith.constant 0 : index
    %496 = vector.load %arg17[%c26_611, %c0_612] : memref<56x128xf32, #tpu.memory_space<vmem>>, vector<1x128xf32>
    %497 = arith.maximumf %495, %496 : vector<1x128xf32>
    %c27 = arith.constant 27 : index
    %c0_613 = arith.constant 0 : index
    %498 = vector.load %arg17[%c27, %c0_613] : memref<56x128xf32, #tpu.memory_space<vmem>>, vector<1x128xf32>
    %499 = arith.maximumf %497, %498 : vector<1x128xf32>
    %c28 = arith.constant 28 : index
    %c0_614 = arith.constant 0 : index
    %500 = vector.load %arg17[%c28, %c0_614] : memref<56x128xf32, #tpu.memory_space<vmem>>, vector<1x128xf32>
    %501 = arith.maximumf %499, %500 : vector<1x128xf32>
    %c34_615 = arith.constant 34 : index
    %c0_616 = arith.constant 0 : index
    %502 = vector.load %arg17[%c34_615, %c0_616] : memref<56x128xf32, #tpu.memory_space<vmem>>, vector<1x128xf32>
    %503 = arith.maximumf %501, %502 : vector<1x128xf32>
    %c35 = arith.constant 35 : index
    %c0_617 = arith.constant 0 : index
    %504 = vector.load %arg17[%c35, %c0_617] : memref<56x128xf32, #tpu.memory_space<vmem>>, vector<1x128xf32>
    %505 = arith.maximumf %503, %504 : vector<1x128xf32>
    %c36 = arith.constant 36 : index
    %c0_618 = arith.constant 0 : index
    %506 = vector.load %arg17[%c36, %c0_618] : memref<56x128xf32, #tpu.memory_space<vmem>>, vector<1x128xf32>
    %507 = arith.maximumf %505, %506 : vector<1x128xf32>
    %c4_619 = arith.constant 4 : index
    %c0_620 = arith.constant 0 : index
    %c0_621 = arith.constant 0 : index
    %508 = vector.load %arg6[%c4_619, %c0_620, %c0_621] : memref<9x128x128xf32, #tpu.memory_space<vmem>>, vector<1x128x128xf32>
    %509 = vector.shape_cast %508 : vector<1x128x128xf32> to vector<128x128xf32>
    %cst_622 = arith.constant dense<0.000000e+00> : vector<1x128xf32>
    %510 = tpu.matmul %507, %509, %cst_622 {dimension_numbers = #tpu.dot_dimension_numbers<[1], [0], [0], [1], [0, 0, 1, 1], [], []>} : vector<1x128xf32>, vector<128x128xf32>, vector<1x128xf32> -> vector<1x128xf32>
    %511 = arith.addf %490, %510 : vector<1x128xf32>
    %c20_623 = arith.constant 20 : index
    %c0_624 = arith.constant 0 : index
    %512 = vector.load %arg17[%c20_623, %c0_624] : memref<56x128xf32, #tpu.memory_space<vmem>>, vector<1x128xf32>
    %c21_625 = arith.constant 21 : index
    %c0_626 = arith.constant 0 : index
    %513 = vector.load %arg17[%c21_625, %c0_626] : memref<56x128xf32, #tpu.memory_space<vmem>>, vector<1x128xf32>
    %514 = arith.maximumf %512, %513 : vector<1x128xf32>
    %c22_627 = arith.constant 22 : index
    %c0_628 = arith.constant 0 : index
    %515 = vector.load %arg17[%c22_627, %c0_628] : memref<56x128xf32, #tpu.memory_space<vmem>>, vector<1x128xf32>
    %516 = arith.maximumf %514, %515 : vector<1x128xf32>
    %c28_629 = arith.constant 28 : index
    %c0_630 = arith.constant 0 : index
    %517 = vector.load %arg17[%c28_629, %c0_630] : memref<56x128xf32, #tpu.memory_space<vmem>>, vector<1x128xf32>
    %518 = arith.maximumf %516, %517 : vector<1x128xf32>
    %c29 = arith.constant 29 : index
    %c0_631 = arith.constant 0 : index
    %519 = vector.load %arg17[%c29, %c0_631] : memref<56x128xf32, #tpu.memory_space<vmem>>, vector<1x128xf32>
    %520 = arith.maximumf %518, %519 : vector<1x128xf32>
    %c30 = arith.constant 30 : index
    %c0_632 = arith.constant 0 : index
    %521 = vector.load %arg17[%c30, %c0_632] : memref<56x128xf32, #tpu.memory_space<vmem>>, vector<1x128xf32>
    %522 = arith.maximumf %520, %521 : vector<1x128xf32>
    %c36_633 = arith.constant 36 : index
    %c0_634 = arith.constant 0 : index
    %523 = vector.load %arg17[%c36_633, %c0_634] : memref<56x128xf32, #tpu.memory_space<vmem>>, vector<1x128xf32>
    %524 = arith.maximumf %522, %523 : vector<1x128xf32>
    %c37 = arith.constant 37 : index
    %c0_635 = arith.constant 0 : index
    %525 = vector.load %arg17[%c37, %c0_635] : memref<56x128xf32, #tpu.memory_space<vmem>>, vector<1x128xf32>
    %526 = arith.maximumf %524, %525 : vector<1x128xf32>
    %c38 = arith.constant 38 : index
    %c0_636 = arith.constant 0 : index
    %527 = vector.load %arg17[%c38, %c0_636] : memref<56x128xf32, #tpu.memory_space<vmem>>, vector<1x128xf32>
    %528 = arith.maximumf %526, %527 : vector<1x128xf32>
    %c5_637 = arith.constant 5 : index
    %c0_638 = arith.constant 0 : index
    %c0_639 = arith.constant 0 : index
    %529 = vector.load %arg6[%c5_637, %c0_638, %c0_639] : memref<9x128x128xf32, #tpu.memory_space<vmem>>, vector<1x128x128xf32>
    %530 = vector.shape_cast %529 : vector<1x128x128xf32> to vector<128x128xf32>
    %cst_640 = arith.constant dense<0.000000e+00> : vector<1x128xf32>
    %531 = tpu.matmul %528, %530, %cst_640 {dimension_numbers = #tpu.dot_dimension_numbers<[1], [0], [0], [1], [0, 0, 1, 1], [], []>} : vector<1x128xf32>, vector<128x128xf32>, vector<1x128xf32> -> vector<1x128xf32>
    %532 = arith.addf %511, %531 : vector<1x128xf32>
    %c32_641 = arith.constant 32 : index
    %c0_642 = arith.constant 0 : index
    %533 = vector.load %arg17[%c32_641, %c0_642] : memref<56x128xf32, #tpu.memory_space<vmem>>, vector<1x128xf32>
    %c33_643 = arith.constant 33 : index
    %c0_644 = arith.constant 0 : index
    %534 = vector.load %arg17[%c33_643, %c0_644] : memref<56x128xf32, #tpu.memory_space<vmem>>, vector<1x128xf32>
    %535 = arith.maximumf %533, %534 : vector<1x128xf32>
    %c34_645 = arith.constant 34 : index
    %c0_646 = arith.constant 0 : index
    %536 = vector.load %arg17[%c34_645, %c0_646] : memref<56x128xf32, #tpu.memory_space<vmem>>, vector<1x128xf32>
    %537 = arith.maximumf %535, %536 : vector<1x128xf32>
    %c40 = arith.constant 40 : index
    %c0_647 = arith.constant 0 : index
    %538 = vector.load %arg17[%c40, %c0_647] : memref<56x128xf32, #tpu.memory_space<vmem>>, vector<1x128xf32>
    %539 = arith.maximumf %537, %538 : vector<1x128xf32>
    %c41 = arith.constant 41 : index
    %c0_648 = arith.constant 0 : index
    %540 = vector.load %arg17[%c41, %c0_648] : memref<56x128xf32, #tpu.memory_space<vmem>>, vector<1x128xf32>
    %541 = arith.maximumf %539, %540 : vector<1x128xf32>
    %c42 = arith.constant 42 : index
    %c0_649 = arith.constant 0 : index
    %542 = vector.load %arg17[%c42, %c0_649] : memref<56x128xf32, #tpu.memory_space<vmem>>, vector<1x128xf32>
    %543 = arith.maximumf %541, %542 : vector<1x128xf32>
    %c48 = arith.constant 48 : index
    %c0_650 = arith.constant 0 : index
    %544 = vector.load %arg17[%c48, %c0_650] : memref<56x128xf32, #tpu.memory_space<vmem>>, vector<1x128xf32>
    %545 = arith.maximumf %543, %544 : vector<1x128xf32>
    %c49 = arith.constant 49 : index
    %c0_651 = arith.constant 0 : index
    %546 = vector.load %arg17[%c49, %c0_651] : memref<56x128xf32, #tpu.memory_space<vmem>>, vector<1x128xf32>
    %547 = arith.maximumf %545, %546 : vector<1x128xf32>
    %c50 = arith.constant 50 : index
    %c0_652 = arith.constant 0 : index
    %548 = vector.load %arg17[%c50, %c0_652] : memref<56x128xf32, #tpu.memory_space<vmem>>, vector<1x128xf32>
    %549 = arith.maximumf %547, %548 : vector<1x128xf32>
    %c6_653 = arith.constant 6 : index
    %c0_654 = arith.constant 0 : index
    %c0_655 = arith.constant 0 : index
    %550 = vector.load %arg6[%c6_653, %c0_654, %c0_655] : memref<9x128x128xf32, #tpu.memory_space<vmem>>, vector<1x128x128xf32>
    %551 = vector.shape_cast %550 : vector<1x128x128xf32> to vector<128x128xf32>
    %cst_656 = arith.constant dense<0.000000e+00> : vector<1x128xf32>
    %552 = tpu.matmul %549, %551, %cst_656 {dimension_numbers = #tpu.dot_dimension_numbers<[1], [0], [0], [1], [0, 0, 1, 1], [], []>} : vector<1x128xf32>, vector<128x128xf32>, vector<1x128xf32> -> vector<1x128xf32>
    %553 = arith.addf %532, %552 : vector<1x128xf32>
    %c34_657 = arith.constant 34 : index
    %c0_658 = arith.constant 0 : index
    %554 = vector.load %arg17[%c34_657, %c0_658] : memref<56x128xf32, #tpu.memory_space<vmem>>, vector<1x128xf32>
    %c35_659 = arith.constant 35 : index
    %c0_660 = arith.constant 0 : index
    %555 = vector.load %arg17[%c35_659, %c0_660] : memref<56x128xf32, #tpu.memory_space<vmem>>, vector<1x128xf32>
    %556 = arith.maximumf %554, %555 : vector<1x128xf32>
    %c36_661 = arith.constant 36 : index
    %c0_662 = arith.constant 0 : index
    %557 = vector.load %arg17[%c36_661, %c0_662] : memref<56x128xf32, #tpu.memory_space<vmem>>, vector<1x128xf32>
    %558 = arith.maximumf %556, %557 : vector<1x128xf32>
    %c42_663 = arith.constant 42 : index
    %c0_664 = arith.constant 0 : index
    %559 = vector.load %arg17[%c42_663, %c0_664] : memref<56x128xf32, #tpu.memory_space<vmem>>, vector<1x128xf32>
    %560 = arith.maximumf %558, %559 : vector<1x128xf32>
    %c43 = arith.constant 43 : index
    %c0_665 = arith.constant 0 : index
    %561 = vector.load %arg17[%c43, %c0_665] : memref<56x128xf32, #tpu.memory_space<vmem>>, vector<1x128xf32>
    %562 = arith.maximumf %560, %561 : vector<1x128xf32>
    %c44 = arith.constant 44 : index
    %c0_666 = arith.constant 0 : index
    %563 = vector.load %arg17[%c44, %c0_666] : memref<56x128xf32, #tpu.memory_space<vmem>>, vector<1x128xf32>
    %564 = arith.maximumf %562, %563 : vector<1x128xf32>
    %c50_667 = arith.constant 50 : index
    %c0_668 = arith.constant 0 : index
    %565 = vector.load %arg17[%c50_667, %c0_668] : memref<56x128xf32, #tpu.memory_space<vmem>>, vector<1x128xf32>
    %566 = arith.maximumf %564, %565 : vector<1x128xf32>
    %c51 = arith.constant 51 : index
    %c0_669 = arith.constant 0 : index
    %567 = vector.load %arg17[%c51, %c0_669] : memref<56x128xf32, #tpu.memory_space<vmem>>, vector<1x128xf32>
    %568 = arith.maximumf %566, %567 : vector<1x128xf32>
    %c52 = arith.constant 52 : index
    %c0_670 = arith.constant 0 : index
    %569 = vector.load %arg17[%c52, %c0_670] : memref<56x128xf32, #tpu.memory_space<vmem>>, vector<1x128xf32>
    %570 = arith.maximumf %568, %569 : vector<1x128xf32>
    %c7_671 = arith.constant 7 : index
    %c0_672 = arith.constant 0 : index
    %c0_673 = arith.constant 0 : index
    %571 = vector.load %arg6[%c7_671, %c0_672, %c0_673] : memref<9x128x128xf32, #tpu.memory_space<vmem>>, vector<1x128x128xf32>
    %572 = vector.shape_cast %571 : vector<1x128x128xf32> to vector<128x128xf32>
    %cst_674 = arith.constant dense<0.000000e+00> : vector<1x128xf32>
    %573 = tpu.matmul %570, %572, %cst_674 {dimension_numbers = #tpu.dot_dimension_numbers<[1], [0], [0], [1], [0, 0, 1, 1], [], []>} : vector<1x128xf32>, vector<128x128xf32>, vector<1x128xf32> -> vector<1x128xf32>
    %574 = arith.addf %553, %573 : vector<1x128xf32>
    %c36_675 = arith.constant 36 : index
    %c0_676 = arith.constant 0 : index
    %575 = vector.load %arg17[%c36_675, %c0_676] : memref<56x128xf32, #tpu.memory_space<vmem>>, vector<1x128xf32>
    %c37_677 = arith.constant 37 : index
    %c0_678 = arith.constant 0 : index
    %576 = vector.load %arg17[%c37_677, %c0_678] : memref<56x128xf32, #tpu.memory_space<vmem>>, vector<1x128xf32>
    %577 = arith.maximumf %575, %576 : vector<1x128xf32>
    %c38_679 = arith.constant 38 : index
    %c0_680 = arith.constant 0 : index
    %578 = vector.load %arg17[%c38_679, %c0_680] : memref<56x128xf32, #tpu.memory_space<vmem>>, vector<1x128xf32>
    %579 = arith.maximumf %577, %578 : vector<1x128xf32>
    %c44_681 = arith.constant 44 : index
    %c0_682 = arith.constant 0 : index
    %580 = vector.load %arg17[%c44_681, %c0_682] : memref<56x128xf32, #tpu.memory_space<vmem>>, vector<1x128xf32>
    %581 = arith.maximumf %579, %580 : vector<1x128xf32>
    %c45 = arith.constant 45 : index
    %c0_683 = arith.constant 0 : index
    %582 = vector.load %arg17[%c45, %c0_683] : memref<56x128xf32, #tpu.memory_space<vmem>>, vector<1x128xf32>
    %583 = arith.maximumf %581, %582 : vector<1x128xf32>
    %c46 = arith.constant 46 : index
    %c0_684 = arith.constant 0 : index
    %584 = vector.load %arg17[%c46, %c0_684] : memref<56x128xf32, #tpu.memory_space<vmem>>, vector<1x128xf32>
    %585 = arith.maximumf %583, %584 : vector<1x128xf32>
    %c52_685 = arith.constant 52 : index
    %c0_686 = arith.constant 0 : index
    %586 = vector.load %arg17[%c52_685, %c0_686] : memref<56x128xf32, #tpu.memory_space<vmem>>, vector<1x128xf32>
    %587 = arith.maximumf %585, %586 : vector<1x128xf32>
    %c53 = arith.constant 53 : index
    %c0_687 = arith.constant 0 : index
    %588 = vector.load %arg17[%c53, %c0_687] : memref<56x128xf32, #tpu.memory_space<vmem>>, vector<1x128xf32>
    %589 = arith.maximumf %587, %588 : vector<1x128xf32>
    %c54 = arith.constant 54 : index
    %c0_688 = arith.constant 0 : index
    %590 = vector.load %arg17[%c54, %c0_688] : memref<56x128xf32, #tpu.memory_space<vmem>>, vector<1x128xf32>
    %591 = arith.maximumf %589, %590 : vector<1x128xf32>
    %c8_689 = arith.constant 8 : index
    %c0_690 = arith.constant 0 : index
    %c0_691 = arith.constant 0 : index
    %592 = vector.load %arg6[%c8_689, %c0_690, %c0_691] : memref<9x128x128xf32, #tpu.memory_space<vmem>>, vector<1x128x128xf32>
    %593 = vector.shape_cast %592 : vector<1x128x128xf32> to vector<128x128xf32>
    %cst_692 = arith.constant dense<0.000000e+00> : vector<1x128xf32>
    %594 = tpu.matmul %591, %593, %cst_692 {dimension_numbers = #tpu.dot_dimension_numbers<[1], [0], [0], [1], [0, 0, 1, 1], [], []>} : vector<1x128xf32>, vector<128x128xf32>, vector<1x128xf32> -> vector<1x128xf32>
    %595 = arith.addf %574, %594 : vector<1x128xf32>
    %cst_693 = arith.constant 0.000000e+00 : f32
    %596 = vector.broadcast %cst_693 : f32 to vector<1x128xf32>
    %597 = arith.maximumf %595, %596 : vector<1x128xf32>
    %c0_694 = arith.constant 0 : index
    %c0_695 = arith.constant 0 : index
    %598 = vector.load %arg8[%c0_694, %c0_695] : memref<128x128xf32, #tpu.memory_space<vmem>>, vector<128x128xf32>
    %cst_696 = arith.constant dense<0.000000e+00> : vector<1x128xf32>
    %599 = tpu.matmul %597, %598, %cst_696 {dimension_numbers = #tpu.dot_dimension_numbers<[1], [0], [0], [1], [0, 0, 1, 1], [], []>} : vector<1x128xf32>, vector<128x128xf32>, vector<1x128xf32> -> vector<1x128xf32>
    %c0_697 = arith.constant 0 : index
    %c0_698 = arith.constant 0 : index
    %600 = vector.load %arg9[%c0_697, %c0_698] : memref<1x128xf32, #tpu.memory_space<vmem>>, vector<1x128xf32>
    %601 = arith.addf %599, %600 : vector<1x128xf32>
    %cst_699 = arith.constant 0.000000e+00 : f32
    %602 = vector.broadcast %cst_699 : f32 to vector<1x128xf32>
    %603 = arith.maximumf %601, %602 : vector<1x128xf32>
    %c0_700 = arith.constant 0 : index
    %c0_701 = arith.constant 0 : index
    %604 = vector.load %arg10[%c0_700, %c0_701] : memref<128x128xf32, #tpu.memory_space<vmem>>, vector<128x128xf32>
    %cst_702 = arith.constant dense<0.000000e+00> : vector<1x128xf32>
    %605 = tpu.matmul %603, %604, %cst_702 {dimension_numbers = #tpu.dot_dimension_numbers<[1], [0], [0], [1], [0, 0, 1, 1], [], []>} : vector<1x128xf32>, vector<128x128xf32>, vector<1x128xf32> -> vector<1x128xf32>
    %c0_703 = arith.constant 0 : index
    %c0_704 = arith.constant 0 : index
    %606 = vector.load %arg11[%c0_703, %c0_704] : memref<1x128xf32, #tpu.memory_space<vmem>>, vector<1x128xf32>
    %607 = arith.addf %605, %606 : vector<1x128xf32>
    %c0_705 = arith.constant 0 : index
    %c0_706 = arith.constant 0 : index
    %c0_707 = arith.constant 0 : index
    %608 = vector.load %arg12[%c0_705, %c0_706, %c0_707] : memref<1x1x128xf32, #tpu.memory_space<vmem>>, vector<1x1x128xf32>
    %609 = vector.shape_cast %608 : vector<1x1x128xf32> to vector<1x128xf32>
    %610 = vector.shape_cast %607 : vector<1x128xf32> to vector<1x1x128xf32>
    tpu.vector_store %arg12[%c0_705, %c0_706, %c0_707], %610 {strides = array<i32>} : memref<1x1x128xf32, #tpu.memory_space<vmem>>, vector<1x1x128xf32>,
    return
  }
  func.func @transform_0(%arg0: i32) -> (i32, i32, i32, i32) {
    %c0_i32 = arith.constant 0 : i32
    %c0_i32_0 = arith.constant 0 : i32
    %c0_i32_1 = arith.constant 0 : i32
    %c0_i32_2 = arith.constant 0 : i32
    return %arg0, %c0_i32, %c0_i32_0, %c0_i32_1 : i32, i32, i32, i32
  }
  func.func @transform_1(%arg0: i32) -> (i32, i32, i32) {
    %c0_i32 = arith.constant 0 : i32
    %c0_i32_0 = arith.constant 0 : i32
    %c0_i32_1 = arith.constant 0 : i32
    %c0_i32_2 = arith.constant 0 : i32
    return %c0_i32, %c0_i32_0, %c0_i32_1 : i32, i32, i32
  }
  func.func @transform_2(%arg0: i32) -> (i32, i32) {
    %c0_i32 = arith.constant 0 : i32
    %c0_i32_0 = arith.constant 0 : i32
    %c0_i32_1 = arith.constant 0 : i32
    return %c0_i32, %c0_i32_0 : i32, i32
  }
  func.func @transform_3(%arg0: i32) -> (i32, i32, i32) {
    %c0_i32 = arith.constant 0 : i32
    %c0_i32_0 = arith.constant 0 : i32
    %c0_i32_1 = arith.constant 0 : i32
    %c0_i32_2 = arith.constant 0 : i32
    return %c0_i32, %c0_i32_0, %c0_i32_1 : i32, i32, i32
  }
  func.func @transform_4(%arg0: i32) -> (i32, i32) {
    %c0_i32 = arith.constant 0 : i32
    %c0_i32_0 = arith.constant 0 : i32
    %c0_i32_1 = arith.constant 0 : i32
    return %c0_i32, %c0_i32_0 : i32, i32
  }
  func.func @transform_5(%arg0: i32) -> (i32, i32, i32) {
    %c0_i32 = arith.constant 0 : i32
    %c0_i32_0 = arith.constant 0 : i32
    %c0_i32_1 = arith.constant 0 : i32
    %c0_i32_2 = arith.constant 0 : i32
    return %c0_i32, %c0_i32_0, %c0_i32_1 : i32, i32, i32
  }
  func.func @transform_6(%arg0: i32) -> (i32, i32) {
    %c0_i32 = arith.constant 0 : i32
    %c0_i32_0 = arith.constant 0 : i32
    %c0_i32_1 = arith.constant 0 : i32
    return %c0_i32, %c0_i32_0 : i32, i32
  }
  func.func @transform_7(%arg0: i32) -> (i32, i32) {
    %c0_i32 = arith.constant 0 : i32
    %c0_i32_0 = arith.constant 0 : i32
    %c0_i32_1 = arith.constant 0 : i32
    return %c0_i32, %c0_i32_0 : i32, i32
  }
  func.func @transform_8(%arg0: i32) -> (i32, i32) {
    %c0_i32 = arith.constant 0 : i32
    %c0_i32_0 = arith.constant 0 : i32
    %c0_i32_1 = arith.constant 0 : i32
    return %c0_i32, %c0_i32_0 : i32, i32
  }
  func.func @transform_9(%arg0: i32) -> (i32, i32) {
    %c0_i32 = arith.constant 0 : i32
    %c0_i32_0 = arith.constant 0 : i32
    %c0_i32_1 = arith.constant 0 : i32
    return %c0_i32, %c0_i32_0 : i32, i32
  }
  func.func @transform_10(%arg0: i32) -> (i32, i32) {
    %c0_i32 = arith.constant 0 : i32
    %c0_i32_0 = arith.constant 0 : i32
    %c0_i32_1 = arith.constant 0 : i32
    return %c0_i32, %c0_i32_0 : i32, i32
  }
  func.func @transform_11(%arg0: i32) -> (i32, i32, i32) {
    %c0_i32 = arith.constant 0 : i32
    %c0_i32_0 = arith.constant 0 : i32
    %c0_i32_1 = arith.constant 0 : i32
    return %arg0, %c0_i32, %c0_i32_0 : i32, i32, i32
  }
}

</mosaic_0001>

<bundles_post_ra>
// kernel: conv_model_forward.1
= control target key start
LH: loop header
LB: loop body
LE: loop exit
PB: predicated region body
PF: predicated region fallthrough
CT: control target
= control target key end

     0   :  { %s28748_s0 = inlined_call_operand.vmem [shape: f32[2,16,16,4], index: 0, kind: input, shape index: {}]   ;;  %s28749_s1 = inlined_call_operand.vmem [shape: f32[25,4,128], index: 1, kind: input, shape index: {}]   ;;  %s28750_s2 = inlined_call_operand.vmem [shape: f32[1,128], index: 2, kind: input, shape index: {}]   ;;  %s28751_s3 = inlined_call_operand.vmem [shape: f32[25,128,128], index: 3, kind: input, shape index: {}]   ;;  %s28752_s4 = inlined_call_operand.vmem [shape: f32[1,128], index: 4, kind: input, shape index: {}]   ;;  %s28753_s5 = inlined_call_operand.vmem [shape: f32[9,128,128], index: 5, kind: input, shape index: {}]   ;;  %s28754_s6 = inlined_call_operand.vmem [shape: f32[1,128], index: 6, kind: input, shape index: {}]   ;;  %s28755_s7 = inlined_call_operand.vmem [shape: f32[128,128], index: 7, kind: input, shape index: {}]   ;;  %s28756_s8 = inlined_call_operand.vmem [shape: f32[1,128], index: 8, kind: input, shape index: {}]   ;;  %s28757_s9 = inlined_call_operand.vmem [shape: f32[128,128], index: 9, kind: input, shape index: {}]   ;;  %s28758_s10 = inlined_call_operand.vmem [shape: f32[1,128], index: 10, kind: input, shape index: {}]   ;;  %s28759_s11 = inlined_call_operand.hbm [shape: f32[2,1,128], index: 11, kind: output, shape index: {}]  }
   0x1   :  { %28896 = sst [smem:[#allocation92_spill]] %s28748_s0 }
   0x2   :  { %16 = vsyncpa [#allocation8], 0 }
   0x3   :  { %18 = vsyncpa [#allocation8 + $0x1], 0  ;;  %s22873_s17 = smov 0   ;;  %s22875_s18 = smov 0  }
   0x4   :  { %s22877_s19 = smov 0   ;;  %s22879_s20 = smov 0  }
   0x5 LB: > { %s22894_s21 = sadd.s32 4294967295, %s22807_s20   ;;  %s15173_s22 = sadd.s32 4294967294, %s22807_s20   ;;  %s22807_s20 = sphi %s22879_s20, %s29173_s20   ;;  %s22803_s19 = sphi %s22877_s19, %s29172_s19   ;;  %s22799_s18 = sphi %s22875_s18, %s29171_s18   ;;  %s22795_s17 = sphi %s22873_s17, %s29170_s17  }
   0x6   : > { %s22898_s23 = sadd.s32 1, %s22807_s20   ;;  %s267_s24 = sadd.s32 1, %s22803_s19 }
   0x7   : > { %s264_s25 = ssub.s32 %s22807_s20, %s22898_s23  ;;  %p277_p0 = scmp.ne.s32.totalorder %s22803_s19, %s22799_s18 }
   0x8   : > { %p265_p1 = scmp.eq.s32.totalorder %s264_s25, 0  ;;  %p278_p2 = scmp.eq.s32.totalorder %s22894_s21, 1 }
   0x9   : > { %p283_p3 = scmp.ne.s32.totalorder %s22799_s18, %s22795_s17  ;;  %p284_p4 = scmp.eq.s32.totalorder %s15173_s22, 1 }
   0xa   : > { %s22909_s26 = scalar_select %p265_p1, %s22803_s19, %s267_s24  }
   0xb   : > { %p22911_p5 = por %p278_p2, %p277_p0  ;;  %p22915_p6 = por %p284_p4, %p283_p3 }
   0xc   : > { %p15176_p7 = scmp.ge.s32.totalorder %s22807_s20, 1  ;;  %p340_p8 = scmp.lt.s32.totalorder %s22807_s20, 3 }
   0xe   : > { %p341_p9 = pnand %p15176_p7, %p340_p8 }
  0x10   : > { %344 = sbr.rel (%p341_p9) target bundleno = 3567 (0xdef), region = 64 }
  0x17   : > { %vm674_vm0 = vcmask 1043456   ;;  %v22924_v0 = vld [vmem:[%s28749_s1 + $0xc] sm:$0xf]  ;;  %vm384_vm1 = vcmask 31744   ;;  %vm387_vm2 = vcmask 27648   ;;  %v22809_v1 = vmov 0.0  }
  0x18   : > { %18283 = vmatprep.subr.msk.mxu0 %vm674_vm0, %v22924_v0  ;;  %385 = vst.msk [vmem:[#allocation2] sm:$0xff] %vm384_vm1, %v22809_v1  ;;  %386 = vst.msk [vmem:[#allocation2 + $0x8] sm:$0xff] %vm384_vm1, %v22809_v1  ;;  %v15314_v2 = vld [vmem:[%s28749_s1 + $0x10] sm:$0xf]  ;;  %p379_p10 = scmp.lt.s32.totalorder %s22894_s21, 1  ;;  %s28899_s0 = sld [smem:[#allocation92_spill]] }
  0x19   : > { %389 = vst.msk [vmem:[#allocation2 + $0x18] sm:$0xff] %vm384_vm1, %v22809_v1  ;;  %390 = vst.msk [vmem:[#allocation2 + $0x20] sm:$0xff] %vm384_vm1, %v22809_v1  ;;  %18284 = vmatpush3.msk.msra.mxu0 %vm674_vm0, %v22924_v0  ;;  %v23097_v11 = vld [vmem:[%s28749_s1 + $0x14] sm:$0xf]  ;;  %v23187_v45 = vld [vmem:[%s28749_s1 + $0x18] sm:$0xf] }
  0x1a   : > { %392 = vst.msk [vmem:[#allocation2 + $0x30] sm:$0xff] %vm384_vm1, %v22809_v1  ;;  %393 = vst.msk [vmem:[#allocation2 + $0x38] sm:$0xff] %vm384_vm1, %v22809_v1  ;;  %18333 = vmatprep.subr.msk.mxu0 %vm674_vm0, %v15314_v2  ;;  %s380_s14 = scalar_select %p379_p10, %s22894_s21, 1  ;;  %vm22811_vm3 = vmmov 0  }
  0x1b   : > { %395 = vst.msk [vmem:[#allocation2 + $0x48] sm:$0xff] %vm384_vm1, %v22809_v1  ;;  %396 = vst.msk [vmem:[#allocation2 + $0x50] sm:$0xff] %vm384_vm1, %v22809_v1  ;;  %s377_s22 = sand.u32 1, %s22799_s18   ;;  %s16542_s30 = sshll.u32 %s22894_s21, 4 }
  0x1c   : > { %398 = vst.msk [vmem:[#allocation2 + $0x60] sm:$0xff] %vm384_vm1, %v22809_v1  ;;  %399 = vst.msk [vmem:[#allocation2 + $0x68] sm:$0xff] %vm384_vm1, %v22809_v1  ;;  %s16545_s15 = sshll.u32 %s380_s14, 8  ;;  %s15106_s16 = scalar_lea.sflag [#allocation8], %s377_s22 }
  0x1d   : > { %401 = vst.msk [vmem:[#allocation2 + $0x78] sm:$0xff] %vm384_vm1, %v22809_v1  ;;  %402 = vst.msk [vmem:[#allocation2 + $0x80] sm:$0xff] %vm384_vm1, %v22809_v1  ;;  %s22812_s21 = smov [#allocation7]  }
  0x1e   : > { %404 = vst.msk [vmem:[#allocation2 + $0x90] sm:$0xff] %vm384_vm1, %v22809_v1  ;;  %405 = vst.msk [vmem:[#allocation2 + $0x98] sm:$0xff] %vm384_vm1, %v22809_v1  ;;  %s23081_s24 = scalar_lea.vmem %s28899_s0, %s16545_s15  ;;  %s28706_s15 = scalar_lea.hbm %s28759_s11, %s16542_s30 }
  0x1f   : > { %407 = vst.msk [vmem:[#allocation2 + $0xa8] sm:$0xff] %vm384_vm1, %v22809_v1  ;;  %408 = vst.msk [vmem:[#allocation2 + $0xb0] sm:$0xff] %vm384_vm1, %v22809_v1  ;;  %v446_v3 = vld [vmem:[%s23081_s24] sm:$0xff]  ;;  %v447_v4 = vld [vmem:[%s23081_s24 + $0x8] sm:$0xff]  ;;  %s22749_s29 = sshll.u32 %s22812_s21, 4  ;;  %s22750_s29 = int_to_ptr.vmem [resolvable:$false] %s22749_s29 }
  0x20   : > { %410 = vst.msk [vmem:[#allocation2 + $0xc0] sm:$0xff] %vm384_vm1, %v22809_v1  ;;  %411 = vst.msk [vmem:[#allocation2 + $0xc8] sm:$0xff] %vm384_vm1, %v22809_v1  ;;  %v448_v5 = vld [vmem:[%s23081_s24 + $0x10] sm:$0xff]  ;;  %v1617_v6 = vld [vmem:[#allocation2 + $0x3] sm:$0xff]  ;;  %s22751_s0 = scalar_lea.vmem %s22750_s29, 32 }
  0x21   : > { %413 = vst.msk [vmem:[#allocation2 + $0xd8] sm:$0xff] %vm384_vm1, %v22809_v1  ;;  %414 = vst.msk [vmem:[#allocation2 + $0xe0] sm:$0xff] %vm384_vm1, %v22809_v1  ;;  %v23086_v8 = vld [vmem:[#allocation2 + $0x1b] sm:$0xff]  ;;  %18285 = vmatprep.mubr.msk.f32.mxu0 %vm384_vm1, %v1617_v6  ;;  %v451_v12 = vld [vmem:[%s23081_s24 + $0x28] sm:$0xff] }
  0x22   : > { %416 = vst.msk [vmem:[#allocation2 + $0xf0] sm:$0xff] %vm384_vm1, %v22809_v1  ;;  %417 = vst.msk [vmem:[#allocation2 + $0xf8] sm:$0xff] %vm384_vm1, %v22809_v1  ;;  %v449_v9 = vld [vmem:[%s23081_s24 + $0x18] sm:$0xff]  ;;  %v450_v10 = vld [vmem:[%s23081_s24 + $0x20] sm:$0xff] }
  0x23   : > { %419 = vst.msk [vmem:[#allocation2 + $0x108] sm:$0xff] %vm384_vm1, %v22809_v1  ;;  %420 = vst.msk [vmem:[#allocation2 + $0x110] sm:$0xff] %vm384_vm1, %v22809_v1  ;;  %v452_v14 = vld [vmem:[%s23081_s24 + $0x30] sm:$0xff]  ;;  %v453_v15 = vld [vmem:[%s23081_s24 + $0x38] sm:$0xff] }
  0x24   : > { %422 = vst.msk [vmem:[#allocation2 + $0x120] sm:$0xff] %vm384_vm1, %v22809_v1  ;;  %423 = vst.msk [vmem:[#allocation2 + $0x128] sm:$0xff] %vm384_vm1, %v22809_v1  ;;  %v454_v16 = vld [vmem:[%s23081_s24 + $0x40] sm:$0xff]  ;;  %v455_v17 = vld [vmem:[%s23081_s24 + $0x48] sm:$0xff] }
  0x25   : > { %425 = vst.msk [vmem:[#allocation2 + $0x138] sm:$0xff] %vm384_vm1, %v22809_v1  ;;  %426 = vst.msk [vmem:[#allocation2 + $0x140] sm:$0xff] %vm384_vm1, %v22809_v1  ;;  %v456_v18 = vld [vmem:[%s23081_s24 + $0x50] sm:$0xff]  ;;  %v457_v19 = vld [vmem:[%s23081_s24 + $0x58] sm:$0xff] }
  0x26   : > { %428 = vst.msk [vmem:[#allocation2 + $0x150] sm:$0xff] %vm384_vm1, %v22809_v1  ;;  %429 = vst.msk [vmem:[#allocation2 + $0x158] sm:$0xff] %vm384_vm1, %v22809_v1  ;;  %v458_v20 = vld [vmem:[%s23081_s24 + $0x60] sm:$0xff]  ;;  %v459_v21 = vld [vmem:[%s23081_s24 + $0x68] sm:$0xff] }
  0x27   : > { %431 = vst.msk [vmem:[#allocation2 + $0x168] sm:$0xff] %vm384_vm1, %v22809_v1  ;;  %432 = vst.msk [vmem:[#allocation2 + $0x170] sm:$0xff] %vm384_vm1, %v22809_v1  ;;  %v460_v22 = vld [vmem:[%s23081_s24 + $0x70] sm:$0xff]  ;;  %v461_v23 = vld [vmem:[%s23081_s24 + $0x78] sm:$0xff] }
  0x28   : > { %434 = vst.msk [vmem:[#allocation2 + $0x180] sm:$0xff] %vm384_vm1, %v22809_v1  ;;  %435 = vst.msk [vmem:[#allocation2 + $0x188] sm:$0xff] %vm384_vm1, %v22809_v1  ;;  %v462_v26 = vld [vmem:[%s23081_s24 + $0x80] sm:$0xff]  ;;  %v463_v27 = vld [vmem:[%s23081_s24 + $0x88] sm:$0xff] }
  0x29   : > { %437 = vst.msk [vmem:[#allocation2 + $0x198] sm:$0xff] %vm384_vm1, %v22809_v1  ;;  %438 = vst.msk [vmem:[#allocation2 + $0x1a0] sm:$0xff] %vm384_vm1, %v22809_v1  ;;  %v464_v30 = vld [vmem:[%s23081_s24 + $0x90] sm:$0xff]  ;;  %v465_v33 = vld [vmem:[%s23081_s24 + $0x98] sm:$0xff] }
  0x2a   : > { %440 = vst.msk [vmem:[#allocation2 + $0x1b0] sm:$0xff] %vm384_vm1, %v22809_v1  ;;  %441 = vst.msk [vmem:[#allocation2 + $0x1b8] sm:$0xff] %vm384_vm1, %v22809_v1  ;;  %v466_v34 = vld [vmem:[%s23081_s24 + $0xa0] sm:$0xff]  ;;  %v467_v36 = vld [vmem:[%s23081_s24 + $0xa8] sm:$0xff] }
  0x2b   : > { %443 = vst.msk [vmem:[#allocation2 + $0x1c8] sm:$0xff] %vm384_vm1, %v22809_v1  ;;  %444 = vst.msk [vmem:[#allocation2 + $0x1d0] sm:$0xff] %vm384_vm1, %v22809_v1  ;;  %v2007_v35 = vld [vmem:[#allocation2 + $0x4] sm:$0xff]  ;;  %v468_v37 = vld [vmem:[%s23081_s24 + $0xb0] sm:$0xff] }
  0x2c   : > { %10407 = vst [vmem:[#allocation5] sm:$0xff] %v22809_v1  ;;  %10408 = vst [vmem:[#allocation5 + $0x8] sm:$0xf] %v22809_v1  ;;  %v469_v38 = vld [vmem:[%s23081_s24 + $0xb8] sm:$0xff]  ;;  %v470_v39 = vld [vmem:[%s23081_s24 + $0xc0] sm:$0xff] }
  0x2d   : > { %10409 = vst [vmem:[#allocation5 + $0x10] sm:$0xff] %v22809_v1  ;;  %10410 = vst [vmem:[#allocation5 + $0x18] sm:$0xf] %v22809_v1  ;;  %v471_v40 = vld [vmem:[%s23081_s24 + $0xc8] sm:$0xff]  ;;  %v472_v41 = vld [vmem:[%s23081_s24 + $0xd0] sm:$0xff] }
  0x2e   : > { %10411 = vst [vmem:[#allocation5 + $0x20] sm:$0xff] %v22809_v1  ;;  %10412 = vst [vmem:[#allocation5 + $0x28] sm:$0xf] %v22809_v1  ;;  %v473_v42 = vld [vmem:[%s23081_s24 + $0xd8] sm:$0xff]  ;;  %v474_v52 = vld [vmem:[%s23081_s24 + $0xe0] sm:$0xff] }
  0x2f   : > { %10413 = vst [vmem:[#allocation5 + $0x30] sm:$0xff] %v22809_v1  ;;  %10414 = vst [vmem:[#allocation5 + $0x38] sm:$0xf] %v22809_v1  ;;  %v23182_v44 = vld [vmem:[#allocation2 + $0x1c] sm:$0xff]  ;;  %v475_v53 = vld [vmem:[%s23081_s24 + $0xe8] sm:$0xff] }
  0x30   : > { %10415 = vst [vmem:[#allocation5 + $0x40] sm:$0xff] %v22809_v1  ;;  %10416 = vst [vmem:[#allocation5 + $0x48] sm:$0xf] %v22809_v1 }
  0x31   : > { %10417 = vst [vmem:[#allocation5 + $0x50] sm:$0xff] %v22809_v1  ;;  %10418 = vst [vmem:[#allocation5 + $0x58] sm:$0xf] %v22809_v1 }
  0x32   : > { %10419 = vst [vmem:[#allocation5 + $0x60] sm:$0xff] %v22809_v1  ;;  %10420 = vst [vmem:[#allocation5 + $0x68] sm:$0xf] %v22809_v1 }
  0x33   : > { %10421 = vst [vmem:[#allocation5 + $0x70] sm:$0xff] %v22809_v1  ;;  %10422 = vst [vmem:[#allocation5 + $0x78] sm:$0xf] %v22809_v1 }
  0x34   : > { %10423 = vst [vmem:[#allocation5 + $0x80] sm:$0xff] %v22809_v1  ;;  %10424 = vst [vmem:[#allocation5 + $0x88] sm:$0xf] %v22809_v1 }
  0x35   : > { %10425 = vst [vmem:[#allocation5 + $0x90] sm:$0xff] %v22809_v1  ;;  %10426 = vst [vmem:[#allocation5 + $0x98] sm:$0xf] %v22809_v1 }
  0x36   : > { %10427 = vst [vmem:[#allocation5 + $0xa0] sm:$0xff] %v22809_v1  ;;  %10428 = vst [vmem:[#allocation5 + $0xa8] sm:$0xf] %v22809_v1 }
  0x37   : > { %388 = vst.msk [vmem:[#allocation2 + $0x10] sm:$0xf] %vm387_vm2, %v22809_v1  ;;  %391 = vst.msk [vmem:[#allocation2 + $0x28] sm:$0xf] %vm387_vm2, %v22809_v1 }
  0x38   : > { %394 = vst.msk [vmem:[#allocation2 + $0x40] sm:$0xf] %vm387_vm2, %v22809_v1  ;;  %397 = vst.msk [vmem:[#allocation2 + $0x58] sm:$0xf] %vm387_vm2, %v22809_v1 }
  0x39   : > { %400 = vst.msk [vmem:[#allocation2 + $0x70] sm:$0xf] %vm387_vm2, %v22809_v1  ;;  %403 = vst.msk [vmem:[#allocation2 + $0x88] sm:$0xf] %vm387_vm2, %v22809_v1 }
  0x3a   : > { %406 = vst.msk [vmem:[#allocation2 + $0xa0] sm:$0xf] %vm387_vm2, %v22809_v1  ;;  %409 = vst.msk [vmem:[#allocation2 + $0xb8] sm:$0xf] %vm387_vm2, %v22809_v1 }
  0x3b   : > { %412 = vst.msk [vmem:[#allocation2 + $0xd0] sm:$0xf] %vm387_vm2, %v22809_v1  ;;  %415 = vst.msk [vmem:[#allocation2 + $0xe8] sm:$0xf] %vm387_vm2, %v22809_v1 }
  0x3c   : > { %418 = vst.msk [vmem:[#allocation2 + $0x100] sm:$0xf] %vm387_vm2, %v22809_v1  ;;  %421 = vst.msk [vmem:[#allocation2 + $0x118] sm:$0xf] %vm387_vm2, %v22809_v1 }
  0x3d   : > { %424 = vst.msk [vmem:[#allocation2 + $0x130] sm:$0xf] %vm387_vm2, %v22809_v1  ;;  %427 = vst.msk [vmem:[#allocation2 + $0x148] sm:$0xf] %vm387_vm2, %v22809_v1 }
  0x3e   : > { %430 = vst.msk [vmem:[#allocation2 + $0x160] sm:$0xf] %vm387_vm2, %v22809_v1  ;;  %433 = vst.msk [vmem:[#allocation2 + $0x178] sm:$0xf] %vm387_vm2, %v22809_v1  ;;  %v1618_v7 = vld [vmem:[#allocation2 + $0xb] sm:$0xff]  ;;  %v23106_v13 = vld [vmem:[#allocation2 + $0x23] sm:$0xff] }
  0x3f   : > { %436 = vst.msk [vmem:[#allocation2 + $0x190] sm:$0xf] %vm387_vm2, %v22809_v1  ;;  %439 = vst.msk [vmem:[#allocation2 + $0x1a8] sm:$0xf] %vm387_vm2, %v22809_v1  ;;  %18286 = vmatmul.mubr.msk.f32.vlgmr.msra.gmra.mrb[0].mxu0 %vm384_vm1, %v1618_v7  ;;  %v2008_v43 = vld [vmem:[#allocation2 + $0xc] sm:$0xff]  ;;  %v23194_v46 = vld [vmem:[#allocation2 + $0x24] sm:$0xff] }
  0x40   : > { %442 = vst.msk [vmem:[#allocation2 + $0x1c0] sm:$0xf] %vm387_vm2, %v22809_v1  ;;  %445 = vst.msk [vmem:[#allocation2 + $0x1d8] sm:$0xf] %vm387_vm2, %v22809_v1  ;;  %18334 = vmatpush3.msk.msra.mxu0 %vm674_vm0, %v15314_v2  ;;  %18288 = vmatprep.mubr.msk.f32.mxu0 %vm384_vm1, %v23086_v8 }
  0x41   : > { %479 = vst.msk [vmem:[#allocation2 + $0x32] sm:$0xff] %vm384_vm1, %v446_v3  ;;  %480 = vst.msk [vmem:[#allocation2 + $0x3a] sm:$0xff] %vm384_vm1, %v447_v4  ;;  %18383 = vmatprep.subr.msk.mxu0 %vm674_vm0, %v23097_v11 }
  0x42   : > { %481 = vst.msk [vmem:[#allocation2 + $0x4a] sm:$0xff] %vm384_vm1, %v448_v5  ;;  %482 = vst.msk [vmem:[#allocation2 + $0x52] sm:$0xff] %vm384_vm1, %v449_v9 }
  0x43   : > { %483 = vst.msk [vmem:[#allocation2 + $0x62] sm:$0xff] %vm384_vm1, %v450_v10  ;;  %484 = vst.msk [vmem:[#allocation2 + $0x6a] sm:$0xff] %vm384_vm1, %v451_v12  ;;  %18289 = vmatmul.mubr.msk.f32.gmra.mrb[2].mxu0 %vm384_vm1, %v23106_v13 }
  0x44   : > { %485 = vst.msk [vmem:[#allocation2 + $0x7a] sm:$0xff] %vm384_vm1, %v452_v14  ;;  %486 = vst.msk [vmem:[#allocation2 + $0x82] sm:$0xff] %vm384_vm1, %v453_v15  ;;  %v2398_v15 = vld [vmem:[#allocation2 + $0x18] sm:$0xff] }
  0x45   : > { %487 = vst.msk [vmem:[#allocation2 + $0x92] sm:$0xff] %vm384_vm1, %v454_v16  ;;  %488 = vst.msk [vmem:[#allocation2 + $0x9a] sm:$0xff] %vm384_vm1, %v455_v17  ;;  %v2399_v16 = vld [vmem:[#allocation2 + $0x20] sm:$0xff] }
  0x46   : > { %489 = vst.msk [vmem:[#allocation2 + $0xaa] sm:$0xff] %vm384_vm1, %v456_v18  ;;  %490 = vst.msk [vmem:[#allocation2 + $0xb2] sm:$0xff] %vm384_vm1, %v457_v19  ;;  %v23322_v18 = vld [vmem:[%s28749_s1 + $0x1c] sm:$0xf] }
  0x47   : > { %491 = vst.msk [vmem:[#allocation2 + $0xc2] sm:$0xff] %vm384_vm1, %v458_v20  ;;  %492 = vst.msk [vmem:[#allocation2 + $0xca] sm:$0xff] %vm384_vm1, %v459_v21 }
  0x48   : > { %v23130_v24 = vld [vmem:[#allocation2 + $0x33] sm:$0xff]  ;;  %v23132_v25 = vld [vmem:[#allocation2 + $0x3b] sm:$0xff]  ;;  %493 = vst.msk [vmem:[#allocation2 + $0xda] sm:$0xff] %vm384_vm1, %v460_v22  ;;  %494 = vst.msk [vmem:[#allocation2 + $0xe2] sm:$0xff] %vm384_vm1, %v461_v23 }
  0x49   : > { %18291 = vmatprep.mubr.msk.f32.mxu0 %vm384_vm1, %v23130_v24  ;;  %v23141_v28 = vld [vmem:[#allocation2 + $0x4b] sm:$0xff]  ;;  %495 = vst.msk [vmem:[#allocation2 + $0xf2] sm:$0xff] %vm384_vm1, %v462_v26  ;;  %496 = vst.msk [vmem:[#allocation2 + $0xfa] sm:$0xff] %vm384_vm1, %v463_v27  ;;  %v23149_v29 = vld [vmem:[#allocation2 + $0x53] sm:$0xff] }
  0x4a   : > { %18292 = vmatmul.mubr.msk.f32.gmra.mrb[4].mxu0 %vm384_vm1, %v23132_v25  ;;  %v23152_v31 = vld [vmem:[#allocation2 + $0x63] sm:$0xff]  ;;  %497 = vst.msk [vmem:[#allocation2 + $0x10a] sm:$0xff] %vm384_vm1, %v464_v30  ;;  %v23159_v32 = vld [vmem:[#allocation2 + $0x6b] sm:$0xff]  ;;  %498 = vst.msk [vmem:[#allocation2 + $0x112] sm:$0xff] %vm384_vm1, %v465_v33 }
  0x4b   : > { %18294 = vmatprep.mubr.msk.f32.mxu0 %vm384_vm1, %v23141_v28  ;;  %499 = vst.msk [vmem:[#allocation2 + $0x122] sm:$0xff] %vm384_vm1, %v466_v34  ;;  %500 = vst.msk [vmem:[#allocation2 + $0x12a] sm:$0xff] %vm384_vm1, %v467_v36  ;;  %v23196_v47 = vld [vmem:[#allocation2 + $0x34] sm:$0xff]  ;;  %v23204_v48 = vld [vmem:[#allocation2 + $0x3c] sm:$0xff] }
  0x4c   : > { %501 = vst.msk [vmem:[#allocation2 + $0x13a] sm:$0xff] %vm384_vm1, %v468_v37  ;;  %502 = vst.msk [vmem:[#allocation2 + $0x142] sm:$0xff] %vm384_vm1, %v469_v38  ;;  %v23206_v49 = vld [vmem:[#allocation2 + $0x4c] sm:$0xff]  ;;  %v23212_v50 = vld [vmem:[#allocation2 + $0x54] sm:$0xff] }
  0x4d   : > { %503 = vst.msk [vmem:[#allocation2 + $0x152] sm:$0xff] %vm384_vm1, %v470_v39  ;;  %504 = vst.msk [vmem:[#allocation2 + $0x15a] sm:$0xff] %vm384_vm1, %v471_v40  ;;  %v23214_v51 = vld [vmem:[#allocation2 + $0x64] sm:$0xff]  ;;  %v23224_v54 = vld [vmem:[#allocation2 + $0x6c] sm:$0xff] }
  0x4e   : > { %18295 = vmatmul.mubr.msk.f32.gmra.mrb[6].mxu0 %vm384_vm1, %v23149_v29  ;;  %505 = vst.msk [vmem:[#allocation2 + $0x16a] sm:$0xff] %vm384_vm1, %v472_v41  ;;  %506 = vst.msk [vmem:[#allocation2 + $0x172] sm:$0xff] %vm384_vm1, %v473_v42  ;;  %v23226_v55 = vld [vmem:[#allocation2 + $0x7c] sm:$0xff]  ;;  %v23232_v56 = vld [vmem:[#allocation2 + $0x84] sm:$0xff] }
  0x4f   : > { %18297 = vmatprep.mubr.msk.f32.mxu0 %vm384_vm1, %v23152_v31  ;;  %507 = vst.msk [vmem:[#allocation2 + $0x182] sm:$0xff] %vm384_vm1, %v474_v52  ;;  %508 = vst.msk [vmem:[#allocation2 + $0x18a] sm:$0xff] %vm384_vm1, %v475_v53  ;;  %v23234_v57 = vld [vmem:[#allocation2 + $0x94] sm:$0xff]  ;;  %v23240_v58 = vld [vmem:[#allocation2 + $0x9c] sm:$0xff] }
  0x50   : > { %v23242_v59 = vld [vmem:[#allocation2 + $0xac] sm:$0xff]  ;;  %v23248_v60 = vld [vmem:[#allocation2 + $0xb4] sm:$0xff]  ;;  %v23250_v61 = vld [vmem:[#allocation2 + $0xc4] sm:$0xff] }
  0x51   : > { %v23256_v62 = vld [vmem:[#allocation2 + $0xcc] sm:$0xff]  ;;  %v23258_v63 = vld [vmem:[#allocation2 + $0xdc] sm:$0xff]  ;;  %v23264_v0 = vld [vmem:[#allocation2 + $0xe4] sm:$0xff] }
  0x52   : > { %18298 = vmatmul.mubr.msk.f32.gmra.mrb[8].mxu0 %vm384_vm1, %v23159_v32  ;;  %v23266_v1 = vld [vmem:[#allocation2 + $0xf4] sm:$0xff]  ;;  %v23272_v2 = vld [vmem:[#allocation2 + $0xfc] sm:$0xff]  ;;  %v23274_v3 = vld [vmem:[#allocation2 + $0x10c] sm:$0xff] }
  0x53   : > { %18335 = vmatprep.mubr.msk.f32.mxu0 %vm384_vm1, %v2007_v35  ;;  %v23280_v4 = vld [vmem:[#allocation2 + $0x114] sm:$0xff]  ;;  %v23282_v5 = vld [vmem:[#allocation2 + $0x124] sm:$0xff]  ;;  %v23288_v6 = vld [vmem:[#allocation2 + $0x12c] sm:$0xff] }
  0x54   : > { %v23290_v7 = vld [vmem:[#allocation2 + $0x13c] sm:$0xff]  ;;  %v23296_v9 = vld [vmem:[#allocation2 + $0x144] sm:$0xff]  ;;  %v23298_v10 = vld [vmem:[#allocation2 + $0x154] sm:$0xff] }
  0x55   : > { %v23306_v12 = vld [vmem:[#allocation2 + $0x16c] sm:$0xff]  ;;  %v23312_v14 = vld [vmem:[#allocation2 + $0x174] sm:$0xff]  ;;  %v23341_v22 = vld [vmem:[#allocation2 + $0x60] sm:$0xff] }
  0x56   : > { %18336 = vmatmul.mubr.msk.f32.vlgmr.msra.gmra.mrb[0].mxu0 %vm384_vm1, %v2008_v43  ;;  %v23317_v17 = vld [vmem:[#allocation2 + $0x30] sm:$0xff]  ;;  %v23329_v19 = vld [vmem:[#allocation2 + $0x38] sm:$0xff]  ;;  %v23331_v20 = vld [vmem:[#allocation2 + $0x48] sm:$0xff] }
  0x57   : > { %18384 = vmatpush3.msk.msra.mxu0 %vm674_vm0, %v23097_v11  ;;  %18338 = vmatprep.mubr.msk.f32.mxu0 %vm384_vm1, %v23182_v44  ;;  %v23304_v11 = vld [vmem:[#allocation2 + $0x15c] sm:$0xff]  ;;  %v23339_v21 = vld [vmem:[#allocation2 + $0x50] sm:$0xff]  ;;  %v23347_v23 = vld [vmem:[#allocation2 + $0x68] sm:$0xff] }
  0x58   : > { %18433 = vmatprep.subr.msk.mxu0 %vm674_vm0, %v23187_v45  ;;  %v23349_v26 = vld [vmem:[#allocation2 + $0x78] sm:$0xff]  ;;  %v23355_v27 = vld [vmem:[#allocation2 + $0x80] sm:$0xff]  ;;  %v23357_v30 = vld [vmem:[#allocation2 + $0x90] sm:$0xff] }
  0x59   : > { %v23363_v33 = vld [vmem:[#allocation2 + $0x98] sm:$0xff]  ;;  %v23365_v34 = vld [vmem:[#allocation2 + $0xa8] sm:$0xff]  ;;  %v23371_v35 = vld [vmem:[#allocation2 + $0xb0] sm:$0xff] }
  0x5a   : > { %18339 = vmatmul.mubr.msk.f32.gmra.mrb[2].mxu0 %vm384_vm1, %v23194_v46  ;;  %v23373_v36 = vld [vmem:[#allocation2 + $0xc0] sm:$0xff]  ;;  %v23379_v37 = vld [vmem:[#allocation2 + $0xc8] sm:$0xff]  ;;  %v23381_v38 = vld [vmem:[#allocation2 + $0xd8] sm:$0xff] }
  0x5b   : > { %18341 = vmatprep.mubr.msk.f32.mxu0 %vm384_vm1, %v23196_v47  ;;  %v23387_v39 = vld [vmem:[#allocation2 + $0xe0] sm:$0xff]  ;;  %v23389_v40 = vld [vmem:[#allocation2 + $0xf0] sm:$0xff]  ;;  %v23395_v41 = vld [vmem:[#allocation2 + $0xf8] sm:$0xff] }
  0x5c   : > { %v23397_v42 = vld [vmem:[#allocation2 + $0x108] sm:$0xff]  ;;  %v23403_v43 = vld [vmem:[#allocation2 + $0x110] sm:$0xff]  ;;  %v23413_v53 = vld [vmem:[#allocation2 + $0x138] sm:$0xff] }
  0x5d   : > { %28900 = vst [vmem:[#allocation10_spill] sm:$0xff] %v23397_v42  ;;  %28901 = vst [vmem:[#allocation11_spill] sm:$0xff] %v23403_v43  ;;  %v23411_v52 = vld [vmem:[#allocation2 + $0x128] sm:$0xff] }
  0x5e   : > { %18342 = vmatmul.mubr.msk.f32.gmra.mrb[4].mxu0 %vm384_vm1, %v23204_v48  ;;  %28903 = vst [vmem:[#allocation13_spill] sm:$0xff] %v23411_v52  ;;  %28904 = vst [vmem:[#allocation14_spill] sm:$0xff] %v23413_v53 }
  0x5f   : > { %18344 = vmatprep.mubr.msk.f32.mxu0 %vm384_vm1, %v23206_v49 }
  0x62   : > { %18345 = vmatmul.mubr.msk.f32.gmra.mrb[6].mxu0 %vm384_vm1, %v23212_v50 }
  0x63   : > { %18347 = vmatprep.mubr.msk.f32.mxu0 %vm384_vm1, %v23214_v51 }
  0x66   : > { %18348 = vmatmul.mubr.msk.f32.gmra.mrb[8].mxu0 %vm384_vm1, %v23224_v54 }
  0x67   : > { %18350 = vmatprep.mubr.msk.f32.mxu0 %vm384_vm1, %v23226_v55 }
  0x6a   : > { %18351 = vmatmul.mubr.msk.f32.gmra.mrb[10].mxu0 %vm384_vm1, %v23232_v56 }
  0x6b   : > { %18353 = vmatprep.mubr.msk.f32.mxu0 %vm384_vm1, %v23234_v57 }
  0x6e   : > { %18354 = vmatmul.mubr.msk.f32.gmra.mrb[12].mxu0 %vm384_vm1, %v23240_v58 }
  0x6f   : > { %18356 = vmatprep.mubr.msk.f32.mxu0 %vm384_vm1, %v23242_v59 }
  0x72   : > { %18357 = vmatmul.mubr.msk.f32.gmra.mrb[14].mxu0 %vm384_vm1, %v23248_v60 }
  0x73   : > { %18359 = vmatprep.mubr.msk.f32.mxu0 %vm384_vm1, %v23250_v61 }
  0x76   : > { %18360 = vmatmul.mubr.msk.f32.gmra.mrb[16].mxu0 %vm384_vm1, %v23256_v62 }
  0x77   : > { %18362 = vmatprep.mubr.msk.f32.mxu0 %vm384_vm1, %v23258_v63 }
  0x7a   : > { %18363 = vmatmul.mubr.msk.f32.gmra.mrb[18].mxu0 %vm384_vm1, %v23264_v0 }
  0x7b   : > { %18365 = vmatprep.mubr.msk.f32.mxu0 %vm384_vm1, %v23266_v1 }
  0x7e   : > { %18366 = vmatmul.mubr.msk.f32.gmra.mrb[20].mxu0 %vm384_vm1, %v23272_v2 }
  0x7f   : > { %18368 = vmatprep.mubr.msk.f32.mxu0 %vm384_vm1, %v23274_v3 }
  0x82   : > { %18369 = vmatmul.mubr.msk.f32.gmra.mrb[22].mxu0 %vm384_vm1, %v23280_v4 }
  0x83   : > { %18371 = vmatprep.mubr.msk.f32.mxu0 %vm384_vm1, %v23282_v5 }
  0x86   : > { %18372 = vmatmul.mubr.msk.f32.gmra.mrb[24].mxu0 %vm384_vm1, %v23288_v6 }
  0x87   : > { %18374 = vmatprep.mubr.msk.f32.mxu0 %vm384_vm1, %v23290_v7 }
  0x8a   : > { %18375 = vmatmul.mubr.msk.f32.gmra.mrb[26].mxu0 %vm384_vm1, %v23296_v9 }
  0x8b   : > { %18377 = vmatprep.mubr.msk.f32.mxu0 %vm384_vm1, %v23298_v10 }
  0x8e   : > { %18378 = vmatmul.mubr.msk.f32.gmra.mrb[28].mxu0 %vm384_vm1, %v23304_v11 }
  0x8f   : > { %18380 = vmatprep.mubr.msk.f32.mxu0 %vm384_vm1, %v23306_v12 }
  0x92   : > { %18381 = vmatmul.mubr.msk.f32.gmra.mrb[30].mxu0 %vm384_vm1, %v23312_v14 }
  0x93   : > { %18385 = vmatprep.mubr.msk.f32.mxu0 %vm384_vm1, %v2398_v15  ;;  %v23419_v15 = vld [vmem:[#allocation2 + $0x140] sm:$0xff] }
  0x94   : > { %28905 = vst [vmem:[#allocation15_spill] sm:$0xff] %v23419_v15 }
  0x96   : > { %18386 = vmatmul.mubr.msk.f32.vlgmr.msra.gmra.mrb[0].mxu0 %vm384_vm1, %v2399_v16  ;;  %v23421_v16 = vld [vmem:[#allocation2 + $0x150] sm:$0xff] }
  0x97   : > { %18434 = vmatpush3.msk.msra.mxu0 %vm674_vm0, %v23187_v45  ;;  %18388 = vmatprep.mubr.msk.f32.mxu0 %vm384_vm1, %v23317_v17  ;;  %v23405_v45 = vld [vmem:[#allocation2 + $0x120] sm:$0xff]  ;;  %28906 = vst [vmem:[#allocation16_spill] sm:$0xff] %v23421_v16 }
  0x98   : > { %18483 = vmatprep.subr.msk.mxu0 %vm674_vm0, %v23322_v18  ;;  %28902 = vst [vmem:[#allocation12_spill] sm:$0xff] %v23405_v45 }
  0x9a   : > { %18389 = vmatmul.mubr.msk.f32.gmra.mrb[2].mxu0 %vm384_vm1, %v23329_v19 }
  0x9b   : > { %18391 = vmatprep.mubr.msk.f32.mxu0 %vm384_vm1, %v23331_v20 }
  0x9e   : > { %18392 = vmatmul.mubr.msk.f32.gmra.mrb[4].mxu0 %vm384_vm1, %v23339_v21 }
  0x9f   : > { %18394 = vmatprep.mubr.msk.f32.mxu0 %vm384_vm1, %v23341_v22 }
  0xa2   : > { %18395 = vmatmul.mubr.msk.f32.gmra.mrb[6].mxu0 %vm384_vm1, %v23347_v23 }
  0xa3   : > { %18397 = vmatprep.mubr.msk.f32.mxu0 %vm384_vm1, %v23349_v26 }
  0xa6   : > { %18398 = vmatmul.mubr.msk.f32.gmra.mrb[8].mxu0 %vm384_vm1, %v23355_v27 }
  0xa7   : > { %18400 = vmatprep.mubr.msk.f32.mxu0 %vm384_vm1, %v23357_v30 }
  0xaa   : > { %18401 = vmatmul.mubr.msk.f32.gmra.mrb[10].mxu0 %vm384_vm1, %v23363_v33 }
  0xab   : > { %18403 = vmatprep.mubr.msk.f32.mxu0 %vm384_vm1, %v23365_v34 }
  0xae   : > { %18404 = vmatmul.mubr.msk.f32.gmra.mrb[12].mxu0 %vm384_vm1, %v23371_v35 }
  0xaf   : > { %18406 = vmatprep.mubr.msk.f32.mxu0 %vm384_vm1, %v23373_v36 }
  0xb2   : > { %18407 = vmatmul.mubr.msk.f32.gmra.mrb[14].mxu0 %vm384_vm1, %v23379_v37 }
  0xb3   : > { %18409 = vmatprep.mubr.msk.f32.mxu0 %vm384_vm1, %v23381_v38 }
  0xb6   : > { %18410 = vmatmul.mubr.msk.f32.gmra.mrb[16].mxu0 %vm384_vm1, %v23387_v39 }
  0xb7   : > { %18412 = vmatprep.mubr.msk.f32.mxu0 %vm384_vm1, %v23389_v40 }
  0xba   : > { %18413 = vmatmul.mubr.msk.f32.gmra.mrb[18].mxu0 %vm384_vm1, %v23395_v41 }
  0xbb   : > { %18415 = vmatprep.mubr.msk.f32.mxu0 %vm384_vm1, %v23397_v42  ;;  %v23453_v42 = vld [vmem:[%s28749_s1 + $0x20] sm:$0xf] }
  0xbe   : > { %18416 = vmatmul.mubr.msk.f32.gmra.mrb[20].mxu0 %vm384_vm1, %v23403_v43  ;;  %v23429_v43 = vld [vmem:[#allocation2 + $0x168] sm:$0xff] }
  0xbf   : > { %18418 = vmatprep.mubr.msk.f32.mxu0 %vm384_vm1, %v23405_v45  ;;  %v23427_v45 = vld [vmem:[#allocation2 + $0x158] sm:$0xff]  ;;  %28908 = vst [vmem:[#allocation18_spill] sm:$0xff] %v23429_v43 }
  0xc0   : > { %28907 = vst [vmem:[#allocation17_spill] sm:$0xff] %v23427_v45 }
  0xc2   : > { %18419 = vmatmul.mubr.msk.f32.gmra.mrb[22].mxu0 %vm384_vm1, %v23411_v52  ;;  %v23437_v52 = vld [vmem:[#allocation2 + $0x180] sm:$0xff] }
  0xc3   : > { %18421 = vmatprep.mubr.msk.f32.mxu0 %vm384_vm1, %v23413_v53  ;;  %v23435_v53 = vld [vmem:[#allocation2 + $0x170] sm:$0xff]  ;;  %28910 = vst [vmem:[#allocation20_spill] sm:$0xff] %v23437_v52 }
  0xc4   : > { %28909 = vst [vmem:[#allocation19_spill] sm:$0xff] %v23435_v53 }
  0xc6   : > { %18422 = vmatmul.mubr.msk.f32.gmra.mrb[24].mxu0 %vm384_vm1, %v23419_v15  ;;  %v2788_v15 = vld [vmem:[#allocation2 + $0x19] sm:$0xff] }
  0xc7   : > { %18424 = vmatprep.mubr.msk.f32.mxu0 %vm384_vm1, %v23421_v16  ;;  %v23443_v16 = vld [vmem:[#allocation2 + $0x188] sm:$0xff] }
  0xc8   : > { %28911 = vst [vmem:[#allocation21_spill] sm:$0xff] %v23443_v16 }
  0xca   : > { %18425 = vmatmul.mubr.msk.f32.gmra.mrb[26].mxu0 %vm384_vm1, %v23427_v45  ;;  %v2789_v45 = vld [vmem:[#allocation2 + $0x21] sm:$0xff] }
  0xcb   : > { %18427 = vmatprep.mubr.msk.f32.mxu0 %vm384_vm1, %v23429_v43  ;;  %v23448_v43 = vld [vmem:[#allocation2 + $0x31] sm:$0xff] }
  0xcc   : > { %28912 = vst [vmem:[#allocation22_spill] sm:$0xff] %v23448_v43 }
  0xce   : > { %18428 = vmatmul.mubr.msk.f32.gmra.mrb[28].mxu0 %vm384_vm1, %v23435_v53  ;;  %v23584_v53 = vld [vmem:[%s28749_s1 + $0x24] sm:$0xf] }
  0xcf   : > { %18430 = vmatprep.mubr.msk.f32.mxu0 %vm384_vm1, %v23437_v52  ;;  %v23460_v52 = vld [vmem:[#allocation2 + $0x39] sm:$0xff] }
  0xd0   : > { %28913 = vst [vmem:[#allocation23_spill] sm:$0xff] %v23460_v52 }
  0xd2   : > { %18431 = vmatmul.mubr.msk.f32.gmra.mrb[32].mxu0 %vm384_vm1, %v23443_v16  ;;  %v23462_v16 = vld [vmem:[#allocation2 + $0x49] sm:$0xff] }
  0xd3   : > { %18435 = vmatprep.mubr.msk.f32.mxu0 %vm384_vm1, %v2788_v15  ;;  %28914 = vst [vmem:[#allocation24_spill] sm:$0xff] %v23462_v16  ;;  %v23472_v15 = vld [vmem:[#allocation2 + $0x61] sm:$0xff] }
  0xd4   : > { %28916 = vst [vmem:[#allocation26_spill] sm:$0xff] %v23472_v15 }
  0xd6   : > { %18436 = vmatmul.mubr.msk.f32.vlgmr.msra.gmra.mrb[0].mxu0 %vm384_vm1, %v2789_v45  ;;  %v23470_v45 = vld [vmem:[#allocation2 + $0x51] sm:$0xff] }
  0xd7   : > { %18484 = vmatpush3.msk.msra.mxu0 %vm674_vm0, %v23322_v18  ;;  %18438 = vmatprep.mubr.msk.f32.mxu0 %vm384_vm1, %v23448_v43  ;;  %28915 = vst [vmem:[#allocation25_spill] sm:$0xff] %v23470_v45  ;;  %v23478_v18 = vld [vmem:[#allocation2 + $0x69] sm:$0xff]  ;;  %v23480_v43 = vld [vmem:[#allocation2 + $0x79] sm:$0xff] }
  0xd8   : > { %18533 = vmatprep.subr.msk.mxu0 %vm674_vm0, %v23453_v42  ;;  %28917 = vst [vmem:[#allocation27_spill] sm:$0xff] %v23478_v18  ;;  %28918 = vst [vmem:[#allocation28_spill] sm:$0xff] %v23480_v43 }
  0xda   : > { %18439 = vmatmul.mubr.msk.f32.gmra.mrb[2].mxu0 %vm384_vm1, %v23460_v52  ;;  %v23488_v52 = vld [vmem:[#allocation2 + $0x91] sm:$0xff] }
  0xdb   : > { %18441 = vmatprep.mubr.msk.f32.mxu0 %vm384_vm1, %v23462_v16  ;;  %v23486_v16 = vld [vmem:[#allocation2 + $0x81] sm:$0xff]  ;;  %28920 = vst [vmem:[#allocation30_spill] sm:$0xff] %v23488_v52 }
  0xdc   : > { %28919 = vst [vmem:[#allocation29_spill] sm:$0xff] %v23486_v16 }
  0xde   : > { %18442 = vmatmul.mubr.msk.f32.gmra.mrb[4].mxu0 %vm384_vm1, %v23470_v45  ;;  %v23496_v45 = vld [vmem:[#allocation2 + $0xa9] sm:$0xff] }
  0xdf   : > { %18444 = vmatprep.mubr.msk.f32.mxu0 %vm384_vm1, %v23472_v15  ;;  %v23494_v15 = vld [vmem:[#allocation2 + $0x99] sm:$0xff]  ;;  %28922 = vst [vmem:[#allocation32_spill] sm:$0xff] %v23496_v45 }
  0xe0   : > { %28921 = vst [vmem:[#allocation31_spill] sm:$0xff] %v23494_v15 }
  0xe2   : > { %18445 = vmatmul.mubr.msk.f32.gmra.mrb[6].mxu0 %vm384_vm1, %v23478_v18  ;;  %v23504_v18 = vld [vmem:[#allocation2 + $0xc1] sm:$0xff] }
  0xe3   : > { %18447 = vmatprep.mubr.msk.f32.mxu0 %vm384_vm1, %v23480_v43  ;;  %v23502_v43 = vld [vmem:[#allocation2 + $0xb1] sm:$0xff]  ;;  %28924 = vst [vmem:[#allocation34_spill] sm:$0xff] %v23504_v18 }
  0xe4   : > { %28923 = vst [vmem:[#allocation33_spill] sm:$0xff] %v23502_v43 }
  0xe6   : > { %18448 = vmatmul.mubr.msk.f32.gmra.mrb[8].mxu0 %vm384_vm1, %v23486_v16  ;;  %v23512_v16 = vld [vmem:[#allocation2 + $0xd9] sm:$0xff] }
  0xe7   : > { %18450 = vmatprep.mubr.msk.f32.mxu0 %vm384_vm1, %v23488_v52  ;;  %v23510_v52 = vld [vmem:[#allocation2 + $0xc9] sm:$0xff]  ;;  %28926 = vst [vmem:[#allocation36_spill] sm:$0xff] %v23512_v16 }
  0xe8   : > { %28925 = vst [vmem:[#allocation35_spill] sm:$0xff] %v23510_v52 }
  0xea   : > { %18451 = vmatmul.mubr.msk.f32.gmra.mrb[10].mxu0 %vm384_vm1, %v23494_v15  ;;  %v23520_v15 = vld [vmem:[#allocation2 + $0xf1] sm:$0xff] }
  0xeb   : > { %18453 = vmatprep.mubr.msk.f32.mxu0 %vm384_vm1, %v23496_v45  ;;  %v23518_v45 = vld [vmem:[#allocation2 + $0xe1] sm:$0xff]  ;;  %28928 = vst [vmem:[#allocation38_spill] sm:$0xff] %v23520_v15 }
  0xec   : > { %28927 = vst [vmem:[#allocation37_spill] sm:$0xff] %v23518_v45 }
  0xee   : > { %18454 = vmatmul.mubr.msk.f32.gmra.mrb[12].mxu0 %vm384_vm1, %v23502_v43  ;;  %v23528_v43 = vld [vmem:[#allocation2 + $0x109] sm:$0xff] }
  0xef   : > { %18456 = vmatprep.mubr.msk.f32.mxu0 %vm384_vm1, %v23504_v18  ;;  %v23526_v18 = vld [vmem:[#allocation2 + $0xf9] sm:$0xff]  ;;  %28930 = vst [vmem:[#allocation40_spill] sm:$0xff] %v23528_v43 }
  0xf0   : > { %28929 = vst [vmem:[#allocation39_spill] sm:$0xff] %v23526_v18 }
  0xf2   : > { %18457 = vmatmul.mubr.msk.f32.gmra.mrb[14].mxu0 %vm384_vm1, %v23510_v52  ;;  %v23536_v52 = vld [vmem:[#allocation2 + $0x121] sm:$0xff] }
  0xf3   : > { %18459 = vmatprep.mubr.msk.f32.mxu0 %vm384_vm1, %v23512_v16  ;;  %v23534_v16 = vld [vmem:[#allocation2 + $0x111] sm:$0xff]  ;;  %28932 = vst [vmem:[#allocation42_spill] sm:$0xff] %v23536_v52 }
  0xf4   : > { %28931 = vst [vmem:[#allocation41_spill] sm:$0xff] %v23534_v16 }
  0xf6   : > { %18460 = vmatmul.mubr.msk.f32.gmra.mrb[16].mxu0 %vm384_vm1, %v23518_v45  ;;  %v23544_v45 = vld [vmem:[#allocation2 + $0x139] sm:$0xff] }
  0xf7   : > { %18462 = vmatprep.mubr.msk.f32.mxu0 %vm384_vm1, %v23520_v15  ;;  %v23542_v15 = vld [vmem:[#allocation2 + $0x129] sm:$0xff]  ;;  %28934 = vst [vmem:[#allocation44_spill] sm:$0xff] %v23544_v45 }
  0xf8   : > { %28933 = vst [vmem:[#allocation43_spill] sm:$0xff] %v23542_v15 }
  0xfa   : > { %18463 = vmatmul.mubr.msk.f32.gmra.mrb[18].mxu0 %vm384_vm1, %v23526_v18  ;;  %v23552_v18 = vld [vmem:[#allocation2 + $0x151] sm:$0xff] }
  0xfb   : > { %18465 = vmatprep.mubr.msk.f32.mxu0 %vm384_vm1, %v23528_v43  ;;  %v23550_v43 = vld [vmem:[#allocation2 + $0x141] sm:$0xff]  ;;  %28936 = vst [vmem:[#allocation46_spill] sm:$0xff] %v23552_v18 }
  0xfc   : > { %28935 = vst [vmem:[#allocation45_spill] sm:$0xff] %v23550_v43 }
  0xfe   : > { %18466 = vmatmul.mubr.msk.f32.gmra.mrb[20].mxu0 %vm384_vm1, %v23534_v16  ;;  %v23560_v16 = vld [vmem:[#allocation2 + $0x169] sm:$0xff] }
  0xff   : > { %18468 = vmatprep.mubr.msk.f32.mxu0 %vm384_vm1, %v23536_v52  ;;  %v23558_v52 = vld [vmem:[#allocation2 + $0x159] sm:$0xff]  ;;  %28938 = vst [vmem:[#allocation48_spill] sm:$0xff] %v23560_v16 }
 0x100   : > { %28937 = vst [vmem:[#allocation47_spill] sm:$0xff] %v23558_v52 }
 0x102   : > { %18469 = vmatmul.mubr.msk.f32.gmra.mrb[22].mxu0 %vm384_vm1, %v23542_v15  ;;  %v23568_v15 = vld [vmem:[#allocation2 + $0x181] sm:$0xff] }
 0x103   : > { %18471 = vmatprep.mubr.msk.f32.mxu0 %vm384_vm1, %v23544_v45  ;;  %v23566_v45 = vld [vmem:[#allocation2 + $0x171] sm:$0xff]  ;;  %28939 = vst [vmem:[#allocation49_spill] sm:$0xff] %v23568_v15 }
 0x106   : > { %18472 = vmatmul.mubr.msk.f32.gmra.mrb[24].mxu0 %vm384_vm1, %v23550_v43  ;;  %v3178_v43 = vld [vmem:[#allocation2 + $0x1a] sm:$0xff] }
 0x107   : > { %18474 = vmatprep.mubr.msk.f32.mxu0 %vm384_vm1, %v23552_v18  ;;  %v23574_v18 = vld [vmem:[#allocation2 + $0x189] sm:$0xff] }
 0x108   : > { %28940 = vst [vmem:[#allocation50_spill] sm:$0xff] %v23574_v18 }
 0x10a   : > { %18475 = vmatmul.mubr.msk.f32.gmra.mrb[26].mxu0 %vm384_vm1, %v23558_v52  ;;  %v3179_v52 = vld [vmem:[#allocation2 + $0x22] sm:$0xff] }
 0x10b   : > { %18477 = vmatprep.mubr.msk.f32.mxu0 %vm384_vm1, %v23560_v16  ;;  %v23579_v16 = vld [vmem:[#allocation2 + $0x32] sm:$0xff] }
 0x10c   : > { %28941 = vst [vmem:[#allocation51_spill] sm:$0xff] %v23579_v16 }
 0x10e   : > { %18478 = vmatmul.mubr.msk.f32.gmra.mrb[28].mxu0 %vm384_vm1, %v23566_v45 }
 0x10f   : > { %18480 = vmatprep.mubr.msk.f32.mxu0 %vm384_vm1, %v23568_v15  ;;  %v23591_v15 = vld [vmem:[#allocation2 + $0x3a] sm:$0xff] }
 0x110   : > { %28942 = vst [vmem:[#allocation52_spill] sm:$0xff] %v23591_v15 }
 0x112   : > { %18481 = vmatmul.mubr.msk.f32.gmra.mrb[34].mxu0 %vm384_vm1, %v23574_v18  ;;  %v23593_v18 = vld [vmem:[#allocation2 + $0x4a] sm:$0xff] }
 0x113   : > { %18485 = vmatprep.mubr.msk.f32.mxu0 %vm384_vm1, %v3178_v43  ;;  %28943 = vst [vmem:[#allocation53_spill] sm:$0xff] %v23593_v18  ;;  %v23601_v43 = vld [vmem:[#allocation2 + $0x52] sm:$0xff] }
 0x114   : > { %28944 = vst [vmem:[#allocation54_spill] sm:$0xff] %v23601_v43 }
 0x116   : > { %18486 = vmatmul.mubr.msk.f32.vlgmr.msra.gmra.mrb[0].mxu0 %vm384_vm1, %v3179_v52  ;;  %v23603_v52 = vld [vmem:[#allocation2 + $0x62] sm:$0xff] }
 0x117   : > { %18534 = vmatpush3.msk.msra.mxu0 %vm674_vm0, %v23453_v42  ;;  %18488 = vmatprep.mubr.msk.f32.mxu0 %vm384_vm1, %v23579_v16  ;;  %28945 = vst [vmem:[#allocation55_spill] sm:$0xff] %v23603_v52  ;;  %v23609_v42 = vld [vmem:[#allocation2 + $0x6a] sm:$0xff]  ;;  %v23611_v16 = vld [vmem:[#allocation2 + $0x7a] sm:$0xff] }
 0x118   : > { %18583 = vmatprep.subr.msk.mxu0 %vm674_vm0, %v23584_v53  ;;  %28946 = vst [vmem:[#allocation56_spill] sm:$0xff] %v23609_v42  ;;  %28947 = vst [vmem:[#allocation57_spill] sm:$0xff] %v23611_v16 }
 0x11a   : > { %18489 = vmatmul.mubr.msk.f32.gmra.mrb[2].mxu0 %vm384_vm1, %v23591_v15  ;;  %v23619_v15 = vld [vmem:[#allocation2 + $0x92] sm:$0xff] }
 0x11b   : > { %18491 = vmatprep.mubr.msk.f32.mxu0 %vm384_vm1, %v23593_v18  ;;  %v23617_v18 = vld [vmem:[#allocation2 + $0x82] sm:$0xff]  ;;  %28949 = vst [vmem:[#allocation59_spill] sm:$0xff] %v23619_v15 }
 0x11c   : > { %28948 = vst [vmem:[#allocation58_spill] sm:$0xff] %v23617_v18 }
 0x11e   : > { %18492 = vmatmul.mubr.msk.f32.gmra.mrb[4].mxu0 %vm384_vm1, %v23601_v43  ;;  %v23627_v43 = vld [vmem:[#allocation2 + $0xaa] sm:$0xff] }
 0x11f   : > { %18494 = vmatprep.mubr.msk.f32.mxu0 %vm384_vm1, %v23603_v52  ;;  %v23625_v52 = vld [vmem:[#allocation2 + $0x9a] sm:$0xff]  ;;  %28951 = vst [vmem:[#allocation61_spill] sm:$0xff] %v23627_v43 }
 0x120   : > { %28950 = vst [vmem:[#allocation60_spill] sm:$0xff] %v23625_v52 }
 0x122   : > { %18495 = vmatmul.mubr.msk.f32.gmra.mrb[6].mxu0 %vm384_vm1, %v23609_v42  ;;  %v23635_v42 = vld [vmem:[#allocation2 + $0xc2] sm:$0xff] }
 0x123   : > { %18497 = vmatprep.mubr.msk.f32.mxu0 %vm384_vm1, %v23611_v16  ;;  %v23633_v16 = vld [vmem:[#allocation2 + $0xb2] sm:$0xff]  ;;  %28953 = vst [vmem:[#allocation63_spill] sm:$0xff] %v23635_v42 }
 0x124   : > { %28952 = vst [vmem:[#allocation62_spill] sm:$0xff] %v23633_v16 }
 0x126   : > { %18498 = vmatmul.mubr.msk.f32.gmra.mrb[8].mxu0 %vm384_vm1, %v23617_v18  ;;  %v23643_v18 = vld [vmem:[#allocation2 + $0xda] sm:$0xff] }
 0x127   : > { %18500 = vmatprep.mubr.msk.f32.mxu0 %vm384_vm1, %v23619_v15  ;;  %v23641_v15 = vld [vmem:[#allocation2 + $0xca] sm:$0xff]  ;;  %28955 = vst [vmem:[#allocation65_spill] sm:$0xff] %v23643_v18 }
 0x128   : > { %28954 = vst [vmem:[#allocation64_spill] sm:$0xff] %v23641_v15 }
 0x12a   : > { %18501 = vmatmul.mubr.msk.f32.gmra.mrb[10].mxu0 %vm384_vm1, %v23625_v52  ;;  %v23651_v52 = vld [vmem:[#allocation2 + $0xf2] sm:$0xff] }
 0x12b   : > { %18503 = vmatprep.mubr.msk.f32.mxu0 %vm384_vm1, %v23627_v43  ;;  %v23649_v43 = vld [vmem:[#allocation2 + $0xe2] sm:$0xff]  ;;  %28957 = vst [vmem:[#allocation67_spill] sm:$0xff] %v23651_v52 }
 0x12c   : > { %28956 = vst [vmem:[#allocation66_spill] sm:$0xff] %v23649_v43 }
 0x12e   : > { %18504 = vmatmul.mubr.msk.f32.gmra.mrb[12].mxu0 %vm384_vm1, %v23633_v16  ;;  %v23659_v16 = vld [vmem:[#allocation2 + $0x10a] sm:$0xff] }
 0x12f   : > { %18506 = vmatprep.mubr.msk.f32.mxu0 %vm384_vm1, %v23635_v42  ;;  %v23657_v42 = vld [vmem:[#allocation2 + $0xfa] sm:$0xff]  ;;  %28959 = vst [vmem:[#allocation69_spill] sm:$0xff] %v23659_v16 }
 0x130   : > { %28958 = vst [vmem:[#allocation68_spill] sm:$0xff] %v23657_v42 }
 0x132   : > { %18507 = vmatmul.mubr.msk.f32.gmra.mrb[14].mxu0 %vm384_vm1, %v23641_v15  ;;  %v23667_v15 = vld [vmem:[#allocation2 + $0x122] sm:$0xff] }
 0x133   : > { %18509 = vmatprep.mubr.msk.f32.mxu0 %vm384_vm1, %v23643_v18  ;;  %v23665_v18 = vld [vmem:[#allocation2 + $0x112] sm:$0xff]  ;;  %28961 = vst [vmem:[#allocation71_spill] sm:$0xff] %v23667_v15 }
 0x134   : > { %28960 = vst [vmem:[#allocation70_spill] sm:$0xff] %v23665_v18 }
 0x136   : > { %18510 = vmatmul.mubr.msk.f32.gmra.mrb[16].mxu0 %vm384_vm1, %v23649_v43  ;;  %v23675_v43 = vld [vmem:[#allocation2 + $0x13a] sm:$0xff] }
 0x137   : > { %18512 = vmatprep.mubr.msk.f32.mxu0 %vm384_vm1, %v23651_v52  ;;  %v23673_v52 = vld [vmem:[#allocation2 + $0x12a] sm:$0xff]  ;;  %28963 = vst [vmem:[#allocation73_spill] sm:$0xff] %v23675_v43 }
 0x138   : > { %28962 = vst [vmem:[#allocation72_spill] sm:$0xff] %v23673_v52 }
 0x13a   : > { %18513 = vmatmul.mubr.msk.f32.gmra.mrb[18].mxu0 %vm384_vm1, %v23657_v42  ;;  %v23683_v42 = vld [vmem:[#allocation2 + $0x152] sm:$0xff] }
 0x13b   : > { %18515 = vmatprep.mubr.msk.f32.mxu0 %vm384_vm1, %v23659_v16  ;;  %v23681_v16 = vld [vmem:[#allocation2 + $0x142] sm:$0xff]  ;;  %28964 = vst [vmem:[#allocation74_spill] sm:$0xff] %v23683_v42 }
 0x13e   : > { %18516 = vmatmul.mubr.msk.f32.gmra.mrb[20].mxu0 %vm384_vm1, %v23665_v18  ;;  %v23691_v18 = vld [vmem:[#allocation2 + $0x16a] sm:$0xff] }
 0x13f   : > { %18518 = vmatprep.mubr.msk.f32.mxu0 %vm384_vm1, %v23667_v15  ;;  %v23689_v15 = vld [vmem:[#allocation2 + $0x15a] sm:$0xff]  ;;  %28965 = vst [vmem:[#allocation75_spill] sm:$0xff] %v23691_v18 }
 0x142   : > { %18519 = vmatmul.mubr.msk.f32.gmra.mrb[22].mxu0 %vm384_vm1, %v23673_v52  ;;  %v23699_v52 = vld [vmem:[#allocation2 + $0x182] sm:$0xff] }
 0x143   : > { %18521 = vmatprep.mubr.msk.f32.mxu0 %vm384_vm1, %v23675_v43  ;;  %v23697_v43 = vld [vmem:[#allocation2 + $0x172] sm:$0xff] }
 0x146   : > { %18522 = vmatmul.mubr.msk.f32.gmra.mrb[24].mxu0 %vm384_vm1, %v23681_v16 }
 0x147   : > { %18524 = vmatprep.mubr.msk.f32.mxu0 %vm384_vm1, %v23683_v42  ;;  %v23705_v42 = vld [vmem:[#allocation2 + $0x18a] sm:$0xff] }
 0x14a   : > { %18525 = vmatmul.mubr.msk.f32.gmra.mrb[26].mxu0 %vm384_vm1, %v23689_v15 }
 0x14b   : > { %18527 = vmatprep.mubr.msk.f32.mxu0 %vm384_vm1, %v23691_v18  ;;  %v23714_v18 = vld [vmem:[%s28749_s1 + $0x28] sm:$0xf] }
 0x14e   : > { %18528 = vmatmul.mubr.msk.f32.gmra.mrb[28].mxu0 %vm384_vm1, %v23697_v43 }
 0x14f   : > { %18530 = vmatprep.mubr.msk.f32.mxu0 %vm384_vm1, %v23699_v52 }
 0x152   : > { %18531 = vmatmul.mubr.msk.f32.gmra.mrb[36].mxu0 %vm384_vm1, %v23705_v42 }
 0x153   : > { %18535 = vmatprep.mubr.msk.f32.mxu0 %vm384_vm1, %v23086_v8  ;;  %v23732_v8 = vld [vmem:[#allocation2 + $0x7b] sm:$0xff] }
 0x156   : > { %18536 = vmatmul.mubr.msk.f32.vlgmr.msra.gmra.mrb[0].mxu0 %vm384_vm1, %v23106_v13  ;;  %v23738_v13 = vld [vmem:[#allocation2 + $0x83] sm:$0xff] }
 0x157   : > { %18584 = vmatpush3.msk.msra.mxu0 %vm674_vm0, %v23584_v53  ;;  %18538 = vmatprep.mubr.msk.f32.mxu0 %vm384_vm1, %v23130_v24  ;;  %v23740_v24 = vld [vmem:[#allocation2 + $0x93] sm:$0xff]  ;;  %v23756_v53 = vld [vmem:[#allocation2 + $0xc3] sm:$0xff] }
 0x158   : > { %18633 = vmatprep.subr.msk.mxu0 %vm674_vm0, %v23714_v18  ;;  %28966 = vst [vmem:[#allocation76_spill] sm:$0xff] %v23740_v24  ;;  %28970 = vst [vmem:[#allocation80_spill] sm:$0xff] %v23756_v53 }
 0x15a   : > { %18539 = vmatmul.mubr.msk.f32.gmra.mrb[2].mxu0 %vm384_vm1, %v23132_v25 }
 0x15b   : > { %18541 = vmatprep.mubr.msk.f32.mxu0 %vm384_vm1, %v23141_v28 }
 0x15e   : > { %18542 = vmatmul.mubr.msk.f32.gmra.mrb[4].mxu0 %vm384_vm1, %v23149_v29  ;;  %v23746_v29 = vld [vmem:[#allocation2 + $0x9b] sm:$0xff] }
 0x15f   : > { %18544 = vmatprep.mubr.msk.f32.mxu0 %vm384_vm1, %v23152_v31  ;;  %28967 = vst [vmem:[#allocation77_spill] sm:$0xff] %v23746_v29  ;;  %v23748_v31 = vld [vmem:[#allocation2 + $0xab] sm:$0xff] }
 0x160   : > { %28968 = vst [vmem:[#allocation78_spill] sm:$0xff] %v23748_v31 }
 0x162   : > { %18545 = vmatmul.mubr.msk.f32.gmra.mrb[6].mxu0 %vm384_vm1, %v23159_v32  ;;  %v23754_v32 = vld [vmem:[#allocation2 + $0xb3] sm:$0xff] }
 0x163   : > { %18547 = vmatprep.mubr.msk.f32.mxu0 %vm384_vm1, %v23732_v8  ;;  %28969 = vst [vmem:[#allocation79_spill] sm:$0xff] %v23754_v32 }
 0x165   : > { %v18382_v25 = vpop.f32.mrb[30].mxu0 }
 0x166   : > { %v2356_v28 = vpop.f32.mrb[31].mxu0  ;;  %18548 = vmatmul.mubr.msk.f32.gmra.mrb[8].mxu0 %vm384_vm1, %v23738_v13  ;;  %v23762_v25 = vld [vmem:[#allocation2 + $0xcb] sm:$0xff] }
 0x167   : > { %18550 = vmatprep.mubr.msk.f32.mxu0 %vm384_vm1, %v23740_v24  ;;  %28971 = vst [vmem:[#allocation81_spill] sm:$0xff] %v23762_v25  ;;  %v23764_v28 = vld [vmem:[#allocation2 + $0xdb] sm:$0xff]  ;;  %v476_v24 = vld [vmem:[%s23081_s24 + $0xf0] sm:$0xff] }
 0x168   : > { %28972 = vst [vmem:[#allocation82_spill] sm:$0xff] %v23764_v28  ;;  %509 = vst.msk [vmem:[#allocation2 + $0x19a] sm:$0xff] %vm384_vm1, %v476_v24  ;;  %v23830_v24 = vld [vmem:[#allocation2 + $0x18b] sm:$0xff] }
 0x16a   : > { %18551 = vmatmul.mubr.msk.f32.gmra.mrb[10].mxu0 %vm384_vm1, %v23746_v29  ;;  %v23772_v29 = vld [vmem:[#allocation2 + $0xf3] sm:$0xff] }
 0x16b   : > { %18553 = vmatprep.mubr.msk.f32.mxu0 %vm384_vm1, %v23748_v31  ;;  %v23770_v31 = vld [vmem:[#allocation2 + $0xe3] sm:$0xff]  ;;  %28974 = vst [vmem:[#allocation84_spill] sm:$0xff] %v23772_v29 }
 0x16c   : > { %28973 = vst [vmem:[#allocation83_spill] sm:$0xff] %v23770_v31 }
 0x16e   : > { %18554 = vmatmul.mubr.msk.f32.gmra.mrb[12].mxu0 %vm384_vm1, %v23754_v32  ;;  %v23780_v32 = vld [vmem:[#allocation2 + $0x10b] sm:$0xff] }
 0x16f   : > { %18556 = vmatprep.mubr.msk.f32.mxu0 %vm384_vm1, %v23756_v53  ;;  %v23778_v53 = vld [vmem:[#allocation2 + $0xfb] sm:$0xff]  ;;  %28976 = vst [vmem:[#allocation86_spill] sm:$0xff] %v23780_v32 }
 0x170   : > { %28975 = vst [vmem:[#allocation85_spill] sm:$0xff] %v23778_v53 }
 0x172   : > { %18557 = vmatmul.mubr.msk.f32.gmra.mrb[14].mxu0 %vm384_vm1, %v23762_v25  ;;  %v23788_v25 = vld [vmem:[#allocation2 + $0x123] sm:$0xff] }
 0x173   : > { %18559 = vmatprep.mubr.msk.f32.mxu0 %vm384_vm1, %v23764_v28  ;;  %v23786_v28 = vld [vmem:[#allocation2 + $0x113] sm:$0xff]  ;;  %28978 = vst [vmem:[#allocation88_spill] sm:$0xff] %v23788_v25 }
 0x174   : > { %28977 = vst [vmem:[#allocation87_spill] sm:$0xff] %v23786_v28 }
 0x176   : > { %18560 = vmatmul.mubr.msk.f32.gmra.mrb[16].mxu0 %vm384_vm1, %v23770_v31  ;;  %v23796_v31 = vld [vmem:[#allocation2 + $0x13b] sm:$0xff] }
 0x177   : > { %18562 = vmatprep.mubr.msk.f32.mxu0 %vm384_vm1, %v23772_v29  ;;  %v23794_v29 = vld [vmem:[#allocation2 + $0x12b] sm:$0xff]  ;;  %28980 = vst [vmem:[#allocation90_spill] sm:$0xff] %v23796_v31 }
 0x178   : > { %28979 = vst [vmem:[#allocation89_spill] sm:$0xff] %v23794_v29 }
 0x17a   : > { %18563 = vmatmul.mubr.msk.f32.gmra.mrb[18].mxu0 %vm384_vm1, %v23778_v53  ;;  %v23804_v53 = vld [vmem:[#allocation2 + $0x153] sm:$0xff] }
 0x17b   : > { %18565 = vmatprep.mubr.msk.f32.mxu0 %vm384_vm1, %v23780_v32  ;;  %v23802_v32 = vld [vmem:[#allocation2 + $0x143] sm:$0xff] }
 0x17c   : > { %28981 = vst [vmem:[#allocation91_spill] sm:$0xff] %v23802_v32 }
 0x17e   : > { %18566 = vmatmul.mubr.msk.f32.gmra.mrb[20].mxu0 %vm384_vm1, %v23786_v28  ;;  %v23812_v28 = vld [vmem:[#allocation2 + $0x16b] sm:$0xff] }
 0x17f   : > { %18568 = vmatprep.mubr.msk.f32.mxu0 %vm384_vm1, %v23788_v25  ;;  %v23810_v25 = vld [vmem:[#allocation2 + $0x15b] sm:$0xff] }
 0x182   : > { %18569 = vmatmul.mubr.msk.f32.gmra.mrb[22].mxu0 %vm384_vm1, %v23794_v29  ;;  %v477_v29 = vld [vmem:[%s23081_s24 + $0xf8] sm:$0xff]  ;;  %s378_s24 = scalar_lea.vmem [#allocation7], %s377_s22 }
 0x183   : > { %18571 = vmatprep.mubr.msk.f32.mxu0 %vm384_vm1, %v23796_v31  ;;  %510 = vst.msk [vmem:[#allocation2 + $0x1a2] sm:$0xff] %vm384_vm1, %v477_v29  ;;  %v23824_v31 = vld [vmem:[#allocation2 + $0x183] sm:$0xff]  ;;  %v15552_v29 = vld [vmem:[%s28749_s1 + $0x2c] sm:$0xf]  ;;  %s15118_s12 = sshll.u32 %s378_s24, 4  ;;  %s28708_s12 = int_to_ptr.vmem [resolvable:$true] %s15118_s12 }
 0x184   : > { %s22745_s25 = scalar_lea.vmem %s28708_s12, 16  ;;  %p22752_p0 = scmp.lt.s32.totalorder %s28708_s12, %s22750_s29 }
 0x185   : > { %p22746_p11 = scmp.ne.s32.totalorder %s28708_s12, %s22745_s25  ;;  %p22753_p1 = scmp.lt.s32.totalorder %s22751_s0, %s22745_s25 }
 0x186   : > { %18572 = vmatmul.mubr.msk.f32.gmra.mrb[24].mxu0 %vm384_vm1, %v23802_v32  ;;  %v23822_v32 = vld [vmem:[#allocation2 + $0x173] sm:$0xff] }
 0x187   : > { %18574 = vmatprep.mubr.msk.f32.mxu0 %vm384_vm1, %v23804_v53  ;;  %p22747_p12 = pnand %p22746_p11, %p22911_p5  ;;  %p22754_p2 = por %p22753_p1, %p22752_p0 }
 0x189   : > { %p22748_p13 = pneg %p22747_p12 }
 0x18a   : > { %18575 = vmatmul.mubr.msk.f32.gmra.mrb[26].mxu0 %vm384_vm1, %v23810_v25 }
 0x18b   : > { %18577 = vmatprep.mubr.msk.f32.mxu0 %vm384_vm1, %v23812_v28  ;;  %p22755_p3 = pnand %p22754_p2, %p22748_p13 }
 0x18e   : > { %18578 = vmatmul.mubr.msk.f32.gmra.mrb[28].mxu0 %vm384_vm1, %v23822_v32 }
 0x18f   : > { %18580 = vmatprep.mubr.msk.f32.mxu0 %vm384_vm1, %v23824_v31 }
 0x192   : > { %18581 = vmatmul.mubr.msk.f32.gmra.mrb[38].mxu0 %vm384_vm1, %v23830_v24 }
 0x193   : > { %18585 = vmatprep.mubr.msk.f32.mxu0 %vm384_vm1, %v23182_v44 }
 0x196   : > { %18586 = vmatmul.mubr.msk.f32.vlgmr.msra.gmra.mrb[0].mxu0 %vm384_vm1, %v23194_v46 }
 0x197   : > { %18634 = vmatpush3.msk.msra.mxu0 %vm674_vm0, %v23714_v18  ;;  %18588 = vmatprep.mubr.msk.f32.mxu0 %vm384_vm1, %v23196_v47  ;;  %v23898_v47 = vld [vmem:[#allocation2 + $0x184] sm:$0xff]  ;;  %v29018_v18 = vld [vmem:[#allocation46_spill] sm:$0xff] }
 0x198   : > { %18683 = vmatprep.subr.msk.mxu0 %vm674_vm0, %v15552_v29 }
 0x19a   : > { %18589 = vmatmul.mubr.msk.f32.gmra.mrb[2].mxu0 %vm384_vm1, %v23204_v48  ;;  %v23904_v48 = vld [vmem:[#allocation2 + $0x18c] sm:$0xff] }
 0x19b   : > { %18591 = vmatprep.mubr.msk.f32.mxu0 %vm384_vm1, %v23206_v49  ;;  %v15586_v49 = vld [vmem:[%s28749_s1 + $0x30] sm:$0xf] }
 0x19e   : > { %18592 = vmatmul.mubr.msk.f32.gmra.mrb[4].mxu0 %vm384_vm1, %v23212_v50 }
 0x19f   : > { %18594 = vmatprep.mubr.msk.f32.mxu0 %vm384_vm1, %v23214_v51 }
 0x1a2   : > { %18595 = vmatmul.mubr.msk.f32.gmra.mrb[6].mxu0 %vm384_vm1, %v23224_v54  ;;  %v28982_v54 = vld [vmem:[#allocation10_spill] sm:$0xff] }
 0x1a3   : > { %18597 = vmatprep.mubr.msk.f32.mxu0 %vm384_vm1, %v23226_v55  ;;  %v28983_v55 = vld [vmem:[#allocation11_spill] sm:$0xff] }
 0x1a5   : > { %v18432_v44 = vpop.f32.mrb[32].mxu0 }
 0x1a6   : > { %v2747_v46 = vpop.f32.mrb[33].mxu0  ;;  %18598 = vmatmul.mubr.msk.f32.gmra.mrb[8].mxu0 %vm384_vm1, %v23232_v56  ;;  %v28984_v56 = vld [vmem:[#allocation12_spill] sm:$0xff] }
 0x1a7   : > { %18600 = vmatprep.mubr.msk.f32.mxu0 %vm384_vm1, %v23234_v57  ;;  %v28985_v57 = vld [vmem:[#allocation13_spill] sm:$0xff]  ;;  %v29020_v44 = vld [vmem:[#allocation48_spill] sm:$0xff] }
 0x1a8   : > { %v29021_v46 = vld [vmem:[#allocation49_spill] sm:$0xff] }
 0x1aa   : > { %18601 = vmatmul.mubr.msk.f32.gmra.mrb[10].mxu0 %vm384_vm1, %v23240_v58  ;;  %v28986_v58 = vld [vmem:[#allocation14_spill] sm:$0xff] }
 0x1ab   : > { %18603 = vmatprep.mubr.msk.f32.mxu0 %vm384_vm1, %v23242_v59  ;;  %v28987_v59 = vld [vmem:[#allocation15_spill] sm:$0xff] }
 0x1ae   : > { %18604 = vmatmul.mubr.msk.f32.gmra.mrb[12].mxu0 %vm384_vm1, %v23248_v60  ;;  %v28988_v60 = vld [vmem:[#allocation16_spill] sm:$0xff] }
 0x1af   : > { %18606 = vmatprep.mubr.msk.f32.mxu0 %vm384_vm1, %v23250_v61  ;;  %v28989_v61 = vld [vmem:[#allocation17_spill] sm:$0xff] }
 0x1b2   : > { %18607 = vmatmul.mubr.msk.f32.gmra.mrb[14].mxu0 %vm384_vm1, %v23256_v62  ;;  %v28990_v62 = vld [vmem:[#allocation18_spill] sm:$0xff] }
 0x1b3   : > { %18609 = vmatprep.mubr.msk.f32.mxu0 %vm384_vm1, %v23258_v63  ;;  %v28991_v63 = vld [vmem:[#allocation19_spill] sm:$0xff] }
 0x1b6   : > { %18610 = vmatmul.mubr.msk.f32.gmra.mrb[16].mxu0 %vm384_vm1, %v23264_v0  ;;  %v28992_v0 = vld [vmem:[#allocation20_spill] sm:$0xff] }
 0x1b7   : > { %18612 = vmatprep.mubr.msk.f32.mxu0 %vm384_vm1, %v23266_v1  ;;  %v23971_v1 = vld [vmem:[#allocation2 + $0x198] sm:$0xff] }
 0x1ba   : > { %18613 = vmatmul.mubr.msk.f32.gmra.mrb[18].mxu0 %vm384_vm1, %v23272_v2  ;;  %v28993_v2 = vld [vmem:[#allocation21_spill] sm:$0xff] }
 0x1bb   : > { %18615 = vmatprep.mubr.msk.f32.mxu0 %vm384_vm1, %v23274_v3  ;;  %v23977_v3 = vld [vmem:[#allocation2 + $0x1a0] sm:$0xff] }
 0x1be   : > { %18616 = vmatmul.mubr.msk.f32.gmra.mrb[20].mxu0 %vm384_vm1, %v23280_v4  ;;  %v28994_v4 = vld [vmem:[#allocation22_spill] sm:$0xff] }
 0x1bf   : > { %18618 = vmatprep.mubr.msk.f32.mxu0 %vm384_vm1, %v23282_v5  ;;  %v15620_v5 = vld [vmem:[%s28749_s1 + $0x34] sm:$0xf] }
 0x1c2   : > { %18619 = vmatmul.mubr.msk.f32.gmra.mrb[22].mxu0 %vm384_vm1, %v23288_v6  ;;  %v28995_v6 = vld [vmem:[#allocation23_spill] sm:$0xff] }
 0x1c3   : > { %18621 = vmatprep.mubr.msk.f32.mxu0 %vm384_vm1, %v23290_v7  ;;  %v28996_v7 = vld [vmem:[#allocation24_spill] sm:$0xff] }
 0x1c6   : > { %18622 = vmatmul.mubr.msk.f32.gmra.mrb[24].mxu0 %vm384_vm1, %v23296_v9  ;;  %v28997_v9 = vld [vmem:[#allocation25_spill] sm:$0xff] }
 0x1c7   : > { %18624 = vmatprep.mubr.msk.f32.mxu0 %vm384_vm1, %v23298_v10  ;;  %v28998_v10 = vld [vmem:[#allocation26_spill] sm:$0xff] }
 0x1ca   : > { %18625 = vmatmul.mubr.msk.f32.gmra.mrb[26].mxu0 %vm384_vm1, %v23304_v11  ;;  %v28999_v11 = vld [vmem:[#allocation27_spill] sm:$0xff] }
 0x1cb   : > { %18627 = vmatprep.mubr.msk.f32.mxu0 %vm384_vm1, %v23306_v12  ;;  %v29000_v12 = vld [vmem:[#allocation28_spill] sm:$0xff] }
 0x1ce   : > { %18628 = vmatmul.mubr.msk.f32.gmra.mrb[28].mxu0 %vm384_vm1, %v23312_v14  ;;  %v29001_v14 = vld [vmem:[#allocation29_spill] sm:$0xff] }
 0x1cf   : > { %18630 = vmatprep.mubr.msk.f32.mxu0 %vm384_vm1, %v23898_v47 }
 0x1d2   : > { %18631 = vmatmul.mubr.msk.f32.gmra.mrb[40].mxu0 %vm384_vm1, %v23904_v48 }
 0x1d3   : > { %18635 = vmatprep.mubr.msk.f32.mxu0 %vm384_vm1, %v23317_v17  ;;  %v29002_v17 = vld [vmem:[#allocation30_spill] sm:$0xff] }
 0x1d6   : > { %18636 = vmatmul.mubr.msk.f32.vlgmr.msra.gmra.mrb[0].mxu0 %vm384_vm1, %v23329_v19 }
 0x1d7   : > { %18684 = vmatpush3.msk.msra.mxu0 %vm674_vm0, %v15552_v29  ;;  %18638 = vmatprep.mubr.msk.f32.mxu0 %vm384_vm1, %v23331_v20  ;;  %v29019_v29 = vld [vmem:[#allocation47_spill] sm:$0xff] }
 0x1d8   : > { %18733 = vmatprep.subr.msk.mxu0 %vm674_vm0, %v15586_v49 }
 0x1da   : > { %18639 = vmatmul.mubr.msk.f32.gmra.mrb[2].mxu0 %vm384_vm1, %v23339_v21  ;;  %v29003_v21 = vld [vmem:[#allocation31_spill] sm:$0xff] }
 0x1db   : > { %18641 = vmatprep.mubr.msk.f32.mxu0 %vm384_vm1, %v23341_v22  ;;  %v29004_v22 = vld [vmem:[#allocation32_spill] sm:$0xff] }
 0x1de   : > { %18642 = vmatmul.mubr.msk.f32.gmra.mrb[4].mxu0 %vm384_vm1, %v23347_v23  ;;  %v29005_v23 = vld [vmem:[#allocation33_spill] sm:$0xff] }
 0x1df   : > { %18644 = vmatprep.mubr.msk.f32.mxu0 %vm384_vm1, %v23349_v26  ;;  %v29006_v26 = vld [vmem:[#allocation34_spill] sm:$0xff] }
 0x1e2   : > { %18645 = vmatmul.mubr.msk.f32.gmra.mrb[6].mxu0 %vm384_vm1, %v23355_v27  ;;  %v29007_v27 = vld [vmem:[#allocation35_spill] sm:$0xff] }
 0x1e3   : > { %18647 = vmatprep.mubr.msk.f32.mxu0 %vm384_vm1, %v23357_v30  ;;  %v29008_v30 = vld [vmem:[#allocation36_spill] sm:$0xff] }
 0x1e5   : > { %v18482_v50 = vpop.f32.mrb[34].mxu0 }
 0x1e6   : > { %v3137_v51 = vpop.f32.mrb[35].mxu0  ;;  %18648 = vmatmul.mubr.msk.f32.gmra.mrb[8].mxu0 %vm384_vm1, %v23363_v33  ;;  %v29009_v33 = vld [vmem:[#allocation37_spill] sm:$0xff]  ;;  %v29022_v50 = vld [vmem:[#allocation50_spill] sm:$0xff] }
 0x1e7   : > { %18650 = vmatprep.mubr.msk.f32.mxu0 %vm384_vm1, %v23365_v34  ;;  %v29010_v34 = vld [vmem:[#allocation38_spill] sm:$0xff] }
 0x1e8   : > { %v24050_v51 = vld [vmem:[#allocation2 + $0x1a1] sm:$0xff] }
 0x1ea   : > { %18651 = vmatmul.mubr.msk.f32.gmra.mrb[10].mxu0 %vm384_vm1, %v23371_v35  ;;  %v29011_v35 = vld [vmem:[#allocation39_spill] sm:$0xff] }
 0x1eb   : > { %18653 = vmatprep.mubr.msk.f32.mxu0 %vm384_vm1, %v23373_v36  ;;  %v29012_v36 = vld [vmem:[#allocation40_spill] sm:$0xff] }
 0x1ee   : > { %18654 = vmatmul.mubr.msk.f32.gmra.mrb[12].mxu0 %vm384_vm1, %v23379_v37  ;;  %v29013_v37 = vld [vmem:[#allocation41_spill] sm:$0xff] }
 0x1ef   : > { %18656 = vmatprep.mubr.msk.f32.mxu0 %vm384_vm1, %v23381_v38  ;;  %v29014_v38 = vld [vmem:[#allocation42_spill] sm:$0xff] }
 0x1f2   : > { %18657 = vmatmul.mubr.msk.f32.gmra.mrb[14].mxu0 %vm384_vm1, %v23387_v39  ;;  %v29015_v39 = vld [vmem:[#allocation43_spill] sm:$0xff] }
 0x1f3   : > { %18659 = vmatprep.mubr.msk.f32.mxu0 %vm384_vm1, %v23389_v40  ;;  %v29016_v40 = vld [vmem:[#allocation44_spill] sm:$0xff] }
 0x1f6   : > { %18660 = vmatmul.mubr.msk.f32.gmra.mrb[16].mxu0 %vm384_vm1, %v23395_v41  ;;  %v29017_v41 = vld [vmem:[#allocation45_spill] sm:$0xff] }
 0x1f7   : > { %18662 = vmatprep.mubr.msk.f32.mxu0 %vm384_vm1, %v28982_v54  ;;  %v29023_v54 = vld [vmem:[#allocation51_spill] sm:$0xff] }
 0x1fa   : > { %18663 = vmatmul.mubr.msk.f32.gmra.mrb[18].mxu0 %vm384_vm1, %v28983_v55  ;;  %v29024_v55 = vld [vmem:[#allocation52_spill] sm:$0xff] }
 0x1fb   : > { %18665 = vmatprep.mubr.msk.f32.mxu0 %vm384_vm1, %v28984_v56  ;;  %v29025_v56 = vld [vmem:[#allocation53_spill] sm:$0xff] }
 0x1fe   : > { %18666 = vmatmul.mubr.msk.f32.gmra.mrb[20].mxu0 %vm384_vm1, %v28985_v57  ;;  %v29026_v57 = vld [vmem:[#allocation54_spill] sm:$0xff] }
 0x1ff   : > { %18668 = vmatprep.mubr.msk.f32.mxu0 %vm384_vm1, %v28986_v58  ;;  %v29027_v58 = vld [vmem:[#allocation55_spill] sm:$0xff] }
 0x202   : > { %18669 = vmatmul.mubr.msk.f32.gmra.mrb[22].mxu0 %vm384_vm1, %v28987_v59  ;;  %v29028_v59 = vld [vmem:[#allocation56_spill] sm:$0xff] }
 0x203   : > { %18671 = vmatprep.mubr.msk.f32.mxu0 %vm384_vm1, %v28988_v60  ;;  %v29029_v60 = vld [vmem:[#allocation57_spill] sm:$0xff] }
 0x206   : > { %18672 = vmatmul.mubr.msk.f32.gmra.mrb[24].mxu0 %vm384_vm1, %v28989_v61  ;;  %v29030_v61 = vld [vmem:[#allocation58_spill] sm:$0xff] }
 0x207   : > { %18674 = vmatprep.mubr.msk.f32.mxu0 %vm384_vm1, %v28990_v62  ;;  %v29031_v62 = vld [vmem:[#allocation59_spill] sm:$0xff] }
 0x20a   : > { %18675 = vmatmul.mubr.msk.f32.gmra.mrb[26].mxu0 %vm384_vm1, %v28991_v63 }
 0x20b   : > { %18677 = vmatprep.mubr.msk.f32.mxu0 %vm384_vm1, %v28992_v0 }
 0x20e   : > { %18678 = vmatmul.mubr.msk.f32.gmra.mrb[28].mxu0 %vm384_vm1, %v28993_v2  ;;  %v29032_v2 = vld [vmem:[#allocation60_spill] sm:$0xff] }
 0x20f   : > { %18680 = vmatprep.mubr.msk.f32.mxu0 %vm384_vm1, %v23971_v1 }
 0x212   : > { %18681 = vmatmul.mubr.msk.f32.gmra.mrb[42].mxu0 %vm384_vm1, %v23977_v3 }
 0x213   : > { %18685 = vmatprep.mubr.msk.f32.mxu0 %vm384_vm1, %v28994_v4  ;;  %v29033_v4 = vld [vmem:[#allocation61_spill] sm:$0xff] }
 0x216   : > { %18686 = vmatmul.mubr.msk.f32.vlgmr.msra.gmra.mrb[0].mxu0 %vm384_vm1, %v28995_v6  ;;  %v29035_v6 = vld [vmem:[#allocation63_spill] sm:$0xff] }
 0x217   : > { %18734 = vmatpush3.msk.msra.mxu0 %vm674_vm0, %v15586_v49  ;;  %18688 = vmatprep.mubr.msk.f32.mxu0 %vm384_vm1, %v28996_v7  ;;  %v24044_v49 = vld [vmem:[#allocation2 + $0x199] sm:$0xff]  ;;  %v29036_v7 = vld [vmem:[#allocation64_spill] sm:$0xff] }
 0x218   : > { %18783 = vmatprep.subr.msk.mxu0 %vm674_vm0, %v15620_v5 }
 0x21a   : > { %18689 = vmatmul.mubr.msk.f32.gmra.mrb[2].mxu0 %vm384_vm1, %v28997_v9  ;;  %v29037_v9 = vld [vmem:[#allocation65_spill] sm:$0xff] }
 0x21b   : > { %18691 = vmatprep.mubr.msk.f32.mxu0 %vm384_vm1, %v28998_v10  ;;  %v29038_v10 = vld [vmem:[#allocation66_spill] sm:$0xff] }
 0x21e   : > { %18692 = vmatmul.mubr.msk.f32.gmra.mrb[4].mxu0 %vm384_vm1, %v28999_v11  ;;  %v29039_v11 = vld [vmem:[#allocation67_spill] sm:$0xff] }
 0x21f   : > { %18694 = vmatprep.mubr.msk.f32.mxu0 %vm384_vm1, %v29000_v12  ;;  %v29040_v12 = vld [vmem:[#allocation68_spill] sm:$0xff] }
 0x222   : > { %18695 = vmatmul.mubr.msk.f32.gmra.mrb[6].mxu0 %vm384_vm1, %v29001_v14  ;;  %v29041_v14 = vld [vmem:[#allocation69_spill] sm:$0xff] }
 0x223   : > { %18697 = vmatprep.mubr.msk.f32.mxu0 %vm384_vm1, %v29002_v17  ;;  %v29042_v17 = vld [vmem:[#allocation70_spill] sm:$0xff] }
 0x225   : > { %v18532_v19 = vpop.f32.mrb[36].mxu0 }
 0x226   : > { %v3527_v20 = vpop.f32.mrb[37].mxu0  ;;  %18698 = vmatmul.mubr.msk.f32.gmra.mrb[8].mxu0 %vm384_vm1, %v29003_v21  ;;  %v29043_v19 = vld [vmem:[#allocation71_spill] sm:$0xff]  ;;  %v29045_v21 = vld [vmem:[#allocation73_spill] sm:$0xff] }
 0x227   : > { %18700 = vmatprep.mubr.msk.f32.mxu0 %vm384_vm1, %v29004_v22  ;;  %v29044_v20 = vld [vmem:[#allocation72_spill] sm:$0xff]  ;;  %v29046_v22 = vld [vmem:[#allocation74_spill] sm:$0xff] }
 0x22a   : > { %18701 = vmatmul.mubr.msk.f32.gmra.mrb[10].mxu0 %vm384_vm1, %v29005_v23  ;;  %v29047_v23 = vld [vmem:[#allocation75_spill] sm:$0xff] }
 0x22b   : > { %18703 = vmatprep.mubr.msk.f32.mxu0 %vm384_vm1, %v29006_v26  ;;  %v24117_v26 = vld [vmem:[#allocation2 + $0x19a] sm:$0xff] }
 0x22e   : > { %18704 = vmatmul.mubr.msk.f32.gmra.mrb[12].mxu0 %vm384_vm1, %v29007_v27  ;;  %v24128_v27 = vld [vmem:[#allocation2 + $0x4b] sm:$0xff] }
 0x22f   : > { %18706 = vmatprep.mubr.msk.f32.mxu0 %vm384_vm1, %v29008_v30  ;;  %v24139_v30 = vld [vmem:[#allocation2 + $0x63] sm:$0xff] }
 0x232   : > { %18707 = vmatmul.mubr.msk.f32.gmra.mrb[14].mxu0 %vm384_vm1, %v29009_v33  ;;  %v24146_v33 = vld [vmem:[#allocation2 + $0x6b] sm:$0xff] }
 0x233   : > { %18709 = vmatprep.mubr.msk.f32.mxu0 %vm384_vm1, %v29010_v34  ;;  %v29048_v34 = vld [vmem:[#allocation76_spill] sm:$0xff] }
 0x236   : > { %18710 = vmatmul.mubr.msk.f32.gmra.mrb[16].mxu0 %vm384_vm1, %v29011_v35 }
 0x237   : > { %18712 = vmatprep.mubr.msk.f32.mxu0 %vm384_vm1, %v29012_v36 }
 0x23a   : > { %18713 = vmatmul.mubr.msk.f32.gmra.mrb[18].mxu0 %vm384_vm1, %v29013_v37  ;;  %v29049_v37 = vld [vmem:[#allocation77_spill] sm:$0xff] }
 0x23b   : > { %18715 = vmatprep.mubr.msk.f32.mxu0 %vm384_vm1, %v29014_v38  ;;  %v29050_v38 = vld [vmem:[#allocation78_spill] sm:$0xff] }
 0x23e   : > { %18716 = vmatmul.mubr.msk.f32.gmra.mrb[20].mxu0 %vm384_vm1, %v29015_v39  ;;  %v29051_v39 = vld [vmem:[#allocation79_spill] sm:$0xff] }
 0x23f   : > { %18718 = vmatprep.mubr.msk.f32.mxu0 %vm384_vm1, %v29016_v40  ;;  %v29052_v40 = vld [vmem:[#allocation80_spill] sm:$0xff] }
 0x242   : > { %18719 = vmatmul.mubr.msk.f32.gmra.mrb[22].mxu0 %vm384_vm1, %v29017_v41  ;;  %v29055_v41 = vld [vmem:[#allocation83_spill] sm:$0xff] }
 0x243   : > { %18721 = vmatprep.mubr.msk.f32.mxu0 %vm384_vm1, %v29018_v18  ;;  %v29056_v18 = vld [vmem:[#allocation84_spill] sm:$0xff] }
 0x246   : > { %18722 = vmatmul.mubr.msk.f32.gmra.mrb[24].mxu0 %vm384_vm1, %v29019_v29  ;;  %v29057_v29 = vld [vmem:[#allocation85_spill] sm:$0xff] }
 0x247   : > { %18724 = vmatprep.mubr.msk.f32.mxu0 %vm384_vm1, %v29020_v44  ;;  %v29058_v44 = vld [vmem:[#allocation86_spill] sm:$0xff] }
 0x24a   : > { %18725 = vmatmul.mubr.msk.f32.gmra.mrb[26].mxu0 %vm384_vm1, %v23566_v45  ;;  %v15654_v45 = vld [vmem:[%s28749_s1 + $0x38] sm:$0xf] }
 0x24b   : > { %18727 = vmatprep.mubr.msk.f32.mxu0 %vm384_vm1, %v29021_v46  ;;  %v29059_v46 = vld [vmem:[#allocation87_spill] sm:$0xff] }
 0x24e   : > { %18728 = vmatmul.mubr.msk.f32.gmra.mrb[28].mxu0 %vm384_vm1, %v29022_v50  ;;  %v29060_v50 = vld [vmem:[#allocation88_spill] sm:$0xff] }
 0x24f   : > { %18730 = vmatprep.mubr.msk.f32.mxu0 %vm384_vm1, %v24044_v49 }
 0x252   : > { %18731 = vmatmul.mubr.msk.f32.gmra.mrb[44].mxu0 %vm384_vm1, %v24050_v51 }
 0x253   : > { %18735 = vmatprep.mubr.msk.f32.mxu0 %vm384_vm1, %v29023_v54  ;;  %v29061_v54 = vld [vmem:[#allocation89_spill] sm:$0xff] }
 0x256   : > { %18736 = vmatmul.mubr.msk.f32.vlgmr.msra.gmra.mrb[0].mxu0 %vm384_vm1, %v29024_v55  ;;  %v29063_v55 = vld [vmem:[#allocation91_spill] sm:$0xff] }
 0x257   : > { %18784 = vmatpush3.msk.msra.mxu0 %vm674_vm0, %v15620_v5  ;;  %18738 = vmatprep.mubr.msk.f32.mxu0 %vm384_vm1, %v29025_v56  ;;  %v29034_v5 = vld [vmem:[#allocation62_spill] sm:$0xff] }
 0x258   : > { %18833 = vmatprep.subr.msk.mxu0 %vm674_vm0, %v15654_v45  ;;  %v24196_v56 = vld [vmem:[#allocation2 + $0x19b] sm:$0xff] }
 0x259   : > { %29064 = vst [vmem:[#allocation10_spill] sm:$0xff] %v24196_v56 }
 0x25a   : > { %18739 = vmatmul.mubr.msk.f32.gmra.mrb[2].mxu0 %vm384_vm1, %v29026_v57  ;;  %v24220_v57 = vld [vmem:[#allocation2 + $0x64] sm:$0xff] }
 0x25b   : > { %18741 = vmatprep.mubr.msk.f32.mxu0 %vm384_vm1, %v29027_v58  ;;  %29068 = vst [vmem:[#allocation14_spill] sm:$0xff] %v24220_v57  ;;  %v24228_v58 = vld [vmem:[#allocation2 + $0x6c] sm:$0xff] }
 0x25c   : > { %29069 = vst [vmem:[#allocation15_spill] sm:$0xff] %v24228_v58 }
 0x25e   : > { %18742 = vmatmul.mubr.msk.f32.gmra.mrb[4].mxu0 %vm384_vm1, %v29028_v59  ;;  %v24230_v59 = vld [vmem:[#allocation2 + $0x7c] sm:$0xff] }
 0x25f   : > { %18744 = vmatprep.mubr.msk.f32.mxu0 %vm384_vm1, %v29029_v60  ;;  %29070 = vst [vmem:[#allocation16_spill] sm:$0xff] %v24230_v59  ;;  %v24236_v60 = vld [vmem:[#allocation2 + $0x84] sm:$0xff] }
 0x260   : > { %29071 = vst [vmem:[#allocation17_spill] sm:$0xff] %v24236_v60 }
 0x262   : > { %18745 = vmatmul.mubr.msk.f32.gmra.mrb[6].mxu0 %vm384_vm1, %v29030_v61  ;;  %v24238_v61 = vld [vmem:[#allocation2 + $0x94] sm:$0xff] }
 0x263   : > { %18747 = vmatprep.mubr.msk.f32.mxu0 %vm384_vm1, %v29031_v62  ;;  %29072 = vst [vmem:[#allocation18_spill] sm:$0xff] %v24238_v61  ;;  %v24244_v62 = vld [vmem:[#allocation2 + $0x9c] sm:$0xff] }
 0x264   : > { %29073 = vst [vmem:[#allocation19_spill] sm:$0xff] %v24244_v62 }
 0x265   : > { %v18582_v63 = vpop.f32.mrb[38].mxu0 }
 0x266   : > { %v3917_v0 = vpop.f32.mrb[39].mxu0  ;;  %18748 = vmatmul.mubr.msk.f32.gmra.mrb[8].mxu0 %vm384_vm1, %v29032_v2  ;;  %v24246_v63 = vld [vmem:[#allocation2 + $0xac] sm:$0xff] }
 0x267   : > { %18750 = vmatprep.mubr.msk.f32.mxu0 %vm384_vm1, %v29033_v4  ;;  %29074 = vst [vmem:[#allocation20_spill] sm:$0xff] %v24246_v63  ;;  %v24252_v4 = vld [vmem:[#allocation2 + $0xb4] sm:$0xff] }
 0x268   : > { %29075 = vst [vmem:[#allocation21_spill] sm:$0xff] %v24252_v4 }
 0x26a   : > { %18751 = vmatmul.mubr.msk.f32.gmra.mrb[10].mxu0 %vm384_vm1, %v29034_v5  ;;  %v24254_v5 = vld [vmem:[#allocation2 + $0xc4] sm:$0xff] }
 0x26b   : > { %18753 = vmatprep.mubr.msk.f32.mxu0 %vm384_vm1, %v29035_v6  ;;  %29076 = vst [vmem:[#allocation22_spill] sm:$0xff] %v24254_v5  ;;  %v24260_v6 = vld [vmem:[#allocation2 + $0xcc] sm:$0xff] }
 0x26c   : > { %29077 = vst [vmem:[#allocation23_spill] sm:$0xff] %v24260_v6 }
 0x26e   : > { %18754 = vmatmul.mubr.msk.f32.gmra.mrb[12].mxu0 %vm384_vm1, %v29036_v7  ;;  %v24262_v7 = vld [vmem:[#allocation2 + $0xdc] sm:$0xff] }
 0x26f   : > { %18756 = vmatprep.mubr.msk.f32.mxu0 %vm384_vm1, %v29037_v9  ;;  %29078 = vst [vmem:[#allocation24_spill] sm:$0xff] %v24262_v7  ;;  %v24268_v9 = vld [vmem:[#allocation2 + $0xe4] sm:$0xff] }
 0x270   : > { %29079 = vst [vmem:[#allocation25_spill] sm:$0xff] %v24268_v9 }
 0x272   : > { %18757 = vmatmul.mubr.msk.f32.gmra.mrb[14].mxu0 %vm384_vm1, %v29038_v10  ;;  %v24270_v10 = vld [vmem:[#allocation2 + $0xf4] sm:$0xff] }
 0x273   : > { %18759 = vmatprep.mubr.msk.f32.mxu0 %vm384_vm1, %v29039_v11  ;;  %29080 = vst [vmem:[#allocation26_spill] sm:$0xff] %v24270_v10  ;;  %v24276_v11 = vld [vmem:[#allocation2 + $0xfc] sm:$0xff] }
 0x274   : > { %29081 = vst [vmem:[#allocation27_spill] sm:$0xff] %v24276_v11 }
 0x276   : > { %18760 = vmatmul.mubr.msk.f32.gmra.mrb[16].mxu0 %vm384_vm1, %v29040_v12  ;;  %v24278_v12 = vld [vmem:[#allocation2 + $0x10c] sm:$0xff] }
 0x277   : > { %18762 = vmatprep.mubr.msk.f32.mxu0 %vm384_vm1, %v29041_v14  ;;  %29082 = vst [vmem:[#allocation28_spill] sm:$0xff] %v24278_v12  ;;  %v24284_v14 = vld [vmem:[#allocation2 + $0x114] sm:$0xff] }
 0x278   : > { %29083 = vst [vmem:[#allocation29_spill] sm:$0xff] %v24284_v14 }
 0x27a   : > { %18763 = vmatmul.mubr.msk.f32.gmra.mrb[18].mxu0 %vm384_vm1, %v29042_v17  ;;  %v24286_v17 = vld [vmem:[#allocation2 + $0x124] sm:$0xff] }
 0x27b   : > { %18765 = vmatprep.mubr.msk.f32.mxu0 %vm384_vm1, %v29043_v19  ;;  %29084 = vst [vmem:[#allocation30_spill] sm:$0xff] %v24286_v17  ;;  %v24292_v19 = vld [vmem:[#allocation2 + $0x12c] sm:$0xff] }
 0x27c   : > { %29085 = vst [vmem:[#allocation31_spill] sm:$0xff] %v24292_v19 }
 0x27e   : > { %18766 = vmatmul.mubr.msk.f32.gmra.mrb[20].mxu0 %vm384_vm1, %v29044_v20  ;;  %v24294_v20 = vld [vmem:[#allocation2 + $0x13c] sm:$0xff] }
 0x27f   : > { %18768 = vmatprep.mubr.msk.f32.mxu0 %vm384_vm1, %v29045_v21  ;;  %29086 = vst [vmem:[#allocation32_spill] sm:$0xff] %v24294_v20  ;;  %v24300_v21 = vld [vmem:[#allocation2 + $0x144] sm:$0xff] }
 0x280   : > { %29087 = vst [vmem:[#allocation33_spill] sm:$0xff] %v24300_v21 }
 0x282   : > { %18769 = vmatmul.mubr.msk.f32.gmra.mrb[22].mxu0 %vm384_vm1, %v23681_v16  ;;  %v24123_v16 = vld [vmem:[#allocation2 + $0x1a2] sm:$0xff] }
 0x283   : > { %18771 = vmatprep.mubr.msk.f32.mxu0 %vm384_vm1, %v29046_v22  ;;  %v24302_v22 = vld [vmem:[#allocation2 + $0x154] sm:$0xff] }
 0x284   : > { %29088 = vst [vmem:[#allocation34_spill] sm:$0xff] %v24302_v22 }
 0x286   : > { %18772 = vmatmul.mubr.msk.f32.gmra.mrb[24].mxu0 %vm384_vm1, %v23689_v15  ;;  %v5518_v15 = vld [vmem:[#allocation2 + $0x33] sm:$0xff] }
 0x287   : > { %18774 = vmatprep.mubr.msk.f32.mxu0 %vm384_vm1, %v29047_v23  ;;  %v24308_v23 = vld [vmem:[#allocation2 + $0x15c] sm:$0xff] }
 0x288   : > { %29089 = vst [vmem:[#allocation35_spill] sm:$0xff] %v24308_v23 }
 0x28a   : > { %18775 = vmatmul.mubr.msk.f32.gmra.mrb[26].mxu0 %vm384_vm1, %v23697_v43  ;;  %v5519_v43 = vld [vmem:[#allocation2 + $0x3b] sm:$0xff] }
 0x28b   : > { %18777 = vmatprep.mubr.msk.f32.mxu0 %vm384_vm1, %v23699_v52  ;;  %v15688_v52 = vld [vmem:[%s28749_s1 + $0x3c] sm:$0xf] }
 0x28e   : > { %18778 = vmatmul.mubr.msk.f32.gmra.mrb[28].mxu0 %vm384_vm1, %v23705_v42  ;;  %v24137_v42 = vld [vmem:[#allocation2 + $0x53] sm:$0xff] }
 0x28f   : > { %18780 = vmatprep.mubr.msk.f32.mxu0 %vm384_vm1, %v24117_v26 }
 0x292   : > { %18781 = vmatmul.mubr.msk.f32.gmra.mrb[46].mxu0 %vm384_vm1, %v24123_v16 }
 0x293   : > { %18785 = vmatprep.mubr.msk.f32.mxu0 %vm384_vm1, %v5518_v15  ;;  %v24310_v15 = vld [vmem:[#allocation2 + $0x16c] sm:$0xff] }
 0x294   : > { %29090 = vst [vmem:[#allocation36_spill] sm:$0xff] %v24310_v15 }
 0x296   : > { %18786 = vmatmul.mubr.msk.f32.vlgmr.msra.gmra.mrb[0].mxu0 %vm384_vm1, %v5519_v43  ;;  %v24316_v43 = vld [vmem:[#allocation2 + $0x174] sm:$0xff] }
 0x297   : > { %18834 = vmatpush3.msk.msra.mxu0 %vm674_vm0, %v15654_v45  ;;  %18788 = vmatprep.mubr.msk.f32.mxu0 %vm384_vm1, %v24128_v27  ;;  %v29062_v45 = vld [vmem:[#allocation90_spill] sm:$0xff]  ;;  %29091 = vst [vmem:[#allocation37_spill] sm:$0xff] %v24316_v43 }
 0x298   : > { %18883 = vmatprep.subr.msk.mxu0 %vm674_vm0, %v15688_v52 }
 0x29a   : > { %18789 = vmatmul.mubr.msk.f32.gmra.mrb[2].mxu0 %vm384_vm1, %v24137_v42 }
 0x29b   : > { %18791 = vmatprep.mubr.msk.f32.mxu0 %vm384_vm1, %v24139_v30 }
 0x29e   : > { %18792 = vmatmul.mubr.msk.f32.gmra.mrb[4].mxu0 %vm384_vm1, %v24146_v33 }
 0x29f   : > { %18794 = vmatprep.mubr.msk.f32.mxu0 %vm384_vm1, %v23732_v8  ;;  %v29053_v8 = vld [vmem:[#allocation81_spill] sm:$0xff] }
 0x2a2   : > { %18795 = vmatmul.mubr.msk.f32.gmra.mrb[6].mxu0 %vm384_vm1, %v23738_v13  ;;  %v29054_v13 = vld [vmem:[#allocation82_spill] sm:$0xff] }
 0x2a3   : > { %18797 = vmatprep.mubr.msk.f32.mxu0 %vm384_vm1, %v29048_v34  ;;  %v24328_v34 = vld [vmem:[#allocation2 + $0x1a4] sm:$0xff] }
 0x2a4   : > { %29093 = vst [vmem:[#allocation39_spill] sm:$0xff] %v24328_v34 }
 0x2a5   : > { %v18632_v35 = vpop.f32.mrb[40].mxu0 }
 0x2a6   : > { %v4307_v36 = vpop.f32.mrb[41].mxu0  ;;  %18798 = vmatmul.mubr.msk.f32.gmra.mrb[8].mxu0 %vm384_vm1, %v29049_v37  ;;  %v24330_v35 = vld [vmem:[#allocation2 + $0x48] sm:$0xff] }
 0x2a7   : > { %18800 = vmatprep.mubr.msk.f32.mxu0 %vm384_vm1, %v29050_v38  ;;  %v24336_v36 = vld [vmem:[#allocation2 + $0x50] sm:$0xff]  ;;  %v24351_v37 = vld [vmem:[#allocation2 + $0x68] sm:$0xff]  ;;  %v24353_v38 = vld [vmem:[#allocation2 + $0x78] sm:$0xff] }
 0x2aa   : > { %18801 = vmatmul.mubr.msk.f32.gmra.mrb[10].mxu0 %vm384_vm1, %v29051_v39  ;;  %v24361_v39 = vld [vmem:[#allocation2 + $0x80] sm:$0xff] }
 0x2ab   : > { %18803 = vmatprep.mubr.msk.f32.mxu0 %vm384_vm1, %v29052_v40  ;;  %v24363_v40 = vld [vmem:[#allocation2 + $0x90] sm:$0xff] }
 0x2ae   : > { %18804 = vmatmul.mubr.msk.f32.gmra.mrb[12].mxu0 %vm384_vm1, %v29053_v8  ;;  %v24369_v8 = vld [vmem:[#allocation2 + $0x98] sm:$0xff] }
 0x2af   : > { %18806 = vmatprep.mubr.msk.f32.mxu0 %vm384_vm1, %v29054_v13  ;;  %v24371_v13 = vld [vmem:[#allocation2 + $0xa8] sm:$0xff] }
 0x2b2   : > { %18807 = vmatmul.mubr.msk.f32.gmra.mrb[14].mxu0 %vm384_vm1, %v29055_v41  ;;  %v24377_v41 = vld [vmem:[#allocation2 + $0xb0] sm:$0xff] }
 0x2b3   : > { %18809 = vmatprep.mubr.msk.f32.mxu0 %vm384_vm1, %v29056_v18  ;;  %v24379_v18 = vld [vmem:[#allocation2 + $0xc0] sm:$0xff] }
 0x2b6   : > { %18810 = vmatmul.mubr.msk.f32.gmra.mrb[16].mxu0 %vm384_vm1, %v29057_v29 }
 0x2b7   : > { %18812 = vmatprep.mubr.msk.f32.mxu0 %vm384_vm1, %v29058_v44 }
 0x2ba   : > { %18813 = vmatmul.mubr.msk.f32.gmra.mrb[18].mxu0 %vm384_vm1, %v29059_v46  ;;  %v24385_v46 = vld [vmem:[#allocation2 + $0xc8] sm:$0xff] }
 0x2bb   : > { %18815 = vmatprep.mubr.msk.f32.mxu0 %vm384_vm1, %v29060_v50  ;;  %v24387_v50 = vld [vmem:[#allocation2 + $0xd8] sm:$0xff] }
 0x2bc   : > { %29094 = vst [vmem:[#allocation40_spill] sm:$0xff] %v24387_v50 }
 0x2be   : > { %18816 = vmatmul.mubr.msk.f32.gmra.mrb[20].mxu0 %vm384_vm1, %v29061_v54  ;;  %v24393_v54 = vld [vmem:[#allocation2 + $0xe0] sm:$0xff] }
 0x2bf   : > { %18818 = vmatprep.mubr.msk.f32.mxu0 %vm384_vm1, %v29062_v45  ;;  %29095 = vst [vmem:[#allocation41_spill] sm:$0xff] %v24393_v54  ;;  %v24395_v45 = vld [vmem:[#allocation2 + $0xf0] sm:$0xff] }
 0x2c0   : > { %29096 = vst [vmem:[#allocation42_spill] sm:$0xff] %v24395_v45 }
 0x2c2   : > { %18819 = vmatmul.mubr.msk.f32.gmra.mrb[22].mxu0 %vm384_vm1, %v29063_v55  ;;  %v24401_v55 = vld [vmem:[#allocation2 + $0xf8] sm:$0xff] }
 0x2c3   : > { %18821 = vmatprep.mubr.msk.f32.mxu0 %vm384_vm1, %v23804_v53  ;;  %v24202_v53 = vld [vmem:[#allocation2 + $0x1a3] sm:$0xff]  ;;  %29097 = vst [vmem:[#allocation43_spill] sm:$0xff] %v24401_v55 }
 0x2c4   : > { %29065 = vst [vmem:[#allocation11_spill] sm:$0xff] %v24202_v53 }
 0x2c6   : > { %18822 = vmatmul.mubr.msk.f32.gmra.mrb[24].mxu0 %vm384_vm1, %v23810_v25  ;;  %v5908_v25 = vld [vmem:[#allocation2 + $0x34] sm:$0xff] }
 0x2c7   : > { %18824 = vmatprep.mubr.msk.f32.mxu0 %vm384_vm1, %v23812_v28  ;;  %v24207_v28 = vld [vmem:[#allocation2 + $0x4c] sm:$0xff] }
 0x2c8   : > { %29066 = vst [vmem:[#allocation12_spill] sm:$0xff] %v24207_v28 }
 0x2ca   : > { %18825 = vmatmul.mubr.msk.f32.gmra.mrb[26].mxu0 %vm384_vm1, %v23822_v32  ;;  %v5909_v32 = vld [vmem:[#allocation2 + $0x3c] sm:$0xff] }
 0x2cb   : > { %18827 = vmatprep.mubr.msk.f32.mxu0 %vm384_vm1, %v23824_v31  ;;  %v24212_v31 = vld [vmem:[%s28749_s1 + $0x40] sm:$0xf] }
 0x2ce   : > { %18828 = vmatmul.mubr.msk.f32.gmra.mrb[28].mxu0 %vm384_vm1, %v23830_v24  ;;  %v24218_v24 = vld [vmem:[#allocation2 + $0x54] sm:$0xff] }
 0x2cf   : > { %18830 = vmatprep.mubr.msk.f32.mxu0 %vm384_vm1, %v24196_v56  ;;  %29067 = vst [vmem:[#allocation13_spill] sm:$0xff] %v24218_v24  ;;  %v24573_v56 = vld [vmem:[#allocation2 + $0x159] sm:$0xff] }
 0x2d2   : > { %18831 = vmatmul.mubr.msk.f32.gmra.mrb[48].mxu0 %vm384_vm1, %v24202_v53  ;;  %v547_v53 = vld [vmem:[#allocation2 + $0x21] sm:$0xff] }
 0x2d3   : > { %18835 = vmatprep.mubr.msk.f32.mxu0 %vm384_vm1, %v5908_v25  ;;  %v24403_v25 = vld [vmem:[#allocation2 + $0x108] sm:$0xff] }
 0x2d4   : > { %29098 = vst [vmem:[#allocation44_spill] sm:$0xff] %v24403_v25 }
 0x2d6   : > { %18836 = vmatmul.mubr.msk.f32.vlgmr.msra.gmra.mrb[0].mxu0 %vm384_vm1, %v5909_v32  ;;  %v24409_v32 = vld [vmem:[#allocation2 + $0x110] sm:$0xff] }
 0x2d7   : > { %18884 = vmatpush3.msk.msra.mxu0 %vm674_vm0, %v15688_v52  ;;  %18838 = vmatprep.mubr.msk.f32.mxu0 %vm384_vm1, %v24207_v28  ;;  %v24322_v52 = vld [vmem:[#allocation2 + $0x19c] sm:$0xff]  ;;  %29099 = vst [vmem:[#allocation45_spill] sm:$0xff] %v24409_v32 }
 0x2d8   : > { %18933 = vmatprep.subr.msk.mxu0 %vm674_vm0, %v24212_v31  ;;  %29092 = vst [vmem:[#allocation38_spill] sm:$0xff] %v24322_v52  ;;  %v546_v28 = vld [vmem:[#allocation2 + $0x19] sm:$0xff] }
 0x2da   : > { %18839 = vmatmul.mubr.msk.f32.gmra.mrb[2].mxu0 %vm384_vm1, %v24218_v24  ;;  %v24564_v24 = vld [vmem:[#allocation2 + $0x151] sm:$0xff] }
 0x2db   : > { %18841 = vmatprep.mubr.msk.f32.mxu0 %vm384_vm1, %v24220_v57  ;;  %v24561_v57 = vld [vmem:[#allocation2 + $0x141] sm:$0xff] }
 0x2de   : > { %18842 = vmatmul.mubr.msk.f32.gmra.mrb[4].mxu0 %vm384_vm1, %v24228_v58  ;;  %v545_v58 = vld [vmem:[#allocation2 + $0x9] sm:$0xff] }
 0x2df   : > { %18844 = vmatprep.mubr.msk.f32.mxu0 %vm384_vm1, %v24230_v59  ;;  %v544_v59 = vld [vmem:[#allocation2 + $0x1] sm:$0xff] }
 0x2e0   : > { %18135 = vmatprep.mubr.msk.f32.mxu1 %vm384_vm1, %v544_v59  ;;  %v549_v59 = vld [vmem:[#allocation2 + $0x39] sm:$0xff] }
 0x2e2   : > { %18845 = vmatmul.mubr.msk.f32.gmra.mrb[6].mxu0 %vm384_vm1, %v24236_v60  ;;  %v15179_v60 = vld [vmem:[%s28749_s1 + $0x4] sm:$0xf] }
 0x2e3   : > { %18847 = vmatprep.mubr.msk.f32.mxu0 %vm384_vm1, %v24238_v61  ;;  %v24552_v61 = vld [vmem:[#allocation2 + $0x139] sm:$0xff]  ;;  %18133 = vmatprep.subr.msk.mxu1 %vm674_vm0, %v15179_v60 }
 0x2e4   : > { %18134 = vmatpush3.msk.msra.mxu1 %vm674_vm0, %v15179_v60  ;;  %v24583_v60 = vld [vmem:[#allocation2 + $0x171] sm:$0xff] }
 0x2e5   : > { %v18682_v0 = vpop.f32.mrb[42].mxu0  ;;  %18136 = vmatmul.mubr.msk.f32.vlgmr.msra.gmra.mrb[0].mxu1 %vm384_vm1, %v545_v58  ;;  %v548_v58 = vld [vmem:[#allocation2 + $0x31] sm:$0xff] }
 0x2e6   : > { %v4697_v2 = vpop.f32.mrb[43].mxu0  ;;  %18848 = vmatmul.mubr.msk.f32.gmra.mrb[8].mxu0 %vm384_vm1, %v24244_v62  ;;  %v24417_v0 = vld [vmem:[#allocation2 + $0x128] sm:$0xff]  ;;  %18138 = vmatprep.mubr.msk.f32.mxu1 %vm384_vm1, %v546_v28  ;;  %v6719_v28 = vld [vmem:[#allocation2 + $0x1b1] sm:$0xff] }
 0x2e7   : > { %18850 = vmatprep.mubr.msk.f32.mxu0 %vm384_vm1, %v24246_v63  ;;  %29101 = vst [vmem:[#allocation47_spill] sm:$0xff] %v24417_v0  ;;  %v24419_v2 = vld [vmem:[#allocation2 + $0x138] sm:$0xff]  ;;  %v24544_v63 = vld [vmem:[#allocation2 + $0x121] sm:$0xff]  ;;  %v24550_v62 = vld [vmem:[#allocation2 + $0x129] sm:$0xff] }
 0x2e8   : > { %29102 = vst [vmem:[#allocation48_spill] sm:$0xff] %v24419_v2 }
 0x2e9   : > { %18139 = vmatmul.mubr.msk.f32.gmra.mrb[2].mxu1 %vm384_vm1, %v547_v53  ;;  %v6716_v53 = vld [vmem:[#allocation2 + $0x189] sm:$0xff] }
 0x2ea   : > { %18851 = vmatmul.mubr.msk.f32.gmra.mrb[10].mxu0 %vm384_vm1, %v24252_v4  ;;  %v24542_v4 = vld [vmem:[#allocation2 + $0x111] sm:$0xff]  ;;  %18141 = vmatprep.mubr.msk.f32.mxu1 %vm384_vm1, %v548_v58  ;;  %v24636_v58 = vld [vmem:[#allocation2 + $0x7a] sm:$0xff] }
 0x2eb   : > { %18853 = vmatprep.mubr.msk.f32.mxu0 %vm384_vm1, %v24254_v5  ;;  %v24536_v5 = vld [vmem:[#allocation2 + $0x109] sm:$0xff] }
 0x2ed   : > { %18142 = vmatmul.mubr.msk.f32.gmra.mrb[4].mxu1 %vm384_vm1, %v549_v59 }
 0x2ee   : > { %18854 = vmatmul.mubr.msk.f32.gmra.mrb[12].mxu0 %vm384_vm1, %v24260_v6  ;;  %v24526_v6 = vld [vmem:[#allocation2 + $0xe1] sm:$0xff] }
 0x2ef   : > { %18856 = vmatprep.mubr.msk.f32.mxu0 %vm384_vm1, %v24262_v7  ;;  %v24520_v7 = vld [vmem:[#allocation2 + $0xd9] sm:$0xff] }
 0x2f2   : > { %18857 = vmatmul.mubr.msk.f32.gmra.mrb[14].mxu0 %vm384_vm1, %v24268_v9  ;;  %v24518_v9 = vld [vmem:[#allocation2 + $0xc9] sm:$0xff] }
 0x2f3   : > { %18859 = vmatprep.mubr.msk.f32.mxu0 %vm384_vm1, %v24270_v10 }
 0x2f6   : > { %18860 = vmatmul.mubr.msk.f32.gmra.mrb[16].mxu0 %vm384_vm1, %v24276_v11 }
 0x2f7   : > { %18862 = vmatprep.mubr.msk.f32.mxu0 %vm384_vm1, %v24278_v12  ;;  %v24512_v12 = vld [vmem:[#allocation2 + $0xc1] sm:$0xff] }
 0x2fa   : > { %18863 = vmatmul.mubr.msk.f32.gmra.mrb[18].mxu0 %vm384_vm1, %v24284_v14  ;;  %v24510_v14 = vld [vmem:[#allocation2 + $0xb1] sm:$0xff] }
 0x2fb   : > { %18865 = vmatprep.mubr.msk.f32.mxu0 %vm384_vm1, %v24286_v17  ;;  %v24504_v17 = vld [vmem:[#allocation2 + $0xa9] sm:$0xff] }
 0x2fe   : > { %18866 = vmatmul.mubr.msk.f32.gmra.mrb[20].mxu0 %vm384_vm1, %v24292_v19  ;;  %v24496_v19 = vld [vmem:[#allocation2 + $0x91] sm:$0xff] }
 0x2ff   : > { %18868 = vmatprep.mubr.msk.f32.mxu0 %vm384_vm1, %v24294_v20  ;;  %v24463_v20 = vld [vmem:[#allocation2 + $0x49] sm:$0xff] }
 0x300   : > { %18144 = vmatprep.mubr.msk.f32.mxu1 %vm384_vm1, %v24463_v20 }
 0x302   : > { %18869 = vmatmul.mubr.msk.f32.gmra.mrb[22].mxu0 %vm384_vm1, %v24300_v21  ;;  %v24461_v21 = vld [vmem:[#allocation2 + $0x1b8] sm:$0xff] }
 0x303   : > { %18871 = vmatprep.mubr.msk.f32.mxu0 %vm384_vm1, %v24302_v22  ;;  %v24455_v22 = vld [vmem:[#allocation2 + $0x1b0] sm:$0xff]  ;;  %29111 = vst [vmem:[#allocation57_spill] sm:$0xff] %v24461_v21 }
 0x304   : > { %29110 = vst [vmem:[#allocation56_spill] sm:$0xff] %v24455_v22 }
 0x306   : > { %18872 = vmatmul.mubr.msk.f32.gmra.mrb[24].mxu0 %vm384_vm1, %v24308_v23  ;;  %v24449_v23 = vld [vmem:[#allocation2 + $0x188] sm:$0xff] }
 0x307   : > { %18874 = vmatprep.mubr.msk.f32.mxu0 %vm384_vm1, %v24310_v15  ;;  %v24443_v15 = vld [vmem:[#allocation2 + $0x180] sm:$0xff]  ;;  %29109 = vst [vmem:[#allocation55_spill] sm:$0xff] %v24449_v23 }
 0x308   : > { %29108 = vst [vmem:[#allocation54_spill] sm:$0xff] %v24443_v15 }
 0x30a   : > { %18875 = vmatmul.mubr.msk.f32.gmra.mrb[26].mxu0 %vm384_vm1, %v24316_v43  ;;  %v24441_v43 = vld [vmem:[#allocation2 + $0x170] sm:$0xff] }
 0x30b   : > { %18877 = vmatprep.mubr.msk.f32.mxu0 %vm384_vm1, %v23898_v47  ;;  %v24338_v47 = vld [vmem:[#allocation2 + $0x60] sm:$0xff]  ;;  %29107 = vst [vmem:[#allocation53_spill] sm:$0xff] %v24441_v43 }
 0x30e   : > { %18878 = vmatmul.mubr.msk.f32.gmra.mrb[28].mxu0 %vm384_vm1, %v23904_v48  ;;  %v24343_v48 = vld [vmem:[%s28749_s1 + $0x44] sm:$0xf] }
 0x30f   : > { %18880 = vmatprep.mubr.msk.f32.mxu0 %vm384_vm1, %v24322_v52  ;;  %v24435_v52 = vld [vmem:[#allocation2 + $0x168] sm:$0xff] }
 0x310   : > { %29106 = vst [vmem:[#allocation52_spill] sm:$0xff] %v24435_v52 }
 0x312   : > { %18881 = vmatmul.mubr.msk.f32.gmra.mrb[50].mxu0 %vm384_vm1, %v24328_v34  ;;  %v24433_v34 = vld [vmem:[#allocation2 + $0x158] sm:$0xff] }
 0x313   : > { %18885 = vmatprep.mubr.msk.f32.mxu0 %vm384_vm1, %v24330_v35  ;;  %29105 = vst [vmem:[#allocation51_spill] sm:$0xff] %v24433_v34 }
 0x316   : > { %18886 = vmatmul.mubr.msk.f32.vlgmr.msra.gmra.mrb[0].mxu0 %vm384_vm1, %v24336_v36 }
 0x317   : > { %18934 = vmatpush3.msk.msra.mxu0 %vm674_vm0, %v24212_v31  ;;  %18888 = vmatprep.mubr.msk.f32.mxu0 %vm384_vm1, %v24338_v47  ;;  %v24411_v31 = vld [vmem:[#allocation2 + $0x120] sm:$0xff] }
 0x318   : > { %18983 = vmatprep.subr.msk.mxu0 %vm674_vm0, %v24343_v48  ;;  %29100 = vst [vmem:[#allocation46_spill] sm:$0xff] %v24411_v31 }
 0x31a   : > { %18889 = vmatmul.mubr.msk.f32.gmra.mrb[2].mxu0 %vm384_vm1, %v24351_v37 }
 0x31b   : > { %18891 = vmatprep.mubr.msk.f32.mxu0 %vm384_vm1, %v24353_v38 }
 0x31e   : > { %18892 = vmatmul.mubr.msk.f32.gmra.mrb[4].mxu0 %vm384_vm1, %v24361_v39 }
 0x31f   : > { %18894 = vmatprep.mubr.msk.f32.mxu0 %vm384_vm1, %v24363_v40 }
 0x322   : > { %18895 = vmatmul.mubr.msk.f32.gmra.mrb[6].mxu0 %vm384_vm1, %v24369_v8 }
 0x323   : > { %18897 = vmatprep.mubr.msk.f32.mxu0 %vm384_vm1, %v24371_v13 }
 0x325   : > { %v18732_v29 = vpop.f32.mrb[44].mxu0 }
 0x326   : > { %v5087_v44 = vpop.f32.mrb[45].mxu0  ;;  %18898 = vmatmul.mubr.msk.f32.gmra.mrb[8].mxu0 %vm384_vm1, %v24377_v41  ;;  %v24425_v29 = vld [vmem:[#allocation2 + $0x140] sm:$0xff] }
 0x327   : > { %18900 = vmatprep.mubr.msk.f32.mxu0 %vm384_vm1, %v24379_v18  ;;  %29103 = vst [vmem:[#allocation49_spill] sm:$0xff] %v24425_v29  ;;  %v24427_v44 = vld [vmem:[#allocation2 + $0x150] sm:$0xff] }
 0x328   : > { %29104 = vst [vmem:[#allocation50_spill] sm:$0xff] %v24427_v44 }
 0x32a   : > { %18901 = vmatmul.mubr.msk.f32.gmra.mrb[10].mxu0 %vm384_vm1, %v24385_v46 }
 0x32b   : > { %18903 = vmatprep.mubr.msk.f32.mxu0 %vm384_vm1, %v24387_v50 }
 0x32e   : > { %18904 = vmatmul.mubr.msk.f32.gmra.mrb[12].mxu0 %vm384_vm1, %v24393_v54 }
 0x32f   : > { %18906 = vmatprep.mubr.msk.f32.mxu0 %vm384_vm1, %v24395_v45 }
 0x332   : > { %18907 = vmatmul.mubr.msk.f32.gmra.mrb[14].mxu0 %vm384_vm1, %v24401_v55 }
 0x333   : > { %18909 = vmatprep.mubr.msk.f32.mxu0 %vm384_vm1, %v24403_v25 }
 0x336   : > { %18910 = vmatmul.mubr.msk.f32.gmra.mrb[16].mxu0 %vm384_vm1, %v24409_v32 }
 0x337   : > { %18912 = vmatprep.mubr.msk.f32.mxu0 %vm384_vm1, %v24411_v31 }
 0x33a   : > { %18913 = vmatmul.mubr.msk.f32.gmra.mrb[18].mxu0 %vm384_vm1, %v24417_v0 }
 0x33b   : > { %18915 = vmatprep.mubr.msk.f32.mxu0 %vm384_vm1, %v24419_v2 }
 0x33e   : > { %18916 = vmatmul.mubr.msk.f32.gmra.mrb[20].mxu0 %vm384_vm1, %v24425_v29 }
 0x33f   : > { %18918 = vmatprep.mubr.msk.f32.mxu0 %vm384_vm1, %v24427_v44 }
 0x342   : > { %18919 = vmatmul.mubr.msk.f32.gmra.mrb[22].mxu0 %vm384_vm1, %v24433_v34 }
 0x343   : > { %18921 = vmatprep.mubr.msk.f32.mxu0 %vm384_vm1, %v24435_v52  ;;  %v6715_v52 = vld [vmem:[#allocation2 + $0x181] sm:$0xff] }
 0x346   : > { %18922 = vmatmul.mubr.msk.f32.gmra.mrb[24].mxu0 %vm384_vm1, %v24441_v43  ;;  %v24576_v43 = vld [vmem:[#allocation2 + $0x169] sm:$0xff] }
 0x347   : > { %18924 = vmatprep.mubr.msk.f32.mxu0 %vm384_vm1, %v24443_v15  ;;  %v24494_v15 = vld [vmem:[#allocation2 + $0x81] sm:$0xff] }
 0x348   : > { %29115 = vst [vmem:[#allocation61_spill] sm:$0xff] %v24494_v15 }
 0x34a   : > { %18925 = vmatmul.mubr.msk.f32.gmra.mrb[26].mxu0 %vm384_vm1, %v24449_v23  ;;  %v24469_v23 = vld [vmem:[#allocation2 + $0x51] sm:$0xff] }
 0x34b   : > { %18927 = vmatprep.mubr.msk.f32.mxu0 %vm384_vm1, %v23971_v1  ;;  %v24471_v1 = vld [vmem:[#allocation2 + $0x61] sm:$0xff]  ;;  %18145 = vmatmul.mubr.msk.f32.gmra.mrb[6].mxu1 %vm384_vm1, %v24469_v23 }
 0x34c   : > { %29112 = vst [vmem:[#allocation58_spill] sm:$0xff] %v24471_v1  ;;  %18147 = vmatprep.mubr.msk.f32.mxu1 %vm384_vm1, %v24471_v1 }
 0x34e   : > { %18928 = vmatmul.mubr.msk.f32.gmra.mrb[28].mxu0 %vm384_vm1, %v23977_v3  ;;  %v24476_v3 = vld [vmem:[%s28749_s1 + $0x48] sm:$0xf] }
 0x34f   : > { %18930 = vmatprep.mubr.msk.f32.mxu0 %vm384_vm1, %v24455_v22  ;;  %v24486_v22 = vld [vmem:[#allocation2 + $0x79] sm:$0xff] }
 0x350   : > { %29114 = vst [vmem:[#allocation60_spill] sm:$0xff] %v24486_v22 }
 0x352   : > { %18931 = vmatmul.mubr.msk.f32.gmra.mrb[52].mxu0 %vm384_vm1, %v24461_v21  ;;  %v24484_v21 = vld [vmem:[#allocation2 + $0x69] sm:$0xff] }
 0x353   : > { %18935 = vmatprep.mubr.msk.f32.mxu0 %vm384_vm1, %v24463_v20  ;;  %29113 = vst [vmem:[#allocation59_spill] sm:$0xff] %v24484_v21  ;;  %18148 = vmatmul.mubr.msk.f32.gmra.mrb[8].mxu1 %vm384_vm1, %v24484_v21  ;;  %v6720_v20 = vld [vmem:[#allocation2 + $0x1b9] sm:$0xff] }
 0x354   : > { %18150 = vmatprep.mubr.msk.f32.mxu1 %vm384_vm1, %v24486_v22 }
 0x356   : > { %18936 = vmatmul.mubr.msk.f32.vlgmr.msra.gmra.mrb[0].mxu0 %vm384_vm1, %v24469_v23  ;;  %v24606_v23 = vld [vmem:[#allocation2 + $0x4a] sm:$0xff] }
 0x357   : > { %18984 = vmatpush3.msk.msra.mxu0 %vm674_vm0, %v24343_v48  ;;  %18938 = vmatprep.mubr.msk.f32.mxu0 %vm384_vm1, %v24471_v1  ;;  %v24502_v48 = vld [vmem:[#allocation2 + $0x99] sm:$0xff]  ;;  %v24898_v1 = vld [vmem:[#allocation2 + $0x123] sm:$0xff] }
 0x358   : > { %19033 = vmatprep.subr.msk.mxu0 %vm674_vm0, %v24476_v3  ;;  %18151 = vmatmul.mubr.msk.f32.gmra.mrb[10].mxu1 %vm384_vm1, %v24494_v15 }
 0x359   : > { %18153 = vmatprep.mubr.msk.f32.mxu1 %vm384_vm1, %v24496_v19 }
 0x35a   : > { %18939 = vmatmul.mubr.msk.f32.gmra.mrb[2].mxu0 %vm384_vm1, %v24484_v21  ;;  %v24896_v21 = vld [vmem:[#allocation2 + $0x113] sm:$0xff] }
 0x35b   : > { %18941 = vmatprep.mubr.msk.f32.mxu0 %vm384_vm1, %v24486_v22  ;;  %v7105_v22 = vld [vmem:[#allocation2 + $0x182] sm:$0xff] }
 0x35c   : > { %18154 = vmatmul.mubr.msk.f32.gmra.mrb[12].mxu1 %vm384_vm1, %v24502_v48 }
 0x35d   : > { %18156 = vmatprep.mubr.msk.f32.mxu1 %vm384_vm1, %v24504_v17 }
 0x35e   : > { %18942 = vmatmul.mubr.msk.f32.gmra.mrb[4].mxu0 %vm384_vm1, %v24494_v15  ;;  %v24760_v15 = vld [vmem:[#allocation2 + $0x16a] sm:$0xff] }
 0x35f   : > { %18944 = vmatprep.mubr.msk.f32.mxu0 %vm384_vm1, %v24496_v19  ;;  %v24634_v19 = vld [vmem:[#allocation2 + $0x6a] sm:$0xff] }
 0x360   : > { %18157 = vmatmul.mubr.msk.f32.gmra.mrb[14].mxu1 %vm384_vm1, %v24510_v14 }
 0x361   : > { %18159 = vmatprep.mubr.msk.f32.mxu1 %vm384_vm1, %v24512_v12 }
 0x362   : > { %18945 = vmatmul.mubr.msk.f32.gmra.mrb[6].mxu0 %vm384_vm1, %v24502_v48 }
 0x363   : > { %18947 = vmatprep.mubr.msk.f32.mxu0 %vm384_vm1, %v24504_v17  ;;  %v24648_v17 = vld [vmem:[#allocation2 + $0x82] sm:$0xff] }
 0x364   : > { %18160 = vmatmul.mubr.msk.f32.gmra.mrb[16].mxu1 %vm384_vm1, %v24518_v9 }
 0x365   : > { %v18782_v11 = vpop.f32.mrb[46].mxu0  ;;  %18162 = vmatprep.mubr.msk.f32.mxu1 %vm384_vm1, %v24520_v7 }
 0x366   : > { %v5477_v10 = vpop.f32.mrb[47].mxu0  ;;  %18948 = vmatmul.mubr.msk.f32.gmra.mrb[8].mxu0 %vm384_vm1, %v24510_v14  ;;  %v24528_v11 = vld [vmem:[#allocation2 + $0xf1] sm:$0xff] }
 0x367   : > { %18950 = vmatprep.mubr.msk.f32.mxu0 %vm384_vm1, %v24512_v12  ;;  %v24534_v10 = vld [vmem:[#allocation2 + $0xf9] sm:$0xff]  ;;  %v24662_v14 = vld [vmem:[#allocation2 + $0xaa] sm:$0xff] }
 0x368   : > { %v24660_v12 = vld [vmem:[#allocation2 + $0x9a] sm:$0xff]  ;;  %18163 = vmatmul.mubr.msk.f32.gmra.mrb[18].mxu1 %vm384_vm1, %v24526_v6 }
 0x369   : > { %18165 = vmatprep.mubr.msk.f32.mxu1 %vm384_vm1, %v24528_v11 }
 0x36a   : > { %18951 = vmatmul.mubr.msk.f32.gmra.mrb[10].mxu0 %vm384_vm1, %v24518_v9  ;;  %v24674_v9 = vld [vmem:[#allocation2 + $0xc2] sm:$0xff] }
 0x36b   : > { %18953 = vmatprep.mubr.msk.f32.mxu0 %vm384_vm1, %v24520_v7  ;;  %v24672_v7 = vld [vmem:[#allocation2 + $0xb2] sm:$0xff] }
 0x36c   : > { %18166 = vmatmul.mubr.msk.f32.gmra.mrb[20].mxu1 %vm384_vm1, %v24534_v10 }
 0x36d   : > { %18168 = vmatprep.mubr.msk.f32.mxu1 %vm384_vm1, %v24536_v5 }
 0x36e   : > { %18954 = vmatmul.mubr.msk.f32.gmra.mrb[12].mxu0 %vm384_vm1, %v24526_v6  ;;  %v24684_v6 = vld [vmem:[#allocation2 + $0xca] sm:$0xff] }
 0x36f   : > { %18956 = vmatprep.mubr.msk.f32.mxu0 %vm384_vm1, %v24528_v11  ;;  %v24686_v11 = vld [vmem:[#allocation2 + $0xda] sm:$0xff] }
 0x370   : > { %18169 = vmatmul.mubr.msk.f32.gmra.mrb[22].mxu1 %vm384_vm1, %v24542_v4 }
 0x371   : > { %18171 = vmatprep.mubr.msk.f32.mxu1 %vm384_vm1, %v24544_v63 }
 0x372   : > { %18957 = vmatmul.mubr.msk.f32.gmra.mrb[14].mxu0 %vm384_vm1, %v24534_v10  ;;  %v24698_v10 = vld [vmem:[#allocation2 + $0xf2] sm:$0xff] }
 0x373   : > { %18959 = vmatprep.mubr.msk.f32.mxu0 %vm384_vm1, %v24536_v5  ;;  %v24696_v5 = vld [vmem:[#allocation2 + $0xe2] sm:$0xff] }
 0x374   : > { %18172 = vmatmul.mubr.msk.f32.gmra.mrb[24].mxu1 %vm384_vm1, %v24550_v62 }
 0x375   : > { %18174 = vmatprep.mubr.msk.f32.mxu1 %vm384_vm1, %v24552_v61 }
 0x376   : > { %18960 = vmatmul.mubr.msk.f32.gmra.mrb[16].mxu0 %vm384_vm1, %v24542_v4  ;;  %v24710_v4 = vld [vmem:[#allocation2 + $0x10a] sm:$0xff] }
 0x377   : > { %18962 = vmatprep.mubr.msk.f32.mxu0 %vm384_vm1, %v24544_v63  ;;  %v24708_v63 = vld [vmem:[#allocation2 + $0xfa] sm:$0xff] }
 0x378   : > { %18175 = vmatmul.mubr.msk.f32.gmra.mrb[26].mxu1 %vm384_vm1, %v24561_v57 }
 0x379   : > { %18177 = vmatprep.mubr.msk.f32.mxu1 %vm384_vm1, %v24564_v24 }
 0x37a   : > { %18963 = vmatmul.mubr.msk.f32.gmra.mrb[18].mxu0 %vm384_vm1, %v24550_v62  ;;  %v24722_v62 = vld [vmem:[#allocation2 + $0x122] sm:$0xff] }
 0x37b   : > { %18965 = vmatprep.mubr.msk.f32.mxu0 %vm384_vm1, %v24552_v61  ;;  %v24720_v61 = vld [vmem:[#allocation2 + $0x112] sm:$0xff] }
 0x37c   : > { %18178 = vmatmul.mubr.msk.f32.gmra.mrb[28].mxu1 %vm384_vm1, %v24573_v56 }
 0x37d   : > { %18180 = vmatprep.mubr.msk.f32.mxu1 %vm384_vm1, %v24576_v43 }
 0x37e   : > { %18966 = vmatmul.mubr.msk.f32.gmra.mrb[20].mxu0 %vm384_vm1, %v24561_v57  ;;  %v24734_v57 = vld [vmem:[#allocation2 + $0x13a] sm:$0xff] }
 0x37f   : > { %18968 = vmatprep.mubr.msk.f32.mxu0 %vm384_vm1, %v24564_v24  ;;  %v24732_v24 = vld [vmem:[#allocation2 + $0x12a] sm:$0xff] }
 0x380   : > { %18181 = vmatmul.mubr.msk.f32.gmra.mrb[30].mxu1 %vm384_vm1, %v24583_v60 }
 0x382   : > { %18969 = vmatmul.mubr.msk.f32.gmra.mrb[22].mxu0 %vm384_vm1, %v24573_v56  ;;  %v543_v56 = vld [vmem:[%s28749_s1] sm:$0xf] }
 0x383   : > { %18971 = vmatprep.mubr.msk.f32.mxu0 %vm384_vm1, %v24576_v43  ;;  %v24745_v43 = vld [vmem:[#allocation2 + $0x142] sm:$0xff]  ;;  %18183 = vmatprep.subr.msk.mxu1 %vm674_vm0, %v543_v56 }
 0x384   : > { %18184 = vmatpush3.msk.msra.mxu1 %vm674_vm0, %v543_v56  ;;  %v515_v56 = vld [vmem:[#allocation2 + $0x30] sm:$0xff] }
 0x386   : > { %18972 = vmatmul.mubr.msk.f32.gmra.mrb[24].mxu0 %vm384_vm1, %v24583_v60  ;;  %v513_v60 = vld [vmem:[#allocation2 + $0x18] sm:$0xff] }
 0x387   : > { %18974 = vmatprep.mubr.msk.f32.mxu0 %vm384_vm1, %v6715_v52  ;;  %v24622_v52 = vld [vmem:[%s28749_s1 + $0x4c] sm:$0xf] }
 0x38a   : > { %18975 = vmatmul.mubr.msk.f32.gmra.mrb[26].mxu0 %vm384_vm1, %v6716_v53  ;;  %v511_v53 = vld [vmem:[#allocation2] sm:$0xff] }
 0x38b   : > { %18977 = vmatprep.mubr.msk.f32.mxu0 %vm384_vm1, %v24044_v49  ;;  %v24615_v49 = vld [vmem:[#allocation2 + $0x52] sm:$0xff]  ;;  %18185 = vmatprep.mubr.msk.f32.mxu1 %vm384_vm1, %v511_v53 }
 0x38c   : > { %v516_v53 = vld [vmem:[#allocation2 + $0x38] sm:$0xff] }
 0x38e   : > { %18978 = vmatmul.mubr.msk.f32.gmra.mrb[28].mxu0 %vm384_vm1, %v24050_v51  ;;  %v24617_v51 = vld [vmem:[#allocation2 + $0x62] sm:$0xff] }
 0x38f   : > { %18980 = vmatprep.mubr.msk.f32.mxu0 %vm384_vm1, %v6719_v28  ;;  %v512_v28 = vld [vmem:[#allocation2 + $0x8] sm:$0xff] }
 0x390   : > { %18186 = vmatmul.mubr.msk.f32.vlgmr.msra.gmra.mrb[0].mxu1 %vm384_vm1, %v512_v28  ;;  %v24767_v28 = vld [vmem:[#allocation2 + $0x172] sm:$0xff] }
 0x391   : > { %18188 = vmatprep.mubr.msk.f32.mxu1 %vm384_vm1, %v513_v60  ;;  %v7106_v60 = vld [vmem:[#allocation2 + $0x18a] sm:$0xff] }
 0x392   : > { %18981 = vmatmul.mubr.msk.f32.gmra.mrb[54].mxu0 %vm384_vm1, %v6720_v20  ;;  %v24748_v20 = vld [vmem:[#allocation2 + $0x152] sm:$0xff] }
 0x393   : > { %18985 = vmatprep.mubr.msk.f32.mxu0 %vm384_vm1, %v24606_v23 }
 0x396   : > { %18986 = vmatmul.mubr.msk.f32.vlgmr.msra.gmra.mrb[0].mxu0 %vm384_vm1, %v24615_v49 }
 0x397   : > { %19034 = vmatpush3.msk.msra.mxu0 %vm674_vm0, %v24476_v3  ;;  %18988 = vmatprep.mubr.msk.f32.mxu0 %vm384_vm1, %v24617_v51  ;;  %v24650_v3 = vld [vmem:[#allocation2 + $0x92] sm:$0xff] }
 0x398   : > { %19083 = vmatprep.subr.msk.mxu0 %vm674_vm0, %v24622_v52 }
 0x39a   : > { %18989 = vmatmul.mubr.msk.f32.gmra.mrb[2].mxu0 %vm384_vm1, %v24634_v19 }
 0x39b   : > { %18991 = vmatprep.mubr.msk.f32.mxu0 %vm384_vm1, %v24636_v58 }
 0x39e   : > { %18992 = vmatmul.mubr.msk.f32.gmra.mrb[4].mxu0 %vm384_vm1, %v24648_v17 }
 0x39f   : > { %18994 = vmatprep.mubr.msk.f32.mxu0 %vm384_vm1, %v24650_v3 }
 0x3a2   : > { %18995 = vmatmul.mubr.msk.f32.gmra.mrb[6].mxu0 %vm384_vm1, %v24660_v12 }
 0x3a3   : > { %18997 = vmatprep.mubr.msk.f32.mxu0 %vm384_vm1, %v24662_v14 }
 0x3a5   : > { %v18832_v48 = vpop.f32.mrb[48].mxu0 }
 0x3a6   : > { %v5867_v59 = vpop.f32.mrb[49].mxu0  ;;  %18998 = vmatmul.mubr.msk.f32.gmra.mrb[8].mxu0 %vm384_vm1, %v24672_v7  ;;  %v514_v48 = vld [vmem:[#allocation2 + $0x20] sm:$0xff] }
 0x3a7   : > { %19000 = vmatprep.mubr.msk.f32.mxu0 %vm384_vm1, %v24674_v9  ;;  %v24757_v59 = vld [vmem:[#allocation2 + $0x15a] sm:$0xff]  ;;  %18189 = vmatmul.mubr.msk.f32.gmra.mrb[2].mxu1 %vm384_vm1, %v514_v48  ;;  %v7109_v48 = vld [vmem:[#allocation2 + $0x1b2] sm:$0xff] }
 0x3a8   : > { %18191 = vmatprep.mubr.msk.f32.mxu1 %vm384_vm1, %v515_v56 }
 0x3aa   : > { %19001 = vmatmul.mubr.msk.f32.gmra.mrb[10].mxu0 %vm384_vm1, %v24684_v6 }
 0x3ab   : > { %19003 = vmatprep.mubr.msk.f32.mxu0 %vm384_vm1, %v24686_v11  ;;  %18192 = vmatmul.mubr.msk.f32.gmra.mrb[4].mxu1 %vm384_vm1, %v516_v53  ;;  %v24860_v53 = vld [vmem:[#allocation2 + $0xcb] sm:$0xff] }
 0x3ac   : > { %18194 = vmatprep.mubr.msk.f32.mxu1 %vm384_vm1, %v24330_v35  ;;  %v24848_v35 = vld [vmem:[#allocation2 + $0xb3] sm:$0xff] }
 0x3ae   : > { %19004 = vmatmul.mubr.msk.f32.gmra.mrb[12].mxu0 %vm384_vm1, %v24696_v5 }
 0x3af   : > { %19006 = vmatprep.mubr.msk.f32.mxu0 %vm384_vm1, %v24698_v10  ;;  %18195 = vmatmul.mubr.msk.f32.gmra.mrb[6].mxu1 %vm384_vm1, %v24336_v36  ;;  %v24850_v36 = vld [vmem:[#allocation2 + $0xc3] sm:$0xff] }
 0x3b0   : > { %18197 = vmatprep.mubr.msk.f32.mxu1 %vm384_vm1, %v24338_v47 }
 0x3b2   : > { %19007 = vmatmul.mubr.msk.f32.gmra.mrb[14].mxu0 %vm384_vm1, %v24708_v63 }
 0x3b3   : > { %19009 = vmatprep.mubr.msk.f32.mxu0 %vm384_vm1, %v24710_v4  ;;  %18198 = vmatmul.mubr.msk.f32.gmra.mrb[8].mxu1 %vm384_vm1, %v24351_v37 }
 0x3b4   : > { %18200 = vmatprep.mubr.msk.f32.mxu1 %vm384_vm1, %v24353_v38 }
 0x3b6   : > { %19010 = vmatmul.mubr.msk.f32.gmra.mrb[16].mxu0 %vm384_vm1, %v24720_v61 }
 0x3b7   : > { %19012 = vmatprep.mubr.msk.f32.mxu0 %vm384_vm1, %v24722_v62  ;;  %18201 = vmatmul.mubr.msk.f32.gmra.mrb[10].mxu1 %vm384_vm1, %v24361_v39 }
 0x3b8   : > { %18203 = vmatprep.mubr.msk.f32.mxu1 %vm384_vm1, %v24363_v40 }
 0x3ba   : > { %19013 = vmatmul.mubr.msk.f32.gmra.mrb[18].mxu0 %vm384_vm1, %v24732_v24 }
 0x3bb   : > { %19015 = vmatprep.mubr.msk.f32.mxu0 %vm384_vm1, %v24734_v57  ;;  %18204 = vmatmul.mubr.msk.f32.gmra.mrb[12].mxu1 %vm384_vm1, %v24369_v8 }
 0x3bc   : > { %18206 = vmatprep.mubr.msk.f32.mxu1 %vm384_vm1, %v24371_v13 }
 0x3be   : > { %19016 = vmatmul.mubr.msk.f32.gmra.mrb[20].mxu0 %vm384_vm1, %v24745_v43 }
 0x3bf   : > { %19018 = vmatprep.mubr.msk.f32.mxu0 %vm384_vm1, %v24748_v20  ;;  %18207 = vmatmul.mubr.msk.f32.gmra.mrb[14].mxu1 %vm384_vm1, %v24377_v41 }
 0x3c0   : > { %18209 = vmatprep.mubr.msk.f32.mxu1 %vm384_vm1, %v24379_v18 }
 0x3c2   : > { %19019 = vmatmul.mubr.msk.f32.gmra.mrb[22].mxu0 %vm384_vm1, %v24757_v59 }
 0x3c3   : > { %19021 = vmatprep.mubr.msk.f32.mxu0 %vm384_vm1, %v24760_v15  ;;  %18210 = vmatmul.mubr.msk.f32.gmra.mrb[16].mxu1 %vm384_vm1, %v24385_v46 }
 0x3c4   : > { %18212 = vmatprep.mubr.msk.f32.mxu1 %vm384_vm1, %v24387_v50  ;;  %v7494_v50 = vld [vmem:[#allocation2 + $0x173] sm:$0xff] }
 0x3c6   : > { %19022 = vmatmul.mubr.msk.f32.gmra.mrb[24].mxu0 %vm384_vm1, %v24767_v28 }
 0x3c7   : > { %19024 = vmatprep.mubr.msk.f32.mxu0 %vm384_vm1, %v7105_v22  ;;  %v7110_v22 = vld [vmem:[#allocation2 + $0x1ba] sm:$0xff]  ;;  %18213 = vmatmul.mubr.msk.f32.gmra.mrb[18].mxu1 %vm384_vm1, %v24393_v54 }
 0x3c8   : > { %18215 = vmatprep.mubr.msk.f32.mxu1 %vm384_vm1, %v24395_v45  ;;  %v1230_v45 = vld [vmem:[#allocation2 + $0x22] sm:$0xff]  ;;  %v1232_v54 = vld [vmem:[#allocation2 + $0x3a] sm:$0xff] }
 0x3ca   : > { %19025 = vmatmul.mubr.msk.f32.gmra.mrb[26].mxu0 %vm384_vm1, %v7106_v60  ;;  %v24862_v60 = vld [vmem:[#allocation2 + $0xdb] sm:$0xff] }
 0x3cb   : > { %19027 = vmatprep.mubr.msk.f32.mxu0 %vm384_vm1, %v24117_v26  ;;  %v24800_v26 = vld [vmem:[%s28749_s1 + $0x50] sm:$0xf]  ;;  %18216 = vmatmul.mubr.msk.f32.gmra.mrb[20].mxu1 %vm384_vm1, %v24401_v55  ;;  %v1229_v55 = vld [vmem:[#allocation2 + $0x1a] sm:$0xff] }
 0x3cc   : > { %18218 = vmatprep.mubr.msk.f32.mxu1 %vm384_vm1, %v24403_v25  ;;  %v24924_v25 = vld [vmem:[#allocation2 + $0x153] sm:$0xff] }
 0x3ce   : > { %19028 = vmatmul.mubr.msk.f32.gmra.mrb[28].mxu0 %vm384_vm1, %v24123_v16  ;;  %v24812_v16 = vld [vmem:[#allocation2 + $0x7b] sm:$0xff] }
 0x3cf   : > { %19030 = vmatprep.mubr.msk.f32.mxu0 %vm384_vm1, %v7109_v48  ;;  %18219 = vmatmul.mubr.msk.f32.gmra.mrb[22].mxu1 %vm384_vm1, %v24409_v32  ;;  %v24872_v48 = vld [vmem:[#allocation2 + $0xe3] sm:$0xff] }
 0x3d0   : > { %18221 = vmatprep.mubr.msk.f32.mxu1 %vm384_vm1, %v24411_v31  ;;  %v1227_v31 = vld [vmem:[#allocation2 + $0x2] sm:$0xff]  ;;  %v1228_v32 = vld [vmem:[#allocation2 + $0xa] sm:$0xff] }
 0x3d2   : > { %19031 = vmatmul.mubr.msk.f32.gmra.mrb[56].mxu0 %vm384_vm1, %v7110_v22  ;;  %v24874_v22 = vld [vmem:[#allocation2 + $0xf3] sm:$0xff] }
 0x3d3   : > { %19035 = vmatprep.mubr.msk.f32.mxu0 %vm384_vm1, %v24128_v27  ;;  %v24824_v27 = vld [vmem:[#allocation2 + $0x83] sm:$0xff]  ;;  %18222 = vmatmul.mubr.msk.f32.gmra.mrb[24].mxu1 %vm384_vm1, %v24417_v0  ;;  %v29117_v0 = vld [vmem:[#allocation53_spill] sm:$0xff] }
 0x3d4   : > { %18224 = vmatprep.mubr.msk.f32.mxu1 %vm384_vm1, %v24419_v2  ;;  %v24910_v2 = vld [vmem:[#allocation2 + $0x13b] sm:$0xff] }
 0x3d6   : > { %19036 = vmatmul.mubr.msk.f32.vlgmr.msra.gmra.mrb[0].mxu0 %vm384_vm1, %v24137_v42  ;;  %v24826_v42 = vld [vmem:[#allocation2 + $0x93] sm:$0xff] }
 0x3d7   : > { %19084 = vmatpush3.msk.msra.mxu0 %vm674_vm0, %v24622_v52  ;;  %19038 = vmatprep.mubr.msk.f32.mxu0 %vm384_vm1, %v24139_v30  ;;  %v24836_v30 = vld [vmem:[#allocation2 + $0x9b] sm:$0xff] }
 0x3d8   : > { %19133 = vmatprep.subr.msk.mxu0 %vm674_vm0, %v24800_v26  ;;  %18225 = vmatmul.mubr.msk.f32.gmra.mrb[26].mxu1 %vm384_vm1, %v24425_v29  ;;  %v29116_v29 = vld [vmem:[#allocation52_spill] sm:$0xff] }
 0x3d9   : > { %18227 = vmatprep.mubr.msk.f32.mxu1 %vm384_vm1, %v24427_v44  ;;  %v24908_v44 = vld [vmem:[#allocation2 + $0x12b] sm:$0xff] }
 0x3da   : > { %19039 = vmatmul.mubr.msk.f32.gmra.mrb[2].mxu0 %vm384_vm1, %v24146_v33  ;;  %v24838_v33 = vld [vmem:[#allocation2 + $0xab] sm:$0xff] }
 0x3db   : > { %19041 = vmatprep.mubr.msk.f32.mxu0 %vm384_vm1, %v24812_v16 }
 0x3dc   : > { %18228 = vmatmul.mubr.msk.f32.gmra.mrb[28].mxu1 %vm384_vm1, %v24433_v34  ;;  %v15246_v34 = vld [vmem:[%s28749_s1 + $0x8] sm:$0xf] }
 0x3dd   : > { %18230 = vmatprep.mubr.msk.f32.mxu1 %vm384_vm1, %v29116_v29  ;;  %v24921_v29 = vld [vmem:[#allocation2 + $0x143] sm:$0xff]  ;;  %18233 = vmatprep.subr.msk.mxu1 %vm674_vm0, %v15246_v34 }
 0x3de   : > { %19042 = vmatmul.mubr.msk.f32.gmra.mrb[4].mxu0 %vm384_vm1, %v24824_v27  ;;  %18234 = vmatpush3.msk.msra.mxu1 %vm674_vm0, %v15246_v34  ;;  %v24938_v34 = vld [vmem:[#allocation2 + $0x15b] sm:$0xff] }
 0x3df   : > { %19044 = vmatprep.mubr.msk.f32.mxu0 %vm384_vm1, %v24826_v42 }
 0x3e0   : > { %18231 = vmatmul.mubr.msk.f32.gmra.mrb[32].mxu1 %vm384_vm1, %v29117_v0  ;;  %v22738_v0 = vld [vmem:[%s28749_s1 + $0xc] sm:$0xf] }
 0x3e1   : > { %18235 = vmatprep.mubr.msk.f32.mxu1 %vm384_vm1, %v1227_v31  ;;  %21957 = vmatprep.subr.msk.mxu1 %vm674_vm0, %v22738_v0  ;;  %v1231_v31 = vld [vmem:[#allocation2 + $0x32] sm:$0xff] }
 0x3e2   : > { %19045 = vmatmul.mubr.msk.f32.gmra.mrb[6].mxu0 %vm384_vm1, %v24836_v30 }
 0x3e3   : > { %19047 = vmatprep.mubr.msk.f32.mxu0 %vm384_vm1, %v24838_v33 }
 0x3e4   : > { %18236 = vmatmul.mubr.msk.f32.vlgmr.msra.gmra.mrb[0].mxu1 %vm384_vm1, %v1228_v32  ;;  %v7493_v32 = vld [vmem:[#allocation2 + $0x16b] sm:$0xff] }
 0x3e5   : > { %v18882_v52 = vpop.f32.mrb[50].mxu0  ;;  %21958 = vmatpush3.msk.msra.mxu1 %vm674_vm0, %v22738_v0  ;;  %18238 = vmatprep.mubr.msk.f32.mxu1 %vm384_vm1, %v1229_v55  ;;  %v7495_v0 = vld [vmem:[#allocation2 + $0x183] sm:$0xff]  ;;  %v29118_v55 = vld [vmem:[#allocation10_spill] sm:$0xff] }
 0x3e6   : > { %v6257_v56 = vpop.f32.mrb[51].mxu0  ;;  %19048 = vmatmul.mubr.msk.f32.gmra.mrb[8].mxu0 %vm384_vm1, %v24848_v35  ;;  %v24884_v52 = vld [vmem:[#allocation2 + $0xfb] sm:$0xff] }
 0x3e7   : > { %19050 = vmatprep.mubr.msk.f32.mxu0 %vm384_vm1, %v24850_v36  ;;  %v24886_v56 = vld [vmem:[#allocation2 + $0x10b] sm:$0xff] }
 0x3e8   : > { %18239 = vmatmul.mubr.msk.f32.gmra.mrb[2].mxu1 %vm384_vm1, %v1230_v45  ;;  %v7496_v45 = vld [vmem:[#allocation2 + $0x18b] sm:$0xff] }
 0x3e9   : > { %18241 = vmatprep.mubr.msk.f32.mxu1 %vm384_vm1, %v1231_v31  ;;  %v8280_v31 = vld [vmem:[#allocation2 + $0x1c8] sm:$0xff] }
 0x3ea   : > { %19051 = vmatmul.mubr.msk.f32.gmra.mrb[10].mxu0 %vm384_vm1, %v24860_v53 }
 0x3eb   : > { %19053 = vmatprep.mubr.msk.f32.mxu0 %vm384_vm1, %v24862_v60 }
 0x3ec   : > { %18242 = vmatmul.mubr.msk.f32.gmra.mrb[4].mxu1 %vm384_vm1, %v1232_v54  ;;  %v7499_v54 = vld [vmem:[#allocation2 + $0x1b3] sm:$0xff] }
 0x3ed   : > { %18244 = vmatprep.mubr.msk.f32.mxu1 %vm384_vm1, %v24606_v23  ;;  %v7500_v23 = vld [vmem:[#allocation2 + $0x1bb] sm:$0xff] }
 0x3ee   : > { %19054 = vmatmul.mubr.msk.f32.gmra.mrb[12].mxu0 %vm384_vm1, %v24872_v48 }
 0x3ef   : > { %19056 = vmatprep.mubr.msk.f32.mxu0 %vm384_vm1, %v24874_v22 }
 0x3f0   : > { %18245 = vmatmul.mubr.msk.f32.gmra.mrb[6].mxu1 %vm384_vm1, %v24615_v49  ;;  %v29120_v49 = vld [vmem:[#allocation12_spill] sm:$0xff] }
 0x3f1   : > { %18247 = vmatprep.mubr.msk.f32.mxu1 %vm384_vm1, %v24617_v51  ;;  %v24975_v51 = vld [vmem:[%s28749_s1 + $0x54] sm:$0xf] }
 0x3f2   : > { %19057 = vmatmul.mubr.msk.f32.gmra.mrb[14].mxu0 %vm384_vm1, %v24884_v52 }
 0x3f3   : > { %19059 = vmatprep.mubr.msk.f32.mxu0 %vm384_vm1, %v24886_v56 }
 0x3f4   : > { %18248 = vmatmul.mubr.msk.f32.gmra.mrb[8].mxu1 %vm384_vm1, %v24634_v19  ;;  %v29121_v19 = vld [vmem:[#allocation13_spill] sm:$0xff] }
 0x3f5   : > { %18250 = vmatprep.mubr.msk.f32.mxu1 %vm384_vm1, %v24636_v58  ;;  %v29122_v58 = vld [vmem:[#allocation14_spill] sm:$0xff] }
 0x3f6   : > { %19060 = vmatmul.mubr.msk.f32.gmra.mrb[16].mxu0 %vm384_vm1, %v24896_v21 }
 0x3f7   : > { %19062 = vmatprep.mubr.msk.f32.mxu0 %vm384_vm1, %v24898_v1 }
 0x3f8   : > { %18251 = vmatmul.mubr.msk.f32.gmra.mrb[10].mxu1 %vm384_vm1, %v24648_v17  ;;  %v29123_v17 = vld [vmem:[#allocation15_spill] sm:$0xff] }
 0x3f9   : > { %18253 = vmatprep.mubr.msk.f32.mxu1 %vm384_vm1, %v24650_v3  ;;  %v29124_v3 = vld [vmem:[#allocation16_spill] sm:$0xff] }
 0x3fa   : > { %19063 = vmatmul.mubr.msk.f32.gmra.mrb[18].mxu0 %vm384_vm1, %v24908_v44 }
 0x3fb   : > { %19065 = vmatprep.mubr.msk.f32.mxu0 %vm384_vm1, %v24910_v2 }
 0x3fc   : > { %18254 = vmatmul.mubr.msk.f32.gmra.mrb[12].mxu1 %vm384_vm1, %v24660_v12  ;;  %v29125_v12 = vld [vmem:[#allocation17_spill] sm:$0xff] }
 0x3fd   : > { %18256 = vmatprep.mubr.msk.f32.mxu1 %vm384_vm1, %v24662_v14  ;;  %v29126_v14 = vld [vmem:[#allocation18_spill] sm:$0xff] }
 0x3fe   : > { %19066 = vmatmul.mubr.msk.f32.gmra.mrb[20].mxu0 %vm384_vm1, %v24921_v29 }
 0x3ff   : > { %19068 = vmatprep.mubr.msk.f32.mxu0 %vm384_vm1, %v24924_v25 }
 0x400   : > { %18257 = vmatmul.mubr.msk.f32.gmra.mrb[14].mxu1 %vm384_vm1, %v24672_v7  ;;  %v29127_v7 = vld [vmem:[#allocation19_spill] sm:$0xff] }
 0x401   : > { %18259 = vmatprep.mubr.msk.f32.mxu1 %vm384_vm1, %v24674_v9  ;;  %v29128_v9 = vld [vmem:[#allocation20_spill] sm:$0xff] }
 0x402   : > { %19069 = vmatmul.mubr.msk.f32.gmra.mrb[22].mxu0 %vm384_vm1, %v24938_v34 }
 0x403   : > { %19071 = vmatprep.mubr.msk.f32.mxu0 %vm384_vm1, %v7493_v32  ;;  %v29133_v32 = vld [vmem:[#allocation25_spill] sm:$0xff] }
 0x404   : > { %18260 = vmatmul.mubr.msk.f32.gmra.mrb[16].mxu1 %vm384_vm1, %v24684_v6 }
 0x405   : > { %18262 = vmatprep.mubr.msk.f32.mxu1 %vm384_vm1, %v24686_v11 }
 0x406   : > { %19072 = vmatmul.mubr.msk.f32.gmra.mrb[24].mxu0 %vm384_vm1, %v7494_v50  ;;  %v29119_v50 = vld [vmem:[#allocation11_spill] sm:$0xff] }
 0x407   : > { %19074 = vmatprep.mubr.msk.f32.mxu0 %vm384_vm1, %v7495_v0 }
 0x408   : > { %18263 = vmatmul.mubr.msk.f32.gmra.mrb[18].mxu1 %vm384_vm1, %v24696_v5  ;;  %v29130_v5 = vld [vmem:[#allocation22_spill] sm:$0xff] }
 0x409   : > { %18265 = vmatprep.mubr.msk.f32.mxu1 %vm384_vm1, %v24698_v10  ;;  %v29131_v10 = vld [vmem:[#allocation23_spill] sm:$0xff] }
 0x40a   : > { %19075 = vmatmul.mubr.msk.f32.gmra.mrb[26].mxu0 %vm384_vm1, %v7496_v45 }
 0x40b   : > { %19077 = vmatprep.mubr.msk.f32.mxu0 %vm384_vm1, %v29118_v55  ;;  %v29165_v55 = vld [vmem:[#allocation57_spill] sm:$0xff] }
 0x40c   : > { %18266 = vmatmul.mubr.msk.f32.gmra.mrb[20].mxu1 %vm384_vm1, %v24708_v63  ;;  %v29132_v63 = vld [vmem:[#allocation24_spill] sm:$0xff] }
 0x40d   : > { %18268 = vmatprep.mubr.msk.f32.mxu1 %vm384_vm1, %v24710_v4  ;;  %v29134_v4 = vld [vmem:[#allocation26_spill] sm:$0xff] }
 0x40e   : > { %19078 = vmatmul.mubr.msk.f32.gmra.mrb[28].mxu0 %vm384_vm1, %v29119_v50  ;;  %v29166_v50 = vld [vmem:[#allocation58_spill] sm:$0xff] }
 0x40f   : > { %19080 = vmatprep.mubr.msk.f32.mxu0 %vm384_vm1, %v7499_v54  ;;  %v8281_v54 = vld [vmem:[#allocation2 + $0x1d0] sm:$0xff] }
 0x410   : > { %18269 = vmatmul.mubr.msk.f32.gmra.mrb[22].mxu1 %vm384_vm1, %v24720_v61  ;;  %v29135_v61 = vld [vmem:[#allocation27_spill] sm:$0xff] }
 0x411   : > { %18271 = vmatprep.mubr.msk.f32.mxu1 %vm384_vm1, %v24722_v62  ;;  %v29136_v62 = vld [vmem:[#allocation28_spill] sm:$0xff] }
 0x412   : > { %19081 = vmatmul.mubr.msk.f32.gmra.mrb[58].mxu0 %vm384_vm1, %v7500_v23  ;;  %v25200_v23 = vld [vmem:[%s28749_s1 + $0x5c] sm:$0xf] }
 0x413   : > { %19085 = vmatprep.mubr.msk.f32.mxu0 %vm384_vm1, %v29120_v49  ;;  %v29167_v49 = vld [vmem:[#allocation59_spill] sm:$0xff] }
 0x414   : > { %18272 = vmatmul.mubr.msk.f32.gmra.mrb[24].mxu1 %vm384_vm1, %v24732_v24  ;;  %v29137_v24 = vld [vmem:[#allocation29_spill] sm:$0xff] }
 0x415   : > { %18274 = vmatprep.mubr.msk.f32.mxu1 %vm384_vm1, %v24734_v57  ;;  %v29138_v57 = vld [vmem:[#allocation30_spill] sm:$0xff] }
 0x416   : > { %19086 = vmatmul.mubr.msk.f32.vlgmr.msra.gmra.mrb[0].mxu0 %vm384_vm1, %v29121_v19  ;;  %v8644_v19 = vld [vmem:[#allocation2 + $0x91] sm:$0xff] }
 0x417   : > { %19134 = vmatpush3.msk.msra.mxu0 %vm674_vm0, %v24800_v26  ;;  %19088 = vmatprep.mubr.msk.f32.mxu0 %vm384_vm1, %v29122_v58  ;;  %v29129_v26 = vld [vmem:[#allocation21_spill] sm:$0xff] }
 0x418   : > { %19183 = vmatprep.subr.msk.mxu0 %vm674_vm0, %v24975_v51  ;;  %18275 = vmatmul.mubr.msk.f32.gmra.mrb[26].mxu1 %vm384_vm1, %v24745_v43  ;;  %v29139_v43 = vld [vmem:[#allocation31_spill] sm:$0xff]  ;;  %v29169_v58 = vld [vmem:[#allocation61_spill] sm:$0xff] }
 0x419   : > { %18277 = vmatprep.mubr.msk.f32.mxu1 %vm384_vm1, %v24748_v20  ;;  %v29140_v20 = vld [vmem:[#allocation32_spill] sm:$0xff] }
 0x41a   : > { %19089 = vmatmul.mubr.msk.f32.gmra.mrb[2].mxu0 %vm384_vm1, %v29123_v17  ;;  %v8645_v17 = vld [vmem:[#allocation2 + $0x99] sm:$0xff] }
 0x41b   : > { %19091 = vmatprep.mubr.msk.f32.mxu0 %vm384_vm1, %v29124_v3  ;;  %v8646_v3 = vld [vmem:[#allocation2 + $0xa9] sm:$0xff] }
 0x41c   : > { %18278 = vmatmul.mubr.msk.f32.gmra.mrb[28].mxu1 %vm384_vm1, %v24757_v59  ;;  %v29141_v59 = vld [vmem:[#allocation33_spill] sm:$0xff] }
 0x41d   : > { %18280 = vmatprep.mubr.msk.f32.mxu1 %vm384_vm1, %v24760_v15  ;;  %v29142_v15 = vld [vmem:[#allocation34_spill] sm:$0xff] }
 0x41e   : > { %19092 = vmatmul.mubr.msk.f32.gmra.mrb[4].mxu0 %vm384_vm1, %v29125_v12  ;;  %v8647_v12 = vld [vmem:[#allocation2 + $0xb1] sm:$0xff] }
 0x41f   : > { %19094 = vmatprep.mubr.msk.f32.mxu0 %vm384_vm1, %v29126_v14  ;;  %v8648_v14 = vld [vmem:[#allocation2 + $0xc1] sm:$0xff] }
 0x420   : > { %18281 = vmatmul.mubr.msk.f32.gmra.mrb[34].mxu1 %vm384_vm1, %v24767_v28  ;;  %v29143_v28 = vld [vmem:[#allocation35_spill] sm:$0xff] }
 0x421   : > { %18300 = vmatprep.mubr.msk.f32.mxu1 %vm384_vm1, %v24812_v16  ;;  %v29144_v16 = vld [vmem:[#allocation36_spill] sm:$0xff] }
 0x422   : > { %19095 = vmatmul.mubr.msk.f32.gmra.mrb[6].mxu0 %vm384_vm1, %v29127_v7  ;;  %v8649_v7 = vld [vmem:[#allocation2 + $0xc9] sm:$0xff] }
 0x423   : > { %19097 = vmatprep.mubr.msk.f32.mxu0 %vm384_vm1, %v29128_v9  ;;  %v8650_v9 = vld [vmem:[#allocation2 + $0xd9] sm:$0xff] }
 0x424   : > { %18301 = vmatmul.mubr.msk.f32.vlgmr.msra.gmra.mrb[10].mxu1 %vm384_vm1, %v24824_v27  ;;  %v25077_v27 = vld [vmem:[#allocation2 + $0x184] sm:$0xff] }
 0x425   : > { %v18932_v6 = vpop.f32.mrb[52].mxu0  ;;  %18303 = vmatprep.mubr.msk.f32.mxu1 %vm384_vm1, %v24826_v42  ;;  %v29145_v42 = vld [vmem:[#allocation37_spill] sm:$0xff] }
 0x426   : > { %v6648_v11 = vpop.f32.mrb[53].mxu0  ;;  %19098 = vmatmul.mubr.msk.f32.gmra.mrb[8].mxu0 %vm384_vm1, %v29129_v26  ;;  %v8651_v26 = vld [vmem:[#allocation2 + $0xe1] sm:$0xff] }
 0x427   : > { %19100 = vmatprep.mubr.msk.f32.mxu0 %vm384_vm1, %v29130_v5  ;;  %v8652_v5 = vld [vmem:[#allocation2 + $0xf1] sm:$0xff] }
 0x428   : > { %18304 = vmatmul.mubr.msk.f32.gmra.mrb[12].mxu1 %vm384_vm1, %v24836_v30  ;;  %v25087_v30 = vld [vmem:[#allocation2 + $0x18c] sm:$0xff] }
 0x429   : > { %18306 = vmatprep.mubr.msk.f32.mxu1 %vm384_vm1, %v24838_v33  ;;  %v29146_v33 = vld [vmem:[#allocation38_spill] sm:$0xff] }
 0x42a   : > { %19101 = vmatmul.mubr.msk.f32.gmra.mrb[10].mxu0 %vm384_vm1, %v29131_v10  ;;  %v8653_v10 = vld [vmem:[#allocation2 + $0xf9] sm:$0xff] }
 0x42b   : > { %19103 = vmatprep.mubr.msk.f32.mxu0 %vm384_vm1, %v29132_v63  ;;  %v8654_v63 = vld [vmem:[#allocation2 + $0x109] sm:$0xff] }
 0x42c   : > { %18307 = vmatmul.mubr.msk.f32.gmra.mrb[14].mxu1 %vm384_vm1, %v24848_v35  ;;  %v25097_v35 = vld [vmem:[#allocation2 + $0x1b4] sm:$0xff] }
 0x42d   : > { %18309 = vmatprep.mubr.msk.f32.mxu1 %vm384_vm1, %v24850_v36  ;;  %v29147_v36 = vld [vmem:[#allocation39_spill] sm:$0xff] }
 0x42e   : > { %19104 = vmatmul.mubr.msk.f32.gmra.mrb[12].mxu0 %vm384_vm1, %v29133_v32  ;;  %v8655_v32 = vld [vmem:[#allocation2 + $0x111] sm:$0xff] }
 0x42f   : > { %19106 = vmatprep.mubr.msk.f32.mxu0 %vm384_vm1, %v29134_v4  ;;  %v8656_v4 = vld [vmem:[#allocation2 + $0x121] sm:$0xff] }
 0x430   : > { %18310 = vmatmul.mubr.msk.f32.gmra.mrb[16].mxu1 %vm384_vm1, %v24860_v53  ;;  %v25107_v53 = vld [vmem:[#allocation2 + $0x1bc] sm:$0xff] }
 0x431   : > { %18312 = vmatprep.mubr.msk.f32.mxu1 %vm384_vm1, %v24862_v60  ;;  %v15926_v60 = vld [vmem:[%s28749_s1 + $0x58] sm:$0xf] }
 0x432   : > { %19107 = vmatmul.mubr.msk.f32.gmra.mrb[14].mxu0 %vm384_vm1, %v29135_v61  ;;  %v8657_v61 = vld [vmem:[#allocation2 + $0x129] sm:$0xff] }
 0x433   : > { %19109 = vmatprep.mubr.msk.f32.mxu0 %vm384_vm1, %v29136_v62  ;;  %v8658_v62 = vld [vmem:[#allocation2 + $0x139] sm:$0xff] }
 0x434   : > { %18313 = vmatmul.mubr.msk.f32.gmra.mrb[18].mxu1 %vm384_vm1, %v24872_v48  ;;  %v29162_v48 = vld [vmem:[#allocation54_spill] sm:$0xff] }
 0x435   : > { %18315 = vmatprep.mubr.msk.f32.mxu1 %vm384_vm1, %v24874_v22  ;;  %v8276_v22 = vld [vmem:[#allocation2 + $0x198] sm:$0xff] }
 0x436   : > { %19110 = vmatmul.mubr.msk.f32.gmra.mrb[16].mxu0 %vm384_vm1, %v29137_v24  ;;  %v8659_v24 = vld [vmem:[#allocation2 + $0x141] sm:$0xff] }
 0x437   : > { %19112 = vmatprep.mubr.msk.f32.mxu0 %vm384_vm1, %v29138_v57  ;;  %v8660_v57 = vld [vmem:[#allocation2 + $0x151] sm:$0xff] }
 0x438   : > { %18316 = vmatmul.mubr.msk.f32.gmra.mrb[20].mxu1 %vm384_vm1, %v24884_v52  ;;  %v29163_v52 = vld [vmem:[#allocation55_spill] sm:$0xff] }
 0x439   : > { %18318 = vmatprep.mubr.msk.f32.mxu1 %vm384_vm1, %v24886_v56  ;;  %v8277_v56 = vld [vmem:[#allocation2 + $0x1a0] sm:$0xff] }
 0x43a   : > { %19113 = vmatmul.mubr.msk.f32.gmra.mrb[18].mxu0 %vm384_vm1, %v29139_v43  ;;  %v8661_v43 = vld [vmem:[#allocation2 + $0x159] sm:$0xff] }
 0x43b   : > { %19115 = vmatprep.mubr.msk.f32.mxu0 %vm384_vm1, %v29140_v20  ;;  %v8662_v20 = vld [vmem:[#allocation2 + $0x169] sm:$0xff] }
 0x43c   : > { %18319 = vmatmul.mubr.msk.f32.gmra.mrb[22].mxu1 %vm384_vm1, %v24896_v21 }
 0x43d   : > { %18321 = vmatprep.mubr.msk.f32.mxu1 %vm384_vm1, %v24898_v1  ;;  %v29161_v1 = vld [vmem:[#allocation53_spill] sm:$0xff] }
 0x43e   : > { %19116 = vmatmul.mubr.msk.f32.gmra.mrb[20].mxu0 %vm384_vm1, %v29141_v59  ;;  %v25229_v59 = vld [vmem:[#allocation2 + $0x16b] sm:$0xff] }
 0x43f   : > { %19118 = vmatprep.mubr.msk.f32.mxu0 %vm384_vm1, %v29142_v15  ;;  %v8663_v15 = vld [vmem:[#allocation2 + $0x171] sm:$0xff] }
 0x440   : > { %18322 = vmatmul.mubr.msk.f32.gmra.mrb[24].mxu1 %vm384_vm1, %v24908_v44  ;;  %v29160_v44 = vld [vmem:[#allocation52_spill] sm:$0xff] }
 0x441   : > { %18324 = vmatprep.mubr.msk.f32.mxu1 %vm384_vm1, %v24910_v2  ;;  %v29158_v2 = vld [vmem:[#allocation50_spill] sm:$0xff] }
 0x442   : > { %19119 = vmatmul.mubr.msk.f32.gmra.mrb[22].mxu0 %vm384_vm1, %v29143_v28  ;;  %v25232_v28 = vld [vmem:[#allocation2 + $0x173] sm:$0xff] }
 0x443   : > { %19121 = vmatprep.mubr.msk.f32.mxu0 %vm384_vm1, %v29144_v16  ;;  %v8664_v16 = vld [vmem:[#allocation2 + $0x181] sm:$0xff] }
 0x444   : > { %18325 = vmatmul.mubr.msk.f32.gmra.mrb[26].mxu1 %vm384_vm1, %v24921_v29  ;;  %v29159_v29 = vld [vmem:[#allocation51_spill] sm:$0xff] }
 0x445   : > { %18327 = vmatprep.mubr.msk.f32.mxu1 %vm384_vm1, %v24924_v25  ;;  %v29157_v25 = vld [vmem:[#allocation49_spill] sm:$0xff] }
 0x446   : > { %19122 = vmatmul.mubr.msk.f32.gmra.mrb[24].mxu0 %vm384_vm1, %v29145_v42  ;;  %v8665_v42 = vld [vmem:[#allocation2 + $0x189] sm:$0xff] }
 0x447   : > { %19124 = vmatprep.mubr.msk.f32.mxu0 %vm384_vm1, %v25077_v27 }
 0x448   : > { %18328 = vmatmul.mubr.msk.f32.gmra.mrb[28].mxu1 %vm384_vm1, %v24938_v34  ;;  %v29164_v34 = vld [vmem:[#allocation56_spill] sm:$0xff] }
 0x449   : > { %18330 = vmatprep.mubr.msk.f32.mxu1 %vm384_vm1, %v25229_v59 }
 0x44a   : > { %19125 = vmatmul.mubr.msk.f32.gmra.mrb[26].mxu0 %vm384_vm1, %v25087_v30 }
 0x44b   : > { %19127 = vmatprep.mubr.msk.f32.mxu0 %vm384_vm1, %v29146_v33  ;;  %v8666_v33 = vld [vmem:[#allocation2 + $0x199] sm:$0xff] }
 0x44c   : > { %18331 = vmatmul.mubr.msk.f32.gmra.mrb[36].mxu1 %vm384_vm1, %v25232_v28 }
 0x44e   : > { %19128 = vmatmul.mubr.msk.f32.gmra.mrb[28].mxu0 %vm384_vm1, %v29147_v36  ;;  %v8667_v36 = vld [vmem:[#allocation2 + $0x1a1] sm:$0xff] }
 0x44f   : > { %19130 = vmatprep.mubr.msk.f32.mxu0 %vm384_vm1, %v25097_v35 }
 0x452   : > { %19131 = vmatmul.mubr.msk.f32.gmra.mrb[60].mxu0 %vm384_vm1, %v25107_v53 }
 0x453   : > { %19135 = vmatprep.mubr.msk.f32.mxu0 %vm384_vm1, %v24338_v47  ;;  %v18182_v0 = vpop.f32.mrb[30].mxu1 }
 0x454   : > { %v894_v45 = vpop.f32.mrb[31].mxu1  ;;  %v9044_v0 = vld [vmem:[#allocation2 + $0x10a] sm:$0xff] }
 0x455   : > { %v9045_v45 = vld [vmem:[#allocation2 + $0x112] sm:$0xff] }
 0x456   : > { %19136 = vmatmul.mubr.msk.f32.vlgmr.msra.gmra.mrb[0].mxu0 %vm384_vm1, %v24351_v37  ;;  %v29148_v37 = vld [vmem:[#allocation40_spill] sm:$0xff] }
 0x457   : > { %19184 = vmatpush3.msk.msra.mxu0 %vm674_vm0, %v24975_v51  ;;  %19138 = vmatprep.mubr.msk.f32.mxu0 %vm384_vm1, %v24353_v38  ;;  %v29149_v38 = vld [vmem:[#allocation41_spill] sm:$0xff]  ;;  %v29168_v51 = vld [vmem:[#allocation60_spill] sm:$0xff] }
 0x458   : > { %19233 = vmatprep.subr.msk.mxu0 %vm674_vm0, %v15926_v60 }
 0x45a   : > { %19139 = vmatmul.mubr.msk.f32.gmra.mrb[2].mxu0 %vm384_vm1, %v24361_v39  ;;  %v29150_v39 = vld [vmem:[#allocation42_spill] sm:$0xff] }
 0x45b   : > { %19141 = vmatprep.mubr.msk.f32.mxu0 %vm384_vm1, %v24363_v40  ;;  %v29151_v40 = vld [vmem:[#allocation43_spill] sm:$0xff] }
 0x45e   : > { %19142 = vmatmul.mubr.msk.f32.gmra.mrb[4].mxu0 %vm384_vm1, %v24369_v8  ;;  %v29152_v8 = vld [vmem:[#allocation44_spill] sm:$0xff] }
 0x45f   : > { %19144 = vmatprep.mubr.msk.f32.mxu0 %vm384_vm1, %v24371_v13  ;;  %v29153_v13 = vld [vmem:[#allocation45_spill] sm:$0xff] }
 0x462   : > { %19145 = vmatmul.mubr.msk.f32.gmra.mrb[6].mxu0 %vm384_vm1, %v24377_v41  ;;  %v29154_v41 = vld [vmem:[#allocation46_spill] sm:$0xff] }
 0x463   : > { %19147 = vmatprep.mubr.msk.f32.mxu0 %vm384_vm1, %v24379_v18  ;;  %v29155_v18 = vld [vmem:[#allocation47_spill] sm:$0xff] }
 0x465   : > { %v18982_v21 = vpop.f32.mrb[54].mxu0 }
 0x466   : > { %v7038_v47 = vpop.f32.mrb[55].mxu0  ;;  %19148 = vmatmul.mubr.msk.f32.gmra.mrb[8].mxu0 %vm384_vm1, %v24385_v46  ;;  %v29156_v46 = vld [vmem:[#allocation48_spill] sm:$0xff]  ;;  %v8669_v21 = vld [vmem:[#allocation2 + $0x1b9] sm:$0xff] }
 0x467   : > { %19150 = vmatprep.mubr.msk.f32.mxu0 %vm384_vm1, %v29148_v37  ;;  %v8670_v47 = vld [vmem:[#allocation2 + $0x1c9] sm:$0xff] }
 0x46a   : > { %19151 = vmatmul.mubr.msk.f32.gmra.mrb[10].mxu0 %vm384_vm1, %v29149_v38 }
 0x46b   : > { %19153 = vmatprep.mubr.msk.f32.mxu0 %vm384_vm1, %v29150_v39  ;;  %v8671_v39 = vld [vmem:[#allocation2 + $0x1d1] sm:$0xff] }
 0x46e   : > { %19154 = vmatmul.mubr.msk.f32.gmra.mrb[12].mxu0 %vm384_vm1, %v29151_v40  ;;  %v9030_v40 = vld [vmem:[#allocation2 + $0x62] sm:$0xff] }
 0x46f   : > { %19156 = vmatprep.mubr.msk.f32.mxu0 %vm384_vm1, %v29152_v8  ;;  %v9031_v8 = vld [vmem:[#allocation2 + $0x6a] sm:$0xff] }
 0x472   : > { %19157 = vmatmul.mubr.msk.f32.gmra.mrb[14].mxu0 %vm384_vm1, %v29153_v13  ;;  %v9032_v13 = vld [vmem:[#allocation2 + $0x7a] sm:$0xff] }
 0x473   : > { %19159 = vmatprep.mubr.msk.f32.mxu0 %vm384_vm1, %v29154_v41  ;;  %v25251_v41 = vld [vmem:[%s28749_s1 + $0x60] sm:$0xf] }
 0x476   : > { %19160 = vmatmul.mubr.msk.f32.gmra.mrb[16].mxu0 %vm384_vm1, %v29155_v18  ;;  %v9033_v18 = vld [vmem:[#allocation2 + $0x82] sm:$0xff] }
 0x477   : > { %19162 = vmatprep.mubr.msk.f32.mxu0 %vm384_vm1, %v29156_v46  ;;  %v9034_v46 = vld [vmem:[#allocation2 + $0x92] sm:$0xff] }
 0x47a   : > { %19163 = vmatmul.mubr.msk.f32.gmra.mrb[18].mxu0 %vm384_vm1, %v29157_v25  ;;  %v9035_v25 = vld [vmem:[#allocation2 + $0x9a] sm:$0xff] }
 0x47b   : > { %19165 = vmatprep.mubr.msk.f32.mxu0 %vm384_vm1, %v29158_v2  ;;  %v9036_v2 = vld [vmem:[#allocation2 + $0xaa] sm:$0xff] }
 0x47e   : > { %19166 = vmatmul.mubr.msk.f32.gmra.mrb[20].mxu0 %vm384_vm1, %v29159_v29  ;;  %v9037_v29 = vld [vmem:[#allocation2 + $0xb2] sm:$0xff] }
 0x47f   : > { %19168 = vmatprep.mubr.msk.f32.mxu0 %vm384_vm1, %v29160_v44  ;;  %v9038_v44 = vld [vmem:[#allocation2 + $0xc2] sm:$0xff] }
 0x482   : > { %19169 = vmatmul.mubr.msk.f32.gmra.mrb[22].mxu0 %vm384_vm1, %v29161_v1  ;;  %v9039_v1 = vld [vmem:[#allocation2 + $0xca] sm:$0xff] }
 0x483   : > { %19171 = vmatprep.mubr.msk.f32.mxu0 %vm384_vm1, %v29162_v48  ;;  %v9040_v48 = vld [vmem:[#allocation2 + $0xda] sm:$0xff] }
 0x486   : > { %19172 = vmatmul.mubr.msk.f32.gmra.mrb[24].mxu0 %vm384_vm1, %v29163_v52 }
 0x487   : > { %19174 = vmatprep.mubr.msk.f32.mxu0 %vm384_vm1, %v8276_v22 }
 0x48a   : > { %19175 = vmatmul.mubr.msk.f32.gmra.mrb[26].mxu0 %vm384_vm1, %v8277_v56  ;;  %v9041_v56 = vld [vmem:[#allocation2 + $0xe2] sm:$0xff] }
 0x48b   : > { %19177 = vmatprep.mubr.msk.f32.mxu0 %vm384_vm1, %v29164_v34  ;;  %v9042_v34 = vld [vmem:[#allocation2 + $0xf2] sm:$0xff] }
 0x48e   : > { %19178 = vmatmul.mubr.msk.f32.gmra.mrb[28].mxu0 %vm384_vm1, %v29165_v55  ;;  %v9046_v55 = vld [vmem:[#allocation2 + $0x122] sm:$0xff] }
 0x48f   : > { %19180 = vmatprep.mubr.msk.f32.mxu0 %vm384_vm1, %v8280_v31  ;;  %v9043_v31 = vld [vmem:[#allocation2 + $0xfa] sm:$0xff] }
 0x492   : > { %19181 = vmatmul.mubr.msk.f32.gmra.mrb[62].mxu0 %vm384_vm1, %v8281_v54  ;;  %v9047_v54 = vld [vmem:[#allocation2 + $0x12a] sm:$0xff] }
 0x493   : > { %19185 = vmatprep.mubr.msk.f32.mxu0 %vm384_vm1, %v29166_v50  ;;  %v9048_v50 = vld [vmem:[#allocation2 + $0x13a] sm:$0xff] }
 0x496   : > { %19186 = vmatmul.mubr.msk.f32.vlgmr.msra.gmra.mrb[0].mxu0 %vm384_vm1, %v29167_v49  ;;  %v9050_v49 = vld [vmem:[#allocation2 + $0x152] sm:$0xff] }
 0x497   : > { %19234 = vmatpush3.msk.msra.mxu0 %vm674_vm0, %v15926_v60  ;;  %19188 = vmatprep.mubr.msk.f32.mxu0 %vm384_vm1, %v29168_v51  ;;  %v8668_v60 = vld [vmem:[#allocation2 + $0x1b1] sm:$0xff] }
 0x498   : > { %19283 = vmatprep.subr.msk.mxu0 %vm674_vm0, %v25200_v23 }
 0x49a   : > { %19189 = vmatmul.mubr.msk.f32.gmra.mrb[2].mxu0 %vm384_vm1, %v29169_v58 }
 0x49b   : > { %19191 = vmatprep.mubr.msk.f32.mxu0 %vm384_vm1, %v8644_v19  ;;  %v9051_v19 = vld [vmem:[#allocation2 + $0x15a] sm:$0xff] }
 0x49e   : > { %19192 = vmatmul.mubr.msk.f32.gmra.mrb[4].mxu0 %vm384_vm1, %v8645_v17  ;;  %v9052_v17 = vld [vmem:[#allocation2 + $0x16a] sm:$0xff] }
 0x49f   : > { %19194 = vmatprep.mubr.msk.f32.mxu0 %vm384_vm1, %v8646_v3 }
 0x4a2   : > { %19195 = vmatmul.mubr.msk.f32.gmra.mrb[6].mxu0 %vm384_vm1, %v8647_v12  ;;  %v9053_v12 = vld [vmem:[#allocation2 + $0x172] sm:$0xff] }
 0x4a3   : > { %19197 = vmatprep.mubr.msk.f32.mxu0 %vm384_vm1, %v8648_v14 }
 0x4a5   : > { %v19032_v6 = vpop.f32.mrb[56].mxu0 }
 0x4a6   : > { %v7428_v11 = vpop.f32.mrb[57].mxu0  ;;  %19198 = vmatmul.mubr.msk.f32.gmra.mrb[8].mxu0 %vm384_vm1, %v8649_v7  ;;  %v9054_v7 = vld [vmem:[#allocation2 + $0x182] sm:$0xff]  ;;  %v9055_v6 = vld [vmem:[#allocation2 + $0x18a] sm:$0xff] }
 0x4a7   : > { %19200 = vmatprep.mubr.msk.f32.mxu0 %vm384_vm1, %v8650_v9 }
 0x4aa   : > { %19201 = vmatmul.mubr.msk.f32.gmra.mrb[10].mxu0 %vm384_vm1, %v8651_v26  ;;  %v9056_v26 = vld [vmem:[#allocation2 + $0x19a] sm:$0xff] }
 0x4ab   : > { %19203 = vmatprep.mubr.msk.f32.mxu0 %vm384_vm1, %v8652_v5 }
 0x4ae   : > { %19204 = vmatmul.mubr.msk.f32.gmra.mrb[12].mxu0 %vm384_vm1, %v8653_v10  ;;  %v9057_v10 = vld [vmem:[#allocation2 + $0x1a2] sm:$0xff] }
 0x4af   : > { %19206 = vmatprep.mubr.msk.f32.mxu0 %vm384_vm1, %v8654_v63 }
 0x4b2   : > { %19207 = vmatmul.mubr.msk.f32.gmra.mrb[14].mxu0 %vm384_vm1, %v8655_v32  ;;  %v9058_v32 = vld [vmem:[#allocation2 + $0x1b2] sm:$0xff] }
 0x4b3   : > { %19209 = vmatprep.mubr.msk.f32.mxu0 %vm384_vm1, %v8656_v4  ;;  %v18232_v37 = vpop.f32.mrb[32].mxu1 }
 0x4b4   : > { %v1218_v38 = vpop.f32.mrb[33].mxu1  ;;  %v9424_v37 = vld [vmem:[#allocation2 + $0x93] sm:$0xff] }
 0x4b6   : > { %19210 = vmatmul.mubr.msk.f32.gmra.mrb[16].mxu0 %vm384_vm1, %v8657_v61  ;;  %v9059_v61 = vld [vmem:[#allocation2 + $0x1ba] sm:$0xff] }
 0x4b7   : > { %19212 = vmatprep.mubr.msk.f32.mxu0 %vm384_vm1, %v8658_v62  ;;  %v25276_v51 = vpop.f32.mrb[0].mxu1 }
 0x4b8   : > { %v25279_v58 = vpop.f32.mrb[1].mxu1 }
 0x4ba   : > { %19213 = vmatmul.mubr.msk.f32.gmra.mrb[18].mxu0 %vm384_vm1, %v8659_v24  ;;  %v9060_v24 = vld [vmem:[#allocation2 + $0x1ca] sm:$0xff] }
 0x4bb   : > { %19215 = vmatprep.mubr.msk.f32.mxu0 %vm384_vm1, %v8660_v57  ;;  %v25282_v3 = vpop.f32.mrb[2].mxu1 }
 0x4bc   : > { %v25285_v14 = vpop.f32.mrb[3].mxu1 }
 0x4be   : > { %19216 = vmatmul.mubr.msk.f32.gmra.mrb[20].mxu0 %vm384_vm1, %v8661_v43 }
 0x4bf   : > { %19218 = vmatprep.mubr.msk.f32.mxu0 %vm384_vm1, %v8662_v20  ;;  %v25288_v9 = vpop.f32.mrb[4].mxu1  ;;  %v9061_v20 = vld [vmem:[#allocation2 + $0x1d2] sm:$0xff] }
 0x4c0   : > { %v25291_v11 = vpop.f32.mrb[5].mxu1 }
 0x4c2   : > { %19219 = vmatmul.mubr.msk.f32.gmra.mrb[22].mxu0 %vm384_vm1, %v8663_v15  ;;  %v9420_v15 = vld [vmem:[#allocation2 + $0x63] sm:$0xff] }
 0x4c3   : > { %19221 = vmatprep.mubr.msk.f32.mxu0 %vm384_vm1, %v8664_v16  ;;  %v25294_v5 = vpop.f32.mrb[6].mxu1 }
 0x4c4   : > { %v25297_v63 = vpop.f32.mrb[7].mxu1 }
 0x4c6   : > { %19222 = vmatmul.mubr.msk.f32.gmra.mrb[24].mxu0 %vm384_vm1, %v8665_v42 }
 0x4c7   : > { %19224 = vmatprep.mubr.msk.f32.mxu0 %vm384_vm1, %v8666_v33  ;;  %v25300_v4 = vpop.f32.mrb[8].mxu1  ;;  %v9421_v33 = vld [vmem:[#allocation2 + $0x6b] sm:$0xff] }
 0x4c8   : > { %v25303_v62 = vpop.f32.mrb[9].mxu1 }
 0x4ca   : > { %19225 = vmatmul.mubr.msk.f32.gmra.mrb[26].mxu0 %vm384_vm1, %v8667_v36  ;;  %v9422_v36 = vld [vmem:[#allocation2 + $0x7b] sm:$0xff] }
 0x4cb   : > { %19227 = vmatprep.mubr.msk.f32.mxu0 %vm384_vm1, %v8668_v60 }
 0x4ce   : > { %19228 = vmatmul.mubr.msk.f32.gmra.mrb[28].mxu0 %vm384_vm1, %v8669_v21 }
 0x4cf   : > { %19230 = vmatprep.mubr.msk.f32.mxu0 %vm384_vm1, %v8670_v47  ;;  %v9423_v47 = vld [vmem:[#allocation2 + $0x83] sm:$0xff] }
 0x4d2   : > { %19231 = vmatmul.mubr.msk.f32.gmra.mrb[64].mxu0 %vm384_vm1, %v8671_v39 }
 0x4d3   : > { %19235 = vmatprep.mubr.msk.f32.mxu0 %vm384_vm1, %v9030_v40  ;;  %v9425_v40 = vld [vmem:[#allocation2 + $0x9b] sm:$0xff] }
 0x4d6   : > { %19236 = vmatmul.mubr.msk.f32.vlgmr.msra.gmra.mrb[0].mxu0 %vm384_vm1, %v9031_v8  ;;  %v9426_v8 = vld [vmem:[#allocation2 + $0xab] sm:$0xff] }
 0x4d7   : > { %19284 = vmatpush3.msk.msra.mxu0 %vm674_vm0, %v25200_v23  ;;  %19238 = vmatprep.mubr.msk.f32.mxu0 %vm384_vm1, %v9032_v13  ;;  %v9049_v23 = vld [vmem:[#allocation2 + $0x142] sm:$0xff] }
 0x4d8   : > { %19333 = vmatprep.subr.msk.mxu0 %vm674_vm0, %v25251_v41 }
 0x4da   : > { %19239 = vmatmul.mubr.msk.f32.gmra.mrb[2].mxu0 %vm384_vm1, %v9033_v18 }
 0x4db   : > { %19241 = vmatprep.mubr.msk.f32.mxu0 %vm384_vm1, %v9034_v46  ;;  %v9428_v46 = vld [vmem:[#allocation2 + $0xc3] sm:$0xff] }
 0x4de   : > { %19242 = vmatmul.mubr.msk.f32.gmra.mrb[4].mxu0 %vm384_vm1, %v9035_v25 }
 0x4df   : > { %19244 = vmatprep.mubr.msk.f32.mxu0 %vm384_vm1, %v9036_v2 }
 0x4e2   : > { %19245 = vmatmul.mubr.msk.f32.gmra.mrb[6].mxu0 %vm384_vm1, %v9037_v29  ;;  %v9429_v29 = vld [vmem:[#allocation2 + $0xcb] sm:$0xff] }
 0x4e3   : > { %19247 = vmatprep.mubr.msk.f32.mxu0 %vm384_vm1, %v9038_v44  ;;  %v9430_v44 = vld [vmem:[#allocation2 + $0xdb] sm:$0xff] }
 0x4e5   : > { %v19082_v22 = vpop.f32.mrb[58].mxu0 }
 0x4e6   : > { %v7818_v52 = vpop.f32.mrb[59].mxu0  ;;  %19248 = vmatmul.mubr.msk.f32.gmra.mrb[8].mxu0 %vm384_vm1, %v9039_v1 }
 0x4e7   : > { %19250 = vmatprep.mubr.msk.f32.mxu0 %vm384_vm1, %v9040_v48 }
 0x4ea   : > { %19251 = vmatmul.mubr.msk.f32.gmra.mrb[10].mxu0 %vm384_vm1, %v9041_v56  ;;  %v9431_v56 = vld [vmem:[#allocation2 + $0xe3] sm:$0xff] }
 0x4eb   : > { %19253 = vmatprep.mubr.msk.f32.mxu0 %vm384_vm1, %v9042_v34  ;;  %v9432_v34 = vld [vmem:[#allocation2 + $0xf3] sm:$0xff] }
 0x4ee   : > { %19254 = vmatmul.mubr.msk.f32.gmra.mrb[12].mxu0 %vm384_vm1, %v9043_v31 }
 0x4ef   : > { %19256 = vmatprep.mubr.msk.f32.mxu0 %vm384_vm1, %v9044_v0 }
 0x4f2   : > { %19257 = vmatmul.mubr.msk.f32.gmra.mrb[14].mxu0 %vm384_vm1, %v9045_v45  ;;  %v9433_v45 = vld [vmem:[#allocation2 + $0xfb] sm:$0xff] }
 0x4f3   : > { %19259 = vmatprep.mubr.msk.f32.mxu0 %vm384_vm1, %v9046_v55  ;;  %v18282_v57 = vpop.f32.mrb[34].mxu1  ;;  %v9434_v55 = vld [vmem:[#allocation2 + $0x10b] sm:$0xff] }
 0x4f4   : > { %v1576_v43 = vpop.f32.mrb[35].mxu1  ;;  %v9445_v57 = vld [vmem:[#allocation2 + $0x18b] sm:$0xff] }
 0x4f5   : > { %v9446_v43 = vld [vmem:[#allocation2 + $0x19b] sm:$0xff] }
 0x4f6   : > { %19260 = vmatmul.mubr.msk.f32.gmra.mrb[16].mxu0 %vm384_vm1, %v9047_v54 }
 0x4f7   : > { %19262 = vmatprep.mubr.msk.f32.mxu0 %vm384_vm1, %v9048_v50  ;;  %v25307_v16 = vpop.f32.mrb[10].mxu1 }
 0x4f8   : > { %v25309_v42 = vpop.f32.mrb[11].mxu1 }
 0x4fa   : > { %19263 = vmatmul.mubr.msk.f32.gmra.mrb[18].mxu0 %vm384_vm1, %v9049_v23  ;;  %v9435_v23 = vld [vmem:[#allocation2 + $0x113] sm:$0xff] }
 0x4fb   : > { %19265 = vmatprep.mubr.msk.f32.mxu0 %vm384_vm1, %v9050_v49  ;;  %v25313_v60 = vpop.f32.mrb[12].mxu1  ;;  %v9436_v49 = vld [vmem:[#allocation2 + $0x123] sm:$0xff] }
 0x4fc   : > { %v25315_v21 = vpop.f32.mrb[13].mxu1 }
 0x4fe   : > { %19266 = vmatmul.mubr.msk.f32.gmra.mrb[20].mxu0 %vm384_vm1, %v9051_v19 }
 0x4ff   : > { %19268 = vmatprep.mubr.msk.f32.mxu0 %vm384_vm1, %v9052_v17  ;;  %v25321_v38 = vpop.f32.mrb[14].mxu1 }
 0x500   : > { %v25323_v39 = vpop.f32.mrb[15].mxu1 }
 0x502   : > { %19269 = vmatmul.mubr.msk.f32.gmra.mrb[22].mxu0 %vm384_vm1, %v9053_v12  ;;  %v9437_v12 = vld [vmem:[#allocation2 + $0x12b] sm:$0xff] }
 0x503   : > { %19271 = vmatprep.mubr.msk.f32.mxu0 %vm384_vm1, %v9054_v7  ;;  %v25327_v13 = vpop.f32.mrb[16].mxu1  ;;  %v9438_v7 = vld [vmem:[#allocation2 + $0x13b] sm:$0xff] }
 0x504   : > { %v25329_v18 = vpop.f32.mrb[17].mxu1 }
 0x506   : > { %19272 = vmatmul.mubr.msk.f32.gmra.mrb[24].mxu0 %vm384_vm1, %v9055_v6 }
 0x507   : > { %19274 = vmatprep.mubr.msk.f32.mxu0 %vm384_vm1, %v9056_v26  ;;  %v25333_v25 = vpop.f32.mrb[18].mxu1 }
 0x508   : > { %v25335_v2 = vpop.f32.mrb[19].mxu1 }
 0x50a   : > { %19275 = vmatmul.mubr.msk.f32.gmra.mrb[26].mxu0 %vm384_vm1, %v9057_v10  ;;  %v9439_v10 = vld [vmem:[#allocation2 + $0x143] sm:$0xff] }
 0x50b   : > { %19277 = vmatprep.mubr.msk.f32.mxu0 %vm384_vm1, %v9058_v32  ;;  %v25339_v1 = vpop.f32.mrb[20].mxu1  ;;  %v9440_v32 = vld [vmem:[#allocation2 + $0x153] sm:$0xff] }
 0x50c   : > { %v25341_v22 = vpop.f32.mrb[21].mxu1 }
 0x50e   : > { %19278 = vmatmul.mubr.msk.f32.gmra.mrb[28].mxu0 %vm384_vm1, %v9059_v61  ;;  %v9441_v61 = vld [vmem:[#allocation2 + $0x15b] sm:$0xff] }
 0x50f   : > { %19280 = vmatprep.mubr.msk.f32.mxu0 %vm384_vm1, %v9060_v24  ;;  %v25345_v31 = vpop.f32.mrb[22].mxu1  ;;  %v9444_v24 = vld [vmem:[#allocation2 + $0x183] sm:$0xff] }
 0x510   : > { %v25347_v0 = vpop.f32.mrb[23].mxu1 }
 0x512   : > { %19281 = vmatmul.mubr.msk.f32.gmra.mrb[66].mxu0 %vm384_vm1, %v9061_v20  ;;  %v9447_v20 = vld [vmem:[#allocation2 + $0x1a3] sm:$0xff] }
 0x513   : > { %19285 = vmatprep.mubr.msk.f32.mxu0 %vm384_vm1, %v9420_v15  ;;  %v25351_v54 = vpop.f32.mrb[24].mxu1  ;;  %v9448_v15 = vld [vmem:[#allocation2 + $0x1b3] sm:$0xff] }
 0x514   : > { %v25353_v50 = vpop.f32.mrb[25].mxu1 }
 0x516   : > { %19286 = vmatmul.mubr.msk.f32.vlgmr.msra.gmra.mrb[0].mxu0 %vm384_vm1, %v9421_v33  ;;  %v9449_v33 = vld [vmem:[#allocation2 + $0x1bb] sm:$0xff] }
 0x517   : > { %19334 = vmatpush3.msk.msra.mxu0 %vm674_vm0, %v25251_v41  ;;  %19288 = vmatprep.mubr.msk.f32.mxu0 %vm384_vm1, %v9422_v36  ;;  %v9427_v41 = vld [vmem:[#allocation2 + $0xb3] sm:$0xff]  ;;  %v25357_v19 = vpop.f32.mrb[26].mxu1  ;;  %v9810_v36 = vld [vmem:[#allocation2 + $0x64] sm:$0xff] }
 0x518   : > { %v25359_v17 = vpop.f32.mrb[27].mxu1 }
 0x51a   : > { %19289 = vmatmul.mubr.msk.f32.gmra.mrb[2].mxu0 %vm384_vm1, %v9423_v47  ;;  %v9811_v47 = vld [vmem:[#allocation2 + $0x6c] sm:$0xff] }
 0x51b   : > { %19291 = vmatprep.mubr.msk.f32.mxu0 %vm384_vm1, %v9424_v37  ;;  %v25363_v6 = vpop.f32.mrb[28].mxu1  ;;  %v9812_v37 = vld [vmem:[#allocation2 + $0x7c] sm:$0xff] }
 0x51c   : > { %v25365_v26 = vpop.f32.mrb[29].mxu1 }
 0x51e   : > { %19292 = vmatmul.mubr.msk.f32.gmra.mrb[4].mxu0 %vm384_vm1, %v9425_v40  ;;  %v9813_v40 = vld [vmem:[#allocation2 + $0x84] sm:$0xff] }
 0x51f   : > { %19294 = vmatprep.mubr.msk.f32.mxu0 %vm384_vm1, %v9426_v8  ;;  %v9814_v8 = vld [vmem:[#allocation2 + $0x94] sm:$0xff] }
 0x522   : > { %19295 = vmatmul.mubr.msk.f32.gmra.mrb[6].mxu0 %vm384_vm1, %v9427_v41  ;;  %v9815_v41 = vld [vmem:[#allocation2 + $0x9c] sm:$0xff] }
 0x523   : > { %19297 = vmatprep.mubr.msk.f32.mxu0 %vm384_vm1, %v9428_v46  ;;  %v9816_v46 = vld [vmem:[#allocation2 + $0xac] sm:$0xff] }
 0x525   : > { %v19132_v48 = vpop.f32.mrb[60].mxu0 }
 0x526   : > { %v8208_v52 = vpop.f32.mrb[61].mxu0  ;;  %19298 = vmatmul.mubr.msk.f32.gmra.mrb[8].mxu0 %vm384_vm1, %v9429_v29  ;;  %v9817_v29 = vld [vmem:[#allocation2 + $0xb4] sm:$0xff]  ;;  %v9819_v48 = vld [vmem:[#allocation2 + $0xcc] sm:$0xff] }
 0x527   : > { %19300 = vmatprep.mubr.msk.f32.mxu0 %vm384_vm1, %v9430_v44  ;;  %v9818_v44 = vld [vmem:[#allocation2 + $0xc4] sm:$0xff]  ;;  %v9820_v52 = vld [vmem:[#allocation2 + $0xdc] sm:$0xff] }
 0x52a   : > { %19301 = vmatmul.mubr.msk.f32.gmra.mrb[10].mxu0 %vm384_vm1, %v9431_v56 }
 0x52b   : > { %19303 = vmatprep.mubr.msk.f32.mxu0 %vm384_vm1, %v9432_v34 }
 0x52e   : > { %19304 = vmatmul.mubr.msk.f32.gmra.mrb[12].mxu0 %vm384_vm1, %v9433_v45  ;;  %v9821_v45 = vld [vmem:[#allocation2 + $0xe4] sm:$0xff] }
 0x52f   : > { %19306 = vmatprep.mubr.msk.f32.mxu0 %vm384_vm1, %v9434_v55  ;;  %v9822_v55 = vld [vmem:[#allocation2 + $0xf4] sm:$0xff] }
 0x532   : > { %19307 = vmatmul.mubr.msk.f32.gmra.mrb[14].mxu0 %vm384_vm1, %v9435_v23  ;;  %v9823_v23 = vld [vmem:[#allocation2 + $0xfc] sm:$0xff] }
 0x533   : > { %19309 = vmatprep.mubr.msk.f32.mxu0 %vm384_vm1, %v9436_v49  ;;  %v9824_v49 = vld [vmem:[#allocation2 + $0x10c] sm:$0xff] }
 0x536   : > { %19310 = vmatmul.mubr.msk.f32.gmra.mrb[16].mxu0 %vm384_vm1, %v9437_v12  ;;  %v9825_v12 = vld [vmem:[#allocation2 + $0x114] sm:$0xff] }
 0x537   : > { %19312 = vmatprep.mubr.msk.f32.mxu0 %vm384_vm1, %v9438_v7  ;;  %v9826_v7 = vld [vmem:[#allocation2 + $0x124] sm:$0xff] }
 0x53a   : > { %19313 = vmatmul.mubr.msk.f32.gmra.mrb[18].mxu0 %vm384_vm1, %v9439_v10  ;;  %v9827_v10 = vld [vmem:[#allocation2 + $0x12c] sm:$0xff] }
 0x53b   : > { %19315 = vmatprep.mubr.msk.f32.mxu0 %vm384_vm1, %v9440_v32  ;;  %v9828_v32 = vld [vmem:[#allocation2 + $0x13c] sm:$0xff] }
 0x53e   : > { %19316 = vmatmul.mubr.msk.f32.gmra.mrb[20].mxu0 %vm384_vm1, %v9441_v61  ;;  %v9829_v61 = vld [vmem:[#allocation2 + $0x144] sm:$0xff] }
 0x53f   : > { %19318 = vmatprep.mubr.msk.f32.mxu0 %vm384_vm1, %v25229_v59  ;;  %v9450_v59 = vld [vmem:[#allocation2 + $0x1cb] sm:$0xff] }
 0x542   : > { %19319 = vmatmul.mubr.msk.f32.gmra.mrb[22].mxu0 %vm384_vm1, %v25232_v28  ;;  %v9451_v28 = vld [vmem:[#allocation2 + $0x1d3] sm:$0xff] }
 0x543   : > { %19321 = vmatprep.mubr.msk.f32.mxu0 %vm384_vm1, %v9444_v24  ;;  %v9830_v24 = vld [vmem:[#allocation2 + $0x154] sm:$0xff] }
 0x546   : > { %19322 = vmatmul.mubr.msk.f32.gmra.mrb[24].mxu0 %vm384_vm1, %v9445_v57  ;;  %v9831_v57 = vld [vmem:[#allocation2 + $0x15c] sm:$0xff] }
 0x547   : > { %19324 = vmatprep.mubr.msk.f32.mxu0 %vm384_vm1, %v9446_v43  ;;  %v9832_v43 = vld [vmem:[#allocation2 + $0x16c] sm:$0xff] }
 0x54a   : > { %19325 = vmatmul.mubr.msk.f32.gmra.mrb[26].mxu0 %vm384_vm1, %v9447_v20  ;;  %v9833_v20 = vld [vmem:[#allocation2 + $0x174] sm:$0xff] }
 0x54b   : > { %19327 = vmatprep.mubr.msk.f32.mxu0 %vm384_vm1, %v9448_v15  ;;  %v9836_v15 = vld [vmem:[#allocation2 + $0x19c] sm:$0xff] }
 0x54e   : > { %19328 = vmatmul.mubr.msk.f32.gmra.mrb[28].mxu0 %vm384_vm1, %v9449_v33  ;;  %v9837_v33 = vld [vmem:[#allocation2 + $0x1a4] sm:$0xff] }
 0x54f   : > { %19330 = vmatprep.mubr.msk.f32.mxu0 %vm384_vm1, %v9450_v59  ;;  %v18332_v59 = vpop.f32.mrb[36].mxu1 }
 0x552   : > { %19331 = vmatmul.mubr.msk.f32.gmra.mrb[68].mxu0 %vm384_vm1, %v9451_v28  ;;  %v1966_v28 = vpop.f32.mrb[37].mxu1 }
 0x553   : > { %19335 = vmatprep.mubr.msk.f32.mxu0 %vm384_vm1, %v9810_v36  ;;  %v10733_v28 = vld [vmem:[%s28751_s3 + $0x10] sm:$0xff] }
 0x556   : > { %19336 = vmatmul.mubr.msk.f32.vlgmr.msra.gmra.mrb[0].mxu0 %vm384_vm1, %v9811_v47 }
 0x557   : > { %19338 = vmatprep.mubr.msk.f32.mxu0 %vm384_vm1, %v9812_v37 }
 0x55a   : > { %19339 = vmatmul.mubr.msk.f32.gmra.mrb[2].mxu0 %vm384_vm1, %v9813_v40  ;;  %v22810_v40 = vmov 0.0|0.0  }
 0x55b   : > { %19341 = vmatprep.mubr.msk.f32.mxu0 %vm384_vm1, %v9814_v8  ;;  %21093 = vmatprep.subr.bf16.mxu1 %v22810_v40 }
 0x55e   : > { %19342 = vmatmul.mubr.msk.f32.gmra.mrb[4].mxu0 %vm384_vm1, %v9815_v41  ;;  %v16033_v41 = vld [vmem:[%s28751_s3 + $0xa0] sm:$0xff] }
 0x55f   : > { %19344 = vmatprep.mubr.msk.f32.mxu0 %vm384_vm1, %v9816_v46  ;;  %v16034_v46 = vld [vmem:[%s28751_s3 + $0xa8] sm:$0xff] }
 0x562   : > { %19345 = vmatmul.mubr.msk.f32.gmra.mrb[6].mxu0 %vm384_vm1, %v9817_v29  ;;  %v21100_v29 = vpack.c.bf16 %v16034_v46, %v16033_v41  ;;  %v10738_v41 = vld [vmem:[%s28751_s3 + $0x38] sm:$0xff] }
 0x563   : > { %19347 = vmatprep.mubr.msk.f32.mxu0 %vm384_vm1, %v9818_v44  ;;  %v16035_v44 = vld [vmem:[%s28751_s3 + $0xb0] sm:$0xff] }
 0x565   : > { %v19182_v56 = vpop.f32.mrb[62].mxu0 }
 0x566   : > { %v8599_v34 = vpop.f32.mrb[63].mxu0  ;;  %19348 = vmatmul.mubr.msk.f32.gmra.mrb[8].mxu0 %vm384_vm1, %v9819_v48  ;;  %v16036_v48 = vld [vmem:[%s28751_s3 + $0xb8] sm:$0xff]  ;;  %v16037_v56 = vld [vmem:[%s28751_s3 + $0xc0] sm:$0xff] }
 0x567   : > { %19350 = vmatprep.mubr.msk.f32.mxu0 %vm384_vm1, %v9820_v52  ;;  %v21103_v52 = vpack.c.bf16 %v16036_v48, %v16035_v44  ;;  %v16038_v34 = vld [vmem:[%s28751_s3 + $0xc8] sm:$0xff] }
 0x568   : > { %v10740_v44 = vld [vmem:[%s28751_s3 + $0x48] sm:$0xff] }
 0x56a   : > { %19351 = vmatmul.mubr.msk.f32.gmra.mrb[10].mxu0 %vm384_vm1, %v9821_v45  ;;  %v21106_v45 = vpack.c.bf16 %v16038_v34, %v16037_v56  ;;  %v10742_v56 = vld [vmem:[%s28751_s3 + $0x58] sm:$0xff] }
 0x56b   : > { %19353 = vmatprep.mubr.msk.f32.mxu0 %vm384_vm1, %v9822_v55  ;;  %v16039_v55 = vld [vmem:[%s28751_s3 + $0xd0] sm:$0xff] }
 0x56e   : > { %19354 = vmatmul.mubr.msk.f32.gmra.mrb[12].mxu0 %vm384_vm1, %v9823_v23  ;;  %v16040_v23 = vld [vmem:[%s28751_s3 + $0xd8] sm:$0xff] }
 0x56f   : > { %19356 = vmatprep.mubr.msk.f32.mxu0 %vm384_vm1, %v9824_v49  ;;  %v21109_v49 = vpack.c.bf16 %v16040_v23, %v16039_v55  ;;  %v10744_v55 = vld [vmem:[%s28751_s3 + $0x68] sm:$0xff] }
 0x572   : > { %19357 = vmatmul.mubr.msk.f32.gmra.mrb[14].mxu0 %vm384_vm1, %v9825_v12  ;;  %v16041_v12 = vld [vmem:[%s28751_s3 + $0xe0] sm:$0xff] }
 0x573   : > { %19359 = vmatprep.mubr.msk.f32.mxu0 %vm384_vm1, %v9826_v7  ;;  %v16042_v7 = vld [vmem:[%s28751_s3 + $0xe8] sm:$0xff] }
 0x576   : > { %19360 = vmatmul.mubr.msk.f32.gmra.mrb[16].mxu0 %vm384_vm1, %v9827_v10  ;;  %v21112_v10 = vpack.c.bf16 %v16042_v7, %v16041_v12  ;;  %v10746_v12 = vld [vmem:[%s28751_s3 + $0x78] sm:$0xff] }
 0x577   : > { %19362 = vmatprep.mubr.msk.f32.mxu0 %vm384_vm1, %v9828_v32  ;;  %v16043_v32 = vld [vmem:[%s28751_s3 + $0xf0] sm:$0xff] }
 0x57a   : > { %19363 = vmatmul.mubr.msk.f32.gmra.mrb[18].mxu0 %vm384_vm1, %v9829_v61  ;;  %v16044_v61 = vld [vmem:[%s28751_s3 + $0xf8] sm:$0xff] }
 0x57b   : > { %19365 = vmatprep.mubr.msk.f32.mxu0 %vm384_vm1, %v9830_v24  ;;  %v21115_v24 = vpack.c.bf16 %v16044_v61, %v16043_v32 }
 0x57e   : > { %19366 = vmatmul.mubr.msk.f32.gmra.mrb[20].mxu0 %vm384_vm1, %v9831_v57  ;;  %v25475_v57 = vld [vmem:[#allocation5] sm:$0xff] }
 0x57f   : > { %19368 = vmatprep.mubr.msk.f32.mxu0 %vm384_vm1, %v9832_v43  ;;  %19415 = vmatprep.mubr.msk.f32.mxu1 %vm22811_vm3, %v25475_v57  ;;  %v10747_v43 = vld [vmem:[#allocation5 + $0x1] sm:$0xff] }
 0x582   : > { %19369 = vmatmul.mubr.msk.f32.gmra.mrb[22].mxu0 %vm384_vm1, %v9833_v20  ;;  %v10748_v20 = vld [vmem:[#allocation5 + $0x11] sm:$0xff] }
 0x583   : > { %19371 = vmatprep.mubr.msk.f32.mxu0 %vm384_vm1, %v25077_v27  ;;  %v16029_v27 = vld [vmem:[%s28751_s3 + $0x80] sm:$0xff] }
 0x586   : > { %19372 = vmatmul.mubr.msk.f32.gmra.mrb[24].mxu0 %vm384_vm1, %v25087_v30  ;;  %v16030_v30 = vld [vmem:[%s28751_s3 + $0x88] sm:$0xff] }
 0x587   : > { %19374 = vmatprep.mubr.msk.f32.mxu0 %vm384_vm1, %v9836_v15  ;;  %v21094_v37 = vpack.c.bf16 %v16030_v30, %v16029_v27  ;;  %v10731_v15 = vld [vmem:[%s28751_s3] sm:$0xff] }
 0x589   : > { %21095 = vmatpush3.bf16.msra.mxu1 %v21094_v37  ;;  %v10735_v37 = vld [vmem:[%s28751_s3 + $0x20] sm:$0xff] }
 0x58a   : > { %19375 = vmatmul.mubr.msk.f32.gmra.mrb[26].mxu0 %vm384_vm1, %v9837_v33  ;;  %21096 = vmatprep.subr.bf16.mxu1 %v22810_v40  ;;  %v10732_v33 = vld [vmem:[%s28751_s3 + $0x8] sm:$0xff] }
 0x58b   : > { %19377 = vmatprep.mubr.msk.f32.mxu0 %vm384_vm1, %v25097_v35  ;;  %v16031_v35 = vld [vmem:[%s28751_s3 + $0x90] sm:$0xff]  ;;  %v21118_v59 = vpack.c.bf16 %v10732_v33, %v10731_v15 }
 0x58e   : > { %19378 = vmatmul.mubr.msk.f32.gmra.mrb[28].mxu0 %vm384_vm1, %v25107_v53  ;;  %v16032_v53 = vld [vmem:[%s28751_s3 + $0x98] sm:$0xff] }
 0x58f   : > { %v21097_v8 = vpack.c.bf16 %v16032_v53, %v16031_v35  ;;  %v10736_v35 = vld [vmem:[%s28751_s3 + $0x28] sm:$0xff] }
 0x590   : > { %v21124_v53 = vpack.c.bf16 %v10736_v35, %v10735_v37 }
 0x591   : > { %21098 = vmatpush3.bf16.msra.mxu1 %v21097_v8  ;;  %v10737_v8 = vld [vmem:[%s28751_s3 + $0x30] sm:$0xff] }
 0x592   : > { %21099 = vmatprep.subr.bf16.mxu1 %v22810_v40  ;;  %v21127_v46 = vpack.c.bf16 %v10738_v41, %v10737_v8 }
 0x595   : > { %21101 = vmatpush3.bf16.msra.mxu1 %v21100_v29  ;;  %v10739_v29 = vld [vmem:[%s28751_s3 + $0x40] sm:$0xff] }
 0x596   : > { %21102 = vmatprep.subr.bf16.mxu1 %v22810_v40  ;;  %v21130_v48 = vpack.c.bf16 %v10740_v44, %v10739_v29 }
 0x599   : > { %21104 = vmatpush3.bf16.msra.mxu1 %v21103_v52  ;;  %v10741_v52 = vld [vmem:[%s28751_s3 + $0x50] sm:$0xff] }
 0x59a   : > { %21105 = vmatprep.subr.bf16.mxu1 %v22810_v40  ;;  %v21133_v34 = vpack.c.bf16 %v10742_v56, %v10741_v52 }
 0x59d   : > { %21107 = vmatpush3.bf16.msra.mxu1 %v21106_v45  ;;  %v10743_v45 = vld [vmem:[%s28751_s3 + $0x60] sm:$0xff] }
 0x59e   : > { %21108 = vmatprep.subr.bf16.mxu1 %v22810_v40  ;;  %v21136_v23 = vpack.c.bf16 %v10744_v55, %v10743_v45 }
 0x5a1   : > { %21110 = vmatpush3.bf16.msra.mxu1 %v21109_v49  ;;  %v10745_v49 = vld [vmem:[%s28751_s3 + $0x70] sm:$0xff] }
 0x5a2   : > { %21111 = vmatprep.subr.bf16.mxu1 %v22810_v40  ;;  %v21139_v7 = vpack.c.bf16 %v10746_v12, %v10745_v49 }
 0x5a5   : > { %v19232_v36 = vpop.f32.mrb[64].mxu0  ;;  %21113 = vmatpush3.bf16.msra.mxu1 %v21112_v10 }
 0x5a6   : > { %v8989_v47 = vpop.f32.mrb[65].mxu0  ;;  %21114 = vmatprep.subr.bf16.mxu1 %v22810_v40  ;;  %v10734_v36 = vld [vmem:[%s28751_s3 + $0x18] sm:$0xff] }
 0x5a7   : > { %v21121_v27 = vpack.c.bf16 %v10734_v36, %v10733_v28 }
 0x5a9   : > { %21116 = vmatpush3.bf16.msra.mxu1 %v21115_v24 }
 0x5aa   : > { %21117 = vmatprep.subr.bf16.mxu1 %v22810_v40 }
 0x5ac   : > { %19416 = vmatmul.mubr.f32.vlgmr.msra.gmra.mrb[38].mxu1 %v10747_v43 }
 0x5ad   : > { %19418 = vmatprep.mubr.msk.f32.mxu1 %vm22811_vm3, %v25475_v57  ;;  %21119 = vmatpush3.bf16.msra.mxu1 %v21118_v59 }
 0x5ae   : > { %21120 = vmatprep.subr.bf16.mxu1 %v22810_v40 }
 0x5b0   : > { %19419 = vmatmul.mubr.f32.gmra.mrb[40].mxu1 %v10748_v20  ;;  %v25543_v20 = vld [vmem:[%s28750_s2] ss:$0 sm:$0xff] }
 0x5b1   : > { %19421 = vmatprep.mubr.msk.f32.mxu1 %vm22811_vm3, %v25475_v57  ;;  %21122 = vmatpush3.bf16.msra.mxu1 %v21121_v27 }
 0x5b2   : > { %21123 = vmatprep.subr.bf16.mxu1 %v22810_v40 }
 0x5b5   : > { %21125 = vmatpush3.bf16.msra.mxu1 %v21124_v53 }
 0x5b6   : > { %21126 = vmatprep.subr.bf16.mxu1 %v22810_v40 }
 0x5b9   : > { %21128 = vmatpush3.bf16.msra.mxu1 %v21127_v46 }
 0x5ba   : > { %21129 = vmatprep.subr.bf16.mxu1 %v22810_v40 }
 0x5bd   : > { %21131 = vmatpush3.bf16.msra.mxu1 %v21130_v48 }
 0x5be   : > { %21132 = vmatprep.subr.bf16.mxu1 %v22810_v40 }
 0x5c1   : > { %21134 = vmatpush3.bf16.msra.mxu1 %v21133_v34 }
 0x5c2   : > { %21135 = vmatprep.subr.bf16.mxu1 %v22810_v40 }
 0x5c5   : > { %21137 = vmatpush3.bf16.msra.mxu1 %v21136_v23 }
 0x5c6   : > { %21138 = vmatprep.subr.bf16.mxu1 %v22810_v40 }
 0x5c9   : > { %21140 = vmatpush3.bf16.msra.mxu1 %v21139_v7 }
 0x5ca   : > { %21141 = vmatprep.subr.bf16.mxu1 %v22810_v40 }
 0x5e5   : > { %v19282_v30 = vpop.f32.mrb[66].mxu0 }
 0x5e6   : > { %v9379_v47 = vpop.f32.mrb[67].mxu0 }
 0x625   : > { %v19332_v10 = vpop.f32.mrb[68].mxu0 }
 0x626   : > { %v9769_v32 = vpop.f32.mrb[69].mxu0 }
 0x629   : > { %v19337_v61 = vpop.f32.mrb[0].mxu0 }
 0x62a   : > { %v21959_v24 = vadd.f32 %v19337_v61, %v25276_v51  ;;  %v10009_v43 = vpop.f32.mrb[1].mxu0 }
 0x62b   : > { %v21960_v15 = vadd.f32 %v10009_v43, %v25279_v58 }
 0x62c   : > { %v10208_v59 = vadd.f32 %v21959_v24, %v25543_v20 }
 0x62d   : > { %v19340_v33 = vpop.f32.mrb[2].mxu0  ;;  %v10207_v27 = vadd.f32 %v21960_v15, %v25543_v20 }
 0x62e   : > { %v21961_v28 = vadd.f32 %v19340_v33, %v25282_v3  ;;  %v10019_v36 = vpop.f32.mrb[3].mxu0  ;;  %v10240_v35 = vmax.f32 %v10208_v59, 0.0 }
 0x62f   : > { %v21962_v30 = vadd.f32 %v10019_v36, %v25285_v14  ;;  %v10239_v41 = vmax.f32 %v10207_v27, 0.0 }
 0x630   : > { %v10210_v51 = vadd.f32 %v21961_v28, %v25543_v20 }
 0x631   : > { %v10209_v47 = vadd.f32 %v21962_v30, %v25543_v20  ;;  %v19343_v37 = vpop.f32.mrb[4].mxu0 }
 0x632   : > { %v10242_v53 = vmax.f32 %v10210_v51, 0.0  ;;  %v21963_v8 = vadd.f32 %v19343_v37, %v25288_v9  ;;  %v10029_v58 = vpop.f32.mrb[5].mxu0 }
 0x633   : > { %v10241_v46 = vmax.f32 %v10209_v47, 0.0  ;;  %v21964_v29 = vadd.f32 %v10029_v58, %v25291_v11 }
 0x634   : > { %v10309_v3 = vmax.f32 %v10240_v35, %v10242_v53  ;;  %v10212_v44 = vadd.f32 %v21963_v8, %v25543_v20 }
 0x635   : > { %v10308_v48 = vmax.f32 %v10239_v41, %v10241_v46  ;;  %v10211_v14 = vadd.f32 %v21964_v29, %v25543_v20  ;;  %v19346_v52 = vpop.f32.mrb[6].mxu0 }
 0x636   : > { %v10244_v56 = vmax.f32 %v10212_v44, 0.0  ;;  %v21965_v34 = vadd.f32 %v19346_v52, %v25294_v5  ;;  %v10039_v45 = vpop.f32.mrb[7].mxu0 }
 0x637   : > { %v10243_v55 = vmax.f32 %v10211_v14, 0.0  ;;  %v21966_v23 = vadd.f32 %v10039_v45, %v25297_v63 }
 0x638   : > { %v10314_v9 = vmax.f32 %v10309_v3, %v10244_v56  ;;  %v10214_v49 = vadd.f32 %v21965_v34, %v25543_v20 }
 0x639   : > { %v10313_v12 = vmax.f32 %v10308_v48, %v10243_v55  ;;  %v10213_v11 = vadd.f32 %v21966_v23, %v25543_v20  ;;  %v19349_v7 = vpop.f32.mrb[8].mxu0 }
 0x63a   : > { %10316 = vst [vmem:[#allocation4 + $0x8] sm:$0xff] %v10314_v9  ;;  %v10246_v10 = vmax.f32 %v10214_v49, 0.0  ;;  %v21967_v32 = vadd.f32 %v19349_v7, %v25300_v4  ;;  %v10049_v61 = vpop.f32.mrb[9].mxu0 }
 0x63b   : > { %10315 = vst [vmem:[#allocation4] sm:$0xff] %v10313_v12  ;;  %v10245_v24 = vmax.f32 %v10213_v11, 0.0  ;;  %v21968_v5 = vadd.f32 %v10049_v61, %v25303_v62 }
 0x63c   : > { %v10323_v43 = vmax.f32 %v10244_v56, %v10246_v10  ;;  %v10216_v15 = vadd.f32 %v21967_v32, %v25543_v20 }
 0x63d   : > { %v10322_v63 = vmax.f32 %v10243_v55, %v10245_v24  ;;  %v10215_v33 = vadd.f32 %v21968_v5, %v25543_v20  ;;  %v19352_v59 = vpop.f32.mrb[10].mxu0 }
 0x63e   : > { %v10248_v28 = vmax.f32 %v10216_v15, 0.0  ;;  %v21969_v36 = vadd.f32 %v19352_v59, %v25307_v16  ;;  %v10059_v27 = vpop.f32.mrb[11].mxu0 }
 0x63f   : > { %v10247_v30 = vmax.f32 %v10215_v33, 0.0  ;;  %v21970_v51 = vadd.f32 %v10059_v27, %v25309_v42 }
 0x640   : > { %v10328_v4 = vmax.f32 %v10323_v43, %v10248_v28  ;;  %v10218_v62 = vadd.f32 %v21969_v36, %v25543_v20 }
 0x641   : > { %v10598_v47 = vld [vmem:[#allocation4 + $0x8] sm:$0x1]  ;;  %v10605_v37 = vld [vmem:[#allocation4 + $0x9] sm:$0x1]  ;;  %v10640_v35 = vld [vmem:[#allocation4 + $0xa] sm:$0x1]  ;;  %v10327_v53 = vmax.f32 %v10322_v63, %v10247_v30  ;;  %v10217_v8 = vadd.f32 %v21970_v51, %v25543_v20 }
 0x642   : > { %v10647_v58 = vld [vmem:[#allocation4 + $0xb] sm:$0x1]  ;;  %10331 = vst [vmem:[#allocation4 + $0x18] sm:$0xff] %v10328_v4  ;;  %v10429_v41 = vld [vmem:[#allocation4] sm:$0x1]  ;;  %v10612_v42 = vmax.f32 %v10598_v47, %v10605_v37  ;;  %v10250_v34 = vmax.f32 %v10218_v62, 0.0 }
 0x643   : > { %v10436_v46 = vld [vmem:[#allocation4 + $0x1] sm:$0x1]  ;;  %v10472_v29 = vld [vmem:[#allocation4 + $0x2] sm:$0x1]  ;;  %10330 = vst [vmem:[#allocation4 + $0x10] sm:$0xff] %v10327_v53  ;;  %v10654_v14 = vmax.f32 %v10640_v35, %v10647_v58  ;;  %v10249_v45 = vmax.f32 %v10217_v8, 0.0 }
 0x644   : > { %v10479_v16 = vld [vmem:[#allocation4 + $0x3] sm:$0x1]  ;;  %v10514_v3 = vld [vmem:[#allocation4 + $0x4] sm:$0x1]  ;;  %v10521_v44 = vld [vmem:[#allocation4 + $0x5] sm:$0x1]  ;;  %v10443_v48 = vmax.f32 %v10429_v41, %v10436_v46  ;;  %v10338_v32 = vmax.f32 %v10248_v28, %v10250_v34 }
 0x645   : > { %v10556_v52 = vld [vmem:[#allocation4 + $0x6] sm:$0x1]  ;;  %v10563_v56 = vld [vmem:[#allocation4 + $0x7] sm:$0x1]  ;;  %v10486_v55 = vmax.f32 %v10472_v29, %v10479_v16  ;;  %v10528_v23 = vmax.f32 %v10514_v3, %v10521_v44  ;;  %v25568_v9 = vld [vmem:[#allocation4 + $0xc] sm:$0x1]  ;;  %v10337_v61 = vmax.f32 %v10247_v30, %v10249_v45 }
 0x646   : > { %v25570_v49 = vld [vmem:[#allocation4 + $0xd] sm:$0x1]  ;;  %v19355_v12 = vpop.f32.mrb[12].mxu0  ;;  %v10450_v11 = vld [vmem:[#allocation4 + $0x2] sm:$0x1]  ;;  %v10570_v10 = vmax.f32 %v10556_v52, %v10563_v56 }
 0x647   : > { %v10493_v7 = vld [vmem:[#allocation4 + $0x4] sm:$0x1]  ;;  %v21971_v24 = vadd.f32 %v19355_v12, %v25313_v60  ;;  %v10069_v5 = vpop.f32.mrb[13].mxu0  ;;  %v10457_v43 = vmax.f32 %v10443_v48, %v10450_v11  ;;  %v10535_v15 = vld [vmem:[#allocation4 + $0x6] sm:$0x1] }
 0x648   : > { %v10577_v63 = vld [vmem:[#allocation4 + $0x8] sm:$0x1]  ;;  %v21972_v33 = vadd.f32 %v10069_v5, %v25315_v21  ;;  %v19358_v59 = vpop.f32.mrb[14].mxu0  ;;  %v10500_v36 = vmax.f32 %v10486_v55, %v10493_v7  ;;  %v10542_v27 = vmax.f32 %v10528_v23, %v10535_v15  ;;  %v10619_v4 = vld [vmem:[#allocation4 + $0xa] sm:$0x1] }
 0x649   : > { %v10584_v51 = vmax.f32 %v10570_v10, %v10577_v63  ;;  %v10661_v47 = vld [vmem:[#allocation4 + $0xc] sm:$0x1]  ;;  %v25574_v37 = vld [vmem:[#allocation4 + $0x18] sm:$0x1]  ;;  %v25576_v35 = vld [vmem:[#allocation4 + $0x19] sm:$0x1]  ;;  %v10220_v60 = vadd.f32 %v21971_v24, %v25543_v20  ;;  %v21973_v30 = vadd.f32 %v19358_v59, %v25321_v38  ;;  %v10626_v53 = vmax.f32 %v10612_v42, %v10619_v4 }
 0x64a   : > { %v25578_v28 = vld [vmem:[#allocation4 + $0x1a] sm:$0x1]  ;;  %10465 = vst [vmem:[#allocation5 + $0x22] sm:$0x1] %v10457_v43  ;;  %v10668_v62 = vmax.f32 %v10654_v14, %v10661_v47  ;;  %v10648_v21 = vld [vmem:[#allocation4 + $0x1b] sm:$0x1]  ;;  %v25587_v41 = vadd.f32 %v21972_v33, %v25543_v20  ;;  %v10696_v38 = vmax.f32 %v25568_v9, %v25570_v49  ;;  %v10613_v52 = vmax.f32 %v25574_v37, %v25576_v35 }
 0x64b   : > { %v25582_v8 = vld [vmem:[#allocation4 + $0x1c] sm:$0x1]  ;;  %v25584_v58 = vld [vmem:[#allocation4 + $0x1d] sm:$0x1]  ;;  %10507 = vst [vmem:[#allocation5 + $0x23] sm:$0x1] %v10500_v36  ;;  %v10222_v3 = vadd.f32 %v21973_v30, %v25543_v20  ;;  %v10655_v9 = vmax.f32 %v25578_v28, %v10648_v21 }
 0x64c   : > { %10549 = vst [vmem:[#allocation5 + $0x24] sm:$0x1] %v10542_v27  ;;  %10591 = vst [vmem:[#allocation5 + $0x25] sm:$0x1] %v10584_v51  ;;  %v10430_v46 = vld [vmem:[#allocation4 + $0x10] sm:$0x1]  ;;  %v10697_v49 = vmax.f32 %v25582_v8, %v25584_v58 }
 0x64d   : > { %v10437_v29 = vld [vmem:[#allocation4 + $0x11] sm:$0x1]  ;;  %v10473_v16 = vld [vmem:[#allocation4 + $0x12] sm:$0x1]  ;;  %10633 = vst [vmem:[#allocation5 + $0x26] sm:$0x1] %v10626_v53 }
 0x64e   : > { %10675 = vst [vmem:[#allocation5 + $0x27] sm:$0x1] %v10668_v62  ;;  %v10480_v44 = vld [vmem:[#allocation4 + $0x13] sm:$0x1]  ;;  %v10515_v48 = vld [vmem:[#allocation4 + $0x14] sm:$0x1]  ;;  %v10444_v14 = vmax.f32 %v10430_v46, %v10437_v29 }
 0x64f   : > { %v10522_v42 = vld [vmem:[#allocation4 + $0x15] sm:$0x1]  ;;  %v10557_v56 = vld [vmem:[#allocation4 + $0x16] sm:$0x1]  ;;  %v10564_v34 = vld [vmem:[#allocation4 + $0x17] sm:$0x1]  ;;  %v10487_v23 = vmax.f32 %v10473_v16, %v10480_v44 }
 0x650   : > { %v10252_v45 = vmax.f32 %v10220_v60, 0.0  ;;  %v10251_v55 = vmax.f32 %v25587_v41, 0.0  ;;  %v10529_v12 = vmax.f32 %v10515_v48, %v10522_v42  ;;  %v10254_v11 = vmax.f32 %v10222_v3, 0.0  ;;  %v10079_v7 = vpop.f32.mrb[15].mxu0  ;;  %v10703_v10 = vld [vmem:[#allocation4 + $0xe] sm:$0x1] }
 0x651   : > { %v10571_v24 = vmax.f32 %v10557_v56, %v10564_v34  ;;  %v21974_v15 = vadd.f32 %v10079_v7, %v25323_v39  ;;  %v19361_v63 = vpop.f32.mrb[16].mxu0  ;;  %v10710_v33 = vmax.f32 %v10696_v38, %v10703_v10  ;;  %v10451_v59 = vld [vmem:[#allocation4 + $0x12] sm:$0x1]  ;;  %v10494_v36 = vld [vmem:[#allocation4 + $0x14] sm:$0x1] }
 0x652   : > { %v10343_v5 = vmax.f32 %v10338_v32, %v10252_v45  ;;  %v10342_v43 = vmax.f32 %v10337_v61, %v10251_v55  ;;  %v10353_v27 = vmax.f32 %v10252_v45, %v10254_v11  ;;  %v21975_v51 = vadd.f32 %v19361_v63, %v25327_v13  ;;  %v10089_v4 = vpop.f32.mrb[17].mxu0  ;;  %v10536_v35 = vld [vmem:[#allocation4 + $0x16] sm:$0x1]  ;;  %v10578_v60 = vld [vmem:[#allocation4 + $0x18] sm:$0x1] }
 0x653   : > { %v10458_v47 = vmax.f32 %v10444_v14, %v10451_v59  ;;  %v10501_v37 = vmax.f32 %v10487_v23, %v10494_v36  ;;  %v10221_v28 = vadd.f32 %v21974_v15, %v25543_v20  ;;  %v21976_v32 = vadd.f32 %v10089_v4, %v25329_v18  ;;  %v19364_v61 = vpop.f32.mrb[18].mxu0  ;;  %10717 = vst [vmem:[#allocation5 + $0x28] sm:$0x1] %v10710_v33  ;;  %v10620_v53 = vld [vmem:[#allocation4 + $0x1a] sm:$0x1] }
 0x654   : > { %10346 = vst [vmem:[#allocation4 + $0x28] sm:$0xff] %v10343_v5  ;;  %10345 = vst [vmem:[#allocation4 + $0x20] sm:$0xff] %v10342_v43  ;;  %v10543_v39 = vmax.f32 %v10529_v12, %v10536_v35  ;;  %v10585_v30 = vmax.f32 %v10571_v24, %v10578_v60  ;;  %v10662_v62 = vld [vmem:[#allocation4 + $0x1c] sm:$0x1]  ;;  %v10224_v21 = vadd.f32 %v21975_v51, %v25543_v20  ;;  %v10099_v8 = vpop.f32.mrb[19].mxu0 }
 0x655   : > { %v21977_v13 = vadd.f32 %v19364_v61, %v25333_v25  ;;  %10466 = vst [vmem:[#allocation5 + $0x32] sm:$0x1] %v10458_v47  ;;  %10508 = vst [vmem:[#allocation5 + $0x33] sm:$0x1] %v10501_v37  ;;  %v10627_v58 = vmax.f32 %v10613_v52, %v10620_v53  ;;  %v10669_v41 = vmax.f32 %v10655_v9, %v10662_v62  ;;  %v10704_v46 = vld [vmem:[#allocation4 + $0x1e] sm:$0x1] }
 0x656   : > { %v10253_v29 = vmax.f32 %v10221_v28, 0.0  ;;  %v10223_v16 = vadd.f32 %v21976_v32, %v25543_v20  ;;  %v21978_v18 = vadd.f32 %v10099_v8, %v25335_v2  ;;  %v19367_v3 = vpop.f32.mrb[20].mxu0  ;;  %10550 = vst [vmem:[#allocation5 + $0x34] sm:$0x1] %v10543_v39  ;;  %10592 = vst [vmem:[#allocation5 + $0x35] sm:$0x1] %v10585_v30  ;;  %v10711_v38 = vmax.f32 %v10697_v49, %v10704_v46 }
 0x657   : > { %v10256_v44 = vmax.f32 %v10224_v21, 0.0  ;;  %v10226_v48 = vadd.f32 %v21977_v13, %v25543_v20  ;;  %v21979_v25 = vadd.f32 %v19367_v3, %v25339_v1  ;;  %v10109_v42 = vpop.f32.mrb[21].mxu0  ;;  %10634 = vst [vmem:[#allocation5 + $0x36] sm:$0x1] %v10627_v58  ;;  %10676 = vst [vmem:[#allocation5 + $0x37] sm:$0x1] %v10669_v41 }
 0x658   : > { %v10352_v14 = vmax.f32 %v10251_v55, %v10253_v29  ;;  %v10255_v52 = vmax.f32 %v10223_v16, 0.0  ;;  %v10225_v56 = vadd.f32 %v21978_v18, %v25543_v20  ;;  %v21980_v34 = vadd.f32 %v10109_v42, %v25341_v22  ;;  %v19370_v45 = vpop.f32.mrb[22].mxu0  ;;  %10718 = vst [vmem:[#allocation5 + $0x38] sm:$0x1] %v10711_v38 }
 0x659   : > { %v10358_v2 = vmax.f32 %v10353_v27, %v10256_v44  ;;  %v10258_v23 = vmax.f32 %v10226_v48, 0.0  ;;  %v21981_v12 = vadd.f32 %v19370_v45, %v25345_v31  ;;  %v10119_v11 = vpop.f32.mrb[23].mxu0  ;;  %v10228_v55 = vadd.f32 %v21979_v25, %v25543_v20 }
 0x65a   : > { %v10357_v7 = vmax.f32 %v10352_v14, %v10255_v52  ;;  %v10257_v10 = vmax.f32 %v10225_v56, 0.0  ;;  %v21982_v1 = vadd.f32 %v10119_v11, %v25347_v0  ;;  %v10227_v49 = vadd.f32 %v21980_v34, %v25543_v20  ;;  %v10749_v33 = vld [vmem:[#allocation5 + $0x21] sm:$0xff]  ;;  %v19373_v32 = vpop.f32.mrb[24].mxu0 }
 0x65b   : > { %10361 = vst [vmem:[#allocation4 + $0x38] sm:$0xff] %v10358_v2  ;;  %v10368_v24 = vmax.f32 %v10256_v44, %v10258_v23  ;;  %v10230_v22 = vadd.f32 %v21981_v12, %v25543_v20  ;;  %v10431_v43 = vld [vmem:[#allocation4 + $0x20] sm:$0x1]  ;;  %v10438_v15 = vld [vmem:[#allocation4 + $0x21] sm:$0x1]  ;;  %v10260_v59 = vmax.f32 %v10228_v55, 0.0  ;;  %19422 = vmatmul.mubr.f32.gmra.mrb[42].mxu1 %v10749_v33  ;;  %v21983_v62 = vadd.f32 %v19373_v32, %v25351_v54 }
 0x65c   : > { %10360 = vst [vmem:[#allocation4 + $0x30] sm:$0xff] %v10357_v7  ;;  %v10367_v9 = vmax.f32 %v10255_v52, %v10257_v10  ;;  %v10229_v5 = vadd.f32 %v21982_v1, %v25543_v20  ;;  %v10474_v31 = vld [vmem:[#allocation4 + $0x22] sm:$0x1]  ;;  %v10481_v63 = vld [vmem:[#allocation4 + $0x23] sm:$0x1]  ;;  %v10445_v36 = vmax.f32 %v10431_v43, %v10438_v15  ;;  %v10259_v35 = vmax.f32 %v10227_v49, 0.0  ;;  %19424 = vmatprep.mubr.msk.f32.mxu1 %vm22811_vm3, %v25475_v57 }
 0x65d   : > { %v10488_v0 = vmax.f32 %v10474_v31, %v10481_v63  ;;  %v25616_v27 = vld [vmem:[#allocation4 + $0x28] sm:$0x1]  ;;  %v25618_v51 = vld [vmem:[#allocation4 + $0x29] sm:$0x1]  ;;  %v25620_v4 = vld [vmem:[#allocation4 + $0x2a] sm:$0x1]  ;;  %v10373_v30 = vmax.f32 %v10368_v24, %v10260_v59  ;;  %v25629_v38 = vadd.f32 %v21983_v62, %v25543_v20 }
 0x65e   : > { %v25622_v47 = vld [vmem:[#allocation4 + $0x2b] sm:$0x1]  ;;  %v10516_v37 = vld [vmem:[#allocation4 + $0x24] sm:$0x1]  ;;  %v10262_v60 = vmax.f32 %v10230_v22, 0.0  ;;  %v10261_v28 = vmax.f32 %v10229_v5, 0.0  ;;  %v10372_v8 = vmax.f32 %v10367_v9, %v10259_v35  ;;  %v10614_v52 = vmax.f32 %v25616_v27, %v25618_v51 }
 0x65f   : > { %v10523_v61 = vld [vmem:[#allocation4 + $0x25] sm:$0x1]  ;;  %v10558_v39 = vld [vmem:[#allocation4 + $0x26] sm:$0x1]  ;;  %v10129_v21 = vpop.f32.mrb[25].mxu0  ;;  %10376 = vst [vmem:[#allocation4 + $0x48] sm:$0xff] %v10373_v30  ;;  %v10656_v56 = vmax.f32 %v25620_v4, %v25622_v47 }
 0x660   : > { %v10750_v53 = vld [vmem:[#allocation5 + $0x31] sm:$0xff]  ;;  %v10383_v58 = vmax.f32 %v10260_v59, %v10262_v60  ;;  %v10382_v41 = vmax.f32 %v10259_v35, %v10261_v28  ;;  %v21984_v46 = vadd.f32 %v10129_v21, %v25353_v50  ;;  %v10684_v18 = vld [vmem:[#allocation4 + $0x2c] sm:$0x1]  ;;  %v10691_v3 = vld [vmem:[#allocation4 + $0x2d] sm:$0x1]  ;;  %10375 = vst [vmem:[#allocation4 + $0x40] sm:$0xff] %v10372_v8  ;;  %v10530_v14 = vmax.f32 %v10516_v37, %v10523_v61 }
 0x661   : > { %v10565_v13 = vld [vmem:[#allocation4 + $0x27] sm:$0x1]  ;;  %v10452_v29 = vld [vmem:[#allocation4 + $0x22] sm:$0x1]  ;;  %v10495_v16 = vld [vmem:[#allocation4 + $0x24] sm:$0x1]  ;;  %19425 = vmatmul.mubr.f32.gmra.mrb[44].mxu1 %v10750_v53  ;;  %v10698_v2 = vmax.f32 %v10684_v18, %v10691_v3 }
 0x662   : > { %v10459_v44 = vmax.f32 %v10445_v36, %v10452_v29  ;;  %v10502_v48 = vmax.f32 %v10488_v0, %v10495_v16  ;;  %v25632_v54 = vadd.f32 %v21984_v46, %v25543_v20  ;;  %19427 = vmatprep.mubr.msk.f32.mxu1 %vm22811_vm3, %v25475_v57  ;;  %v10572_v50 = vmax.f32 %v10558_v39, %v10565_v13  ;;  %v19376_v7 = vpop.f32.mrb[26].mxu0  ;;  %v10537_v10 = vld [vmem:[#allocation4 + $0x26] sm:$0x1]  ;;  %v10579_v1 = vld [vmem:[#allocation4 + $0x28] sm:$0x1] }
 0x663   : > { %v10432_v25 = vld [vmem:[#allocation4 + $0x30] sm:$0x1]  ;;  %v10439_v42 = vld [vmem:[#allocation4 + $0x31] sm:$0x1]  ;;  %v10264_v34 = vmax.f32 %v25629_v38, 0.0  ;;  %v21985_v15 = vadd.f32 %v19376_v7, %v25357_v19  ;;  %v10139_v31 = vpop.f32.mrb[27].mxu0  ;;  %v10544_v63 = vmax.f32 %v10530_v14, %v10537_v10 }
 0x664   : > { %10467 = vst [vmem:[#allocation5 + $0x42] sm:$0x1] %v10459_v44  ;;  %10509 = vst [vmem:[#allocation5 + $0x43] sm:$0x1] %v10502_v48  ;;  %v10263_v45 = vmax.f32 %v25632_v54, 0.0  ;;  %v10446_v23 = vmax.f32 %v10432_v25, %v10439_v42  ;;  %v21986_v36 = vadd.f32 %v10139_v31, %v25359_v17  ;;  %v10586_v0 = vmax.f32 %v10572_v50, %v10579_v1  ;;  %v19379_v47 = vpop.f32.mrb[28].mxu0 }
 0x665   : > { %v25642_v12 = vld [vmem:[#allocation4 + $0x32] sm:$0x1]  ;;  %v25644_v11 = vld [vmem:[#allocation4 + $0x33] sm:$0x1]  ;;  %v25646_v24 = vld [vmem:[#allocation4 + $0x38] sm:$0x1]  ;;  %v10388_v5 = vmax.f32 %v10383_v58, %v10264_v34  ;;  %v10234_v32 = vadd.f32 %v21985_v15, %v25543_v20  ;;  %v21987_v61 = vadd.f32 %v19379_v47, %v25363_v6 }
 0x666   : > { %v25648_v55 = vld [vmem:[#allocation4 + $0x39] sm:$0x1]  ;;  %v25650_v9 = vld [vmem:[#allocation4 + $0x3a] sm:$0x1]  ;;  %v25652_v49 = vld [vmem:[#allocation4 + $0x3b] sm:$0x1]  ;;  %v10387_v43 = vmax.f32 %v10382_v41, %v10263_v45  ;;  %v10233_v17 = vadd.f32 %v21986_v36, %v25543_v20  ;;  %v10489_v53 = vmax.f32 %v25642_v12, %v25644_v11 }
 0x667   : > { %v25654_v22 = vld [vmem:[#allocation4 + $0x34] sm:$0x1]  ;;  %v10621_v33 = vld [vmem:[#allocation4 + $0x2a] sm:$0x1]  ;;  %v10663_v59 = vld [vmem:[#allocation4 + $0x2c] sm:$0x1]  ;;  %v10236_v30 = vadd.f32 %v21987_v61, %v25543_v20  ;;  %v10615_v13 = vmax.f32 %v25646_v24, %v25648_v55  ;;  %v10657_v6 = vmax.f32 %v25650_v9, %v25652_v49 }
 0x668   : > { %v10628_v27 = vmax.f32 %v10614_v52, %v10621_v33  ;;  %v10670_v51 = vmax.f32 %v10656_v56, %v10663_v59  ;;  %v10705_v4 = vld [vmem:[#allocation4 + $0x2e] sm:$0x1]  ;;  %v10453_v37 = vld [vmem:[#allocation4 + $0x32] sm:$0x1]  ;;  %v10524_v35 = vld [vmem:[#allocation4 + $0x35] sm:$0x1] }
 0x669   : > { %v10559_v60 = vld [vmem:[#allocation4 + $0x36] sm:$0x1]  ;;  %v10566_v28 = vld [vmem:[#allocation4 + $0x37] sm:$0x1]  ;;  %10391 = vst [vmem:[#allocation4 + $0x58] sm:$0xff] %v10388_v5  ;;  %10390 = vst [vmem:[#allocation4 + $0x50] sm:$0xff] %v10387_v43  ;;  %v10712_v19 = vmax.f32 %v10698_v2, %v10705_v4  ;;  %v10460_v39 = vmax.f32 %v10446_v23, %v10453_v37  ;;  %v10531_v62 = vmax.f32 %v25654_v22, %v10524_v35 }
 0x66a   : > { %10551 = vst [vmem:[#allocation5 + $0x44] sm:$0x1] %v10544_v63  ;;  %10593 = vst [vmem:[#allocation5 + $0x45] sm:$0x1] %v10586_v0  ;;  %v10573_v21 = vmax.f32 %v10559_v60, %v10566_v28  ;;  %v10685_v8 = vld [vmem:[#allocation4 + $0x3c] sm:$0x1] }
 0x66b   : > { %10635 = vst [vmem:[#allocation5 + $0x46] sm:$0x1] %v10628_v27  ;;  %10677 = vst [vmem:[#allocation5 + $0x47] sm:$0x1] %v10670_v51  ;;  %v10692_v58 = vld [vmem:[#allocation4 + $0x3d] sm:$0x1] }
 0x66c   : > { %10719 = vst [vmem:[#allocation5 + $0x48] sm:$0x1] %v10712_v19  ;;  %10468 = vst [vmem:[#allocation5 + $0x52] sm:$0x1] %v10460_v39  ;;  %v10433_v41 = vld [vmem:[#allocation4 + $0x40] sm:$0x1] }
 0x66d   : > { %v10440_v46 = vld [vmem:[#allocation4 + $0x41] sm:$0x1]  ;;  %v10476_v29 = vld [vmem:[#allocation4 + $0x42] sm:$0x1]  ;;  %v10483_v16 = vld [vmem:[#allocation4 + $0x43] sm:$0x1] }
 0x66e   : > { %v10266_v18 = vmax.f32 %v10234_v32, 0.0  ;;  %v10265_v3 = vmax.f32 %v10233_v17, 0.0  ;;  %v10602_v44 = vld [vmem:[#allocation4 + $0x48] sm:$0x1]  ;;  %v10609_v48 = vld [vmem:[#allocation4 + $0x49] sm:$0x1]  ;;  %v10490_v63 = vmax.f32 %v10476_v29, %v10483_v16 }
 0x66f   : > { %v10518_v25 = vld [vmem:[#allocation4 + $0x44] sm:$0x1]  ;;  %v10268_v42 = vmax.f32 %v10236_v30, 0.0  ;;  %v10149_v14 = vpop.f32.mrb[29].mxu0  ;;  %v10496_v50 = vld [vmem:[#allocation4 + $0x34] sm:$0x1]  ;;  %v10616_v36 = vmax.f32 %v10602_v44, %v10609_v48 }
 0x670   : > { %v10538_v52 = vld [vmem:[#allocation4 + $0x36] sm:$0x1]  ;;  %v10644_v56 = vld [vmem:[#allocation4 + $0x4a] sm:$0x1]  ;;  %v10398_v2 = vmax.f32 %v10264_v34, %v10266_v18  ;;  %v10397_v23 = vmax.f32 %v10263_v45, %v10265_v3  ;;  %v21988_v12 = vadd.f32 %v10149_v14, %v25365_v26  ;;  %v10503_v11 = vmax.f32 %v10489_v53, %v10496_v50  ;;  %v10580_v7 = vld [vmem:[#allocation4 + $0x38] sm:$0x1] }
 0x671   : > { %v10622_v10 = vld [vmem:[#allocation4 + $0x3a] sm:$0x1]  ;;  %v10664_v1 = vld [vmem:[#allocation4 + $0x3c] sm:$0x1]  ;;  %v10525_v24 = vld [vmem:[#allocation4 + $0x45] sm:$0x1]  ;;  %v10545_v49 = vmax.f32 %v10531_v62, %v10538_v52  ;;  %v10587_v22 = vmax.f32 %v10573_v21, %v10580_v7  ;;  %v10699_v26 = vmax.f32 %v10685_v8, %v10692_v58  ;;  %v10447_v45 = vmax.f32 %v10433_v41, %v10440_v46 }
 0x672   : > { %v10560_v55 = vld [vmem:[#allocation4 + $0x46] sm:$0x1]  ;;  %v10567_v9 = vld [vmem:[#allocation4 + $0x47] sm:$0x1]  ;;  %v10629_v5 = vmax.f32 %v10615_v13, %v10622_v10  ;;  %v10671_v43 = vmax.f32 %v10657_v6, %v10664_v1  ;;  %v10651_v15 = vld [vmem:[#allocation4 + $0x4b] sm:$0x1]  ;;  %v10403_v34 = vmax.f32 %v10398_v2, %v10268_v42  ;;  %v10235_v54 = vadd.f32 %v21988_v12, %v25543_v20 }
 0x673   : > { %v10686_v31 = vld [vmem:[#allocation4 + $0x4c] sm:$0x1]  ;;  %v10693_v38 = vld [vmem:[#allocation4 + $0x4d] sm:$0x1]  ;;  %10510 = vst [vmem:[#allocation5 + $0x53] sm:$0x1] %v10503_v11  ;;  %v10532_v33 = vmax.f32 %v10518_v25, %v10525_v24  ;;  %v10574_v59 = vmax.f32 %v10560_v55, %v10567_v9  ;;  %v10658_v51 = vmax.f32 %v10644_v56, %v10651_v15 }
 0x674   : > { %10552 = vst [vmem:[#allocation5 + $0x54] sm:$0x1] %v10545_v49  ;;  %10594 = vst [vmem:[#allocation5 + $0x55] sm:$0x1] %v10587_v22  ;;  %v25679_v0 = vld [vmem:[#allocation5 + $0x41] sm:$0xff]  ;;  %v10267_v27 = vmax.f32 %v10235_v54, 0.0  ;;  %v10700_v4 = vmax.f32 %v10686_v31, %v10693_v38 }
 0x675   : > { %10636 = vst [vmem:[#allocation5 + $0x56] sm:$0x1] %v10629_v5  ;;  %10678 = vst [vmem:[#allocation5 + $0x57] sm:$0x1] %v10671_v43  ;;  %19428 = vmatmul.mubr.f32.gmra.mrb[46].mxu1 %v25679_v0  ;;  %v10706_v20 = vld [vmem:[#allocation4 + $0x3e] sm:$0x1] }
 0x676   : > { %10406 = vst [vmem:[#allocation4 + $0x68] sm:$0xff] %v10403_v34  ;;  %v10454_v47 = vld [vmem:[#allocation4 + $0x42] sm:$0x1]  ;;  %v10497_v37 = vld [vmem:[#allocation4 + $0x44] sm:$0x1]  ;;  %v10402_v35 = vmax.f32 %v10397_v23, %v10267_v27  ;;  %19430 = vmatprep.mubr.msk.f32.mxu1 %vm22811_vm3, %v25475_v57  ;;  %v10713_v60 = vmax.f32 %v10699_v26, %v10706_v20  ;;  %v16046_v46 = vld [vmem:[%s28751_s3 + $0x108] sm:$0xff] }
 0x677   : > { %v10461_v28 = vmax.f32 %v10447_v45, %v10454_v47  ;;  %v10504_v32 = vmax.f32 %v10490_v63, %v10497_v37  ;;  %v10539_v19 = vld [vmem:[#allocation4 + $0x46] sm:$0x1]  ;;  %v10581_v61 = vld [vmem:[#allocation4 + $0x48] sm:$0x1]  ;;  %v10623_v39 = vld [vmem:[#allocation4 + $0x4a] sm:$0x1] }
 0x678   : > { %v10546_v17 = vmax.f32 %v10532_v33, %v10539_v19  ;;  %v10588_v30 = vmax.f32 %v10574_v59, %v10581_v61  ;;  %v10630_v53 = vmax.f32 %v10616_v36, %v10623_v39  ;;  %v10665_v62 = vld [vmem:[#allocation4 + $0x4c] sm:$0x1]  ;;  %v10707_v21 = vld [vmem:[#allocation4 + $0x4e] sm:$0x1]  ;;  %10405 = vst [vmem:[#allocation4 + $0x60] sm:$0xff] %v10402_v35  ;;  %v16045_v41 = vld [vmem:[%s28751_s3 + $0x100] sm:$0xff] }
 0x679   : > { %10720 = vst [vmem:[#allocation5 + $0x58] sm:$0x1] %v10713_v60  ;;  %10469 = vst [vmem:[#allocation5 + $0x62] sm:$0x1] %v10461_v28  ;;  %v10672_v13 = vmax.f32 %v10658_v51, %v10665_v62  ;;  %v10714_v6 = vmax.f32 %v10700_v4, %v10707_v21  ;;  %v10603_v29 = vld [vmem:[#allocation4 + $0x58] sm:$0x1]  ;;  %v21142_v12 = vpack.c.bf16 %v16046_v46, %v16045_v41 }
 0x67a   : > { %10511 = vst [vmem:[#allocation5 + $0x63] sm:$0x1] %v10504_v32  ;;  %10553 = vst [vmem:[#allocation5 + $0x64] sm:$0x1] %v10546_v17  ;;  %v10610_v16 = vld [vmem:[#allocation4 + $0x59] sm:$0x1] }
 0x67b   : > { %10595 = vst [vmem:[#allocation5 + $0x65] sm:$0x1] %v10588_v30  ;;  %10637 = vst [vmem:[#allocation5 + $0x66] sm:$0x1] %v10630_v53  ;;  %v10645_v18 = vld [vmem:[#allocation4 + $0x5a] sm:$0x1]  ;;  %v10617_v54 = vmax.f32 %v10603_v29, %v10610_v16 }
 0x67c   : > { %10679 = vst [vmem:[#allocation5 + $0x67] sm:$0x1] %v10672_v13  ;;  %10721 = vst [vmem:[#allocation5 + $0x68] sm:$0x1] %v10714_v6  ;;  %v10434_v3 = vld [vmem:[#allocation4 + $0x50] sm:$0x1] }
 0x67d   : > { %v10441_v44 = vld [vmem:[#allocation4 + $0x51] sm:$0x1]  ;;  %v10477_v48 = vld [vmem:[#allocation4 + $0x52] sm:$0x1]  ;;  %v10484_v25 = vld [vmem:[#allocation4 + $0x53] sm:$0x1] }
 0x67e   : > { %v10519_v42 = vld [vmem:[#allocation4 + $0x54] sm:$0x1]  ;;  %v10526_v14 = vld [vmem:[#allocation4 + $0x55] sm:$0x1]  ;;  %v10652_v50 = vld [vmem:[#allocation4 + $0x5b] sm:$0x1]  ;;  %v10448_v24 = vmax.f32 %v10434_v3, %v10441_v44  ;;  %v10491_v55 = vmax.f32 %v10477_v48, %v10484_v25 }
 0x67f   : > { %v10561_v52 = vld [vmem:[#allocation4 + $0x56] sm:$0x1]  ;;  %v10568_v56 = vld [vmem:[#allocation4 + $0x57] sm:$0x1]  ;;  %v10687_v2 = vld [vmem:[#allocation4 + $0x5c] sm:$0x1]  ;;  %v10533_v9 = vmax.f32 %v10519_v42, %v10526_v14  ;;  %v10659_v26 = vmax.f32 %v10645_v18, %v10652_v50 }
 0x680   : > { %v25684_v8 = vld [vmem:[#allocation5 + $0x51] sm:$0xff]  ;;  %v10694_v23 = vld [vmem:[#allocation4 + $0x5d] sm:$0x1]  ;;  %v16047_v11 = vld [vmem:[%s28751_s3 + $0x110] sm:$0xff]  ;;  %v10575_v34 = vmax.f32 %v10561_v52, %v10568_v56 }
 0x681   : > { %19431 = vmatmul.mubr.f32.gmra.mrb[48].mxu1 %v25684_v8  ;;  %v25703_v7 = vld [vmem:[#allocation4 + $0x60] sm:$0x1]  ;;  %v25705_v10 = vld [vmem:[#allocation4 + $0x61] sm:$0x1]  ;;  %v16048_v1 = vld [vmem:[%s28751_s3 + $0x118] sm:$0xff]  ;;  %v10701_v27 = vmax.f32 %v10687_v2, %v10694_v23 }
 0x682   : > { %19433 = vmatprep.mubr.msk.f32.mxu1 %vm22811_vm3, %v25475_v57  ;;  %v25710_v49 = vld [vmem:[#allocation4 + $0x68] sm:$0x1]  ;;  %v25712_v22 = vld [vmem:[#allocation4 + $0x69] sm:$0x1]  ;;  %v25714_v5 = vld [vmem:[#allocation4 + $0x6a] sm:$0x1]  ;;  %v21145_v51 = vpack.c.bf16 %v16048_v1, %v16047_v11  ;;  %v10449_v37 = vmax.f32 %v25703_v7, %v25705_v10 }
 0x683   : > { %v25689_v58 = vld [vmem:[#allocation5 + $0x61] sm:$0xff]  ;;  %v25716_v43 = vld [vmem:[#allocation4 + $0x6b] sm:$0x1]  ;;  %v10478_v15 = vld [vmem:[#allocation4 + $0x62] sm:$0x1]  ;;  %v10618_v29 = vmax.f32 %v25710_v49, %v25712_v22 }
 0x684   : > { %v10485_v31 = vld [vmem:[#allocation4 + $0x63] sm:$0x1]  ;;  %v10520_v38 = vld [vmem:[#allocation4 + $0x64] sm:$0x1]  ;;  %v10527_v45 = vld [vmem:[#allocation4 + $0x65] sm:$0x1]  ;;  %v10660_v16 = vmax.f32 %v25714_v5, %v25716_v43 }
 0x685   : > { %19434 = vmatmul.mubr.f32.gmra.mrb[50].mxu1 %v25689_v58  ;;  %v10562_v63 = vld [vmem:[#allocation4 + $0x66] sm:$0x1]  ;;  %v10569_v33 = vld [vmem:[#allocation4 + $0x67] sm:$0x1]  ;;  %v16050_v36 = vld [vmem:[%s28751_s3 + $0x128] sm:$0xff]  ;;  %v10492_v39 = vmax.f32 %v10478_v15, %v10485_v31  ;;  %v10534_v6 = vmax.f32 %v10520_v38, %v10527_v45 }
 0x686   : > { %19468 = vmatprep.mubr.msk.f32.mxu1 %vm22811_vm3, %v25475_v57  ;;  %v16049_v59 = vld [vmem:[%s28751_s3 + $0x120] sm:$0xff]  ;;  %v10455_v4 = vld [vmem:[#allocation4 + $0x52] sm:$0x1]  ;;  %v10498_v20 = vld [vmem:[#allocation4 + $0x54] sm:$0x1]  ;;  %v10576_v46 = vmax.f32 %v10562_v63, %v10569_v33 }
 0x687   : > { %v10540_v47 = vld [vmem:[#allocation4 + $0x56] sm:$0x1]  ;;  %v10462_v35 = vmax.f32 %v10448_v24, %v10455_v4  ;;  %v10505_v60 = vmax.f32 %v10491_v55, %v10498_v20  ;;  %v10582_v32 = vld [vmem:[#allocation4 + $0x58] sm:$0x1]  ;;  %v10624_v19 = vld [vmem:[#allocation4 + $0x5a] sm:$0x1]  ;;  %v21148_v3 = vpack.c.bf16 %v16050_v36, %v16049_v59 }
 0x688   : > { %v10547_v28 = vmax.f32 %v10533_v9, %v10540_v47  ;;  %v10666_v61 = vld [vmem:[#allocation4 + $0x5c] sm:$0x1]  ;;  %v10688_v17 = vld [vmem:[#allocation4 + $0x6c] sm:$0x1]  ;;  %v10695_v30 = vld [vmem:[#allocation4 + $0x6d] sm:$0x1]  ;;  %v10589_v53 = vmax.f32 %v10575_v34, %v10582_v32  ;;  %v10631_v62 = vmax.f32 %v10617_v54, %v10624_v19 }
 0x689   : > { %19469 = vmatmul.mubr.f32.vlgmr.msra.gmra.mrb[52].mxu1 %v25475_v57  ;;  %v10673_v21 = vmax.f32 %v10659_v26, %v10666_v61  ;;  %v10708_v13 = vld [vmem:[#allocation4 + $0x5e] sm:$0x1]  ;;  %10470 = vst [vmem:[#allocation5 + $0x72] sm:$0x1] %v10462_v35  ;;  %10512 = vst [vmem:[#allocation5 + $0x73] sm:$0x1] %v10505_v60  ;;  %v10702_v14 = vmax.f32 %v10688_v17, %v10695_v30 }
 0x68a   : > { %21143 = vmatpush3.bf16.msra.mxu1 %v21142_v12  ;;  %19471 = vmatprep.mubr.msk.f32.mxu1 %vm22811_vm3, %v25475_v57  ;;  %10554 = vst [vmem:[#allocation5 + $0x74] sm:$0x1] %v10547_v28  ;;  %v10715_v41 = vmax.f32 %v10701_v27, %v10708_v13  ;;  %v25737_v18 = vld [vmem:[#allocation5 + $0x20] sm:$0xff]  ;;  %v16052_v48 = vld [vmem:[%s28751_s3 + $0x138] sm:$0xff]  ;;  %10596 = vst [vmem:[#allocation5 + $0x75] sm:$0x1] %v10589_v53 }
 0x68b   : > { %21144 = vmatprep.subr.bf16.mxu1 %v22810_v40  ;;  %v16051_v44 = vld [vmem:[%s28751_s3 + $0x130] sm:$0xff]  ;;  %10638 = vst [vmem:[#allocation5 + $0x76] sm:$0x1] %v10631_v62  ;;  %10680 = vst [vmem:[#allocation5 + $0x77] sm:$0x1] %v10673_v21  ;;  %v16053_v9 = vld [vmem:[%s28751_s3 + $0x140] sm:$0xff] }
 0x68c   : > { %10722 = vst [vmem:[#allocation5 + $0x78] sm:$0x1] %v10715_v41  ;;  %v10456_v25 = vld [vmem:[#allocation4 + $0x62] sm:$0x1]  ;;  %v10499_v42 = vld [vmem:[#allocation4 + $0x64] sm:$0x1]  ;;  %v21151_v24 = vpack.c.bf16 %v16052_v48, %v16051_v44 }
 0x68d   : > { %19472 = vmatmul.mubr.f32.gmra.mrb[54].mxu1 %v25475_v57  ;;  %v10463_v50 = vmax.f32 %v10449_v37, %v10456_v25  ;;  %v10506_v52 = vmax.f32 %v10492_v39, %v10499_v42  ;;  %v10583_v2 = vld [vmem:[#allocation4 + $0x68] sm:$0x1]  ;;  %v10625_v23 = vld [vmem:[#allocation4 + $0x6a] sm:$0x1]  ;;  %v10667_v12 = vld [vmem:[#allocation4 + $0x6c] sm:$0x1] }
 0x68e   : > { %21146 = vmatpush3.bf16.msra.mxu1 %v21145_v51  ;;  %19474 = vmatprep.mubr.msk.f32.mxu1 %vm22811_vm3, %v25475_v57  ;;  %v10541_v57 = vld [vmem:[#allocation4 + $0x66] sm:$0x1]  ;;  %v10590_v11 = vmax.f32 %v10576_v46, %v10583_v2  ;;  %v10632_v7 = vmax.f32 %v10618_v29, %v10625_v23  ;;  %v10674_v10 = vmax.f32 %v10660_v16, %v10667_v12  ;;  %v25747_v1 = vld [vmem:[#allocation5] sm:$0xff]  ;;  %v10709_v55 = vld [vmem:[#allocation4 + $0x6e] sm:$0x1]  ;;  %v25839_v62 = vpop.f32.mrb[38].mxu1 }
 0x68f   : > { %21147 = vmatprep.subr.bf16.mxu1 %v22810_v40  ;;  %v10548_v56 = vmax.f32 %v10534_v6, %v10541_v57  ;;  %10471 = vst [vmem:[#allocation5 + $0x82] sm:$0x1] %v10463_v50  ;;  %10513 = vst [vmem:[#allocation5 + $0x83] sm:$0x1] %v10506_v52  ;;  %v16054_v49 = vld [vmem:[%s28751_s3 + $0x148] sm:$0xff]  ;;  %v10716_v22 = vmax.f32 %v10702_v14, %v10709_v55  ;;  %v25758_v5 = vld [vmem:[#allocation5 + $0x30] sm:$0xff] }
 0x690   : > { %10597 = vst [vmem:[#allocation5 + $0x85] sm:$0x1] %v10590_v11  ;;  %10639 = vst [vmem:[#allocation5 + $0x86] sm:$0x1] %v10632_v7  ;;  %v21154_v43 = vpack.c.bf16 %v16054_v49, %v16053_v9  ;;  %v16055_v15 = vld [vmem:[%s28751_s3 + $0x150] sm:$0xff]  ;;  %v16056_v31 = vld [vmem:[%s28751_s3 + $0x158] sm:$0xff] }
 0x691   : > { %19475 = vmatmul.mubr.f32.gmra.mrb[56].mxu1 %v25737_v18  ;;  %10555 = vst [vmem:[#allocation5 + $0x84] sm:$0x1] %v10548_v56  ;;  %10681 = vst [vmem:[#allocation5 + $0x87] sm:$0x1] %v10674_v10  ;;  %v25770_v38 = vld [vmem:[#allocation5 + $0x40] sm:$0xff]  ;;  %v21157_v34 = vpack.c.bf16 %v16056_v31, %v16055_v15  ;;  %v16057_v54 = vld [vmem:[%s28751_s3 + $0x160] sm:$0xff] }
 0x692   : > { %21149 = vmatpush3.bf16.msra.mxu1 %v21148_v3  ;;  %19477 = vmatprep.mubr.msk.f32.mxu1 %vm22811_vm3, %v25747_v1  ;;  %10723 = vst [vmem:[#allocation5 + $0x88] sm:$0x1] %v10716_v22  ;;  %v16058_v26 = vld [vmem:[%s28751_s3 + $0x168] sm:$0xff]  ;;  %v25782_v45 = vld [vmem:[#allocation5 + $0x50] sm:$0xff]  ;;  %v16059_v33 = vld [vmem:[%s28751_s3 + $0x170] sm:$0xff]  ;;  %v19417_v6 = vpop.f32.mrb[39].mxu1 }
 0x693   : > { %21150 = vmatprep.subr.bf16.mxu1 %v22810_v40  ;;  %v21160_v63 = vpack.c.bf16 %v16058_v26, %v16057_v54  ;;  %v16060_v59 = vld [vmem:[%s28751_s3 + $0x178] sm:$0xff]  ;;  %v25794_v36 = vld [vmem:[#allocation5 + $0x60] sm:$0xff]  ;;  %v16061_v51 = vld [vmem:[%s28751_s3 + $0x180] sm:$0xff]  ;;  %v25853_v29 = vpop.f32.mrb[40].mxu1 }
 0x694   : > { %v21163_v27 = vpack.c.bf16 %v16060_v59, %v16059_v33  ;;  %v16062_v4 = vld [vmem:[%s28751_s3 + $0x188] sm:$0xff]  ;;  %v10971_v20 = vld [vmem:[#allocation5 + $0x2] sm:$0xff]  ;;  %v16065_v32 = vld [vmem:[%s28751_s3 + $0x1a0] sm:$0xff]  ;;  %v19420_v44 = vpop.f32.mrb[41].mxu1 }
 0x695   : > { %19478 = vmatmul.mubr.f32.gmra.mrb[58].mxu1 %v25758_v5  ;;  %v21166_v47 = vpack.c.bf16 %v16062_v4, %v16061_v51  ;;  %v16063_v37 = vld [vmem:[%s28751_s3 + $0x190] sm:$0xff]  ;;  %v16064_v35 = vld [vmem:[%s28751_s3 + $0x198] sm:$0xff]  ;;  %v25815_v60 = vld [vmem:[#allocation5 + $0x12] sm:$0xff] }
 0x696   : > { %21152 = vmatpush3.bf16.msra.mxu1 %v21151_v24  ;;  %19480 = vmatprep.mubr.msk.f32.mxu1 %vm22811_vm3, %v25747_v1  ;;  %v21169_v28 = vpack.c.bf16 %v16064_v35, %v16063_v37  ;;  %v16066_v19 = vld [vmem:[%s28751_s3 + $0x1a8] sm:$0xff]  ;;  %v16067_v39 = vld [vmem:[%s28751_s3 + $0x1b0] sm:$0xff]  ;;  %v16068_v17 = vld [vmem:[%s28751_s3 + $0x1b8] sm:$0xff] }
 0x697   : > { %21153 = vmatprep.subr.bf16.mxu1 %v22810_v40  ;;  %v21172_v61 = vpack.c.bf16 %v16066_v19, %v16065_v32  ;;  %v25834_v30 = vld [vmem:[#allocation5 + $0x22] sm:$0xff]  ;;  %v21175_v53 = vpack.c.bf16 %v16068_v17, %v16067_v39  ;;  %v16069_v21 = vld [vmem:[%s28751_s3 + $0x1c0] sm:$0xff]  ;;  %v16070_v13 = vld [vmem:[%s28751_s3 + $0x1c8] sm:$0xff] }
 0x698   : > { %v25848_v41 = vld [vmem:[#allocation5 + $0x32] sm:$0xff]  ;;  %v21178_v46 = vpack.c.bf16 %v16070_v13, %v16069_v21  ;;  %v16071_v16 = vld [vmem:[%s28751_s3 + $0x1d0] sm:$0xff]  ;;  %v16072_v3 = vld [vmem:[%s28751_s3 + $0x1d8] sm:$0xff] }
 0x699   : > { %19481 = vmatmul.mubr.f32.gmra.mrb[60].mxu1 %v25770_v38  ;;  %v25862_v48 = vld [vmem:[#allocation5 + $0x42] sm:$0xff]  ;;  %v21181_v25 = vpack.c.bf16 %v16072_v3, %v16071_v16  ;;  %v16073_v42 = vld [vmem:[%s28751_s3 + $0x1e0] sm:$0xff]  ;;  %v16074_v57 = vld [vmem:[%s28751_s3 + $0x1e8] sm:$0xff] }
 0x69a   : > { %21155 = vmatpush3.bf16.msra.mxu1 %v21154_v43  ;;  %19483 = vmatprep.mubr.msk.f32.mxu1 %vm22811_vm3, %v25747_v1  ;;  %v25874_v14 = vld [vmem:[#allocation5 + $0x52] sm:$0xff]  ;;  %v21184_v50 = vpack.c.bf16 %v16074_v57, %v16073_v42  ;;  %v16075_v52 = vld [vmem:[%s28751_s3 + $0x1f0] sm:$0xff]  ;;  %v16076_v56 = vld [vmem:[%s28751_s3 + $0x1f8] sm:$0xff] }
 0x69b   : > { %21156 = vmatprep.subr.bf16.mxu1 %v22810_v40  ;;  %v25886_v2 = vld [vmem:[#allocation5 + $0x62] sm:$0xff]  ;;  %v21187_v23 = vpack.c.bf16 %v16076_v56, %v16075_v52  ;;  %v16077_v12 = vld [vmem:[%s28751_s3 + $0x200] sm:$0xff]  ;;  %v16078_v11 = vld [vmem:[%s28751_s3 + $0x208] sm:$0xff] }
 0x69c   : > { %v11102_v7 = vld [vmem:[#allocation5 + $0x3] sm:$0xff]  ;;  %v21190_v10 = vpack.c.bf16 %v16078_v11, %v16077_v12  ;;  %v25907_v9 = vld [vmem:[#allocation5 + $0x13] sm:$0xff] }
 0x69d   : > { %19484 = vmatmul.mubr.f32.gmra.mrb[62].mxu1 %v25782_v45  ;;  %v16079_v24 = vld [vmem:[%s28751_s3 + $0x210] sm:$0xff]  ;;  %v16080_v55 = vld [vmem:[%s28751_s3 + $0x218] sm:$0xff]  ;;  %v16081_v22 = vld [vmem:[%s28751_s3 + $0x220] sm:$0xff] }
 0x69e   : > { %21158 = vmatpush3.bf16.msra.mxu1 %v21157_v34  ;;  %19486 = vmatprep.mubr.msk.f32.mxu1 %vm22811_vm3, %v25747_v1  ;;  %v21193_v49 = vpack.c.bf16 %v16080_v55, %v16079_v24  ;;  %v16082_v43 = vld [vmem:[%s28751_s3 + $0x228] sm:$0xff]  ;;  %v16083_v31 = vld [vmem:[%s28751_s3 + $0x230] sm:$0xff]  ;;  %v16084_v34 = vld [vmem:[%s28751_s3 + $0x238] sm:$0xff] }
 0x69f   : > { %21159 = vmatprep.subr.bf16.mxu1 %v22810_v40  ;;  %v21196_v15 = vpack.c.bf16 %v16082_v43, %v16081_v22  ;;  %v25926_v54 = vld [vmem:[#allocation5 + $0x23] sm:$0xff]  ;;  %v21199_v26 = vpack.c.bf16 %v16084_v34, %v16083_v31  ;;  %v16086_v33 = vld [vmem:[%s28751_s3 + $0x248] sm:$0xff]  ;;  %v16089_v37 = vld [vmem:[%s28751_s3 + $0x260] sm:$0xff] }
 0x6a0   : > { %v25938_v59 = vld [vmem:[#allocation5 + $0x33] sm:$0xff]  ;;  %v16087_v51 = vld [vmem:[%s28751_s3 + $0x250] sm:$0xff]  ;;  %v16088_v4 = vld [vmem:[%s28751_s3 + $0x258] sm:$0xff] }
 0x6a1   : > { %19487 = vmatmul.mubr.f32.gmra.mrb[64].mxu1 %v25794_v36  ;;  %v16090_v35 = vld [vmem:[%s28751_s3 + $0x268] sm:$0xff]  ;;  %v16091_v19 = vld [vmem:[%s28751_s3 + $0x270] sm:$0xff]  ;;  %v16096_v16 = vld [vmem:[%s28751_s3 + $0x298] sm:$0xff] }
 0x6a2   : > { %21161 = vmatpush3.bf16.msra.mxu1 %v21160_v63  ;;  %19521 = vmatprep.mubr.msk.f32.mxu1 %vm22811_vm3, %v25747_v1  ;;  %v16085_v63 = vld [vmem:[%s28751_s3 + $0x240] sm:$0xff]  ;;  %v21208_v32 = vpack.c.bf16 %v16090_v35, %v16089_v37  ;;  %v25974_v39 = vld [vmem:[#allocation5 + $0x63] sm:$0xff]  ;;  %v16094_v21 = vld [vmem:[%s28751_s3 + $0x288] sm:$0xff] }
 0x6a3   : > { %21162 = vmatprep.subr.bf16.mxu1 %v22810_v40  ;;  %v11233_v13 = vld [vmem:[#allocation5 + $0x4] sm:$0xff]  ;;  %v25995_v3 = vld [vmem:[#allocation5 + $0x14] sm:$0xff] }
 0x6a4   : > { %v16098_v42 = vld [vmem:[%s28751_s3 + $0x2a8] sm:$0xff]  ;;  %v16100_v52 = vld [vmem:[%s28751_s3 + $0x2b8] sm:$0xff]  ;;  %v16101_v12 = vld [vmem:[%s28751_s3 + $0x2c0] sm:$0xff] }
 0x6a5   : > { %v26014_v56 = vld [vmem:[#allocation5 + $0x24] sm:$0xff]  ;;  %v16102_v11 = vld [vmem:[%s28751_s3 + $0x2c8] sm:$0xff]  ;;  %v16105_v43 = vld [vmem:[%s28751_s3 + $0x2e0] sm:$0xff] }
 0x6a6   : > { %21164 = vmatpush3.bf16.msra.mxu1 %v21163_v27  ;;  %v21202_v27 = vpack.c.bf16 %v16086_v33, %v16085_v63  ;;  %v16103_v24 = vld [vmem:[%s28751_s3 + $0x2d0] sm:$0xff]  ;;  %v16104_v55 = vld [vmem:[%s28751_s3 + $0x2d8] sm:$0xff]  ;;  %v26050_v31 = vld [vmem:[#allocation5 + $0x54] sm:$0xff] }
 0x6a7   : > { %21165 = vmatprep.subr.bf16.mxu1 %v22810_v40  ;;  %v21229_v22 = vpack.c.bf16 %v16104_v55, %v16103_v24  ;;  %v16108_v63 = vld [vmem:[%s28751_s3 + $0x2f8] sm:$0xff]  ;;  %v16111_v37 = vld [vmem:[%s28751_s3 + $0x310] sm:$0xff] }
 0x6a8   : > { %v26062_v33 = vld [vmem:[#allocation5 + $0x64] sm:$0xff] }
 0x6a9   : > { %19522 = vmatmul.mubr.f32.vlgmr.msra.gmra.mrb[66].mxu1 %v10971_v20  ;;  %v25950_v20 = vld [vmem:[#allocation5 + $0x43] sm:$0xff] }
 0x6aa   : > { %21167 = vmatpush3.bf16.msra.mxu1 %v21166_v47  ;;  %19524 = vmatprep.mubr.msk.f32.mxu1 %vm22811_vm3, %v25747_v1  ;;  %v21205_v47 = vpack.c.bf16 %v16088_v4, %v16087_v51  ;;  %v16109_v51 = vld [vmem:[%s28751_s3 + $0x300] sm:$0xff]  ;;  %v16110_v4 = vld [vmem:[%s28751_s3 + $0x308] sm:$0xff]  ;;  %v16112_v35 = vld [vmem:[%s28751_s3 + $0x318] sm:$0xff] }
 0x6ab   : > { %21168 = vmatprep.subr.bf16.mxu1 %v22810_v40  ;;  %v16128_v24 = vld [vmem:[%s28751_s3 + $0x398] sm:$0xff] }
 0x6ad   : > { %19525 = vmatmul.mubr.f32.gmra.mrb[68].mxu1 %v25815_v60 }
 0x6ae   : > { %21170 = vmatpush3.bf16.msra.mxu1 %v21169_v28  ;;  %19527 = vmatprep.mubr.msk.f32.mxu1 %vm22811_vm3, %v25747_v1  ;;  %v25962_v28 = vld [vmem:[#allocation5 + $0x53] sm:$0xff] }
 0x6af   : > { %21171 = vmatprep.subr.bf16.mxu1 %v22810_v40 }
 0x6b1   : > { %19528 = vmatmul.mubr.f32.gmra.mrb[70].mxu1 %v25834_v30 }
 0x6b2   : > { %21173 = vmatpush3.bf16.msra.mxu1 %v21172_v61  ;;  %19530 = vmatprep.mubr.msk.f32.mxu1 %vm22811_vm3, %v25747_v1  ;;  %v16092_v61 = vld [vmem:[%s28751_s3 + $0x278] sm:$0xff] }
 0x6b3   : > { %21174 = vmatprep.subr.bf16.mxu1 %v22810_v40  ;;  %v21211_v17 = vpack.c.bf16 %v16092_v61, %v16091_v19  ;;  %v16113_v19 = vld [vmem:[%s28751_s3 + $0x320] sm:$0xff]  ;;  %v16114_v61 = vld [vmem:[%s28751_s3 + $0x328] sm:$0xff] }
 0x6b5   : > { %19531 = vmatmul.mubr.f32.gmra.mrb[72].mxu1 %v25848_v41 }
 0x6b6   : > { %21176 = vmatpush3.bf16.msra.mxu1 %v21175_v53  ;;  %19533 = vmatprep.mubr.msk.f32.mxu1 %vm22811_vm3, %v25747_v1  ;;  %v16093_v53 = vld [vmem:[%s28751_s3 + $0x280] sm:$0xff] }
 0x6b7   : > { %21177 = vmatprep.subr.bf16.mxu1 %v22810_v40  ;;  %v21214_v6 = vpack.c.bf16 %v16094_v21, %v16093_v53  ;;  %v16115_v53 = vld [vmem:[%s28751_s3 + $0x330] sm:$0xff]  ;;  %v16116_v21 = vld [vmem:[%s28751_s3 + $0x338] sm:$0xff] }
 0x6b9   : > { %19534 = vmatmul.mubr.f32.gmra.mrb[74].mxu1 %v25862_v48 }
 0x6ba   : > { %21179 = vmatpush3.bf16.msra.mxu1 %v21178_v46  ;;  %19536 = vmatprep.mubr.msk.f32.mxu1 %vm22811_vm3, %v25747_v1  ;;  %v16095_v46 = vld [vmem:[%s28751_s3 + $0x290] sm:$0xff] }
 0x6bb   : > { %21180 = vmatprep.subr.bf16.mxu1 %v22810_v40  ;;  %v21217_v44 = vpack.c.bf16 %v16096_v16, %v16095_v46  ;;  %v16119_v46 = vld [vmem:[%s28751_s3 + $0x350] sm:$0xff]  ;;  %v16120_v16 = vld [vmem:[%s28751_s3 + $0x358] sm:$0xff] }
 0x6bd   : > { %19537 = vmatmul.mubr.f32.gmra.mrb[76].mxu1 %v25874_v14 }
 0x6be   : > { %21182 = vmatpush3.bf16.msra.mxu1 %v21181_v25  ;;  %19539 = vmatprep.mubr.msk.f32.mxu1 %vm22811_vm3, %v25747_v1  ;;  %v16097_v25 = vld [vmem:[%s28751_s3 + $0x2a0] sm:$0xff] }
 0x6bf   : > { %21183 = vmatprep.subr.bf16.mxu1 %v22810_v40  ;;  %v21220_v57 = vpack.c.bf16 %v16098_v42, %v16097_v25  ;;  %v16122_v25 = vld [vmem:[%s28751_s3 + $0x368] sm:$0xff]  ;;  %v16123_v42 = vld [vmem:[%s28751_s3 + $0x370] sm:$0xff] }
 0x6c1   : > { %19540 = vmatmul.mubr.f32.gmra.mrb[78].mxu1 %v25886_v2 }
 0x6c2   : > { %21185 = vmatpush3.bf16.msra.mxu1 %v21184_v50  ;;  %19574 = vmatprep.mubr.msk.f32.mxu1 %vm22811_vm3, %v25747_v1  ;;  %v16099_v50 = vld [vmem:[%s28751_s3 + $0x2b0] sm:$0xff] }
 0x6c3   : > { %21186 = vmatprep.subr.bf16.mxu1 %v22810_v40 }
 0x6c6   : > { %21188 = vmatpush3.bf16.msra.mxu1 %v21187_v23  ;;  %v21223_v23 = vpack.c.bf16 %v16100_v52, %v16099_v50  ;;  %v26141_v50 = vld [vmem:[#allocation5 + $0x70] sm:$0xff] }
 0x6c7   : > { %21189 = vmatprep.subr.bf16.mxu1 %v22810_v40  ;;  %v16125_v52 = vld [vmem:[%s28751_s3 + $0x380] sm:$0xff] }
 0x6c9   : > { %19575 = vmatmul.mubr.f32.vlgmr.msra.gmra.mrb[80].mxu1 %v11102_v7  ;;  %v26026_v7 = vld [vmem:[#allocation5 + $0x34] sm:$0xff] }
 0x6ca   : > { %21191 = vmatpush3.bf16.msra.mxu1 %v21190_v10  ;;  %19577 = vmatprep.mubr.msk.f32.mxu1 %vm22811_vm3, %v25747_v1  ;;  %v21226_v10 = vpack.c.bf16 %v16102_v11, %v16101_v12  ;;  %v11496_v12 = vld [vmem:[#allocation5 + $0x11] sm:$0xff] }
 0x6cb   : > { %21192 = vmatprep.subr.bf16.mxu1 %v22810_v40 }
 0x6cd   : > { %19578 = vmatmul.mubr.f32.gmra.mrb[82].mxu1 %v25907_v9 }
 0x6ce   : > { %21194 = vmatpush3.bf16.msra.mxu1 %v21193_v49  ;;  %19580 = vmatprep.mubr.msk.f32.mxu1 %vm22811_vm3, %v25747_v1  ;;  %v26038_v49 = vld [vmem:[#allocation5 + $0x44] sm:$0xff] }
 0x6cf   : > { %21195 = vmatprep.subr.bf16.mxu1 %v22810_v40 }
 0x6d1   : > { %19581 = vmatmul.mubr.f32.gmra.mrb[84].mxu1 %v25926_v54 }
 0x6d2   : > { %21197 = vmatpush3.bf16.msra.mxu1 %v21196_v15  ;;  %19583 = vmatprep.mubr.msk.f32.mxu1 %vm22811_vm3, %v25747_v1  ;;  %v16106_v15 = vld [vmem:[%s28751_s3 + $0x2e8] sm:$0xff] }
 0x6d3   : > { %21198 = vmatprep.subr.bf16.mxu1 %v22810_v40  ;;  %v21232_v34 = vpack.c.bf16 %v16106_v15, %v16105_v43  ;;  %v16130_v43 = vld [vmem:[%s28751_s3 + $0x3a8] sm:$0xff]  ;;  %v26169_v15 = vld [vmem:[#allocation5 + $0x21] sm:$0xff] }
 0x6d5   : > { %19584 = vmatmul.mubr.f32.gmra.mrb[86].mxu1 %v25938_v59 }
 0x6d6   : > { %21200 = vmatpush3.bf16.msra.mxu1 %v21199_v26  ;;  %19586 = vmatprep.mubr.msk.f32.mxu1 %vm22811_vm3, %v25747_v1  ;;  %v16107_v26 = vld [vmem:[%s28751_s3 + $0x2f0] sm:$0xff] }
 0x6d7   : > { %21201 = vmatprep.subr.bf16.mxu1 %v22810_v40 }
 0x6d9   : > { %19587 = vmatmul.mubr.f32.gmra.mrb[88].mxu1 %v25950_v20 }
 0x6da   : > { %21203 = vmatpush3.bf16.msra.mxu1 %v21202_v27  ;;  %19589 = vmatprep.mubr.msk.f32.mxu1 %vm22811_vm3, %v25747_v1  ;;  %v21235_v27 = vpack.c.bf16 %v16108_v63, %v16107_v26  ;;  %v16131_v26 = vld [vmem:[%s28751_s3 + $0x3b0] sm:$0xff]  ;;  %v16132_v63 = vld [vmem:[%s28751_s3 + $0x3b8] sm:$0xff] }
 0x6db   : > { %21204 = vmatprep.subr.bf16.mxu1 %v22810_v40 }
 0x6dd   : > { %19590 = vmatmul.mubr.f32.gmra.mrb[90].mxu1 %v25962_v28 }
 0x6de   : > { %21206 = vmatpush3.bf16.msra.mxu1 %v21205_v47  ;;  %19592 = vmatprep.mubr.msk.f32.mxu1 %vm22811_vm3, %v25747_v1  ;;  %v21238_v47 = vpack.c.bf16 %v16110_v4, %v16109_v51  ;;  %v21271_v4 = vpack.c.bf16 %v16132_v63, %v16131_v26  ;;  %v16153_v63 = vld [vmem:[%s28751_s3 + $0x460] sm:$0xff] }
 0x6df   : > { %21207 = vmatprep.subr.bf16.mxu1 %v22810_v40 }
 0x6e1   : > { %19593 = vmatmul.mubr.f32.gmra.mrb[92].mxu1 %v25974_v39 }
 0x6e2   : > { %21209 = vmatpush3.bf16.msra.mxu1 %v21208_v32  ;;  %19627 = vmatprep.mubr.msk.f32.mxu1 %vm22811_vm3, %v25747_v1  ;;  %v21241_v32 = vpack.c.bf16 %v16112_v35, %v16111_v37  ;;  %v16133_v37 = vld [vmem:[%s28751_s3 + $0x3c0] sm:$0xff]  ;;  %v16134_v35 = vld [vmem:[%s28751_s3 + $0x3c8] sm:$0xff] }
 0x6e3   : > { %21210 = vmatprep.subr.bf16.mxu1 %v22810_v40 }
 0x6e6   : > { %21212 = vmatpush3.bf16.msra.mxu1 %v21211_v17  ;;  %v21244_v17 = vpack.c.bf16 %v16114_v61, %v16113_v19  ;;  %v21274_v19 = vpack.c.bf16 %v16134_v35, %v16133_v37 }
 0x6e7   : > { %21213 = vmatprep.subr.bf16.mxu1 %v22810_v40 }
 0x6e9   : > { %19628 = vmatmul.mubr.f32.vlgmr.msra.gmra.mrb[94].mxu1 %v11233_v13  ;;  %v16117_v13 = vld [vmem:[%s28751_s3 + $0x340] sm:$0xff] }
 0x6ea   : > { %21215 = vmatpush3.bf16.msra.mxu1 %v21214_v6  ;;  %19630 = vmatprep.mubr.msk.f32.mxu1 %vm22811_vm3, %v25747_v1  ;;  %v16118_v6 = vld [vmem:[%s28751_s3 + $0x348] sm:$0xff] }
 0x6eb   : > { %21216 = vmatprep.subr.bf16.mxu1 %v22810_v40 }
 0x6ed   : > { %19631 = vmatmul.mubr.f32.gmra.mrb[96].mxu1 %v25995_v3 }
 0x6ee   : > { %21218 = vmatpush3.bf16.msra.mxu1 %v21217_v44  ;;  %19633 = vmatprep.mubr.msk.f32.mxu1 %vm22811_vm3, %v25747_v1  ;;  %v16121_v44 = vld [vmem:[%s28751_s3 + $0x360] sm:$0xff] }
 0x6ef   : > { %21219 = vmatprep.subr.bf16.mxu1 %v22810_v40 }
 0x6f1   : > { %19634 = vmatmul.mubr.f32.gmra.mrb[98].mxu1 %v26014_v56 }
 0x6f2   : > { %21221 = vmatpush3.bf16.msra.mxu1 %v21220_v57  ;;  %19636 = vmatprep.mubr.msk.f32.mxu1 %vm22811_vm3, %v25747_v1  ;;  %v16124_v57 = vld [vmem:[%s28751_s3 + $0x378] sm:$0xff] }
 0x6f3   : > { %21222 = vmatprep.subr.bf16.mxu1 %v22810_v40 }
 0x6f5   : > { %19637 = vmatmul.mubr.f32.gmra.mrb[100].mxu1 %v26026_v7 }
 0x6f6   : > { %21224 = vmatpush3.bf16.msra.mxu1 %v21223_v23  ;;  %19639 = vmatprep.mubr.msk.f32.mxu1 %vm22811_vm3, %v25747_v1  ;;  %v16126_v23 = vld [vmem:[%s28751_s3 + $0x388] sm:$0xff] }
 0x6f7   : > { %21225 = vmatprep.subr.bf16.mxu1 %v22810_v40  ;;  %v21262_v11 = vpack.c.bf16 %v16126_v23, %v16125_v52  ;;  %v16146_v52 = vld [vmem:[%s28751_s3 + $0x428] sm:$0xff]  ;;  %v16147_v23 = vld [vmem:[%s28751_s3 + $0x430] sm:$0xff] }
 0x6f9   : > { %19640 = vmatmul.mubr.f32.gmra.mrb[102].mxu1 %v26038_v49 }
 0x6fa   : > { %21227 = vmatpush3.bf16.msra.mxu1 %v21226_v10  ;;  %19642 = vmatprep.mubr.msk.f32.mxu1 %vm22811_vm3, %v25747_v1  ;;  %v16127_v10 = vld [vmem:[%s28751_s3 + $0x390] sm:$0xff] }
 0x6fb   : > { %21228 = vmatprep.subr.bf16.mxu1 %v22810_v40  ;;  %v21265_v55 = vpack.c.bf16 %v16128_v24, %v16127_v10  ;;  %v16150_v10 = vld [vmem:[%s28751_s3 + $0x448] sm:$0xff] }
 0x6fd   : > { %19643 = vmatmul.mubr.f32.gmra.mrb[104].mxu1 %v26050_v31 }
 0x6fe   : > { %21230 = vmatpush3.bf16.msra.mxu1 %v21229_v22  ;;  %19645 = vmatprep.mubr.msk.f32.mxu1 %vm22811_vm3, %v25747_v1  ;;  %v16129_v22 = vld [vmem:[%s28751_s3 + $0x3a0] sm:$0xff] }
 0x6ff   : > { %21231 = vmatprep.subr.bf16.mxu1 %v22810_v40 }
 0x701   : > { %19646 = vmatmul.mubr.f32.gmra.mrb[106].mxu1 %v26062_v33 }
 0x702   : > { %21233 = vmatpush3.bf16.msra.mxu1 %v21232_v34  ;;  %19680 = vmatprep.mubr.msk.f32.mxu1 %vm22811_vm3, %v25747_v1  ;;  %v21268_v34 = vpack.c.bf16 %v16130_v43, %v16129_v22  ;;  %v16151_v22 = vld [vmem:[%s28751_s3 + $0x450] sm:$0xff]  ;;  %v16152_v43 = vld [vmem:[%s28751_s3 + $0x458] sm:$0xff] }
 0x703   : > { %21234 = vmatprep.subr.bf16.mxu1 %v22810_v40  ;;  %v21301_v26 = vpack.c.bf16 %v16152_v43, %v16151_v22  ;;  %v16168_v22 = vld [vmem:[%s28751_s3 + $0x4d8] sm:$0xff]  ;;  %v16169_v43 = vld [vmem:[%s28751_s3 + $0x4e0] sm:$0xff] }
 0x706   : > { %21236 = vmatpush3.bf16.msra.mxu1 %v21235_v27  ;;  %v26181_v27 = vld [vmem:[#allocation5 + $0x31] sm:$0xff] }
 0x707   : > { %21237 = vmatprep.subr.bf16.mxu1 %v22810_v40 }
 0x709   : > { %19681 = vmatmul.mubr.f32.vlgmr.msra.gmra.mrb[108].mxu1 %v25747_v1 }
 0x70a   : > { %21239 = vmatpush3.bf16.msra.mxu1 %v21238_v47  ;;  %19683 = vmatprep.mubr.msk.f32.mxu1 %vm22811_vm3, %v25747_v1 }
 0x70b   : > { %21240 = vmatprep.subr.bf16.mxu1 %v22810_v40 }
 0x70d   : > { %19684 = vmatmul.mubr.f32.gmra.mrb[110].mxu1 %v25737_v18  ;;  %v21247_v18 = vpack.c.bf16 %v16116_v21, %v16115_v53  ;;  %v16136_v53 = vld [vmem:[%s28751_s3 + $0x3d8] sm:$0xff]  ;;  %v16137_v21 = vld [vmem:[%s28751_s3 + $0x3e0] sm:$0xff] }
 0x70e   : > { %21242 = vmatpush3.bf16.msra.mxu1 %v21241_v32  ;;  %19686 = vmatprep.mubr.msk.f32.mxu1 %vm22811_vm3, %v25747_v1 }
 0x70f   : > { %21243 = vmatprep.subr.bf16.mxu1 %v22810_v40 }
 0x711   : > { %19687 = vmatmul.mubr.f32.gmra.mrb[112].mxu1 %v25758_v5  ;;  %v21250_v5 = vpack.c.bf16 %v16118_v6, %v16117_v13  ;;  %v16139_v13 = vld [vmem:[%s28751_s3 + $0x3f0] sm:$0xff]  ;;  %v16140_v6 = vld [vmem:[%s28751_s3 + $0x3f8] sm:$0xff] }
 0x712   : > { %21245 = vmatpush3.bf16.msra.mxu1 %v21244_v17  ;;  %19689 = vmatprep.mubr.msk.f32.mxu1 %vm22811_vm3, %v25747_v1  ;;  %v16135_v17 = vld [vmem:[%s28751_s3 + $0x3d0] sm:$0xff] }
 0x713   : > { %21246 = vmatprep.subr.bf16.mxu1 %v22810_v40 }
 0x715   : > { %19690 = vmatmul.mubr.f32.gmra.mrb[114].mxu1 %v25770_v38  ;;  %v21253_v38 = vpack.c.bf16 %v16120_v16, %v16119_v46  ;;  %v16141_v46 = vld [vmem:[%s28751_s3 + $0x400] sm:$0xff]  ;;  %v16142_v16 = vld [vmem:[%s28751_s3 + $0x408] sm:$0xff] }
 0x716   : > { %21248 = vmatpush3.bf16.msra.mxu1 %v21247_v18  ;;  %19692 = vmatprep.mubr.msk.f32.mxu1 %vm22811_vm3, %v25747_v1  ;;  %v16138_v18 = vld [vmem:[%s28751_s3 + $0x3e8] sm:$0xff] }
 0x717   : > { %21249 = vmatprep.subr.bf16.mxu1 %v22810_v40 }
 0x719   : > { %19693 = vmatmul.mubr.f32.gmra.mrb[116].mxu1 %v25782_v45  ;;  %v21256_v45 = vpack.c.bf16 %v16122_v25, %v16121_v44  ;;  %v16143_v25 = vld [vmem:[%s28751_s3 + $0x410] sm:$0xff] }
 0x71a   : > { %21251 = vmatpush3.bf16.msra.mxu1 %v21250_v5  ;;  %19695 = vmatprep.mubr.msk.f32.mxu1 %vm22811_vm3, %v25747_v1  ;;  %v26227_v5 = vld [vmem:[#allocation5 + $0x71] sm:$0xff] }
 0x71b   : > { %21252 = vmatprep.subr.bf16.mxu1 %v22810_v40 }
 0x71d   : > { %19696 = vmatmul.mubr.f32.gmra.mrb[118].mxu1 %v25794_v36  ;;  %v21259_v36 = vpack.c.bf16 %v16124_v57, %v16123_v42 }
 0x71e   : > { %21254 = vmatpush3.bf16.msra.mxu1 %v21253_v38  ;;  %19698 = vmatprep.mubr.msk.f32.mxu1 %vm22811_vm3, %v25747_v1  ;;  %v21286_v38 = vpack.c.bf16 %v16142_v16, %v16141_v46  ;;  %v16160_v46 = vld [vmem:[%s28751_s3 + $0x498] sm:$0xff] }
 0x71f   : > { %21255 = vmatprep.subr.bf16.mxu1 %v22810_v40 }
 0x721   : > { %19699 = vmatmul.mubr.f32.gmra.mrb[120].mxu1 %v26141_v50 }
 0x722   : > { %21257 = vmatpush3.bf16.msra.mxu1 %v21256_v45  ;;  %19733 = vmatprep.mubr.msk.f32.mxu1 %vm22811_vm3, %v25747_v1  ;;  %v16144_v45 = vld [vmem:[%s28751_s3 + $0x418] sm:$0xff] }
 0x723   : > { %21258 = vmatprep.subr.bf16.mxu1 %v22810_v40  ;;  %v21289_v57 = vpack.c.bf16 %v16144_v45, %v16143_v25  ;;  %v16161_v45 = vld [vmem:[%s28751_s3 + $0x4a0] sm:$0xff] }
 0x726   : > { %21260 = vmatpush3.bf16.msra.mxu1 %v21259_v36  ;;  %v16145_v36 = vld [vmem:[%s28751_s3 + $0x420] sm:$0xff] }
 0x727   : > { %21261 = vmatprep.subr.bf16.mxu1 %v22810_v40 }
 0x729   : > { %19734 = vmatmul.mubr.f32.vlgmr.msra.gmra.mrb[122].mxu1 %v11496_v12  ;;  %v16148_v12 = vld [vmem:[%s28751_s3 + $0x438] sm:$0xff] }
 0x72a   : > { %21263 = vmatpush3.bf16.msra.mxu1 %v21262_v11  ;;  %19736 = vmatprep.mubr.msk.f32.mxu1 %vm22811_vm3, %v25747_v1  ;;  %v16149_v11 = vld [vmem:[%s28751_s3 + $0x440] sm:$0xff] }
 0x72b   : > { %21264 = vmatprep.subr.bf16.mxu1 %v22810_v40 }
 0x72d   : > { %19737 = vmatmul.mubr.f32.gmra.mrb[124].mxu1 %v26169_v15 }
 0x72e   : > { %21266 = vmatpush3.bf16.msra.mxu1 %v21265_v55  ;;  %19739 = vmatprep.mubr.msk.f32.mxu1 %vm22811_vm3, %v25747_v1  ;;  %v26184_v51 = vpop.f32.mrb[42].mxu1 }
 0x72f   : > { %21267 = vmatprep.subr.bf16.mxu1 %v22810_v40  ;;  %v19423_v47 = vpop.f32.mrb[43].mxu1 }
 0x731   : > { %19740 = vmatmul.mubr.f32.gmra.mrb[126].mxu1 %v26181_v27 }
 0x732   : > { %21269 = vmatpush3.bf16.msra.mxu1 %v21268_v34  ;;  %19742 = vmatprep.mubr.msk.f32.mxu1 %vm22811_vm3, %v25747_v1 }
 0x733   : > { %21270 = vmatprep.subr.bf16.mxu1 %v22810_v40 }
 0x734   : > { %v26196_v32 = vpop.f32.mrb[44].mxu1 }
 0x735   : > { %19743 = vmatmul.mubr.f32.gmra.mrb[128].mxu1 %v25679_v0  ;;  %v19426_v61 = vpop.f32.mrb[45].mxu1  ;;  %v21277_v0 = vpack.c.bf16 %v16136_v53, %v16135_v17  ;;  %v26315_v17 = vld [vmem:[#allocation5 + $0x72] sm:$0xff] }
 0x736   : > { %21272 = vmatpush3.bf16.msra.mxu1 %v21271_v4  ;;  %19745 = vmatprep.mubr.msk.f32.mxu1 %vm22811_vm3, %v25747_v1  ;;  %v16154_v4 = vld [vmem:[%s28751_s3 + $0x468] sm:$0xff]  ;;  %v16156_v61 = vld [vmem:[%s28751_s3 + $0x478] sm:$0xff] }
 0x737   : > { %21273 = vmatprep.subr.bf16.mxu1 %v22810_v40  ;;  %v21304_v35 = vpack.c.bf16 %v16154_v4, %v16153_v63  ;;  %v16171_v4 = vld [vmem:[%s28751_s3 + $0x4f0] sm:$0xff] }
 0x739   : > { %19746 = vmatmul.mubr.f32.gmra.mrb[130].mxu1 %v25684_v8  ;;  %v21280_v8 = vpack.c.bf16 %v16138_v18, %v16137_v21  ;;  %v16157_v21 = vld [vmem:[%s28751_s3 + $0x480] sm:$0xff]  ;;  %v16158_v18 = vld [vmem:[%s28751_s3 + $0x488] sm:$0xff] }
 0x73a   : > { %21275 = vmatpush3.bf16.msra.mxu1 %v21274_v19  ;;  %19748 = vmatprep.mubr.msk.f32.mxu1 %vm22811_vm3, %v25747_v1  ;;  %v16155_v19 = vld [vmem:[%s28751_s3 + $0x470] sm:$0xff] }
 0x73b   : > { %21276 = vmatprep.subr.bf16.mxu1 %v22810_v40 }
 0x73d   : > { %19749 = vmatmul.mubr.f32.gmra.mrb[132].mxu1 %v25689_v58  ;;  %v21283_v58 = vpack.c.bf16 %v16140_v6, %v16139_v13  ;;  %v21310_v6 = vpack.c.bf16 %v16158_v18, %v16157_v21  ;;  %v16175_v18 = vld [vmem:[%s28751_s3 + $0x510] sm:$0xff] }
 0x73e   : > { %21278 = vmatpush3.bf16.msra.mxu1 %v21277_v0  ;;  %19751 = vmatprep.mubr.msk.f32.mxu1 %vm22811_vm3, %v25747_v1  ;;  %v21307_v0 = vpack.c.bf16 %v16156_v61, %v16155_v19  ;;  %v16173_v61 = vld [vmem:[%s28751_s3 + $0x500] sm:$0xff] }
 0x73f   : > { %21279 = vmatprep.subr.bf16.mxu1 %v22810_v40 }
 0x741   : > { %19752 = vmatmul.mubr.f32.gmra.mrb[134].mxu1 %v26227_v5 }
 0x742   : > { %21281 = vmatpush3.bf16.msra.mxu1 %v21280_v8  ;;  %19786 = vmatprep.mubr.msk.f32.mxu1 %vm22811_vm3, %v25747_v1 }
 0x743   : > { %21282 = vmatprep.subr.bf16.mxu1 %v22810_v40 }
 0x746   : > { %21284 = vmatpush3.bf16.msra.mxu1 %v21283_v58  ;;  %v16159_v58 = vld [vmem:[%s28751_s3 + $0x490] sm:$0xff] }
 0x747   : > { %21285 = vmatprep.subr.bf16.mxu1 %v22810_v40  ;;  %v21313_v25 = vpack.c.bf16 %v16160_v46, %v16159_v58  ;;  %v16177_v46 = vld [vmem:[%s28751_s3 + $0x520] sm:$0xff] }
 0x748   : > { %v26239_v44 = vpop.f32.mrb[46].mxu1 }
 0x749   : > { %v19429_v42 = vpop.f32.mrb[47].mxu1  ;;  %19787 = vmatmul.mubr.f32.vlgmr.msra.gmra.mrb[136].mxu1 %v25815_v60  ;;  %v21292_v60 = vpack.c.bf16 %v16146_v52, %v16145_v36  ;;  %v16163_v52 = vld [vmem:[%s28751_s3 + $0x4b0] sm:$0xff] }
 0x74a   : > { %21287 = vmatpush3.bf16.msra.mxu1 %v21286_v38  ;;  %19789 = vmatprep.mubr.msk.f32.mxu1 %vm22811_vm3, %v25747_v1  ;;  %v16162_v42 = vld [vmem:[%s28751_s3 + $0x4a8] sm:$0xff] }
 0x74b   : > { %21288 = vmatprep.subr.bf16.mxu1 %v22810_v40  ;;  %v21316_v36 = vpack.c.bf16 %v16162_v42, %v16161_v45  ;;  %v16179_v45 = vld [vmem:[%s28751_s3 + $0x530] sm:$0xff]  ;;  %v16180_v42 = vld [vmem:[%s28751_s3 + $0x538] sm:$0xff] }
 0x74d   : > { %19790 = vmatmul.mubr.f32.gmra.mrb[138].mxu1 %v25834_v30  ;;  %v21295_v30 = vpack.c.bf16 %v16148_v12, %v16147_v23 }
 0x74e   : > { %21290 = vmatpush3.bf16.msra.mxu1 %v21289_v57  ;;  %19792 = vmatprep.mubr.msk.f32.mxu1 %vm22811_vm3, %v25747_v1 }
 0x74f   : > { %21291 = vmatprep.subr.bf16.mxu1 %v22810_v40 }
 0x751   : > { %19793 = vmatmul.mubr.f32.gmra.mrb[140].mxu1 %v25848_v41  ;;  %v21298_v41 = vpack.c.bf16 %v16150_v10, %v16149_v11  ;;  %v16166_v11 = vld [vmem:[%s28751_s3 + $0x4c8] sm:$0xff] }
 0x752   : > { %21293 = vmatpush3.bf16.msra.mxu1 %v21292_v60  ;;  %19795 = vmatprep.mubr.msk.f32.mxu1 %vm22811_vm3, %v25747_v1  ;;  %v16164_v60 = vld [vmem:[%s28751_s3 + $0x4b8] sm:$0xff] }
 0x753   : > { %21294 = vmatprep.subr.bf16.mxu1 %v22810_v40  ;;  %v21319_v12 = vpack.c.bf16 %v16164_v60, %v16163_v52  ;;  %v16182_v52 = vld [vmem:[%s28751_s3 + $0x548] sm:$0xff] }
 0x754   : > { %v26278_v24 = vpop.f32.mrb[48].mxu1 }
 0x755   : > { %v19432_v55 = vpop.f32.mrb[49].mxu1  ;;  %19796 = vmatmul.mubr.f32.gmra.mrb[142].mxu1 %v25862_v48 }
 0x756   : > { %21296 = vmatpush3.bf16.msra.mxu1 %v21295_v30  ;;  %19798 = vmatprep.mubr.msk.f32.mxu1 %vm22811_vm3, %v25747_v1  ;;  %v16165_v30 = vld [vmem:[%s28751_s3 + $0x4c0] sm:$0xff] }
 0x757   : > { %21297 = vmatprep.subr.bf16.mxu1 %v22810_v40  ;;  %v21322_v55 = vpack.c.bf16 %v16166_v11, %v16165_v30  ;;  %v16185_v30 = vld [vmem:[%s28751_s3 + $0x560] sm:$0xff]  ;;  %v16186_v11 = vld [vmem:[%s28751_s3 + $0x568] sm:$0xff] }
 0x758   : > { %v26290_v34 = vpop.f32.mrb[50].mxu1 }
 0x759   : > { %19799 = vmatmul.mubr.f32.gmra.mrb[144].mxu1 %v25874_v14  ;;  %v19435_v48 = vpop.f32.mrb[51].mxu1 }
 0x75a   : > { %21299 = vmatpush3.bf16.msra.mxu1 %v21298_v41  ;;  %19801 = vmatprep.mubr.msk.f32.mxu1 %vm22811_vm3, %v25747_v1  ;;  %v16167_v41 = vld [vmem:[%s28751_s3 + $0x4d0] sm:$0xff] }
 0x75b   : > { %21300 = vmatprep.subr.bf16.mxu1 %v22810_v40 }
 0x75c   : > { %v10937_v47 = vpop.f32.mrb[52].mxu1 }
 0x75d   : > { %v26303_v37 = vadd.f32 %v10937_v47, %v25839_v62  ;;  %19802 = vmatmul.mubr.f32.gmra.mrb[146].mxu1 %v25886_v2  ;;  %v19470_v14 = vpop.f32.mrb[53].mxu1  ;;  %v16172_v47 = vld [vmem:[%s28751_s3 + $0x4f8] sm:$0xff] }
 0x75e   : > { %21302 = vmatpush3.bf16.msra.mxu1 %v21301_v26  ;;  %19804 = vmatprep.mubr.msk.f32.mxu1 %vm22811_vm3, %v25747_v1  ;;  %v26415_v14 = vld [vmem:[#allocation5 + $0x73] sm:$0xff]  ;;  %v21331_v19 = vpack.c.bf16 %v16172_v47, %v16171_v4 }
 0x75f   : > { %21303 = vmatprep.subr.bf16.mxu1 %v22810_v40 }
 0x760   : > { %v10942_v62 = vpop.f32.mrb[54].mxu1 }
 0x761   : > { %v26318_v2 = vadd.f32 %v10942_v62, %v25853_v29  ;;  %19805 = vmatmul.mubr.f32.gmra.mrb[148].mxu1 %v26315_v17  ;;  %v19473_v53 = vpop.f32.mrb[55].mxu1  ;;  %v16174_v62 = vld [vmem:[%s28751_s3 + $0x508] sm:$0xff] }
 0x762   : > { %21305 = vmatpush3.bf16.msra.mxu1 %v21304_v35  ;;  %19839 = vmatprep.mubr.msk.f32.mxu1 %vm22811_vm3, %v25747_v1  ;;  %v21334_v21 = vpack.c.bf16 %v16174_v62, %v16173_v61 }
 0x763   : > { %21306 = vmatprep.subr.bf16.mxu1 %v22810_v40 }
 0x764   : > { %v10947_v29 = vpop.f32.mrb[56].mxu1 }
 0x765   : > { %v26331_v8 = vadd.f32 %v10947_v29, %v26184_v51  ;;  %v19476_v13 = vpop.f32.mrb[57].mxu1  ;;  %v16176_v29 = vld [vmem:[%s28751_s3 + $0x518] sm:$0xff] }
 0x766   : > { %21308 = vmatpush3.bf16.msra.mxu1 %v21307_v0 }
 0x767   : > { %21309 = vmatprep.subr.bf16.mxu1 %v22810_v40 }
 0x768   : > { %v10952_v16 = vpop.f32.mrb[58].mxu1 }
 0x769   : > { %v26341_v38 = vadd.f32 %v10952_v16, %v26196_v32  ;;  %19840 = vmatmul.mubr.f32.vlgmr.msra.gmra.mrb[150].mxu1 %v25907_v9  ;;  %v19479_v51 = vpop.f32.mrb[59].mxu1  ;;  %v16178_v16 = vld [vmem:[%s28751_s3 + $0x528] sm:$0xff] }
 0x76a   : > { %21311 = vmatpush3.bf16.msra.mxu1 %v21310_v6  ;;  %19842 = vmatprep.mubr.msk.f32.mxu1 %vm22811_vm3, %v25747_v1 }
 0x76b   : > { %21312 = vmatprep.subr.bf16.mxu1 %v22810_v40 }
 0x76c   : > { %v10957_v32 = vpop.f32.mrb[60].mxu1 }
 0x76d   : > { %v26354_v57 = vadd.f32 %v10957_v32, %v26239_v44  ;;  %19843 = vmatmul.mubr.f32.gmra.mrb[152].mxu1 %v25926_v54  ;;  %v19482_v9 = vpop.f32.mrb[61].mxu1 }
 0x76e   : > { %21314 = vmatpush3.bf16.msra.mxu1 %v21313_v25  ;;  %19845 = vmatprep.mubr.msk.f32.mxu1 %vm22811_vm3, %v25747_v1  ;;  %v21340_v25 = vpack.c.bf16 %v16178_v16, %v16177_v46  ;;  %v21343_v9 = vpack.c.bf16 %v16180_v42, %v16179_v45  ;;  %v26569_v16 = vld [vmem:[#allocation5 + $0x40] sm:$0xff]  ;;  %v16198_v45 = vld [vmem:[%s28751_s3 + $0x5c8] sm:$0xff] }
 0x76f   : > { %21315 = vmatprep.subr.bf16.mxu1 %v22810_v40 }
 0x770   : > { %v10962_v44 = vpop.f32.mrb[62].mxu1 }
 0x771   : > { %v26367_v23 = vadd.f32 %v10962_v44, %v26278_v24  ;;  %19846 = vmatmul.mubr.f32.gmra.mrb[154].mxu1 %v25938_v59  ;;  %v19485_v54 = vpop.f32.mrb[63].mxu1 }
 0x772   : > { %21317 = vmatpush3.bf16.msra.mxu1 %v21316_v36  ;;  %19848 = vmatprep.mubr.msk.f32.mxu1 %vm22811_vm3, %v25747_v1  ;;  %v16181_v36 = vld [vmem:[%s28751_s3 + $0x540] sm:$0xff]  ;;  %v16183_v54 = vld [vmem:[%s28751_s3 + $0x550] sm:$0xff] }
 0x773   : > { %21318 = vmatprep.subr.bf16.mxu1 %v22810_v40 }
 0x774   : > { %v10967_v10 = vpop.f32.mrb[64].mxu1 }
 0x775   : > { %v26380_v24 = vadd.f32 %v10967_v10, %v26290_v34  ;;  %19849 = vmatmul.mubr.f32.gmra.mrb[156].mxu1 %v25950_v20  ;;  %v19488_v59 = vpop.f32.mrb[65].mxu1  ;;  %v21325_v20 = vpack.c.bf16 %v16168_v22, %v16167_v41  ;;  %v16170_v34 = vld [vmem:[%s28751_s3 + $0x4e8] sm:$0xff]  ;;  %v16188_v41 = vld [vmem:[%s28751_s3 + $0x578] sm:$0xff] }
 0x776   : > { %21320 = vmatpush3.bf16.msra.mxu1 %v21319_v12  ;;  %19851 = vmatprep.mubr.msk.f32.mxu1 %vm22811_vm3, %v25747_v1  ;;  %v21328_v63 = vpack.c.bf16 %v16170_v34, %v16169_v43  ;;  %v16184_v12 = vld [vmem:[%s28751_s3 + $0x558] sm:$0xff]  ;;  %v21352_v59 = vpack.c.bf16 %v16186_v11, %v16185_v30  ;;  %v16203_v11 = vld [vmem:[%s28751_s3 + $0x5f0] sm:$0xff] }
 0x777   : > { %21321 = vmatprep.subr.bf16.mxu1 %v22810_v40 }
 0x779   : > { %19852 = vmatmul.mubr.f32.gmra.mrb[158].mxu1 %v25962_v28 }
 0x77a   : > { %21323 = vmatpush3.bf16.msra.mxu1 %v21322_v55  ;;  %19854 = vmatprep.mubr.msk.f32.mxu1 %vm22811_vm3, %v25747_v1  ;;  %v16187_v55 = vld [vmem:[%s28751_s3 + $0x570] sm:$0xff] }
 0x77b   : > { %21324 = vmatprep.subr.bf16.mxu1 %v22810_v40  ;;  %v21355_v34 = vpack.c.bf16 %v16188_v41, %v16187_v55  ;;  %v16205_v41 = vld [vmem:[%s28751_s3 + $0x600] sm:$0xff] }
 0x77c   : > { %v11061_v48 = vpop.f32.mrb[66].mxu1 }
 0x77d   : > { %v26403_v26 = vadd.f32 %v11061_v48, %v26303_v37  ;;  %v19523_v28 = vpop.f32.mrb[67].mxu1  ;;  %19855 = vmatmul.mubr.f32.gmra.mrb[160].mxu1 %v25974_v39  ;;  %v16189_v48 = vld [vmem:[%s28751_s3 + $0x580] sm:$0xff] }
 0x77e   : > { %21326 = vmatpush3.bf16.msra.mxu1 %v21325_v20  ;;  %19857 = vmatprep.mubr.msk.f32.mxu1 %vm22811_vm3, %v25747_v1  ;;  %v26517_v20 = vld [vmem:[#allocation5 + $0x74] sm:$0xff] }
 0x77f   : > { %21327 = vmatprep.subr.bf16.mxu1 %v22810_v40 }
 0x780   : > { %v11066_v37 = vpop.f32.mrb[68].mxu1 }
 0x781   : > { %v26418_v39 = vadd.f32 %v11066_v37, %v26318_v2  ;;  %19858 = vmatmul.mubr.f32.gmra.mrb[162].mxu1 %v26415_v14  ;;  %v19526_v35 = vpop.f32.mrb[69].mxu1  ;;  %v16191_v37 = vld [vmem:[%s28751_s3 + $0x590] sm:$0xff] }
 0x782   : > { %21329 = vmatpush3.bf16.msra.mxu1 %v21328_v63  ;;  %19892 = vmatprep.mubr.msk.f32.mxu1 %vm22811_vm3, %v25747_v1 }
 0x783   : > { %21330 = vmatprep.subr.bf16.mxu1 %v22810_v40 }
 0x784   : > { %v11071_v2 = vpop.f32.mrb[70].mxu1 }
 0x785   : > { %v26431_v53 = vadd.f32 %v11071_v2, %v26331_v8  ;;  %v19529_v0 = vpop.f32.mrb[71].mxu1  ;;  %v21337_v8 = vpack.c.bf16 %v16176_v29, %v16175_v18  ;;  %v26554_v18 = vld [vmem:[#allocation5 + $0x30] sm:$0xff] }
 0x786   : > { %21332 = vmatpush3.bf16.msra.mxu1 %v21331_v19  ;;  %v12020_v19 = vld [vmem:[#allocation5 + $0x20] sm:$0xff]  ;;  %v16194_v0 = vld [vmem:[%s28751_s3 + $0x5a8] sm:$0xff] }
 0x787   : > { %21333 = vmatprep.subr.bf16.mxu1 %v22810_v40 }
 0x788   : > { %v11076_v13 = vpop.f32.mrb[72].mxu1 }
 0x789   : > { %v26441_v6 = vadd.f32 %v11076_v13, %v26341_v38  ;;  %v19532_v58 = vpop.f32.mrb[73].mxu1  ;;  %19893 = vmatmul.mubr.f32.vlgmr.msra.gmra.mrb[164].mxu1 %v25995_v3 }
 0x78a   : > { %21335 = vmatpush3.bf16.msra.mxu1 %v21334_v21  ;;  %19895 = vmatprep.mubr.msk.f32.mxu1 %vm22811_vm3, %v25747_v1  ;;  %v26457_v1 = vld [vmem:[#allocation5] sm:$0xff] }
 0x78b   : > { %21336 = vmatprep.subr.bf16.mxu1 %v22810_v40  ;;  %v16195_v58 = vld [vmem:[%s28751_s3 + $0x5b0] sm:$0xff] }
 0x78c   : > { %v11081_v38 = vpop.f32.mrb[74].mxu1 }
 0x78d   : > { %v26454_v51 = vadd.f32 %v11081_v38, %v26354_v57  ;;  %v19535_v3 = vpop.f32.mrb[75].mxu1  ;;  %19896 = vmatmul.mubr.f32.gmra.mrb[166].mxu1 %v26014_v56 }
 0x78e   : > { %21338 = vmatpush3.bf16.msra.mxu1 %v21337_v8  ;;  %19898 = vmatprep.mubr.msk.f32.mxu1 %vm22811_vm3, %v26457_v1  ;;  %v16196_v8 = vld [vmem:[%s28751_s3 + $0x5b8] sm:$0xff] }
 0x78f   : > { %21339 = vmatprep.subr.bf16.mxu1 %v22810_v40  ;;  %v21367_v3 = vpack.c.bf16 %v16196_v8, %v16195_v58  ;;  %v16214_v58 = vld [vmem:[%s28751_s3 + $0x648] sm:$0xff] }
 0x790   : > { %v11086_v32 = vpop.f32.mrb[76].mxu1 }
 0x791   : > { %v26469_v56 = vadd.f32 %v11086_v32, %v26367_v23  ;;  %v19538_v57 = vpop.f32.mrb[77].mxu1  ;;  %19899 = vmatmul.mubr.f32.gmra.mrb[168].mxu1 %v26026_v7  ;;  %v21346_v23 = vpack.c.bf16 %v16182_v52, %v16181_v36  ;;  %v26584_v32 = vld [vmem:[#allocation5 + $0x50] sm:$0xff]  ;;  %v16199_v36 = vld [vmem:[%s28751_s3 + $0x5d0] sm:$0xff]  ;;  %v16200_v52 = vld [vmem:[%s28751_s3 + $0x5d8] sm:$0xff] }
 0x792   : > { %21341 = vmatpush3.bf16.msra.mxu1 %v21340_v25  ;;  %19901 = vmatprep.mubr.msk.f32.mxu1 %vm22811_vm3, %v26457_v1  ;;  %v16197_v25 = vld [vmem:[%s28751_s3 + $0x5c0] sm:$0xff] }
 0x793   : > { %21342 = vmatprep.subr.bf16.mxu1 %v22810_v40 }
 0x794   : > { %v11091_v60 = vpop.f32.mrb[78].mxu1 }
 0x795   : > { %v26482_v44 = vadd.f32 %v11091_v60, %v26380_v24  ;;  %v19541_v7 = vpop.f32.mrb[79].mxu1  ;;  %19902 = vmatmul.mubr.f32.gmra.mrb[170].mxu1 %v26038_v49  ;;  %v21349_v49 = vpack.c.bf16 %v16184_v12, %v16183_v54  ;;  %v26599_v60 = vld [vmem:[#allocation5 + $0x60] sm:$0xff] }
 0x796   : > { %21344 = vmatpush3.bf16.msra.mxu1 %v21343_v9  ;;  %19904 = vmatprep.mubr.msk.f32.mxu1 %vm22811_vm3, %v26457_v1  ;;  %v21370_v9 = vpack.c.bf16 %v16198_v45, %v16197_v25  ;;  %v16201_v7 = vld [vmem:[%s28751_s3 + $0x5e0] sm:$0xff]  ;;  %v16215_v25 = vld [vmem:[%s28751_s3 + $0x650] sm:$0xff]  ;;  %v16216_v45 = vld [vmem:[%s28751_s3 + $0x658] sm:$0xff] }
 0x797   : > { %21345 = vmatprep.subr.bf16.mxu1 %v22810_v40 }
 0x799   : > { %19905 = vmatmul.mubr.f32.gmra.mrb[172].mxu1 %v26050_v31 }
 0x79a   : > { %21347 = vmatpush3.bf16.msra.mxu1 %v21346_v23  ;;  %19907 = vmatprep.mubr.msk.f32.mxu1 %vm22811_vm3, %v26457_v1  ;;  %v16202_v23 = vld [vmem:[%s28751_s3 + $0x5e8] sm:$0xff] }
 0x79b   : > { %21348 = vmatprep.subr.bf16.mxu1 %v22810_v40  ;;  %v21376_v30 = vpack.c.bf16 %v16202_v23, %v16201_v7  ;;  %v16219_v23 = vld [vmem:[%s28751_s3 + $0x670] sm:$0xff] }
 0x79c   : > { %v11192_v10 = vpop.f32.mrb[80].mxu1 }
 0x79d   : > { %v26505_v24 = vadd.f32 %v11192_v10, %v26403_v26  ;;  %v19576_v31 = vpop.f32.mrb[81].mxu1  ;;  %19908 = vmatmul.mubr.f32.gmra.mrb[174].mxu1 %v26062_v33  ;;  %v16190_v26 = vld [vmem:[%s28751_s3 + $0x588] sm:$0xff]  ;;  %v16204_v10 = vld [vmem:[%s28751_s3 + $0x5f8] sm:$0xff] }
 0x79e   : > { %21350 = vmatpush3.bf16.msra.mxu1 %v21349_v49  ;;  %19910 = vmatprep.mubr.msk.f32.mxu1 %vm22811_vm3, %v26457_v1  ;;  %v21358_v47 = vpack.c.bf16 %v16190_v26, %v16189_v48  ;;  %v26624_v31 = vld [vmem:[#allocation5 + $0x80] sm:$0xff]  ;;  %v21379_v55 = vpack.c.bf16 %v16204_v10, %v16203_v11  ;;  %v16221_v10 = vld [vmem:[%s28751_s3 + $0x680] sm:$0xff] }
 0x79f   : > { %21351 = vmatprep.subr.bf16.mxu1 %v22810_v40  ;;  %v16207_v26 = vld [vmem:[%s28751_s3 + $0x610] sm:$0xff] }
 0x7a0   : > { %v11197_v22 = vpop.f32.mrb[82].mxu1 }
 0x7a1   : > { %v26520_v33 = vadd.f32 %v11197_v22, %v26418_v39  ;;  %19911 = vmatmul.mubr.f32.gmra.mrb[176].mxu1 %v26517_v20  ;;  %v19579_v43 = vpop.f32.mrb[83].mxu1  ;;  %v16192_v39 = vld [vmem:[%s28751_s3 + $0x598] sm:$0xff]  ;;  %v16206_v22 = vld [vmem:[%s28751_s3 + $0x608] sm:$0xff] }
 0x7a2   : > { %21353 = vmatpush3.bf16.msra.mxu1 %v21352_v59  ;;  %19945 = vmatprep.mubr.msk.f32.mxu1 %vm22811_vm3, %v26457_v1  ;;  %v21361_v2 = vpack.c.bf16 %v16192_v39, %v16191_v37  ;;  %v21382_v48 = vpack.c.bf16 %v16206_v22, %v16205_v41  ;;  %v16209_v39 = vld [vmem:[%s28751_s3 + $0x620] sm:$0xff]  ;;  %v16223_v22 = vld [vmem:[%s28751_s3 + $0x690] sm:$0xff] }
 0x7a3   : > { %21354 = vmatprep.subr.bf16.mxu1 %v22810_v40 }
 0x7a4   : > { %v11202_v28 = vpop.f32.mrb[84].mxu1 }
 0x7a5   : > { %v26533_v63 = vadd.f32 %v11202_v28, %v26431_v53  ;;  %v19582_v4 = vpop.f32.mrb[85].mxu1  ;;  %v16193_v53 = vld [vmem:[%s28751_s3 + $0x5a0] sm:$0xff]  ;;  %v16208_v28 = vld [vmem:[%s28751_s3 + $0x618] sm:$0xff] }
 0x7a6   : > { %21356 = vmatpush3.bf16.msra.mxu1 %v21355_v34 }
 0x7a7   : > { %21357 = vmatprep.subr.bf16.mxu1 %v22810_v40 }
 0x7a8   : > { %v11207_v35 = vpop.f32.mrb[86].mxu1 }
 0x7a9   : > { %v26543_v61 = vadd.f32 %v11207_v35, %v26441_v6  ;;  %v19585_v62 = vpop.f32.mrb[87].mxu1  ;;  %19946 = vmatmul.mubr.f32.vlgmr.msra.gmra.mrb[178].mxu1 %v12020_v19  ;;  %v21364_v6 = vpack.c.bf16 %v16194_v0, %v16193_v53  ;;  %v16210_v35 = vld [vmem:[%s28751_s3 + $0x628] sm:$0xff]  ;;  %v16212_v53 = vld [vmem:[%s28751_s3 + $0x638] sm:$0xff] }
 0x7aa   : > { %21359 = vmatpush3.bf16.msra.mxu1 %v21358_v47  ;;  %19948 = vmatprep.mubr.msk.f32.mxu1 %vm22811_vm3, %v26457_v1  ;;  %v21388_v62 = vpack.c.bf16 %v16210_v35, %v16209_v39 }
 0x7ab   : > { %21360 = vmatprep.subr.bf16.mxu1 %v22810_v40 }
 0x7ac   : > { %v11212_v21 = vpop.f32.mrb[88].mxu1 }
 0x7ad   : > { %v26557_v29 = vadd.f32 %v11212_v21, %v26454_v51  ;;  %v19588_v13 = vpop.f32.mrb[89].mxu1  ;;  %19949 = vmatmul.mubr.f32.gmra.mrb[180].mxu1 %v26554_v18  ;;  %v26675_v21 = vld [vmem:[#allocation5 + $0x41] sm:$0xff] }
 0x7ae   : > { %21362 = vmatpush3.bf16.msra.mxu1 %v21361_v2  ;;  %19951 = vmatprep.mubr.msk.f32.mxu1 %vm22811_vm3, %v26457_v1  ;;  %v16211_v2 = vld [vmem:[%s28751_s3 + $0x630] sm:$0xff] }
 0x7af   : > { %21363 = vmatprep.subr.bf16.mxu1 %v22810_v40  ;;  %v21391_v13 = vpack.c.bf16 %v16212_v53, %v16211_v2  ;;  %v26782_v2 = vld [vmem:[#allocation5 + $0x42] sm:$0xff] }
 0x7b0   : > { %v11217_v46 = vpop.f32.mrb[90].mxu1 }
 0x7b1   : > { %v26572_v38 = vadd.f32 %v11217_v46, %v26469_v56  ;;  %v19591_v51 = vpop.f32.mrb[91].mxu1  ;;  %19952 = vmatmul.mubr.f32.gmra.mrb[182].mxu1 %v26569_v16  ;;  %v26690_v46 = vld [vmem:[#allocation5 + $0x51] sm:$0xff] }
 0x7b2   : > { %21365 = vmatpush3.bf16.msra.mxu1 %v21364_v6  ;;  %19954 = vmatprep.mubr.msk.f32.mxu1 %vm22811_vm3, %v26457_v1  ;;  %v16213_v6 = vld [vmem:[%s28751_s3 + $0x640] sm:$0xff] }
 0x7b3   : > { %21366 = vmatprep.subr.bf16.mxu1 %v22810_v40 }
 0x7b4   : > { %v11222_v42 = vpop.f32.mrb[92].mxu1 }
 0x7b5   : > { %v26587_v56 = vadd.f32 %v11222_v42, %v26482_v44  ;;  %v19594_v57 = vpop.f32.mrb[93].mxu1  ;;  %19955 = vmatmul.mubr.f32.gmra.mrb[184].mxu1 %v26584_v32  ;;  %v21373_v44 = vpack.c.bf16 %v16200_v52, %v16199_v36  ;;  %v26705_v42 = vld [vmem:[#allocation5 + $0x61] sm:$0xff] }
 0x7b6   : > { %21368 = vmatpush3.bf16.msra.mxu1 %v21367_v3  ;;  %19957 = vmatprep.mubr.msk.f32.mxu1 %vm22811_vm3, %v26457_v1  ;;  %v21394_v3 = vpack.c.bf16 %v16214_v58, %v16213_v6  ;;  %v16217_v57 = vld [vmem:[%s28751_s3 + $0x660] sm:$0xff]  ;;  %v16230_v6 = vld [vmem:[%s28751_s3 + $0x6c8] sm:$0xff] }
 0x7b7   : > { %21369 = vmatprep.subr.bf16.mxu1 %v22810_v40  ;;  %v26797_v58 = vld [vmem:[#allocation5 + $0x52] sm:$0xff] }
 0x7b9   : > { %19958 = vmatmul.mubr.f32.gmra.mrb[186].mxu1 %v26599_v60 }
 0x7ba   : > { %21371 = vmatpush3.bf16.msra.mxu1 %v21370_v9  ;;  %19960 = vmatprep.mubr.msk.f32.mxu1 %vm22811_vm3, %v26457_v1  ;;  %v16218_v9 = vld [vmem:[%s28751_s3 + $0x668] sm:$0xff] }
 0x7bb   : > { %21372 = vmatprep.subr.bf16.mxu1 %v22810_v40  ;;  %v21400_v7 = vpack.c.bf16 %v16218_v9, %v16217_v57  ;;  %v16233_v57 = vld [vmem:[%s28751_s3 + $0x6e0] sm:$0xff]  ;;  %v16234_v9 = vld [vmem:[%s28751_s3 + $0x6e8] sm:$0xff] }
 0x7bc   : > { %v11323_v54 = vpop.f32.mrb[94].mxu1 }
 0x7bd   : > { %v26612_v12 = vadd.f32 %v11323_v54, %v26505_v24  ;;  %v19629_v49 = vpop.f32.mrb[95].mxu1  ;;  %19961 = vmatmul.mubr.f32.gmra.mrb[188].mxu1 %v26141_v50  ;;  %v16220_v54 = vld [vmem:[%s28751_s3 + $0x678] sm:$0xff] }
 0x7be   : > { %21374 = vmatpush3.bf16.msra.mxu1 %v21373_v44  ;;  %19963 = vmatprep.mubr.msk.f32.mxu1 %vm22811_vm3, %v26457_v1  ;;  %v26730_v49 = vld [vmem:[#allocation5 + $0x81] sm:$0xff]  ;;  %v21403_v11 = vpack.c.bf16 %v16220_v54, %v16219_v23  ;;  %v21424_v23 = vpack.c.bf16 %v16234_v9, %v16233_v57 }
 0x7bf   : > { %21375 = vmatprep.subr.bf16.mxu1 %v22810_v40  ;;  %v16235_v54 = vld [vmem:[%s28751_s3 + $0x6f0] sm:$0xff] }
 0x7c0   : > { %v11328_v24 = vpop.f32.mrb[96].mxu1  ;;  %v16247_v9 = vld [vmem:[%s28751_s3 + $0x750] sm:$0xff] }
 0x7c1   : > { %v26627_v50 = vadd.f32 %v11328_v24, %v26520_v33  ;;  %19964 = vmatmul.mubr.f32.gmra.mrb[190].mxu1 %v26624_v31  ;;  %v19632_v59 = vpop.f32.mrb[97].mxu1  ;;  %v16222_v24 = vld [vmem:[%s28751_s3 + $0x688] sm:$0xff] }
 0x7c2   : > { %21377 = vmatpush3.bf16.msra.mxu1 %v21376_v30  ;;  %19998 = vmatprep.mubr.msk.f32.mxu1 %vm22811_vm3, %v26457_v1  ;;  %v21406_v41 = vpack.c.bf16 %v16222_v24, %v16221_v10  ;;  %v16237_v24 = vld [vmem:[%s28751_s3 + $0x700] sm:$0xff] }
 0x7c3   : > { %21378 = vmatprep.subr.bf16.mxu1 %v22810_v40 }
 0x7c4   : > { %v11333_v33 = vpop.f32.mrb[98].mxu1 }
 0x7c5   : > { %v26640_v43 = vadd.f32 %v11333_v33, %v26533_v63  ;;  %v19635_v34 = vpop.f32.mrb[99].mxu1  ;;  %v21385_v63 = vpack.c.bf16 %v16208_v28, %v16207_v26  ;;  %v16224_v33 = vld [vmem:[%s28751_s3 + $0x698] sm:$0xff] }
 0x7c6   : > { %21380 = vmatpush3.bf16.msra.mxu1 %v21379_v55  ;;  %v21409_v28 = vpack.c.bf16 %v16224_v33, %v16223_v22  ;;  %v16239_v33 = vld [vmem:[%s28751_s3 + $0x710] sm:$0xff] }
 0x7c7   : > { %21381 = vmatprep.subr.bf16.mxu1 %v22810_v40 }
 0x7c8   : > { %v11338_v4 = vpop.f32.mrb[100].mxu1 }
 0x7c9   : > { %v26650_v47 = vadd.f32 %v11338_v4, %v26543_v61  ;;  %v19638_v37 = vpop.f32.mrb[101].mxu1  ;;  %19999 = vmatmul.mubr.f32.vlgmr.msra.gmra.mrb[192].mxu1 %v26169_v15  ;;  %v16225_v4 = vld [vmem:[%s28751_s3 + $0x6a0] sm:$0xff] }
 0x7ca   : > { %21383 = vmatpush3.bf16.msra.mxu1 %v21382_v48  ;;  %20001 = vmatprep.mubr.msk.f32.mxu1 %vm22811_vm3, %v26457_v1  ;;  %v12282_v48 = vld [vmem:[#allocation5 + $0x22] sm:$0xff]  ;;  %v16226_v37 = vld [vmem:[%s28751_s3 + $0x6a8] sm:$0xff] }
 0x7cb   : > { %21384 = vmatprep.subr.bf16.mxu1 %v22810_v40 }
 0x7cc   : > { %v11343_v19 = vpop.f32.mrb[102].mxu1 }
 0x7cd   : > { %v26663_v61 = vadd.f32 %v11343_v19, %v26557_v29  ;;  %v19641_v15 = vpop.f32.mrb[103].mxu1  ;;  %20002 = vmatmul.mubr.f32.gmra.mrb[194].mxu1 %v26181_v27  ;;  %v21412_v19 = vpack.c.bf16 %v16226_v37, %v16225_v4  ;;  %v16241_v37 = vld [vmem:[%s28751_s3 + $0x720] sm:$0xff] }
 0x7ce   : > { %21386 = vmatpush3.bf16.msra.mxu1 %v21385_v63  ;;  %20004 = vmatprep.mubr.msk.f32.mxu1 %vm22811_vm3, %v26457_v1  ;;  %v16227_v15 = vld [vmem:[%s28751_s3 + $0x6b0] sm:$0xff] }
 0x7cf   : > { %21387 = vmatprep.subr.bf16.mxu1 %v22810_v40 }
 0x7d0   : > { %v11348_v0 = vpop.f32.mrb[104].mxu1 }
 0x7d1   : > { %v26678_v27 = vadd.f32 %v11348_v0, %v26572_v38  ;;  %v19644_v29 = vpop.f32.mrb[105].mxu1  ;;  %20005 = vmatmul.mubr.f32.gmra.mrb[196].mxu1 %v26675_v21 }
 0x7d2   : > { %21389 = vmatpush3.bf16.msra.mxu1 %v21388_v62  ;;  %20007 = vmatprep.mubr.msk.f32.mxu1 %vm22811_vm3, %v26457_v1  ;;  %v16228_v62 = vld [vmem:[%s28751_s3 + $0x6b8] sm:$0xff] }
 0x7d3   : > { %21390 = vmatprep.subr.bf16.mxu1 %v22810_v40  ;;  %v21415_v29 = vpack.c.bf16 %v16228_v62, %v16227_v15 }
 0x7d4   : > { %v11353_v8 = vpop.f32.mrb[106].mxu1 }
 0x7d5   : > { %v26693_v38 = vadd.f32 %v11353_v8, %v26587_v56  ;;  %v19647_v51 = vpop.f32.mrb[107].mxu1  ;;  %20008 = vmatmul.mubr.f32.gmra.mrb[198].mxu1 %v26690_v46  ;;  %v21397_v56 = vpack.c.bf16 %v16216_v45, %v16215_v25  ;;  %v16231_v25 = vld [vmem:[%s28751_s3 + $0x6d0] sm:$0xff]  ;;  %v16232_v45 = vld [vmem:[%s28751_s3 + $0x6d8] sm:$0xff] }
 0x7d6   : > { %21392 = vmatpush3.bf16.msra.mxu1 %v21391_v13  ;;  %20010 = vmatprep.mubr.msk.f32.mxu1 %vm22811_vm3, %v26457_v1  ;;  %v16229_v13 = vld [vmem:[%s28751_s3 + $0x6c0] sm:$0xff] }
 0x7d7   : > { %21393 = vmatprep.subr.bf16.mxu1 %v22810_v40 }
 0x7d9   : > { %20011 = vmatmul.mubr.f32.gmra.mrb[200].mxu1 %v26705_v42 }
 0x7da   : > { %21395 = vmatpush3.bf16.msra.mxu1 %v21394_v3  ;;  %20013 = vmatprep.mubr.msk.f32.mxu1 %vm22811_vm3, %v26457_v1  ;;  %v21418_v3 = vpack.c.bf16 %v16230_v6, %v16229_v13  ;;  %v26889_v13 = vld [vmem:[#allocation5 + $0x43] sm:$0xff] }
 0x7db   : > { %21396 = vmatprep.subr.bf16.mxu1 %v22810_v40 }
 0x7dc   : > { %v11455_v36 = vpop.f32.mrb[108].mxu1 }
 0x7dd   : > { %v26718_v52 = vadd.f32 %v11455_v36, %v26612_v12  ;;  %v19682_v44 = vpop.f32.mrb[109].mxu1  ;;  %20014 = vmatmul.mubr.f32.gmra.mrb[202].mxu1 %v26227_v5 }
 0x7de   : > { %21398 = vmatpush3.bf16.msra.mxu1 %v21397_v56  ;;  %20016 = vmatprep.mubr.msk.f32.mxu1 %vm22811_vm3, %v26457_v1  ;;  %v21421_v56 = vpack.c.bf16 %v16232_v45, %v16231_v25  ;;  %v26904_v45 = vld [vmem:[#allocation5 + $0x53] sm:$0xff] }
 0x7df   : > { %21399 = vmatprep.subr.bf16.mxu1 %v22810_v40 }
 0x7e0   : > { %v11460_v12 = vpop.f32.mrb[110].mxu1 }
 0x7e1   : > { %v26733_v5 = vadd.f32 %v11460_v12, %v26627_v50  ;;  %v19685_v30 = vpop.f32.mrb[111].mxu1  ;;  %20017 = vmatmul.mubr.f32.gmra.mrb[204].mxu1 %v26730_v49  ;;  %v16236_v12 = vld [vmem:[%s28751_s3 + $0x6f8] sm:$0xff] }
 0x7e2   : > { %21401 = vmatpush3.bf16.msra.mxu1 %v21400_v7  ;;  %20051 = vmatprep.mubr.msk.f32.mxu1 %vm22811_vm3, %v26457_v1  ;;  %v26837_v30 = vld [vmem:[#allocation5 + $0x82] sm:$0xff]  ;;  %v21427_v10 = vpack.c.bf16 %v16236_v12, %v16235_v54  ;;  %v16250_v54 = vld [vmem:[%s28751_s3 + $0x768] sm:$0xff] }
 0x7e3   : > { %21402 = vmatprep.subr.bf16.mxu1 %v22810_v40 }
 0x7e4   : > { %v11465_v50 = vpop.f32.mrb[112].mxu1 }
 0x7e5   : > { %v26746_v59 = vadd.f32 %v11465_v50, %v26640_v43  ;;  %v19688_v55 = vpop.f32.mrb[113].mxu1  ;;  %v16238_v50 = vld [vmem:[%s28751_s3 + $0x708] sm:$0xff] }
 0x7e6   : > { %21404 = vmatpush3.bf16.msra.mxu1 %v21403_v11  ;;  %v21430_v22 = vpack.c.bf16 %v16238_v50, %v16237_v24  ;;  %v16251_v24 = vld [vmem:[%s28751_s3 + $0x770] sm:$0xff]  ;;  %v16252_v50 = vld [vmem:[%s28751_s3 + $0x778] sm:$0xff] }
 0x7e7   : > { %21405 = vmatprep.subr.bf16.mxu1 %v22810_v40 }
 0x7e8   : > { %v11470_v34 = vpop.f32.mrb[114].mxu1 }
 0x7e9   : > { %v26756_v26 = vadd.f32 %v11470_v34, %v26650_v47  ;;  %v19691_v43 = vpop.f32.mrb[115].mxu1  ;;  %20052 = vmatmul.mubr.f32.vlgmr.msra.gmra.mrb[206].mxu1 %v12282_v48  ;;  %v26767_v47 = vld [vmem:[#allocation5 + $0x32] sm:$0xff]  ;;  %v16240_v34 = vld [vmem:[%s28751_s3 + $0x718] sm:$0xff] }
 0x7ea   : > { %21407 = vmatpush3.bf16.msra.mxu1 %v21406_v41  ;;  %20054 = vmatprep.mubr.msk.f32.mxu1 %vm22811_vm3, %v26457_v1  ;;  %v12413_v43 = vld [vmem:[#allocation5 + $0x23] sm:$0xff] }
 0x7eb   : > { %21408 = vmatprep.subr.bf16.mxu1 %v22810_v40 }
 0x7ec   : > { %v11475_v63 = vpop.f32.mrb[116].mxu1 }
 0x7ed   : > { %v26770_v39 = vadd.f32 %v11475_v63, %v26663_v61  ;;  %v19694_v35 = vpop.f32.mrb[117].mxu1  ;;  %20055 = vmatmul.mubr.f32.gmra.mrb[208].mxu1 %v26767_v47  ;;  %v16242_v63 = vld [vmem:[%s28751_s3 + $0x728] sm:$0xff] }
 0x7ee   : > { %21410 = vmatpush3.bf16.msra.mxu1 %v21409_v28  ;;  %20057 = vmatprep.mubr.msk.f32.mxu1 %vm22811_vm3, %v26457_v1  ;;  %v21436_v62 = vpack.c.bf16 %v16242_v63, %v16241_v37  ;;  %v16256_v37 = vld [vmem:[%s28751_s3 + $0x798] sm:$0xff] }
 0x7ef   : > { %21411 = vmatprep.subr.bf16.mxu1 %v22810_v40 }
 0x7f0   : > { %v11480_v61 = vpop.f32.mrb[118].mxu1 }
 0x7f1   : > { %v26785_v53 = vadd.f32 %v11480_v61, %v26678_v27  ;;  %v19697_v0 = vpop.f32.mrb[119].mxu1  ;;  %20058 = vmatmul.mubr.f32.gmra.mrb[210].mxu1 %v26782_v2  ;;  %v16243_v61 = vld [vmem:[%s28751_s3 + $0x730] sm:$0xff] }
 0x7f2   : > { %21413 = vmatpush3.bf16.msra.mxu1 %v21412_v19  ;;  %20060 = vmatprep.mubr.msk.f32.mxu1 %vm22811_vm3, %v26457_v1  ;;  %v26874_v19 = vld [vmem:[#allocation5 + $0x33] sm:$0xff]  ;;  %v16244_v0 = vld [vmem:[%s28751_s3 + $0x738] sm:$0xff] }
 0x7f3   : > { %21414 = vmatprep.subr.bf16.mxu1 %v22810_v40 }
 0x7f4   : > { %v11485_v27 = vpop.f32.mrb[120].mxu1 }
 0x7f5   : > { %v26800_v8 = vadd.f32 %v11485_v27, %v26693_v38  ;;  %v19700_v51 = vpop.f32.mrb[121].mxu1  ;;  %20061 = vmatmul.mubr.f32.gmra.mrb[212].mxu1 %v26797_v58  ;;  %v26812_v38 = vld [vmem:[#allocation5 + $0x62] sm:$0xff]  ;;  %v21439_v27 = vpack.c.bf16 %v16244_v0, %v16243_v61  ;;  %v16257_v61 = vld [vmem:[%s28751_s3 + $0x7a0] sm:$0xff]  ;;  %v16258_v0 = vld [vmem:[%s28751_s3 + $0x7a8] sm:$0xff] }
 0x7f6   : > { %21416 = vmatpush3.bf16.msra.mxu1 %v21415_v29  ;;  %20063 = vmatprep.mubr.msk.f32.mxu1 %vm22811_vm3, %v26457_v1  ;;  %v16245_v51 = vld [vmem:[%s28751_s3 + $0x740] sm:$0xff] }
 0x7f7   : > { %21417 = vmatprep.subr.bf16.mxu1 %v22810_v40 }
 0x7f9   : > { %20064 = vmatmul.mubr.f32.gmra.mrb[214].mxu1 %v26812_v38 }
 0x7fa   : > { %21419 = vmatpush3.bf16.msra.mxu1 %v21418_v3  ;;  %20066 = vmatprep.mubr.msk.f32.mxu1 %vm22811_vm3, %v26457_v1  ;;  %v16246_v3 = vld [vmem:[%s28751_s3 + $0x748] sm:$0xff] }
 0x7fb   : > { %21420 = vmatprep.subr.bf16.mxu1 %v22810_v40  ;;  %v21442_v57 = vpack.c.bf16 %v16246_v3, %v16245_v51  ;;  %v21460_v51 = vpack.c.bf16 %v16258_v0, %v16257_v61  ;;  %v16259_v3 = vld [vmem:[%s28751_s3 + $0x7b0] sm:$0xff] }
 0x7fc   : > { %v11586_v36 = vpop.f32.mrb[122].mxu1 }
 0x7fd   : > { %v26825_v44 = vadd.f32 %v11586_v36, %v26718_v52  ;;  %v19735_v7 = vpop.f32.mrb[123].mxu1  ;;  %20067 = vmatmul.mubr.f32.gmra.mrb[216].mxu1 %v26315_v17  ;;  %v16248_v36 = vld [vmem:[%s28751_s3 + $0x758] sm:$0xff] }
 0x7fe   : > { %21422 = vmatpush3.bf16.msra.mxu1 %v21421_v56  ;;  %20069 = vmatprep.mubr.msk.f32.mxu1 %vm22811_vm3, %v26457_v1  ;;  %v26919_v7 = vld [vmem:[#allocation5 + $0x63] sm:$0xff] }
 0x7ff   : > { %21423 = vmatprep.subr.bf16.mxu1 %v22810_v40 }
 0x800   : > { %v11591_v52 = vpop.f32.mrb[124].mxu1 }
 0x801   : > { %v19738_v11 = vpop.f32.mrb[125].mxu1  ;;  %20070 = vmatmul.mubr.f32.gmra.mrb[218].mxu1 %v26837_v30  ;;  %v26841_v17 = vadd.f32 %v11591_v52, %v26733_v5 }
 0x802   : > { %21425 = vmatpush3.bf16.msra.mxu1 %v21424_v23  ;;  %20104 = vmatprep.mubr.msk.f32.mxu1 %vm22811_vm3, %v26457_v1  ;;  %v16249_v23 = vld [vmem:[%s28751_s3 + $0x760] sm:$0xff] }
 0x803   : > { %21426 = vmatprep.subr.bf16.mxu1 %v22810_v40 }
 0x804   : > { %v11596_v55 = vpop.f32.mrb[126].mxu1 }
 0x805   : > { %v19741_v41 = vpop.f32.mrb[127].mxu1  ;;  %v26853_v5 = vadd.f32 %v11596_v55, %v26746_v59  ;;  %v21433_v59 = vpack.c.bf16 %v16240_v34, %v16239_v33  ;;  %v16253_v33 = vld [vmem:[%s28751_s3 + $0x780] sm:$0xff]  ;;  %v16254_v34 = vld [vmem:[%s28751_s3 + $0x788] sm:$0xff] }
 0x806   : > { %21428 = vmatpush3.bf16.msra.mxu1 %v21427_v10  ;;  %v21448_v10 = vpack.c.bf16 %v16250_v54, %v16249_v23  ;;  %v16262_v23 = vld [vmem:[%s28751_s3 + $0x7c8] sm:$0xff] }
 0x807   : > { %21429 = vmatprep.subr.bf16.mxu1 %v22810_v40  ;;  %v27011_v54 = vld [vmem:[#allocation5 + $0x54] sm:$0xff] }
 0x808   : > { %v11601_v48 = vpop.f32.mrb[128].mxu1 }
 0x809   : > { %v19744_v28 = vpop.f32.mrb[129].mxu1  ;;  %20105 = vmatmul.mubr.f32.vlgmr.msra.gmra.mrb[220].mxu1 %v12413_v43  ;;  %v26863_v4 = vadd.f32 %v11601_v48, %v26756_v26 }
 0x80a   : > { %21431 = vmatpush3.bf16.msra.mxu1 %v21430_v22  ;;  %20107 = vmatprep.mubr.msk.f32.mxu1 %vm22811_vm3, %v26457_v1  ;;  %v21451_v22 = vpack.c.bf16 %v16252_v50, %v16251_v24  ;;  %v21454_v28 = vpack.c.bf16 %v16254_v34, %v16253_v33  ;;  %v16263_v24 = vld [vmem:[%s28751_s3 + $0x7d0] sm:$0xff]  ;;  %v16264_v50 = vld [vmem:[%s28751_s3 + $0x7d8] sm:$0xff] }
 0x80b   : > { %21432 = vmatprep.subr.bf16.mxu1 %v22810_v40 }
 0x80c   : > { %v11606_v35 = vpop.f32.mrb[130].mxu1 }
 0x80d   : > { %v19747_v26 = vpop.f32.mrb[131].mxu1  ;;  %20108 = vmatmul.mubr.f32.gmra.mrb[222].mxu1 %v26874_v19  ;;  %v26878_v15 = vadd.f32 %v11606_v35, %v26770_v39  ;;  %v12544_v35 = vld [vmem:[#allocation5 + $0x24] sm:$0xff] }
 0x80e   : > { %21434 = vmatpush3.bf16.msra.mxu1 %v21433_v59  ;;  %20110 = vmatprep.mubr.msk.f32.mxu1 %vm22811_vm3, %v26457_v1  ;;  %v16255_v59 = vld [vmem:[%s28751_s3 + $0x790] sm:$0xff] }
 0x80f   : > { %21435 = vmatprep.subr.bf16.mxu1 %v22810_v40 }
 0x810   : > { %v11611_v29 = vpop.f32.mrb[132].mxu1 }
 0x811   : > { %v19750_v39 = vpop.f32.mrb[133].mxu1  ;;  %20111 = vmatmul.mubr.f32.gmra.mrb[224].mxu1 %v26889_v13  ;;  %v26893_v6 = vadd.f32 %v11611_v29, %v26785_v53 }
 0x812   : > { %21437 = vmatpush3.bf16.msra.mxu1 %v21436_v62  ;;  %20113 = vmatprep.mubr.msk.f32.mxu1 %vm22811_vm3, %v26457_v1  ;;  %v21457_v62 = vpack.c.bf16 %v16256_v37, %v16255_v59  ;;  %v16268_v59 = vld [vmem:[%s28751_s3 + $0x7f8] sm:$0xff] }
 0x813   : > { %21438 = vmatprep.subr.bf16.mxu1 %v22810_v40  ;;  %v27051_v37 = vld [vmem:[#allocation5 + $0x84] sm:$0xff] }
 0x814   : > { %v11616_v25 = vpop.f32.mrb[134].mxu1 }
 0x815   : > { %v19753_v53 = vpop.f32.mrb[135].mxu1  ;;  %20114 = vmatmul.mubr.f32.gmra.mrb[226].mxu1 %v26904_v45  ;;  %v26908_v56 = vadd.f32 %v11616_v25, %v26800_v8  ;;  %v21445_v8 = vpack.c.bf16 %v16248_v36, %v16247_v9  ;;  %v16260_v25 = vld [vmem:[%s28751_s3 + $0x7b8] sm:$0xff] }
 0x816   : > { %21440 = vmatpush3.bf16.msra.mxu1 %v21439_v27  ;;  %20116 = vmatprep.mubr.msk.f32.mxu1 %vm22811_vm3, %v26457_v1  ;;  %v26996_v53 = vld [vmem:[#allocation5 + $0x44] sm:$0xff]  ;;  %v21463_v36 = vpack.c.bf16 %v16260_v25, %v16259_v3 }
 0x817   : > { %21441 = vmatprep.subr.bf16.mxu1 %v22810_v40 }
 0x819   : > { %20117 = vmatmul.mubr.f32.gmra.mrb[228].mxu1 %v26919_v7 }
 0x81a   : > { %21443 = vmatpush3.bf16.msra.mxu1 %v21442_v57  ;;  %20119 = vmatprep.mubr.msk.f32.mxu1 %vm22811_vm3, %v26457_v1 }
 0x81b   : > { %21444 = vmatprep.subr.bf16.mxu1 %v22810_v40 }
 0x81c   : > { %v11717_v12 = vpop.f32.mrb[136].mxu1 }
 0x81d   : > { %v19788_v52 = vpop.f32.mrb[137].mxu1  ;;  %20120 = vmatmul.mubr.f32.gmra.mrb[230].mxu1 %v26415_v14  ;;  %v26933_v11 = vadd.f32 %v11717_v12, %v26825_v44  ;;  %v26944_v14 = vld [vmem:[#allocation5 + $0x83] sm:$0xff] }
 0x81e   : > { %21446 = vmatpush3.bf16.msra.mxu1 %v21445_v8  ;;  %20122 = vmatprep.mubr.msk.f32.mxu1 %vm22811_vm3, %v26457_v1  ;;  %v16261_v8 = vld [vmem:[%s28751_s3 + $0x7c0] sm:$0xff] }
 0x81f   : > { %21447 = vmatprep.subr.bf16.mxu1 %v22810_v40 }
 0x820   : > { %v11722_v55 = vpop.f32.mrb[138].mxu1 }
 0x821   : > { %v26947_v44 = vadd.f32 %v11722_v55, %v26841_v17  ;;  %v19791_v41 = vpop.f32.mrb[139].mxu1  ;;  %20123 = vmatmul.mubr.f32.gmra.mrb[232].mxu1 %v26944_v14  ;;  %v21469_v55 = vpack.c.bf16 %v16264_v50, %v16263_v24  ;;  %v16277_v50 = vld [vmem:[%s28751_s3 + $0x840] sm:$0xff] }
 0x822   : > { %21449 = vmatpush3.bf16.msra.mxu1 %v21448_v10  ;;  %20157 = vmatprep.mubr.msk.f32.mxu1 %vm22811_vm3, %v26457_v1  ;;  %v21466_v10 = vpack.c.bf16 %v16262_v23, %v16261_v8  ;;  %v16265_v41 = vld [vmem:[%s28751_s3 + $0x7e0] sm:$0xff] }
 0x823   : > { %21450 = vmatprep.subr.bf16.mxu1 %v22810_v40 }
 0x824   : > { %v11727_v17 = vpop.f32.mrb[140].mxu1 }
 0x825   : > { %v26960_v48 = vadd.f32 %v11727_v17, %v26853_v5  ;;  %v19794_v43 = vpop.f32.mrb[141].mxu1 }
 0x826   : > { %21452 = vmatpush3.bf16.msra.mxu1 %v21451_v22  ;;  %v16266_v22 = vld [vmem:[%s28751_s3 + $0x7e8] sm:$0xff] }
 0x827   : > { %21453 = vmatprep.subr.bf16.mxu1 %v22810_v40  ;;  %v21472_v43 = vpack.c.bf16 %v16266_v22, %v16265_v41 }
 0x828   : > { %v11732_v63 = vpop.f32.mrb[142].mxu1 }
 0x829   : > { %v26970_v26 = vadd.f32 %v11732_v63, %v26863_v4  ;;  %v19797_v5 = vpop.f32.mrb[143].mxu1  ;;  %20158 = vmatmul.mubr.f32.vlgmr.msra.gmra.mrb[234].mxu1 %v12544_v35  ;;  %v26981_v4 = vld [vmem:[#allocation5 + $0x34] sm:$0xff] }
 0x82a   : > { %21455 = vmatpush3.bf16.msra.mxu1 %v21454_v28  ;;  %20160 = vmatprep.mubr.msk.f32.mxu1 %vm22811_vm3, %v26457_v1  ;;  %v16267_v28 = vld [vmem:[%s28751_s3 + $0x7f0] sm:$0xff]  ;;  %v16269_v5 = vld [vmem:[%s28751_s3 + $0x800] sm:$0xff] }
 0x82b   : > { %21456 = vmatprep.subr.bf16.mxu1 %v22810_v40  ;;  %v21475_v35 = vpack.c.bf16 %v16268_v59, %v16267_v28  ;;  %v16282_v28 = vld [vmem:[%s28751_s3 + $0x868] sm:$0xff] }
 0x82c   : > { %v11737_v29 = vpop.f32.mrb[144].mxu1 }
 0x82d   : > { %v26984_v39 = vadd.f32 %v11737_v29, %v26878_v15  ;;  %v19800_v27 = vpop.f32.mrb[145].mxu1  ;;  %20161 = vmatmul.mubr.f32.gmra.mrb[236].mxu1 %v26981_v4 }
 0x82e   : > { %21458 = vmatpush3.bf16.msra.mxu1 %v21457_v62  ;;  %20163 = vmatprep.mubr.msk.f32.mxu1 %vm22811_vm3, %v26457_v1  ;;  %v16270_v62 = vld [vmem:[%s28751_s3 + $0x808] sm:$0xff]  ;;  %v16271_v27 = vld [vmem:[%s28751_s3 + $0x810] sm:$0xff] }
 0x82f   : > { %21459 = vmatprep.subr.bf16.mxu1 %v22810_v40  ;;  %v21478_v29 = vpack.c.bf16 %v16270_v62, %v16269_v5  ;;  %v16283_v5 = vld [vmem:[%s28751_s3 + $0x870] sm:$0xff] }
 0x830   : > { %v11742_v15 = vpop.f32.mrb[146].mxu1 }
 0x831   : > { %v26999_v57 = vadd.f32 %v11742_v15, %v26893_v6  ;;  %v19803_v9 = vpop.f32.mrb[147].mxu1  ;;  %20164 = vmatmul.mubr.f32.gmra.mrb[238].mxu1 %v26996_v53 }
 0x832   : > { %21461 = vmatpush3.bf16.msra.mxu1 %v21460_v51  ;;  %20166 = vmatprep.mubr.msk.f32.mxu1 %vm22811_vm3, %v26457_v1  ;;  %v16272_v51 = vld [vmem:[%s28751_s3 + $0x818] sm:$0xff]  ;;  %v16273_v9 = vld [vmem:[%s28751_s3 + $0x820] sm:$0xff] }
 0x833   : > { %21462 = vmatprep.subr.bf16.mxu1 %v22810_v40 }
 0x834   : > { %v11747_v6 = vpop.f32.mrb[148].mxu1 }
 0x835   : > { %v27014_v12 = vadd.f32 %v11747_v6, %v26908_v56  ;;  %v19806_v52 = vpop.f32.mrb[149].mxu1  ;;  %20167 = vmatmul.mubr.f32.gmra.mrb[240].mxu1 %v27011_v54  ;;  %v27026_v56 = vld [vmem:[#allocation5 + $0x64] sm:$0xff] }
 0x836   : > { %21464 = vmatpush3.bf16.msra.mxu1 %v21463_v36  ;;  %20169 = vmatprep.mubr.msk.f32.mxu1 %vm22811_vm3, %v26457_v1  ;;  %v16274_v36 = vld [vmem:[%s28751_s3 + $0x828] sm:$0xff]  ;;  %v16275_v6 = vld [vmem:[%s28751_s3 + $0x830] sm:$0xff]  ;;  %v16276_v52 = vld [vmem:[%s28751_s3 + $0x838] sm:$0xff] }
 0x837   : > { %21465 = vmatprep.subr.bf16.mxu1 %v22810_v40  ;;  %v21484_v23 = vpack.c.bf16 %v16274_v36, %v16273_v9  ;;  %v21487_v24 = vpack.c.bf16 %v16276_v52, %v16275_v6  ;;  %v16288_v9 = vld [vmem:[%s28751_s3 + $0x898] sm:$0xff]  ;;  %v16289_v6 = vld [vmem:[%s28751_s3 + $0x8a0] sm:$0xff]  ;;  %v16290_v52 = vld [vmem:[%s28751_s3 + $0x8a8] sm:$0xff] }
 0x839   : > { %20170 = vmatmul.mubr.f32.gmra.mrb[242].mxu1 %v27026_v56 }
 0x83a   : > { %21467 = vmatpush3.bf16.msra.mxu1 %v21466_v10  ;;  %20172 = vmatprep.mubr.msk.f32.mxu1 %vm22811_vm3, %v26457_v1 }
 0x83b   : > { %21468 = vmatprep.subr.bf16.mxu1 %v22810_v40 }
 0x83c   : > { %v11848_v33 = vpop.f32.mrb[150].mxu1 }
 0x83d   : > { %v27039_v34 = vadd.f32 %v11848_v33, %v26933_v11  ;;  %v19841_v17 = vpop.f32.mrb[151].mxu1  ;;  %20173 = vmatmul.mubr.f32.gmra.mrb[244].mxu1 %v26517_v20  ;;  %v16279_v33 = vld [vmem:[%s28751_s3 + $0x850] sm:$0xff] }
 0x83e   : > { %21470 = vmatpush3.bf16.msra.mxu1 %v21469_v55  ;;  %20175 = vmatprep.mubr.msk.f32.mxu1 %vm22811_vm3, %v26457_v1  ;;  %v16278_v55 = vld [vmem:[%s28751_s3 + $0x848] sm:$0xff]  ;;  %v16280_v17 = vld [vmem:[%s28751_s3 + $0x858] sm:$0xff] }
 0x83f   : > { %21471 = vmatprep.subr.bf16.mxu1 %v22810_v40  ;;  %v21490_v22 = vpack.c.bf16 %v16278_v55, %v16277_v50  ;;  %v16291_v50 = vld [vmem:[%s28751_s3 + $0x8b0] sm:$0xff]  ;;  %v16292_v55 = vld [vmem:[%s28751_s3 + $0x8b8] sm:$0xff] }
 0x840   : > { %v11853_v11 = vpop.f32.mrb[152].mxu1 }
 0x841   : > { %v27054_v20 = vadd.f32 %v11853_v11, %v26947_v44  ;;  %v19844_v63 = vpop.f32.mrb[153].mxu1  ;;  %20176 = vmatmul.mubr.f32.gmra.mrb[246].mxu1 %v27051_v37 }
 0x842   : > { %21473 = vmatpush3.bf16.msra.mxu1 %v21472_v43  ;;  %20210 = vmatprep.mubr.msk.f32.mxu1 %vm22811_vm3, %v26457_v1  ;;  %v16281_v43 = vld [vmem:[%s28751_s3 + $0x860] sm:$0xff] }
 0x843   : > { %21474 = vmatprep.subr.bf16.mxu1 %v22810_v40 }
 0x844   : > { %v11858_v44 = vpop.f32.mrb[154].mxu1 }
 0x845   : > { %v27067_v61 = vadd.f32 %v11858_v44, %v26960_v48  ;;  %v19847_v0 = vpop.f32.mrb[155].mxu1  ;;  %v21481_v48 = vpack.c.bf16 %v16272_v51, %v16271_v27  ;;  %v16286_v27 = vld [vmem:[%s28751_s3 + $0x888] sm:$0xff] }
 0x846   : > { %21476 = vmatpush3.bf16.msra.mxu1 %v21475_v35  ;;  %v21496_v35 = vpack.c.bf16 %v16282_v28, %v16281_v43  ;;  %v16295_v43 = vld [vmem:[%s28751_s3 + $0x8d0] sm:$0xff]  ;;  %v16296_v28 = vld [vmem:[%s28751_s3 + $0x8d8] sm:$0xff] }
 0x847   : > { %21477 = vmatprep.subr.bf16.mxu1 %v22810_v40 }
 0x848   : > { %v11863_v3 = vpop.f32.mrb[156].mxu1 }
 0x849   : > { %v27077_v25 = vadd.f32 %v11863_v3, %v26970_v26  ;;  %v19850_v15 = vpop.f32.mrb[157].mxu1  ;;  %20211 = vmatmul.mubr.f32.vlgmr.msra.gmra.mrb[248].mxu1 %v26554_v18 }
 0x84a   : > { %21479 = vmatpush3.bf16.msra.mxu1 %v21478_v29  ;;  %20213 = vmatprep.mubr.msk.f32.mxu1 %vm22811_vm3, %v26457_v1  ;;  %v16285_v29 = vld [vmem:[%s28751_s3 + $0x880] sm:$0xff] }
 0x84b   : > { %21480 = vmatprep.subr.bf16.mxu1 %v22810_v40  ;;  %v21502_v15 = vpack.c.bf16 %v16286_v27, %v16285_v29 }
 0x84c   : > { %v11868_v26 = vpop.f32.mrb[158].mxu1 }
 0x84d   : > { %v27090_v8 = vadd.f32 %v11868_v26, %v26984_v39  ;;  %v19853_v18 = vpop.f32.mrb[159].mxu1  ;;  %20214 = vmatmul.mubr.f32.gmra.mrb[250].mxu1 %v26569_v16  ;;  %v12807_v26 = vld [vmem:[#allocation5 + $0x31] sm:$0xff] }
 0x84e   : > { %21482 = vmatpush3.bf16.msra.mxu1 %v21481_v48  ;;  %20216 = vmatprep.mubr.msk.f32.mxu1 %vm22811_vm3, %v26457_v1  ;;  %v16287_v48 = vld [vmem:[%s28751_s3 + $0x890] sm:$0xff] }
 0x84f   : > { %21483 = vmatprep.subr.bf16.mxu1 %v22810_v40 }
 0x850   : > { %v11873_v39 = vpop.f32.mrb[160].mxu1 }
 0x851   : > { %v27103_v10 = vadd.f32 %v11873_v39, %v26999_v57  ;;  %v19856_v16 = vpop.f32.mrb[161].mxu1  ;;  %20217 = vmatmul.mubr.f32.gmra.mrb[252].mxu1 %v26584_v32 }
 0x852   : > { %21485 = vmatpush3.bf16.msra.mxu1 %v21484_v23  ;;  %20219 = vmatprep.mubr.msk.f32.mxu1 %vm22811_vm3, %v26457_v1  ;;  %v21505_v23 = vpack.c.bf16 %v16288_v9, %v16287_v48 }
 0x853   : > { %21486 = vmatprep.subr.bf16.mxu1 %v22810_v40 }
 0x854   : > { %v11878_v57 = vpop.f32.mrb[162].mxu1 }
 0x855   : > { %v27116_v41 = vadd.f32 %v11878_v57, %v27014_v12  ;;  %v19859_v32 = vpop.f32.mrb[163].mxu1  ;;  %20220 = vmatmul.mubr.f32.gmra.mrb[254].mxu1 %v26599_v60  ;;  %v27128_v12 = vld [vmem:[#allocation5 + $0x70] sm:$0xff]  ;;  %v21493_v60 = vpack.c.bf16 %v16280_v17, %v16279_v33  ;;  %v16294_v33 = vld [vmem:[%s28751_s3 + $0x8c8] sm:$0xff] }
 0x856   : > { %21488 = vmatpush3.bf16.msra.mxu1 %v21487_v24  ;;  %20222 = vmatprep.mubr.msk.f32.mxu1 %vm22811_vm3, %v26457_v1  ;;  %v21508_v24 = vpack.c.bf16 %v16290_v52, %v16289_v6  ;;  %v21511_v32 = vpack.c.bf16 %v16292_v55, %v16291_v50  ;;  %v16307_v55 = vld [vmem:[%s28751_s3 + $0x930] sm:$0xff] }
 0x857   : > { %21489 = vmatprep.subr.bf16.mxu1 %v22810_v40 }
 0x859   : > { %20223 = vmatmul.mubr.f32.gmra.mrb[30].mxu1 %v27128_v12 }
 0x85a   : > { %21491 = vmatpush3.bf16.msra.mxu1 %v21490_v22  ;;  %20225 = vmatprep.mubr.msk.f32.mxu1 %vm22811_vm3, %v26457_v1  ;;  %v27144_v1 = vld [vmem:[#allocation5] sm:$0xff]  ;;  %v16293_v22 = vld [vmem:[%s28751_s3 + $0x8c0] sm:$0xff] }
 0x85b   : > { %21492 = vmatprep.subr.bf16.mxu1 %v22810_v40 }
 0x85c   : > { %v11979_v59 = vpop.f32.mrb[164].mxu1 }
 0x85d   : > { %v27141_v11 = vadd.f32 %v11979_v59, %v27039_v34  ;;  %v19894_v63 = vpop.f32.mrb[165].mxu1  ;;  %20226 = vmatmul.mubr.f32.gmra.mrb[32].mxu1 %v26624_v31  ;;  %v16284_v34 = vld [vmem:[%s28751_s3 + $0x878] sm:$0xff]  ;;  %v16297_v59 = vld [vmem:[%s28751_s3 + $0x8e0] sm:$0xff] }
 0x85e   : > { %21494 = vmatpush3.bf16.msra.mxu1 %v21493_v60  ;;  %20228 = vmatprep.mubr.msk.f32.mxu1 %vm22811_vm3, %v27144_v1  ;;  %v21499_v0 = vpack.c.bf16 %v16284_v34, %v16283_v5  ;;  %v21514_v60 = vpack.c.bf16 %v16294_v33, %v16293_v22  ;;  %v16298_v63 = vld [vmem:[%s28751_s3 + $0x8e8] sm:$0xff]  ;;  %v16309_v22 = vld [vmem:[%s28751_s3 + $0x940] sm:$0xff] }
 0x85f   : > { %21495 = vmatprep.subr.bf16.mxu1 %v22810_v40  ;;  %v16310_v33 = vld [vmem:[%s28751_s3 + $0x948] sm:$0xff] }
 0x860   : > { %v11984_v62 = vpop.f32.mrb[166].mxu1 }
 0x861   : > { %v27156_v31 = vadd.f32 %v11984_v62, %v27054_v20  ;;  %v19897_v44 = vpop.f32.mrb[167].mxu1  ;;  %20229 = vmatmul.mubr.f32.gmra.mrb[0].mxu1 %v27144_v1  ;;  %v27247_v62 = vld [vmem:[#allocation5 + $0x91] sm:$0xff] }
 0x862   : > { %21497 = vmatpush3.bf16.msra.mxu1 %v21496_v35  ;;  %20263 = vmatprep.mubr.msk.f32.mxu1 %vm22811_vm3, %v27144_v1  ;;  %v21520_v44 = vpack.c.bf16 %v16298_v63, %v16297_v59 }
 0x863   : > { %21498 = vmatprep.subr.bf16.mxu1 %v22810_v40 }
 0x864   : > { %v11989_v20 = vpop.f32.mrb[168].mxu1 }
 0x865   : > { %v27169_v51 = vadd.f32 %v11989_v20, %v27067_v61  ;;  %v19900_v3 = vpop.f32.mrb[169].mxu1 }
 0x866   : > { %21500 = vmatpush3.bf16.msra.mxu1 %v21499_v0  ;;  %v16299_v0 = vld [vmem:[%s28751_s3 + $0x8f0] sm:$0xff]  ;;  %v16301_v3 = vld [vmem:[%s28751_s3 + $0x900] sm:$0xff] }
 0x867   : > { %21501 = vmatprep.subr.bf16.mxu1 %v22810_v40 }
 0x868   : > { %v11994_v36 = vpop.f32.mrb[170].mxu1 }
 0x869   : > { %v27179_v18 = vadd.f32 %v11994_v36, %v27077_v25  ;;  %v19903_v61 = vpop.f32.mrb[171].mxu1  ;;  %20264 = vmatmul.mubr.f32.vlgmr.msra.gmra.mrb[34].mxu1 %v12807_v26  ;;  %v16303_v26 = vld [vmem:[%s28751_s3 + $0x910] sm:$0xff] }
 0x86a   : > { %21503 = vmatpush3.bf16.msra.mxu1 %v21502_v15  ;;  %20266 = vmatprep.mubr.msk.f32.mxu1 %vm22811_vm3, %v27144_v1  ;;  %v16302_v15 = vld [vmem:[%s28751_s3 + $0x908] sm:$0xff]  ;;  %v16304_v61 = vld [vmem:[%s28751_s3 + $0x918] sm:$0xff] }
 0x86b   : > { %21504 = vmatprep.subr.bf16.mxu1 %v22810_v40  ;;  %v21526_v36 = vpack.c.bf16 %v16302_v15, %v16301_v3  ;;  %v16318_v3 = vld [vmem:[%s28751_s3 + $0x988] sm:$0xff] }
 0x86c   : > { %v11999_v39 = vpop.f32.mrb[172].mxu1 }
 0x86d   : > { %v27191_v25 = vadd.f32 %v11999_v39, %v27090_v8  ;;  %v19906_v16 = vpop.f32.mrb[173].mxu1  ;;  %20267 = vmatmul.mubr.f32.gmra.mrb[2].mxu1 %v26675_v21  ;;  %v16305_v39 = vld [vmem:[%s28751_s3 + $0x920] sm:$0xff] }
 0x86e   : > { %21506 = vmatpush3.bf16.msra.mxu1 %v21505_v23  ;;  %20269 = vmatprep.mubr.msk.f32.mxu1 %vm22811_vm3, %v27144_v1  ;;  %v16306_v16 = vld [vmem:[%s28751_s3 + $0x928] sm:$0xff] }
 0x86f   : > { %21507 = vmatprep.subr.bf16.mxu1 %v22810_v40  ;;  %v21532_v50 = vpack.c.bf16 %v16306_v16, %v16305_v39  ;;  %v16322_v39 = vld [vmem:[%s28751_s3 + $0x9a8] sm:$0xff] }
 0x870   : > { %v12004_v8 = vpop.f32.mrb[174].mxu1 }
 0x871   : > { %v27204_v57 = vadd.f32 %v12004_v8, %v27103_v10  ;;  %v19909_v21 = vpop.f32.mrb[175].mxu1  ;;  %20270 = vmatmul.mubr.f32.gmra.mrb[4].mxu1 %v26690_v46  ;;  %v16308_v8 = vld [vmem:[%s28751_s3 + $0x938] sm:$0xff] }
 0x872   : > { %21509 = vmatpush3.bf16.msra.mxu1 %v21508_v24  ;;  %20272 = vmatprep.mubr.msk.f32.mxu1 %vm22811_vm3, %v27144_v1 }
 0x873   : > { %21510 = vmatprep.subr.bf16.mxu1 %v22810_v40 }
 0x874   : > { %v12009_v10 = vpop.f32.mrb[176].mxu1 }
 0x875   : > { %v27217_v17 = vadd.f32 %v12009_v10, %v27116_v41  ;;  %v19912_v46 = vpop.f32.mrb[177].mxu1  ;;  %20273 = vmatmul.mubr.f32.gmra.mrb[6].mxu1 %v26705_v42  ;;  %v27229_v41 = vld [vmem:[#allocation5 + $0x71] sm:$0xff]  ;;  %v21517_v42 = vpack.c.bf16 %v16296_v28, %v16295_v43  ;;  %v16312_v43 = vld [vmem:[%s28751_s3 + $0x958] sm:$0xff] }
 0x876   : > { %21512 = vmatpush3.bf16.msra.mxu1 %v21511_v32  ;;  %20275 = vmatprep.mubr.msk.f32.mxu1 %vm22811_vm3, %v27144_v1  ;;  %v21535_v32 = vpack.c.bf16 %v16308_v8, %v16307_v55  ;;  %v21538_v46 = vpack.c.bf16 %v16310_v33, %v16309_v22  ;;  %v16313_v28 = vld [vmem:[%s28751_s3 + $0x960] sm:$0xff]  ;;  %v16327_v33 = vld [vmem:[%s28751_s3 + $0x9d0] sm:$0xff] }
 0x877   : > { %21513 = vmatprep.subr.bf16.mxu1 %v22810_v40 }
 0x879   : > { %20276 = vmatmul.mubr.f32.gmra.mrb[8].mxu1 %v27229_v41 }
 0x87a   : > { %21515 = vmatpush3.bf16.msra.mxu1 %v21514_v60  ;;  %20278 = vmatprep.mubr.msk.f32.mxu1 %vm22811_vm3, %v27144_v1  ;;  %v16311_v60 = vld [vmem:[%s28751_s3 + $0x950] sm:$0xff] }
 0x87b   : > { %21516 = vmatprep.subr.bf16.mxu1 %v22810_v40 }
 0x87c   : > { %v12110_v35 = vpop.f32.mrb[178].mxu1 }
 0x87d   : > { %v27242_v5 = vadd.f32 %v12110_v35, %v27141_v11  ;;  %v19947_v34 = vpop.f32.mrb[179].mxu1  ;;  %20279 = vmatmul.mubr.f32.gmra.mrb[36].mxu1 %v26730_v49  ;;  %v16300_v11 = vld [vmem:[%s28751_s3 + $0x8f8] sm:$0xff] }
 0x87e   : > { %21518 = vmatpush3.bf16.msra.mxu1 %v21517_v42  ;;  %20281 = vmatprep.mubr.msk.f32.mxu1 %vm22811_vm3, %v27144_v1  ;;  %v21523_v20 = vpack.c.bf16 %v16300_v11, %v16299_v0  ;;  %v16314_v42 = vld [vmem:[%s28751_s3 + $0x968] sm:$0xff]  ;;  %v16315_v0 = vld [vmem:[%s28751_s3 + $0x970] sm:$0xff] }
 0x87f   : > { %21519 = vmatprep.subr.bf16.mxu1 %v22810_v40  ;;  %v27349_v34 = vld [vmem:[#allocation5 + $0x92] sm:$0xff] }
 0x880   : > { %v12115_v29 = vpop.f32.mrb[180].mxu1 }
 0x881   : > { %v27257_v49 = vadd.f32 %v12115_v29, %v27156_v31  ;;  %v19950_v27 = vpop.f32.mrb[181].mxu1  ;;  %20282 = vmatmul.mubr.f32.gmra.mrb[10].mxu1 %v27247_v62 }
 0x882   : > { %21521 = vmatpush3.bf16.msra.mxu1 %v21520_v44  ;;  %20316 = vmatprep.mubr.msk.f32.mxu1 %vm22811_vm3, %v27144_v1  ;;  %v21544_v44 = vpack.c.bf16 %v16314_v42, %v16313_v28  ;;  %v27451_v28 = vld [vmem:[#allocation5 + $0x93] sm:$0xff] }
 0x883   : > { %21522 = vmatprep.subr.bf16.mxu1 %v22810_v40 }
 0x884   : > { %v12120_v31 = vpop.f32.mrb[182].mxu1 }
 0x885   : > { %v27270_v48 = vadd.f32 %v12120_v31, %v27169_v51  ;;  %v19953_v9 = vpop.f32.mrb[183].mxu1  ;;  %v21529_v51 = vpack.c.bf16 %v16304_v61, %v16303_v26  ;;  %v16320_v26 = vld [vmem:[%s28751_s3 + $0x998] sm:$0xff] }
 0x886   : > { %21524 = vmatpush3.bf16.msra.mxu1 %v21523_v20  ;;  %v16317_v20 = vld [vmem:[%s28751_s3 + $0x980] sm:$0xff] }
 0x887   : > { %21525 = vmatprep.subr.bf16.mxu1 %v22810_v40  ;;  %v21550_v9 = vpack.c.bf16 %v16318_v3, %v16317_v20  ;;  %v16335_v3 = vld [vmem:[%s28751_s3 + $0xa10] sm:$0xff] }
 0x888   : > { %v12125_v23 = vpop.f32.mrb[184].mxu1 }
 0x889   : > { %v27280_v6 = vadd.f32 %v12125_v23, %v27179_v18  ;;  %v19956_v52 = vpop.f32.mrb[185].mxu1  ;;  %20317 = vmatmul.mubr.f32.vlgmr.msra.gmra.mrb[12].mxu1 %v26767_v47 }
 0x88a   : > { %21527 = vmatpush3.bf16.msra.mxu1 %v21526_v36  ;;  %20319 = vmatprep.mubr.msk.f32.mxu1 %vm22811_vm3, %v27144_v1  ;;  %v16319_v36 = vld [vmem:[%s28751_s3 + $0x990] sm:$0xff] }
 0x88b   : > { %21528 = vmatprep.subr.bf16.mxu1 %v22810_v40 }
 0x88c   : > { %v12130_v18 = vpop.f32.mrb[186].mxu1 }
 0x88d   : > { %v27293_v24 = vadd.f32 %v12130_v18, %v27191_v25  ;;  %v19959_v47 = vpop.f32.mrb[187].mxu1  ;;  %20320 = vmatmul.mubr.f32.gmra.mrb[14].mxu1 %v26782_v2 }
 0x88e   : > { %21530 = vmatpush3.bf16.msra.mxu1 %v21529_v51  ;;  %20322 = vmatprep.mubr.msk.f32.mxu1 %vm22811_vm3, %v27144_v1  ;;  %v16321_v51 = vld [vmem:[%s28751_s3 + $0x9a0] sm:$0xff]  ;;  %v16323_v47 = vld [vmem:[%s28751_s3 + $0x9b0] sm:$0xff] }
 0x88f   : > { %21531 = vmatprep.subr.bf16.mxu1 %v22810_v40  ;;  %v21556_v18 = vpack.c.bf16 %v16322_v39, %v16321_v51  ;;  %v16339_v51 = vld [vmem:[%s28751_s3 + $0xa30] sm:$0xff]  ;;  %v16340_v39 = vld [vmem:[%s28751_s3 + $0xa38] sm:$0xff] }
 0x890   : > { %v12135_v25 = vpop.f32.mrb[188].mxu1 }
 0x891   : > { %v27306_v21 = vadd.f32 %v12135_v25, %v27204_v57  ;;  %v19962_v2 = vpop.f32.mrb[189].mxu1  ;;  %20323 = vmatmul.mubr.f32.gmra.mrb[16].mxu1 %v26797_v58  ;;  %v16325_v25 = vld [vmem:[%s28751_s3 + $0x9c0] sm:$0xff] }
 0x892   : > { %21533 = vmatpush3.bf16.msra.mxu1 %v21532_v50  ;;  %20325 = vmatprep.mubr.msk.f32.mxu1 %vm22811_vm3, %v27144_v1  ;;  %v16324_v50 = vld [vmem:[%s28751_s3 + $0x9b8] sm:$0xff]  ;;  %v16326_v2 = vld [vmem:[%s28751_s3 + $0x9c8] sm:$0xff] }
 0x893   : > { %21534 = vmatprep.subr.bf16.mxu1 %v22810_v40  ;;  %v21559_v8 = vpack.c.bf16 %v16324_v50, %v16323_v47  ;;  %v21562_v22 = vpack.c.bf16 %v16326_v2, %v16325_v25  ;;  %v16342_v47 = vld [vmem:[%s28751_s3 + $0xa48] sm:$0xff]  ;;  %v16345_v2 = vld [vmem:[%s28751_s3 + $0xa60] sm:$0xff] }
 0x894   : > { %v12140_v57 = vpop.f32.mrb[190].mxu1  ;;  %v27535_v25 = vld [vmem:[#allocation5 + $0x74] sm:$0xff] }
 0x895   : > { %v27319_v10 = vadd.f32 %v12140_v57, %v27217_v17  ;;  %v19965_v58 = vpop.f32.mrb[191].mxu1  ;;  %20326 = vmatmul.mubr.f32.gmra.mrb[18].mxu1 %v26812_v38  ;;  %v27331_v17 = vld [vmem:[#allocation5 + $0x72] sm:$0xff]  ;;  %v21541_v38 = vpack.c.bf16 %v16312_v43, %v16311_v60  ;;  %v16328_v57 = vld [vmem:[%s28751_s3 + $0x9d8] sm:$0xff] }
 0x896   : > { %21536 = vmatpush3.bf16.msra.mxu1 %v21535_v32  ;;  %20328 = vmatprep.mubr.msk.f32.mxu1 %vm22811_vm3, %v27144_v1  ;;  %v16329_v58 = vld [vmem:[%s28751_s3 + $0x9e0] sm:$0xff] }
 0x897   : > { %21537 = vmatprep.subr.bf16.mxu1 %v22810_v40 }
 0x899   : > { %20329 = vmatmul.mubr.f32.gmra.mrb[20].mxu1 %v27331_v17 }
 0x89a   : > { %21539 = vmatpush3.bf16.msra.mxu1 %v21538_v46  ;;  %20331 = vmatprep.mubr.msk.f32.mxu1 %vm22811_vm3, %v27144_v1  ;;  %v16330_v46 = vld [vmem:[%s28751_s3 + $0x9e8] sm:$0xff] }
 0x89b   : > { %21540 = vmatprep.subr.bf16.mxu1 %v22810_v40  ;;  %v21568_v42 = vpack.c.bf16 %v16330_v46, %v16329_v58  ;;  %v16348_v58 = vld [vmem:[%s28751_s3 + $0xa78] sm:$0xff] }
 0x89c   : > { %v12241_v59 = vpop.f32.mrb[192].mxu1 }
 0x89d   : > { %v27344_v63 = vadd.f32 %v12241_v59, %v27242_v5  ;;  %v20000_v35 = vpop.f32.mrb[193].mxu1  ;;  %20332 = vmatmul.mubr.f32.gmra.mrb[22].mxu1 %v26837_v30  ;;  %v16316_v5 = vld [vmem:[%s28751_s3 + $0x978] sm:$0xff]  ;;  %v16331_v59 = vld [vmem:[%s28751_s3 + $0x9f0] sm:$0xff] }
 0x89e   : > { %21542 = vmatpush3.bf16.msra.mxu1 %v21541_v38  ;;  %20334 = vmatprep.mubr.msk.f32.mxu1 %vm22811_vm3, %v27144_v1  ;;  %v21547_v27 = vpack.c.bf16 %v16316_v5, %v16315_v0  ;;  %v16333_v5 = vld [vmem:[%s28751_s3 + $0xa00] sm:$0xff] }
 0x89f   : > { %21543 = vmatprep.subr.bf16.mxu1 %v22810_v40 }
 0x8a0   : > { %v12246_v11 = vpop.f32.mrb[194].mxu1 }
 0x8a1   : > { %v27359_v30 = vadd.f32 %v12246_v11, %v27257_v49  ;;  %v20003_v29 = vpop.f32.mrb[195].mxu1  ;;  %20335 = vmatmul.mubr.f32.gmra.mrb[24].mxu1 %v27349_v34  ;;  %v16334_v11 = vld [vmem:[%s28751_s3 + $0xa08] sm:$0xff] }
 0x8a2   : > { %21545 = vmatpush3.bf16.msra.mxu1 %v21544_v44  ;;  %20369 = vmatprep.mubr.msk.f32.mxu1 %vm22811_vm3, %v27144_v1  ;;  %v21574_v20 = vpack.c.bf16 %v16334_v11, %v16333_v5  ;;  %v13332_v11 = vld [vmem:[#allocation5 + $0x40] sm:$0xff] }
 0x8a3   : > { %21546 = vmatprep.subr.bf16.mxu1 %v22810_v40 }
 0x8a4   : > { %v12251_v49 = vpop.f32.mrb[196].mxu1 }
 0x8a5   : > { %v27372_v15 = vadd.f32 %v12251_v49, %v27270_v48  ;;  %v20006_v31 = vpop.f32.mrb[197].mxu1  ;;  %v21553_v48 = vpack.c.bf16 %v16320_v26, %v16319_v36  ;;  %v16336_v49 = vld [vmem:[%s28751_s3 + $0xa18] sm:$0xff]  ;;  %v16337_v26 = vld [vmem:[%s28751_s3 + $0xa20] sm:$0xff] }
 0x8a6   : > { %21548 = vmatpush3.bf16.msra.mxu1 %v21547_v27 }
 0x8a7   : > { %21549 = vmatprep.subr.bf16.mxu1 %v22810_v40 }
 0x8a8   : > { %v12256_v61 = vpop.f32.mrb[198].mxu1 }
 0x8a9   : > { %v27382_v23 = vadd.f32 %v12256_v61, %v27280_v6  ;;  %v20009_v52 = vpop.f32.mrb[199].mxu1  ;;  %20370 = vmatmul.mubr.f32.vlgmr.msra.gmra.mrb[26].mxu1 %v26874_v19  ;;  %v16338_v61 = vld [vmem:[%s28751_s3 + $0xa28] sm:$0xff] }
 0x8aa   : > { %21551 = vmatpush3.bf16.msra.mxu1 %v21550_v9  ;;  %20372 = vmatprep.mubr.msk.f32.mxu1 %vm22811_vm3, %v27144_v1 }
 0x8ab   : > { %21552 = vmatprep.subr.bf16.mxu1 %v22810_v40 }
 0x8ac   : > { %v12261_v6 = vpop.f32.mrb[200].mxu1 }
 0x8ad   : > { %v27395_v16 = vadd.f32 %v12261_v6, %v27293_v24  ;;  %v20012_v19 = vpop.f32.mrb[201].mxu1  ;;  %20373 = vmatmul.mubr.f32.gmra.mrb[28].mxu1 %v26889_v13 }
 0x8ae   : > { %21554 = vmatpush3.bf16.msra.mxu1 %v21553_v48  ;;  %20375 = vmatprep.mubr.msk.f32.mxu1 %vm22811_vm3, %v27144_v1  ;;  %v21580_v48 = vpack.c.bf16 %v16338_v61, %v16337_v26  ;;  %v21583_v19 = vpack.c.bf16 %v16340_v39, %v16339_v51  ;;  %v16355_v26 = vld [vmem:[%s28751_s3 + $0xab0] sm:$0xff]  ;;  %v16356_v61 = vld [vmem:[%s28751_s3 + $0xab8] sm:$0xff]  ;;  %v16357_v39 = vld [vmem:[%s28751_s3 + $0xac0] sm:$0xff] }
 0x8af   : > { %21555 = vmatprep.subr.bf16.mxu1 %v22810_v40  ;;  %v21607_v51 = vpack.c.bf16 %v16356_v61, %v16355_v26 }
 0x8b0   : > { %v12266_v24 = vpop.f32.mrb[202].mxu1 }
 0x8b1   : > { %v27408_v55 = vadd.f32 %v12266_v24, %v27306_v21  ;;  %v20015_v13 = vpop.f32.mrb[203].mxu1  ;;  %20376 = vmatmul.mubr.f32.gmra.mrb[38].mxu1 %v26904_v45 }
 0x8b2   : > { %21557 = vmatpush3.bf16.msra.mxu1 %v21556_v18  ;;  %20378 = vmatprep.mubr.msk.f32.mxu1 %vm22811_vm3, %v27144_v1  ;;  %v16341_v18 = vld [vmem:[%s28751_s3 + $0xa40] sm:$0xff]  ;;  %v16343_v13 = vld [vmem:[%s28751_s3 + $0xa50] sm:$0xff] }
 0x8b3   : > { %21558 = vmatprep.subr.bf16.mxu1 %v22810_v40 }
 0x8b4   : > { %v12271_v21 = vpop.f32.mrb[204].mxu1 }
 0x8b5   : > { %v27421_v32 = vadd.f32 %v12271_v21, %v27319_v10  ;;  %v20018_v45 = vpop.f32.mrb[205].mxu1  ;;  %20379 = vmatmul.mubr.f32.gmra.mrb[40].mxu1 %v26919_v7  ;;  %v27433_v10 = vld [vmem:[#allocation5 + $0x73] sm:$0xff]  ;;  %v21565_v7 = vpack.c.bf16 %v16328_v57, %v16327_v33 }
 0x8b6   : > { %21560 = vmatpush3.bf16.msra.mxu1 %v21559_v8  ;;  %20381 = vmatprep.mubr.msk.f32.mxu1 %vm22811_vm3, %v27144_v1  ;;  %v16344_v8 = vld [vmem:[%s28751_s3 + $0xa58] sm:$0xff]  ;;  %v16346_v21 = vld [vmem:[%s28751_s3 + $0xa68] sm:$0xff] }
 0x8b7   : > { %21561 = vmatprep.subr.bf16.mxu1 %v22810_v40  ;;  %v27553_v33 = vld [vmem:[#allocation5 + $0x94] sm:$0xff]  ;;  %v21592_v57 = vpack.c.bf16 %v16346_v21, %v16345_v2  ;;  %v16363_v21 = vld [vmem:[%s28751_s3 + $0xaf0] sm:$0xff] }
 0x8b9   : > { %20382 = vmatmul.mubr.f32.gmra.mrb[42].mxu1 %v27433_v10 }
 0x8ba   : > { %21563 = vmatpush3.bf16.msra.mxu1 %v21562_v22  ;;  %20384 = vmatprep.mubr.msk.f32.mxu1 %vm22811_vm3, %v27144_v1 }
 0x8bb   : > { %21564 = vmatprep.subr.bf16.mxu1 %v22810_v40 }
 0x8bc   : > { %v12372_v60 = vpop.f32.mrb[206].mxu1 }
 0x8bd   : > { %v27446_v43 = vadd.f32 %v12372_v60, %v27344_v63  ;;  %v20053_v38 = vpop.f32.mrb[207].mxu1  ;;  %20385 = vmatmul.mubr.f32.gmra.mrb[44].mxu1 %v26944_v14  ;;  %v16332_v63 = vld [vmem:[%s28751_s3 + $0x9f8] sm:$0xff] }
 0x8be   : > { %21566 = vmatpush3.bf16.msra.mxu1 %v21565_v7  ;;  %20387 = vmatprep.mubr.msk.f32.mxu1 %vm22811_vm3, %v27144_v1  ;;  %v21571_v0 = vpack.c.bf16 %v16332_v63, %v16331_v59  ;;  %v16347_v7 = vld [vmem:[%s28751_s3 + $0xa70] sm:$0xff]  ;;  %v16349_v38 = vld [vmem:[%s28751_s3 + $0xa80] sm:$0xff] }
 0x8bf   : > { %21567 = vmatprep.subr.bf16.mxu1 %v22810_v40 }
 0x8c0   : > { %v12377_v35 = vpop.f32.mrb[208].mxu1 }
 0x8c1   : > { %v27461_v14 = vadd.f32 %v12377_v35, %v27359_v30  ;;  %v20056_v44 = vpop.f32.mrb[209].mxu1  ;;  %20388 = vmatmul.mubr.f32.gmra.mrb[46].mxu1 %v27451_v28 }
 0x8c2   : > { %21569 = vmatpush3.bf16.msra.mxu1 %v21568_v42  ;;  %20422 = vmatprep.mubr.msk.f32.mxu1 %vm22811_vm3, %v27144_v1  ;;  %v16350_v42 = vld [vmem:[%s28751_s3 + $0xa88] sm:$0xff]  ;;  %v16351_v44 = vld [vmem:[%s28751_s3 + $0xa90] sm:$0xff] }
 0x8c3   : > { %21570 = vmatprep.subr.bf16.mxu1 %v22810_v40 }
 0x8c4   : > { %v12382_v30 = vpop.f32.mrb[210].mxu1 }
 0x8c5   : > { %v27474_v29 = vadd.f32 %v12382_v30, %v27372_v15  ;;  %v20059_v27 = vpop.f32.mrb[211].mxu1  ;;  %v21577_v15 = vpack.c.bf16 %v16336_v49, %v16335_v3  ;;  %v16354_v3 = vld [vmem:[%s28751_s3 + $0xaa8] sm:$0xff] }
 0x8c6   : > { %21572 = vmatpush3.bf16.msra.mxu1 %v21571_v0  ;;  %v16352_v0 = vld [vmem:[%s28751_s3 + $0xa98] sm:$0xff] }
 0x8c7   : > { %21573 = vmatprep.subr.bf16.mxu1 %v22810_v40  ;;  %v21601_v27 = vpack.c.bf16 %v16352_v0, %v16351_v44 }
 0x8c8   : > { %v12387_v31 = vpop.f32.mrb[212].mxu1 }
 0x8c9   : > { %v27484_v9 = vadd.f32 %v12387_v31, %v27382_v23  ;;  %v20062_v36 = vpop.f32.mrb[213].mxu1  ;;  %20423 = vmatmul.mubr.f32.vlgmr.msra.gmra.mrb[48].mxu1 %v26981_v4  ;;  %v13333_v31 = vld [vmem:[#allocation5 + $0x50] sm:$0xff] }
 0x8ca   : > { %21575 = vmatpush3.bf16.msra.mxu1 %v21574_v20  ;;  %20425 = vmatprep.mubr.msk.f32.mxu1 %vm22811_vm3, %v27144_v1  ;;  %v16353_v20 = vld [vmem:[%s28751_s3 + $0xaa0] sm:$0xff] }
 0x8cb   : > { %21576 = vmatprep.subr.bf16.mxu1 %v22810_v40 }
 0x8cc   : > { %v12392_v23 = vpop.f32.mrb[214].mxu1 }
 0x8cd   : > { %v27497_v52 = vadd.f32 %v12392_v23, %v27395_v16  ;;  %v20065_v4 = vpop.f32.mrb[215].mxu1  ;;  %20426 = vmatmul.mubr.f32.gmra.mrb[50].mxu1 %v26996_v53 }
 0x8ce   : > { %21578 = vmatpush3.bf16.msra.mxu1 %v21577_v15  ;;  %20428 = vmatprep.mubr.msk.f32.mxu1 %vm22811_vm3, %v27144_v1  ;;  %v21604_v15 = vpack.c.bf16 %v16354_v3, %v16353_v20 }
 0x8cf   : > { %21579 = vmatprep.subr.bf16.mxu1 %v22810_v40 }
 0x8d0   : > { %v12397_v6 = vpop.f32.mrb[216].mxu1 }
 0x8d1   : > { %v27510_v16 = vadd.f32 %v12397_v6, %v27408_v55  ;;  %v20068_v53 = vpop.f32.mrb[217].mxu1  ;;  %20429 = vmatmul.mubr.f32.gmra.mrb[52].mxu1 %v27011_v54  ;;  %v21586_v55 = vpack.c.bf16 %v16342_v47, %v16341_v18  ;;  %v16358_v6 = vld [vmem:[%s28751_s3 + $0xac8] sm:$0xff]  ;;  %v16359_v47 = vld [vmem:[%s28751_s3 + $0xad0] sm:$0xff] }
 0x8d2   : > { %21581 = vmatpush3.bf16.msra.mxu1 %v21580_v48  ;;  %20431 = vmatprep.mubr.msk.f32.mxu1 %vm22811_vm3, %v27144_v1  ;;  %v21610_v18 = vpack.c.bf16 %v16358_v6, %v16357_v39  ;;  %v16375_v6 = vld [vmem:[%s28751_s3 + $0xb50] sm:$0xff] }
 0x8d3   : > { %21582 = vmatprep.subr.bf16.mxu1 %v22810_v40 }
 0x8d4   : > { %v12402_v50 = vpop.f32.mrb[218].mxu1 }
 0x8d5   : > { %v27523_v24 = vadd.f32 %v12402_v50, %v27421_v32  ;;  %v20071_v54 = vpop.f32.mrb[219].mxu1  ;;  %20432 = vmatmul.mubr.f32.gmra.mrb[54].mxu1 %v27026_v56  ;;  %v21589_v56 = vpack.c.bf16 %v16344_v8, %v16343_v13  ;;  %v16360_v50 = vld [vmem:[%s28751_s3 + $0xad8] sm:$0xff] }
 0x8d6   : > { %21584 = vmatpush3.bf16.msra.mxu1 %v21583_v19  ;;  %20434 = vmatprep.mubr.msk.f32.mxu1 %vm22811_vm3, %v27144_v1  ;;  %v16361_v54 = vld [vmem:[%s28751_s3 + $0xae0] sm:$0xff] }
 0x8d7   : > { %21585 = vmatprep.subr.bf16.mxu1 %v22810_v40 }
 0x8d9   : > { %20435 = vmatmul.mubr.f32.gmra.mrb[56].mxu1 %v27535_v25 }
 0x8da   : > { %21587 = vmatpush3.bf16.msra.mxu1 %v21586_v55  ;;  %20437 = vmatprep.mubr.msk.f32.mxu1 %vm22811_vm3, %v27144_v1  ;;  %v16362_v55 = vld [vmem:[%s28751_s3 + $0xae8] sm:$0xff] }
 0x8db   : > { %21588 = vmatprep.subr.bf16.mxu1 %v22810_v40  ;;  %v21616_v2 = vpack.c.bf16 %v16362_v55, %v16361_v54  ;;  %v16379_v55 = vld [vmem:[%s28751_s3 + $0xb70] sm:$0xff] }
 0x8dc   : > { %v12503_v32 = vpop.f32.mrb[220].mxu1 }
 0x8dd   : > { %v27548_v45 = vadd.f32 %v12503_v32, %v27446_v43  ;;  %v20106_v22 = vpop.f32.mrb[221].mxu1  ;;  %20438 = vmatmul.mubr.f32.gmra.mrb[58].mxu1 %v27051_v37  ;;  %v21595_v43 = vpack.c.bf16 %v16348_v58, %v16347_v7  ;;  %v16364_v32 = vld [vmem:[%s28751_s3 + $0xaf8] sm:$0xff]  ;;  %v16365_v58 = vld [vmem:[%s28751_s3 + $0xb00] sm:$0xff] }
 0x8de   : > { %21590 = vmatpush3.bf16.msra.mxu1 %v21589_v56  ;;  %20440 = vmatprep.mubr.msk.f32.mxu1 %vm22811_vm3, %v27144_v1  ;;  %v21619_v7 = vpack.c.bf16 %v16364_v32, %v16363_v21  ;;  %v16381_v21 = vld [vmem:[%s28751_s3 + $0xb80] sm:$0xff]  ;;  %v16382_v32 = vld [vmem:[%s28751_s3 + $0xb88] sm:$0xff] }
 0x8df   : > { %21591 = vmatprep.subr.bf16.mxu1 %v22810_v40 }
 0x8e0   : > { %v12508_v46 = vpop.f32.mrb[222].mxu1 }
 0x8e1   : > { %v27563_v37 = vadd.f32 %v12508_v46, %v27461_v14  ;;  %v20109_v60 = vpop.f32.mrb[223].mxu1  ;;  %20441 = vmatmul.mubr.f32.gmra.mrb[60].mxu1 %v27553_v33  ;;  %v21598_v14 = vpack.c.bf16 %v16350_v42, %v16349_v38  ;;  %v16366_v46 = vld [vmem:[%s28751_s3 + $0xb08] sm:$0xff]  ;;  %v16367_v42 = vld [vmem:[%s28751_s3 + $0xb10] sm:$0xff] }
 0x8e2   : > { %21593 = vmatpush3.bf16.msra.mxu1 %v21592_v57  ;;  %20475 = vmatprep.mubr.msk.f32.mxu1 %vm22811_vm3, %v27144_v1  ;;  %v21622_v38 = vpack.c.bf16 %v16366_v46, %v16365_v58  ;;  %v16383_v58 = vld [vmem:[%s28751_s3 + $0xb90] sm:$0xff]  ;;  %v16384_v46 = vld [vmem:[%s28751_s3 + $0xb98] sm:$0xff] }
 0x8e3   : > { %21594 = vmatprep.subr.bf16.mxu1 %v22810_v40 }
 0x8e4   : > { %v12513_v59 = vpop.f32.mrb[224].mxu1 }
 0x8e5   : > { %v27576_v63 = vadd.f32 %v12513_v59, %v27474_v29  ;;  %v20112_v35 = vpop.f32.mrb[225].mxu1  ;;  %v16368_v59 = vld [vmem:[%s28751_s3 + $0xb18] sm:$0xff] }
 0x8e6   : > { %21596 = vmatpush3.bf16.msra.mxu1 %v21595_v43  ;;  %v21625_v0 = vpack.c.bf16 %v16368_v59, %v16367_v42  ;;  %v21649_v42 = vpack.c.bf16 %v16384_v46, %v16383_v58  ;;  %v16385_v59 = vld [vmem:[%s28751_s3 + $0xba0] sm:$0xff]  ;;  %v16402_v58 = vld [vmem:[%s28751_s3 + $0xc28] sm:$0xff] }
 0x8e7   : > { %21597 = vmatprep.subr.bf16.mxu1 %v22810_v40 }
 0x8e8   : > { %v12518_v5 = vpop.f32.mrb[226].mxu1 }
 0x8e9   : > { %v27586_v30 = vadd.f32 %v12518_v5, %v27484_v9  ;;  %v20115_v29 = vpop.f32.mrb[227].mxu1  ;;  %20476 = vmatmul.mubr.f32.vlgmr.msra.gmra.mrb[62].mxu1 %v13332_v11  ;;  %v16369_v5 = vld [vmem:[%s28751_s3 + $0xb20] sm:$0xff]  ;;  %v16370_v11 = vld [vmem:[%s28751_s3 + $0xb28] sm:$0xff] }
 0x8ea   : > { %21599 = vmatpush3.bf16.msra.mxu1 %v21598_v14  ;;  %20478 = vmatprep.mubr.msk.f32.mxu1 %vm22811_vm3, %v27144_v1  ;;  %v13463_v14 = vld [vmem:[#allocation5 + $0x41] sm:$0xff]  ;;  %v21628_v3 = vpack.c.bf16 %v16370_v11, %v16369_v5 }
 0x8eb   : > { %21600 = vmatprep.subr.bf16.mxu1 %v22810_v40  ;;  %v16387_v11 = vld [vmem:[%s28751_s3 + $0xbb0] sm:$0xff] }
 0x8ec   : > { %v12523_v49 = vpop.f32.mrb[228].mxu1 }
 0x8ed   : > { %v27598_v9 = vadd.f32 %v12523_v49, %v27497_v52  ;;  %v20118_v36 = vpop.f32.mrb[229].mxu1  ;;  %20479 = vmatmul.mubr.f32.gmra.mrb[64].mxu1 %v13333_v31  ;;  %v13334_v52 = vld [vmem:[#allocation5 + $0x60] sm:$0xff]  ;;  %v16372_v31 = vld [vmem:[%s28751_s3 + $0xb38] sm:$0xff] }
 0x8ee   : > { %21602 = vmatpush3.bf16.msra.mxu1 %v21601_v27  ;;  %20481 = vmatprep.mubr.msk.f32.mxu1 %vm22811_vm3, %v27144_v1  ;;  %v16371_v49 = vld [vmem:[%s28751_s3 + $0xb30] sm:$0xff] }
 0x8ef   : > { %21603 = vmatprep.subr.bf16.mxu1 %v22810_v40  ;;  %v21631_v61 = vpack.c.bf16 %v16372_v31, %v16371_v49  ;;  %v16389_v31 = vld [vmem:[%s28751_s3 + $0xbc0] sm:$0xff] }
 0x8f0   : > { %v12528_v23 = vpop.f32.mrb[230].mxu1 }
 0x8f1   : > { %v27610_v4 = vadd.f32 %v12528_v23, %v27510_v16  ;;  %v20121_v48 = vpop.f32.mrb[231].mxu1  ;;  %20482 = vmatmul.mubr.f32.gmra.mrb[66].mxu1 %v13334_v52  ;;  %v16373_v23 = vld [vmem:[%s28751_s3 + $0xb40] sm:$0xff]  ;;  %v16374_v52 = vld [vmem:[%s28751_s3 + $0xb48] sm:$0xff] }
 0x8f2   : > { %21605 = vmatpush3.bf16.msra.mxu1 %v21604_v15  ;;  %20484 = vmatprep.mubr.msk.f32.mxu1 %vm22811_vm3, %v27144_v1  ;;  %v21634_v39 = vpack.c.bf16 %v16374_v52, %v16373_v23  ;;  %v16391_v23 = vld [vmem:[%s28751_s3 + $0xbd0] sm:$0xff]  ;;  %v16392_v52 = vld [vmem:[%s28751_s3 + $0xbd8] sm:$0xff] }
 0x8f3   : > { %21606 = vmatprep.subr.bf16.mxu1 %v22810_v40 }
 0x8f4   : > { %v12533_v53 = vpop.f32.mrb[232].mxu1 }
 0x8f5   : > { %v27622_v16 = vadd.f32 %v12533_v53, %v27523_v24  ;;  %v20124_v19 = vpop.f32.mrb[233].mxu1  ;;  %20485 = vmatmul.mubr.f32.gmra.mrb[68].mxu1 %v27128_v12  ;;  %v13336_v24 = vld [vmem:[#allocation5 + $0x80] sm:$0xff]  ;;  %v21613_v12 = vpack.c.bf16 %v16360_v50, %v16359_v47  ;;  %v16376_v53 = vld [vmem:[%s28751_s3 + $0xb58] sm:$0xff] }
 0x8f6   : > { %21608 = vmatpush3.bf16.msra.mxu1 %v21607_v51  ;;  %20487 = vmatprep.mubr.msk.f32.mxu1 %vm22811_vm3, %v27144_v1  ;;  %v16377_v19 = vld [vmem:[%s28751_s3 + $0xb60] sm:$0xff] }
 0x8f7   : > { %21609 = vmatprep.subr.bf16.mxu1 %v22810_v40 }
 0x8f9   : > { %20488 = vmatmul.mubr.f32.gmra.mrb[70].mxu1 %v13336_v24 }
 0x8fa   : > { %21611 = vmatpush3.bf16.msra.mxu1 %v21610_v18  ;;  %20490 = vmatprep.mubr.msk.f32.mxu1 %vm22811_vm3, %v27144_v1  ;;  %v16378_v18 = vld [vmem:[%s28751_s3 + $0xb68] sm:$0xff] }
 0x8fb   : > { %21612 = vmatprep.subr.bf16.mxu1 %v22810_v40  ;;  %v21640_v54 = vpack.c.bf16 %v16378_v18, %v16377_v19  ;;  %v16395_v19 = vld [vmem:[%s28751_s3 + $0xbf0] sm:$0xff]  ;;  %v16396_v18 = vld [vmem:[%s28751_s3 + $0xbf8] sm:$0xff] }
 0x8fc   : > { %v12634_v13 = vpop.f32.mrb[234].mxu1 }
 0x8fd   : > { %v27644_v8 = vadd.f32 %v12634_v13, %v27548_v45  ;;  %v20159_v56 = vpop.f32.mrb[235].mxu1  ;;  %20491 = vmatmul.mubr.f32.gmra.mrb[72].mxu1 %v27144_v1  ;;  %v16380_v13 = vld [vmem:[%s28751_s3 + $0xb78] sm:$0xff] }
 0x8fe   : > { %21614 = vmatpush3.bf16.msra.mxu1 %v21613_v12  ;;  %20493 = vmatprep.mubr.msk.f32.mxu1 %vm22811_vm3, %v27144_v1  ;;  %v13469_v12 = vld [vmem:[#allocation5 + $0xa1] sm:$0xff] }
 0x8ff   : > { %21615 = vmatprep.subr.bf16.mxu1 %v22810_v40 }
 0x900   : > { %v12639_v45 = vpop.f32.mrb[236].mxu1 }
 0x901   : > { %v27657_v22 = vadd.f32 %v12639_v45, %v27563_v37  ;;  %v20162_v57 = vpop.f32.mrb[237].mxu1  ;;  %20494 = vmatmul.mubr.f32.gmra.mrb[74].mxu1 %v27144_v1 }
 0x902   : > { %21617 = vmatpush3.bf16.msra.mxu1 %v21616_v2  ;;  %20528 = vmatprep.mubr.msk.f32.mxu1 %vm22811_vm3, %v27144_v1  ;;  %v21643_v2 = vpack.c.bf16 %v16380_v13, %v16379_v55 }
 0x903   : > { %21618 = vmatprep.subr.bf16.mxu1 %v22810_v40 }
 0x904   : > { %v12644_v37 = vpop.f32.mrb[238].mxu1 }
 0x905   : > { %v27670_v60 = vadd.f32 %v12644_v37, %v27576_v63  ;;  %v20165_v43 = vpop.f32.mrb[239].mxu1 }
 0x906   : > { %21620 = vmatpush3.bf16.msra.mxu1 %v21619_v7  ;;  %v21646_v7 = vpack.c.bf16 %v16382_v32, %v16381_v21  ;;  %v13594_v43 = vld [vmem:[#allocation5 + $0x42] sm:$0xff] }
 0x907   : > { %21621 = vmatprep.subr.bf16.mxu1 %v22810_v40  ;;  %v13725_v32 = vld [vmem:[#allocation5 + $0x43] sm:$0xff] }
 0x908   : > { %v12649_v35 = vpop.f32.mrb[240].mxu1 }
 0x909   : > { %v27680_v44 = vadd.f32 %v12649_v35, %v27586_v30  ;;  %v20168_v63 = vpop.f32.mrb[241].mxu1  ;;  %20529 = vmatmul.mubr.f32.vlgmr.msra.gmra.mrb[76].mxu1 %v13463_v14  ;;  %v13464_v30 = vld [vmem:[#allocation5 + $0x51] sm:$0xff] }
 0x90a   : > { %21623 = vmatpush3.bf16.msra.mxu1 %v21622_v38  ;;  %20531 = vmatprep.mubr.msk.f32.mxu1 %vm22811_vm3, %v27144_v1  ;;  %v16386_v35 = vld [vmem:[%s28751_s3 + $0xba8] sm:$0xff] }
 0x90b   : > { %21624 = vmatprep.subr.bf16.mxu1 %v22810_v40  ;;  %v21652_v5 = vpack.c.bf16 %v16386_v35, %v16385_v59  ;;  %v16404_v59 = vld [vmem:[%s28751_s3 + $0xc38] sm:$0xff] }
 0x90c   : > { %v12654_v29 = vpop.f32.mrb[242].mxu1 }
 0x90d   : > { %v27692_v27 = vadd.f32 %v12654_v29, %v27598_v9  ;;  %v20171_v20 = vpop.f32.mrb[243].mxu1  ;;  %20532 = vmatmul.mubr.f32.gmra.mrb[78].mxu1 %v13464_v30  ;;  %v13465_v9 = vld [vmem:[#allocation5 + $0x61] sm:$0xff] }
 0x90e   : > { %21626 = vmatpush3.bf16.msra.mxu1 %v21625_v0  ;;  %20534 = vmatprep.mubr.msk.f32.mxu1 %vm22811_vm3, %v27144_v1  ;;  %v16388_v29 = vld [vmem:[%s28751_s3 + $0xbb8] sm:$0xff] }
 0x90f   : > { %21627 = vmatprep.subr.bf16.mxu1 %v22810_v40  ;;  %v21655_v49 = vpack.c.bf16 %v16388_v29, %v16387_v11  ;;  %v16406_v11 = vld [vmem:[%s28751_s3 + $0xc48] sm:$0xff] }
 0x910   : > { %v12659_v36 = vpop.f32.mrb[244].mxu1 }
 0x911   : > { %v27704_v15 = vadd.f32 %v12659_v36, %v27610_v4  ;;  %v20174_v26 = vpop.f32.mrb[245].mxu1  ;;  %20535 = vmatmul.mubr.f32.gmra.mrb[80].mxu1 %v13465_v9  ;;  %v16390_v36 = vld [vmem:[%s28751_s3 + $0xbc8] sm:$0xff] }
 0x912   : > { %21629 = vmatpush3.bf16.msra.mxu1 %v21628_v3  ;;  %20537 = vmatprep.mubr.msk.f32.mxu1 %vm22811_vm3, %v27144_v1 }
 0x913   : > { %21630 = vmatprep.subr.bf16.mxu1 %v22810_v40 }
 0x914   : > { %v12664_v48 = vpop.f32.mrb[246].mxu1 }
 0x915   : > { %v27716_v4 = vadd.f32 %v12664_v48, %v27622_v16  ;;  %v20177_v51 = vpop.f32.mrb[247].mxu1  ;;  %20538 = vmatmul.mubr.f32.gmra.mrb[82].mxu1 %v27229_v41  ;;  %v13467_v16 = vld [vmem:[#allocation5 + $0x81] sm:$0xff]  ;;  %v21637_v41 = vpack.c.bf16 %v16376_v53, %v16375_v6 }
 0x916   : > { %21632 = vmatpush3.bf16.msra.mxu1 %v21631_v61  ;;  %20540 = vmatprep.mubr.msk.f32.mxu1 %vm22811_vm3, %v27144_v1  ;;  %v21658_v61 = vpack.c.bf16 %v16390_v36, %v16389_v31  ;;  %v13598_v48 = vld [vmem:[#allocation5 + $0x82] sm:$0xff]  ;;  %v16394_v51 = vld [vmem:[%s28751_s3 + $0xbe8] sm:$0xff]  ;;  %v16409_v36 = vld [vmem:[%s28751_s3 + $0xc60] sm:$0xff] }
 0x917   : > { %21633 = vmatprep.subr.bf16.mxu1 %v22810_v40  ;;  %v13729_v31 = vld [vmem:[#allocation5 + $0x83] sm:$0xff] }
 0x919   : > { %20541 = vmatmul.mubr.f32.gmra.mrb[84].mxu1 %v13467_v16  ;;  %v13600_v16 = vld [vmem:[#allocation5 + $0xa2] sm:$0xff] }
 0x91a   : > { %21635 = vmatpush3.bf16.msra.mxu1 %v21634_v39  ;;  %20543 = vmatprep.mubr.msk.f32.mxu1 %vm22811_vm3, %v27144_v1 }
 0x91b   : > { %21636 = vmatprep.subr.bf16.mxu1 %v22810_v40 }
 0x91c   : > { %v12766_v47 = vpop.f32.mrb[248].mxu1 }
 0x91d   : > { %v27738_v50 = vadd.f32 %v12766_v47, %v27644_v8  ;;  %v20212_v24 = vpop.f32.mrb[249].mxu1  ;;  %20544 = vmatmul.mubr.f32.gmra.mrb[86].mxu1 %v27247_v62 }
 0x91e   : > { %21638 = vmatpush3.bf16.msra.mxu1 %v21637_v41  ;;  %20546 = vmatprep.mubr.msk.f32.mxu1 %vm22811_vm3, %v27144_v1  ;;  %v21667_v24 = vpack.c.bf16 %v16396_v18, %v16395_v19  ;;  %v13856_v19 = vld [vmem:[#allocation5 + $0x44] sm:$0xff] }
 0x91f   : > { %21639 = vmatprep.subr.bf16.mxu1 %v22810_v40 }
 0x920   : > { %v12771_v8 = vpop.f32.mrb[250].mxu1 }
 0x921   : > { %v27751_v56 = vadd.f32 %v12771_v8, %v27657_v22  ;;  %v20215_v62 = vpop.f32.mrb[251].mxu1  ;;  %20547 = vmatmul.mubr.f32.gmra.mrb[88].mxu1 %v13469_v12  ;;  %v16397_v12 = vld [vmem:[%s28751_s3 + $0xc00] sm:$0xff] }
 0x922   : > { %21641 = vmatpush3.bf16.msra.mxu1 %v21640_v54  ;;  %20581 = vmatprep.mubr.msk.f32.mxu1 %vm22811_vm3, %v27144_v1  ;;  %v16398_v54 = vld [vmem:[%s28751_s3 + $0xc08] sm:$0xff]  ;;  %v16399_v62 = vld [vmem:[%s28751_s3 + $0xc10] sm:$0xff] }
 0x923   : > { %21642 = vmatprep.subr.bf16.mxu1 %v22810_v40 }
 0x924   : > { %v12776_v45 = vpop.f32.mrb[252].mxu1 }
 0x925   : > { %v27763_v22 = vadd.f32 %v12776_v45, %v27670_v60  ;;  %v20218_v57 = vpop.f32.mrb[253].mxu1 }
 0x926   : > { %21644 = vmatpush3.bf16.msra.mxu1 %v21643_v2  ;;  %v16400_v2 = vld [vmem:[%s28751_s3 + $0xc18] sm:$0xff] }
 0x927   : > { %21645 = vmatprep.subr.bf16.mxu1 %v22810_v40  ;;  %v21673_v57 = vpack.c.bf16 %v16400_v2, %v16399_v62 }
 0x928   : > { %v12781_v37 = vpop.f32.mrb[254].mxu1 }
 0x929   : > { %v27773_v38 = vadd.f32 %v12781_v37, %v27680_v44  ;;  %v20221_v60 = vpop.f32.mrb[255].mxu1  ;;  %20582 = vmatmul.mubr.f32.vlgmr.msra.gmra.mrb[90].mxu1 %v13594_v43  ;;  %v13595_v44 = vld [vmem:[#allocation5 + $0x52] sm:$0xff] }
 0x92a   : > { %21647 = vmatpush3.bf16.msra.mxu1 %v21646_v7  ;;  %20584 = vmatprep.mubr.msk.f32.mxu1 %vm22811_vm3, %v27144_v1  ;;  %v16401_v7 = vld [vmem:[%s28751_s3 + $0xc20] sm:$0xff] }
 0x92b   : > { %21648 = vmatprep.subr.bf16.mxu1 %v22810_v40  ;;  %v13726_v37 = vld [vmem:[#allocation5 + $0x53] sm:$0xff]  ;;  %v21676_v60 = vpack.c.bf16 %v16402_v58, %v16401_v7 }
 0x92c   : > { %v12786_v14 = vpop.f32.mrb[30].mxu1 }
 0x92d   : > { %v27785_v63 = vadd.f32 %v12786_v14, %v27692_v27  ;;  %v20224_v0 = vpop.f32.mrb[31].mxu1  ;;  %20585 = vmatmul.mubr.f32.gmra.mrb[92].mxu1 %v13595_v44  ;;  %v13596_v27 = vld [vmem:[#allocation5 + $0x62] sm:$0xff] }
 0x92e   : > { %21650 = vmatpush3.bf16.msra.mxu1 %v21649_v42  ;;  %20587 = vmatprep.mubr.msk.f32.mxu1 %vm22811_vm3, %v27144_v1  ;;  %v27799_v1 = vld [vmem:[#allocation5] sm:$0xff] }
 0x92f   : > { %21651 = vmatprep.subr.bf16.mxu1 %v22810_v40  ;;  %v16403_v42 = vld [vmem:[%s28751_s3 + $0xc30] sm:$0xff] }
 0x930   : > { %v12791_v30 = vpop.f32.mrb[32].mxu1  ;;  %v13727_v14 = vld [vmem:[#allocation5 + $0x63] sm:$0xff]  ;;  %v21679_v0 = vpack.c.bf16 %v16404_v59, %v16403_v42 }
 0x931   : > { %v27797_v20 = vadd.f32 %v12791_v30, %v27704_v15  ;;  %v20227_v3 = vpop.f32.mrb[33].mxu1  ;;  %20588 = vmatmul.mubr.f32.gmra.mrb[94].mxu1 %v13596_v27 }
 0x932   : > { %21653 = vmatpush3.bf16.msra.mxu1 %v21652_v5  ;;  %20590 = vmatprep.mubr.msk.f32.mxu1 %vm22811_vm3, %v27799_v1  ;;  %v16405_v5 = vld [vmem:[%s28751_s3 + $0xc40] sm:$0xff]  ;;  %v16407_v3 = vld [vmem:[%s28751_s3 + $0xc50] sm:$0xff] }
 0x933   : > { %21654 = vmatprep.subr.bf16.mxu1 %v22810_v40 }
 0x934   : > { %v12796_v9 = vpop.f32.mrb[0].mxu1 }
 0x935   : > { %v27811_v15 = vadd.f32 %v12796_v9, %v27716_v4  ;;  %20591 = vmatmul.mubr.f32.gmra.mrb[96].mxu1 %v27331_v17  ;;  %v20230_v26 = vpop.f32.mrb[1].mxu1  ;;  %v21661_v17 = vpack.c.bf16 %v16392_v52, %v16391_v23  ;;  %v16393_v4 = vld [vmem:[%s28751_s3 + $0xbe0] sm:$0xff]  ;;  %v16410_v9 = vld [vmem:[%s28751_s3 + $0xc68] sm:$0xff]  ;;  %v13731_v23 = vld [vmem:[#allocation5 + $0xa3] sm:$0xff] }
 0x936   : > { %21656 = vmatpush3.bf16.msra.mxu1 %v21655_v49  ;;  %20593 = vmatprep.mubr.msk.f32.mxu1 %vm22811_vm3, %v27799_v1  ;;  %v21664_v41 = vpack.c.bf16 %v16394_v51, %v16393_v4  ;;  %v16408_v49 = vld [vmem:[%s28751_s3 + $0xc58] sm:$0xff]  ;;  %v21688_v52 = vpack.c.bf16 %v16410_v9, %v16409_v36 }
 0x937   : > { %21657 = vmatprep.subr.bf16.mxu1 %v22810_v40 }
 0x939   : > { %20594 = vmatmul.mubr.f32.gmra.mrb[98].mxu1 %v13598_v48  ;;  %v16411_v48 = vld [vmem:[%s28751_s3 + $0xc70] sm:$0xff] }
 0x93a   : > { %21659 = vmatpush3.bf16.msra.mxu1 %v21658_v61  ;;  %20596 = vmatprep.mubr.msk.f32.mxu1 %vm22811_vm3, %v27799_v1 }
 0x93b   : > { %21660 = vmatprep.subr.bf16.mxu1 %v22810_v40 }
 0x93c   : > { %v12897_v39 = vpop.f32.mrb[34].mxu1 }
 0x93d   : > { %v27833_v6 = vadd.f32 %v12897_v39, %v27738_v50  ;;  %v20265_v53 = vpop.f32.mrb[35].mxu1  ;;  %20597 = vmatmul.mubr.f32.gmra.mrb[100].mxu1 %v27349_v34 }
 0x93e   : > { %21662 = vmatpush3.bf16.msra.mxu1 %v21661_v17  ;;  %20599 = vmatprep.mubr.msk.f32.mxu1 %vm22811_vm3, %v27799_v1  ;;  %v16412_v17 = vld [vmem:[%s28751_s3 + $0xc78] sm:$0xff] }
 0x93f   : > { %21663 = vmatprep.subr.bf16.mxu1 %v22810_v40  ;;  %v21691_v39 = vpack.c.bf16 %v16412_v17, %v16411_v48 }
 0x940   : > { %v12902_v47 = vpop.f32.mrb[2].mxu1 }
 0x941   : > { %v27846_v50 = vadd.f32 %v12902_v47, %v27751_v56  ;;  %v20268_v34 = vpop.f32.mrb[3].mxu1  ;;  %20600 = vmatmul.mubr.f32.gmra.mrb[102].mxu1 %v13600_v16  ;;  %v21670_v56 = vpack.c.bf16 %v16398_v54, %v16397_v12 }
 0x942   : > { %21665 = vmatpush3.bf16.msra.mxu1 %v21664_v41  ;;  %20634 = vmatprep.mubr.msk.f32.mxu1 %vm22811_vm3, %v27799_v1  ;;  %v13857_v34 = vld [vmem:[#allocation5 + $0x54] sm:$0xff] }
 0x943   : > { %21666 = vmatprep.subr.bf16.mxu1 %v22810_v40 }
 0x944   : > { %v12907_v55 = vpop.f32.mrb[4].mxu1 }
 0x945   : > { %v27858_v13 = vadd.f32 %v12907_v55, %v27763_v22  ;;  %v20271_v8 = vpop.f32.mrb[5].mxu1  ;;  %v13858_v55 = vld [vmem:[#allocation5 + $0x64] sm:$0xff] }
 0x946   : > { %21668 = vmatpush3.bf16.msra.mxu1 %v21667_v24 }
 0x947   : > { %21669 = vmatprep.subr.bf16.mxu1 %v22810_v40 }
 0x948   : > { %v12912_v21 = vpop.f32.mrb[6].mxu1 }
 0x949   : > { %v27868_v45 = vadd.f32 %v12912_v21, %v27773_v38  ;;  %v20274_v22 = vpop.f32.mrb[7].mxu1  ;;  %20635 = vmatmul.mubr.f32.vlgmr.msra.gmra.mrb[104].mxu1 %v13725_v32  ;;  %v13860_v21 = vld [vmem:[#allocation5 + $0x84] sm:$0xff] }
 0x94a   : > { %21671 = vmatpush3.bf16.msra.mxu1 %v21670_v56  ;;  %20637 = vmatprep.mubr.msk.f32.mxu1 %vm22811_vm3, %v27799_v1 }
 0x94b   : > { %21672 = vmatprep.subr.bf16.mxu1 %v22810_v40 }
 0x94c   : > { %v12917_v46 = vpop.f32.mrb[8].mxu1 }
 0x94d   : > { %v27880_v43 = vadd.f32 %v12917_v46, %v27785_v63  ;;  %v20277_v38 = vpop.f32.mrb[9].mxu1  ;;  %20638 = vmatmul.mubr.f32.gmra.mrb[106].mxu1 %v13726_v37 }
 0x94e   : > { %21674 = vmatpush3.bf16.msra.mxu1 %v21673_v57  ;;  %20640 = vmatprep.mubr.msk.f32.mxu1 %vm22811_vm3, %v27799_v1  ;;  %v13862_v57 = vld [vmem:[#allocation5 + $0xa4] sm:$0xff] }
 0x94f   : > { %21675 = vmatprep.subr.bf16.mxu1 %v22810_v40 }
 0x950   : > { %v12922_v35 = vpop.f32.mrb[36].mxu1 }
 0x951   : > { %v27892_v44 = vadd.f32 %v12922_v35, %v27797_v20  ;;  %v20280_v63 = vpop.f32.mrb[37].mxu1  ;;  %20641 = vmatmul.mubr.f32.gmra.mrb[108].mxu1 %v13727_v14  ;;  %v21682_v20 = vpack.c.bf16 %v16406_v11, %v16405_v5 }
 0x952   : > { %21677 = vmatpush3.bf16.msra.mxu1 %v21676_v60  ;;  %20643 = vmatprep.mubr.msk.f32.mxu1 %vm22811_vm3, %v27799_v1 }
 0x953   : > { %21678 = vmatprep.subr.bf16.mxu1 %v22810_v40 }
 0x954   : > { %v12927_v29 = vpop.f32.mrb[10].mxu1 }
 0x955   : > { %v12937_v30 = vadd.f32 %v12927_v29, %v27811_v15  ;;  %20644 = vmatmul.mubr.f32.gmra.mrb[110].mxu1 %v27433_v10  ;;  %v20283_v27 = vpop.f32.mrb[11].mxu1  ;;  %v21685_v10 = vpack.c.bf16 %v16408_v49, %v16407_v3 }
 0x956   : > { %21680 = vmatpush3.bf16.msra.mxu1 %v21679_v0  ;;  %20646 = vmatprep.mubr.msk.f32.mxu1 %vm22811_vm3, %v27799_v1 }
 0x957   : > { %21681 = vmatprep.subr.bf16.mxu1 %v22810_v40 }
 0x959   : > { %20647 = vmatmul.mubr.f32.gmra.mrb[112].mxu1 %v13729_v31 }
 0x95a   : > { %21683 = vmatpush3.bf16.msra.mxu1 %v21682_v20  ;;  %20649 = vmatprep.mubr.msk.f32.mxu1 %vm22811_vm3, %v27799_v1 }
 0x95b   : > { %21684 = vmatprep.subr.bf16.mxu1 %v22810_v40 }
 0x95c   : > { %v13028_v15 = vpop.f32.mrb[12].mxu1 }
 0x95d   : > { %v13062_v26 = vadd.f32 %v13028_v15, %v27833_v6  ;;  %v20318_v61 = vpop.f32.mrb[13].mxu1  ;;  %20650 = vmatmul.mubr.f32.gmra.mrb[114].mxu1 %v27451_v28 }
 0x95e   : > { %21686 = vmatpush3.bf16.msra.mxu1 %v21685_v10  ;;  %20652 = vmatprep.mubr.msk.f32.mxu1 %vm22811_vm3, %v27799_v1 }
 0x95f   : > { %21687 = vmatprep.subr.bf16.mxu1 %v22810_v40 }
 0x960   : > { %v13033_v4 = vpop.f32.mrb[14].mxu1 }
 0x961   : > { %v13063_v51 = vadd.f32 %v13033_v4, %v27846_v50  ;;  %v20321_v28 = vpop.f32.mrb[15].mxu1  ;;  %20653 = vmatmul.mubr.f32.gmra.mrb[116].mxu1 %v13731_v23 }
 0x962   : > { %21689 = vmatpush3.bf16.msra.mxu1 %v21688_v52  ;;  %20687 = vmatprep.mubr.msk.f32.mxu1 %vm22811_vm3, %v27799_v1 }
 0x963   : > { %21690 = vmatprep.subr.bf16.mxu1 %v22810_v40 }
 0x964   : > { %v13038_v6 = vpop.f32.mrb[16].mxu1 }
 0x965   : > { %v13064_v53 = vadd.f32 %v13038_v6, %v27858_v13  ;;  %v20324_v16 = vpop.f32.mrb[17].mxu1  ;;  %v14033_v6 = vld [vmem:[%s28753_s5] sm:$0xff] }
 0x966   : > { %21692 = vmatpush3.bf16.msra.mxu1 %v21691_v39 }
 0x967   : > { %21693 = vmatprep.subr.bf16.mxu1 %v22810_v40 }
 0x968   : > { %v13043_v41 = vpop.f32.mrb[18].mxu1 }
 0x969   : > { %v13065_v18 = vadd.f32 %v13043_v41, %v27868_v45  ;;  %v20327_v47 = vpop.f32.mrb[19].mxu1  ;;  %20688 = vmatmul.mubr.f32.vlgmr.msra.gmra.mrb[118].mxu1 %v13856_v19 }
 0x96a   : > { %20690 = vmatprep.mubr.msk.f32.mxu1 %vm22811_vm3, %v27799_v1 }
 0x96c   : > { %v13048_v50 = vpop.f32.mrb[20].mxu1 }
 0x96d   : > { %v13066_v24 = vadd.f32 %v13048_v50, %v27880_v43  ;;  %v20330_v12 = vpop.f32.mrb[21].mxu1  ;;  %20691 = vmatmul.mubr.f32.gmra.mrb[120].mxu1 %v13857_v34 }
 0x96e   : > { %20693 = vmatprep.mubr.msk.f32.mxu1 %vm22811_vm3, %v27799_v1 }
 0x970   : > { %v13053_v54 = vpop.f32.mrb[22].mxu1 }
 0x971   : > { %v13067_v13 = vadd.f32 %v13053_v54, %v27892_v44  ;;  %v20333_v8 = vpop.f32.mrb[23].mxu1  ;;  %20694 = vmatmul.mubr.f32.gmra.mrb[122].mxu1 %v13858_v55 }
 0x972   : > { %20696 = vmatprep.mubr.msk.f32.mxu1 %vm22811_vm3, %v27799_v1 }
 0x974   : > { %v13058_v56 = vpop.f32.mrb[24].mxu1 }
 0x975   : > { %v13068_v62 = vadd.f32 %v13058_v56, %v12937_v30  ;;  %20697 = vmatmul.mubr.f32.gmra.mrb[124].mxu1 %v27535_v25  ;;  %v20336_v2 = vpop.f32.mrb[25].mxu1  ;;  %v14035_v56 = vld [vmem:[%s28753_s5 + $0x10] sm:$0xff] }
 0x976   : > { %20699 = vmatprep.mubr.msk.f32.mxu1 %vm22811_vm3, %v27799_v1  ;;  %v14037_v2 = vld [vmem:[%s28753_s5 + $0x20] sm:$0xff] }
 0x979   : > { %20700 = vmatmul.mubr.f32.gmra.mrb[126].mxu1 %v13860_v21 }
 0x97a   : > { %20702 = vmatprep.mubr.msk.f32.mxu1 %vm22811_vm3, %v27799_v1 }
 0x97c   : > { %v13159_v32 = vpop.f32.mrb[26].mxu1 }
 0x97d   : > { %v13193_v45 = vadd.f32 %v13159_v32, %v13062_v26  ;;  %v20371_v22 = vpop.f32.mrb[27].mxu1  ;;  %20703 = vmatmul.mubr.f32.gmra.mrb[128].mxu1 %v27553_v33 }
 0x97e   : > { %20705 = vmatprep.mubr.msk.f32.mxu1 %vm22811_vm3, %v27799_v1 }
 0x980   : > { %v13164_v7 = vpop.f32.mrb[28].mxu1 }
 0x981   : > { %v13194_v25 = vadd.f32 %v13164_v7, %v13063_v51  ;;  %v20374_v58 = vpop.f32.mrb[29].mxu1  ;;  %20706 = vmatmul.mubr.f32.gmra.mrb[130].mxu1 %v13862_v57 }
 0x982   : > { %20740 = vmatprep.mubr.msk.f32.mxu1 %vm22811_vm3, %v27799_v1  ;;  %v14040_v58 = vld [vmem:[%s28753_s5 + $0x38] sm:$0xff] }
 0x984   : > { %v13169_v46 = vpop.f32.mrb[38].mxu1 }
 0x985   : > { %v13195_v37 = vadd.f32 %v13169_v46, %v13064_v53  ;;  %v20377_v43 = vpop.f32.mrb[39].mxu1  ;;  %v14034_v53 = vld [vmem:[%s28753_s5 + $0x8] sm:$0xff] }
 0x986   : > { %v21694_v16 = vpack.c.bf16 %v14034_v53, %v14033_v6 }
 0x988   : > { %v13174_v38 = vpop.f32.mrb[40].mxu1  ;;  %21695 = vmatpush3.bf16.msra.mxu1 %v21694_v16 }
 0x989   : > { %v13196_v60 = vadd.f32 %v13174_v38, %v13065_v18  ;;  %v20380_v42 = vpop.f32.mrb[41].mxu1  ;;  %21696 = vmatprep.subr.bf16.mxu1 %v22810_v40 }
 0x98a   : > { %v14042_v42 = vld [vmem:[%s28753_s5 + $0x48] sm:$0xff] }
 0x98c   : > { %v13179_v59 = vpop.f32.mrb[42].mxu1 }
 0x98d   : > { %v13197_v35 = vadd.f32 %v13179_v59, %v13066_v24  ;;  %v20383_v33 = vpop.f32.mrb[43].mxu1 }
 0x990   : > { %v13184_v14 = vpop.f32.mrb[44].mxu1 }
 0x991   : > { %v13198_v44 = vadd.f32 %v13184_v14, %v13067_v13  ;;  %v20386_v63 = vpop.f32.mrb[45].mxu1 }
 0x992   : > { %v14044_v63 = vld [vmem:[%s28753_s5 + $0x58] sm:$0xff] }
 0x994   : > { %v13189_v0 = vpop.f32.mrb[46].mxu1 }
 0x995   : > { %v13199_v5 = vadd.f32 %v13189_v0, %v13068_v62  ;;  %v20389_v11 = vpop.f32.mrb[47].mxu1  ;;  %v14036_v62 = vld [vmem:[%s28753_s5 + $0x18] sm:$0xff] }
 0x996   : > { %v21697_v32 = vpack.c.bf16 %v14036_v62, %v14035_v56  ;;  %v14046_v11 = vld [vmem:[%s28753_s5 + $0x68] sm:$0xff] }
 0x998   : > { %21698 = vmatpush3.bf16.msra.mxu1 %v21697_v32 }
 0x999   : > { %21699 = vmatprep.subr.bf16.mxu1 %v22810_v40 }
 0x99c   : > { %v13290_v29 = vpop.f32.mrb[48].mxu1 }
 0x99d   : > { %v13324_v30 = vadd.f32 %v13290_v29, %v13193_v45  ;;  %v20424_v27 = vpop.f32.mrb[49].mxu1  ;;  %v14038_v45 = vld [vmem:[%s28753_s5 + $0x28] sm:$0xff] }
 0x99e   : > { %v21700_v7 = vpack.c.bf16 %v14038_v45, %v14037_v2 }
 0x9a0   : > { %v13295_v20 = vpop.f32.mrb[50].mxu1  ;;  %21701 = vmatpush3.bf16.msra.mxu1 %v21700_v7 }
 0x9a1   : > { %v13325_v3 = vadd.f32 %v13295_v20, %v13194_v25  ;;  %v20427_v49 = vpop.f32.mrb[51].mxu1  ;;  %v14039_v25 = vld [vmem:[%s28753_s5 + $0x30] sm:$0xff]  ;;  %21702 = vmatprep.subr.bf16.mxu1 %v22810_v40 }
 0x9a2   : > { %v21703_v38 = vpack.c.bf16 %v14040_v58, %v14039_v25  ;;  %v14048_v49 = vld [vmem:[%s28753_s5 + $0x78] sm:$0xff] }
 0x9a4   : > { %v13300_v31 = vpop.f32.mrb[52].mxu1  ;;  %21704 = vmatpush3.bf16.msra.mxu1 %v21703_v38 }
 0x9a5   : > { %v13326_v10 = vadd.f32 %v13300_v31, %v13195_v37  ;;  %v20430_v36 = vpop.f32.mrb[53].mxu1  ;;  %21705 = vmatprep.subr.bf16.mxu1 %v22810_v40 }
 0x9a8   : > { %v13305_v9 = vpop.f32.mrb[54].mxu1 }
 0x9a9   : > { %v13327_v15 = vadd.f32 %v13305_v9, %v13196_v60  ;;  %v20433_v26 = vpop.f32.mrb[55].mxu1  ;;  %v14041_v60 = vld [vmem:[%s28753_s5 + $0x40] sm:$0xff] }
 0x9aa   : > { %v21706_v14 = vpack.c.bf16 %v14042_v42, %v14041_v60 }
 0x9ac   : > { %v13310_v61 = vpop.f32.mrb[56].mxu1  ;;  %21707 = vmatpush3.bf16.msra.mxu1 %v21706_v14 }
 0x9ad   : > { %v13328_v23 = vadd.f32 %v13310_v61, %v13197_v35  ;;  %v20436_v52 = vpop.f32.mrb[57].mxu1  ;;  %21708 = vmatprep.subr.bf16.mxu1 %v22810_v40 }
 0x9b0   : > { %v13315_v48 = vpop.f32.mrb[58].mxu1 }
 0x9b1   : > { %v13329_v17 = vadd.f32 %v13315_v48, %v13198_v44  ;;  %v20439_v4 = vpop.f32.mrb[59].mxu1  ;;  %v14043_v44 = vld [vmem:[%s28753_s5 + $0x50] sm:$0xff] }
 0x9b2   : > { %v21709_v0 = vpack.c.bf16 %v14044_v63, %v14043_v44 }
 0x9b4   : > { %v13320_v51 = vpop.f32.mrb[60].mxu1  ;;  %21710 = vmatpush3.bf16.msra.mxu1 %v21709_v0 }
 0x9b5   : > { %v13330_v28 = vadd.f32 %v13320_v51, %v13199_v5  ;;  %v20442_v39 = vpop.f32.mrb[61].mxu1  ;;  %v14045_v5 = vld [vmem:[%s28753_s5 + $0x60] sm:$0xff]  ;;  %21711 = vmatprep.subr.bf16.mxu1 %v22810_v40 }
 0x9b6   : > { %v21712_v20 = vpack.c.bf16 %v14046_v11, %v14045_v5 }
 0x9b8   : > { %21713 = vmatpush3.bf16.msra.mxu1 %v21712_v20 }
 0x9b9   : > { %21714 = vmatprep.subr.bf16.mxu1 %v22810_v40 }
 0x9bc   : > { %v13422_v41 = vpop.f32.mrb[62].mxu1 }
 0x9bd   : > { %v13456_v19 = vadd.f32 %v13422_v41, %v13324_v30  ;;  %v20477_v18 = vpop.f32.mrb[63].mxu1 }
 0x9c0   : > { %v13427_v47 = vpop.f32.mrb[64].mxu1 }
 0x9c1   : > { %v13457_v50 = vadd.f32 %v13427_v47, %v13325_v3  ;;  %v20480_v34 = vpop.f32.mrb[65].mxu1  ;;  %v14047_v3 = vld [vmem:[%s28753_s5 + $0x70] sm:$0xff] }
 0x9c2   : > { %v21715_v9 = vpack.c.bf16 %v14048_v49, %v14047_v3 }
 0x9c4   : > { %v13432_v24 = vpop.f32.mrb[66].mxu1  ;;  %21716 = vmatpush3.bf16.msra.mxu1 %v21715_v9 }
 0x9c5   : > { %v13458_v12 = vadd.f32 %v13432_v24, %v13326_v10  ;;  %v20483_v54 = vpop.f32.mrb[67].mxu1  ;;  %21717 = vmatprep.subr.bf16.mxu1 %v22810_v40 }
 0x9c8   : > { %v13437_v55 = vpop.f32.mrb[68].mxu1 }
 0x9c9   : > { %v13459_v13 = vadd.f32 %v13437_v55, %v13327_v15  ;;  %v20486_v8 = vpop.f32.mrb[69].mxu1 }
 0x9cc   : > { %v13442_v21 = vpop.f32.mrb[70].mxu1 }
 0x9cd   : > { %v13460_v22 = vadd.f32 %v13442_v21, %v13328_v23  ;;  %v20489_v57 = vpop.f32.mrb[71].mxu1 }
 0x9d0   : > { %v13447_v46 = vpop.f32.mrb[72].mxu1 }
 0x9d1   : > { %v13461_v37 = vadd.f32 %v13447_v46, %v13329_v17  ;;  %v20492_v43 = vpop.f32.mrb[73].mxu1 }
 0x9d4   : > { %v13452_v59 = vpop.f32.mrb[74].mxu1 }
 0x9d5   : > { %v13462_v35 = vadd.f32 %v13452_v59, %v13330_v28  ;;  %v20495_v33 = vpop.f32.mrb[75].mxu1 }
 0x9dc   : > { %v13553_v29 = vpop.f32.mrb[76].mxu1 }
 0x9dd   : > { %v13587_v30 = vadd.f32 %v13553_v29, %v13456_v19  ;;  %v20530_v27 = vpop.f32.mrb[77].mxu1 }
 0x9e0   : > { %v13558_v31 = vpop.f32.mrb[78].mxu1 }
 0x9e1   : > { %v13588_v10 = vadd.f32 %v13558_v31, %v13457_v50  ;;  %v20533_v36 = vpop.f32.mrb[79].mxu1  ;;  %v28018_v31 = vld [vmem:[%s28752_s4] ss:$0 sm:$0xff] }
 0x9e4   : > { %v13563_v15 = vpop.f32.mrb[80].mxu1 }
 0x9e5   : > { %v13589_v26 = vadd.f32 %v13563_v15, %v13458_v12  ;;  %v20536_v61 = vpop.f32.mrb[81].mxu1 }
 0x9e8   : > { %v13568_v23 = vpop.f32.mrb[82].mxu1 }
 0x9e9   : > { %v13590_v52 = vadd.f32 %v13568_v23, %v13459_v13  ;;  %v20539_v48 = vpop.f32.mrb[83].mxu1 }
 0x9ec   : > { %v13573_v17 = vpop.f32.mrb[84].mxu1 }
 0x9ed   : > { %v13591_v4 = vadd.f32 %v13573_v17, %v13460_v22  ;;  %v20542_v51 = vpop.f32.mrb[85].mxu1 }
 0x9f0   : > { %v13578_v28 = vpop.f32.mrb[86].mxu1 }
 0x9f1   : > { %v13592_v39 = vadd.f32 %v13578_v28, %v13461_v37  ;;  %v20545_v6 = vpop.f32.mrb[87].mxu1 }
 0x9f4   : > { %v13583_v53 = vpop.f32.mrb[88].mxu1 }
 0x9f5   : > { %v13593_v16 = vadd.f32 %v13583_v53, %v13462_v35  ;;  %v20548_v41 = vpop.f32.mrb[89].mxu1 }
 0x9fc   : > { %v13684_v19 = vpop.f32.mrb[90].mxu1 }
 0x9fd   : > { %v13718_v18 = vadd.f32 %v13684_v19, %v13587_v30  ;;  %v20583_v47 = vpop.f32.mrb[91].mxu1 }
 0xa00   : > { %v13689_v50 = vpop.f32.mrb[92].mxu1 }
 0xa01   : > { %v13719_v34 = vadd.f32 %v13689_v50, %v13588_v10  ;;  %v20586_v24 = vpop.f32.mrb[93].mxu1 }
 0xa04   : > { %v13694_v12 = vpop.f32.mrb[94].mxu1 }
 0xa05   : > { %v13720_v54 = vadd.f32 %v13694_v12, %v13589_v26  ;;  %v20589_v55 = vpop.f32.mrb[95].mxu1 }
 0xa08   : > { %v13699_v13 = vpop.f32.mrb[96].mxu1 }
 0xa09   : > { %v13721_v8 = vadd.f32 %v13699_v13, %v13590_v52  ;;  %v20592_v56 = vpop.f32.mrb[97].mxu1 }
 0xa0c   : > { %v13704_v62 = vpop.f32.mrb[98].mxu1 }
 0xa0d   : > { %v13722_v2 = vadd.f32 %v13704_v62, %v13591_v4  ;;  %v20595_v21 = vpop.f32.mrb[99].mxu1 }
 0xa10   : > { %v13709_v32 = vpop.f32.mrb[100].mxu1 }
 0xa11   : > { %v13723_v45 = vadd.f32 %v13709_v32, %v13592_v39  ;;  %v20598_v22 = vpop.f32.mrb[101].mxu1 }
 0xa14   : > { %v13714_v57 = vpop.f32.mrb[102].mxu1 }
 0xa15   : > { %v13724_v7 = vadd.f32 %v13714_v57, %v13593_v16  ;;  %v20601_v25 = vpop.f32.mrb[103].mxu1 }
 0xa1c   : > { %v13815_v58 = vpop.f32.mrb[104].mxu1 }
 0xa1d   : > { %v13849_v46 = vadd.f32 %v13815_v58, %v13718_v18  ;;  %v20636_v37 = vpop.f32.mrb[105].mxu1 }
 0xa20   : > { %v13820_v43 = vpop.f32.mrb[106].mxu1 }
 0xa21   : > { %v13850_v38 = vadd.f32 %v13820_v43, %v13719_v34  ;;  %v20639_v60 = vpop.f32.mrb[107].mxu1 }
 0xa24   : > { %v13825_v42 = vpop.f32.mrb[108].mxu1 }
 0xa25   : > { %v13851_v59 = vadd.f32 %v13825_v42, %v13720_v54  ;;  %v20642_v35 = vpop.f32.mrb[109].mxu1 }
 0xa28   : > { %v13830_v33 = vpop.f32.mrb[110].mxu1 }
 0xa29   : > { %v13852_v14 = vadd.f32 %v13830_v33, %v13721_v8  ;;  %v20645_v44 = vpop.f32.mrb[111].mxu1 }
 0xa2c   : > { %v13835_v63 = vpop.f32.mrb[112].mxu1 }
 0xa2d   : > { %v13853_v0 = vadd.f32 %v13835_v63, %v13722_v2  ;;  %v20648_v5 = vpop.f32.mrb[113].mxu1 }
 0xa2e   : > { %v16415_v5 = vld [vmem:[%s28753_s5 + $0x88] sm:$0xff] }
 0xa30   : > { %v13840_v11 = vpop.f32.mrb[114].mxu1 }
 0xa31   : > { %v13854_v29 = vadd.f32 %v13840_v11, %v13723_v45  ;;  %v20651_v30 = vpop.f32.mrb[115].mxu1 }
 0xa34   : > { %v13845_v27 = vpop.f32.mrb[116].mxu1 }
 0xa35   : > { %v13855_v20 = vadd.f32 %v13845_v27, %v13724_v7  ;;  %v20654_v3 = vpop.f32.mrb[117].mxu1 }
 0xa3c   : > { %v13946_v49 = vpop.f32.mrb[118].mxu1 }
 0xa3d   : > { %v13980_v10 = vadd.f32 %v13946_v49, %v13849_v46  ;;  %v20689_v36 = vpop.f32.mrb[119].mxu1 }
 0xa3f   : > { %v13994_v9 = vadd.f32 %v28018_v31, %v13980_v10 }
 0xa40   : > { %v13951_v15 = vpop.f32.mrb[120].mxu1 }
 0xa41   : > { %v14001_v26 = vmax.f32 %v13994_v9, 0.0  ;;  %v13981_v61 = vadd.f32 %v13951_v15, %v13850_v38  ;;  %v20692_v23 = vpop.f32.mrb[121].mxu1  ;;  %v16416_v15 = vld [vmem:[%s28753_s5 + $0x90] sm:$0xff] }
 0xa43   : > { %14008 = vst [vmem:[#allocation6] sm:$0xff] %v14001_v26  ;;  %v13995_v52 = vadd.f32 %v28018_v31, %v13981_v61  ;;  %v16417_v26 = vld [vmem:[%s28753_s5 + $0x98] sm:$0xff] }
 0xa44   : > { %v13956_v48 = vpop.f32.mrb[122].mxu1 }
 0xa45   : > { %v14002_v17 = vmax.f32 %v13995_v52, 0.0  ;;  %v13982_v4 = vadd.f32 %v13956_v48, %v13851_v59  ;;  %v20695_v51 = vpop.f32.mrb[123].mxu1 }
 0xa46   : > { %v21721_v51 = vpack.c.bf16 %v16417_v26, %v16416_v15 }
 0xa47   : > { %14009 = vst [vmem:[#allocation6 + $0x8] sm:$0xff] %v14002_v17  ;;  %v13996_v28 = vadd.f32 %v28018_v31, %v13982_v4 }
 0xa48   : > { %v13961_v39 = vpop.f32.mrb[124].mxu1 }
 0xa49   : > { %v14003_v6 = vmax.f32 %v13996_v28, 0.0  ;;  %v13983_v53 = vadd.f32 %v13961_v39, %v13852_v14  ;;  %v20698_v16 = vpop.f32.mrb[125].mxu1 }
 0xa4a   : > { %v14016_v41 = vld [vmem:[#allocation6] sm:$0x1]  ;;  %v14017_v19 = vld [vmem:[#allocation6 + $0x1] sm:$0x1]  ;;  %v28024_v50 = vld [vmem:[#allocation6 + $0x2] sm:$0x1] }
 0xa4b   : > { %v14018_v18 = vmax.f32 %v14016_v41, %v14017_v19  ;;  %14010 = vst [vmem:[#allocation6 + $0x10] sm:$0xff] %v14003_v6  ;;  %v13997_v47 = vadd.f32 %v28018_v31, %v13983_v53  ;;  %v14120_v61 = vld [vmem:[#allocation6 + $0x3] sm:$0x1]  ;;  %v16419_v53 = vld [vmem:[%s28753_s5 + $0xa8] sm:$0xff]  ;;  %v14224_v15 = vld [vmem:[#allocation6 + $0x6] sm:$0x1] }
 0xa4c   : > { %v13966_v34 = vpop.f32.mrb[126].mxu1  ;;  %v16418_v6 = vld [vmem:[%s28753_s5 + $0xa0] sm:$0xff]  ;;  %v14121_v16 = vmax.f32 %v28024_v50, %v14120_v61 }
 0xa4d   : > { %v14004_v24 = vmax.f32 %v13997_v47, 0.0  ;;  %v13984_v12 = vadd.f32 %v13966_v34, %v13853_v0  ;;  %v20701_v54 = vpop.f32.mrb[127].mxu1  ;;  %v14020_v55 = vmax.f32 %v14018_v18, %v28024_v50  ;;  %v16414_v0 = vld [vmem:[%s28753_s5 + $0x80] sm:$0xff]  ;;  %v16420_v50 = vld [vmem:[%s28753_s5 + $0xb0] sm:$0xff] }
 0xa4e   : > { %v14021_v13 = vld [vmem:[#allocation6 + $0x8] sm:$0x1]  ;;  %v14023_v2 = vld [vmem:[#allocation6 + $0x9] sm:$0x1]  ;;  %v28028_v57 = vld [vmem:[#allocation6 + $0xa] sm:$0x1]  ;;  %v21718_v10 = vpack.c.bf16 %v16415_v5, %v16414_v0 }
 0xa4f   : > { %14011 = vst [vmem:[#allocation6 + $0x18] sm:$0xff] %v14004_v24  ;;  %v13998_v8 = vadd.f32 %v28018_v31, %v13984_v12  ;;  %v14022_v56 = vmax.f32 %v14020_v55, %v14021_v13  ;;  %v21724_v24 = vpack.c.bf16 %v16419_v53, %v16418_v6  ;;  %v14122_v12 = vld [vmem:[#allocation6 + $0x4] sm:$0x1]  ;;  %v16421_v54 = vld [vmem:[%s28753_s5 + $0xb8] sm:$0xff]  ;;  %v16431_v0 = vld [vmem:[%s28753_s5 + $0x108] sm:$0xff] }
 0xa50   : > { %v13971_v62 = vpop.f32.mrb[128].mxu1  ;;  %v14123_v55 = vmax.f32 %v14121_v16, %v14122_v12  ;;  %v21727_v13 = vpack.c.bf16 %v16421_v54, %v16420_v50  ;;  %v16438_v6 = vld [vmem:[%s28753_s5 + $0x140] sm:$0xff]  ;;  %v16439_v53 = vld [vmem:[%s28753_s5 + $0x148] sm:$0xff] }
 0xa51   : > { %v14005_v21 = vmax.f32 %v13998_v8, 0.0  ;;  %v13985_v32 = vadd.f32 %v13971_v62, %v13854_v29  ;;  %v20704_v45 = vpop.f32.mrb[129].mxu1  ;;  %v14024_v22 = vmax.f32 %v14022_v56, %v14023_v2  ;;  %v16422_v8 = vld [vmem:[%s28753_s5 + $0xc0] sm:$0xff]  ;;  %v16423_v56 = vld [vmem:[%s28753_s5 + $0xc8] sm:$0xff]  ;;  %v21754_v16 = vpack.c.bf16 %v16439_v53, %v16438_v6 }
 0xa52   : > { %v14027_v7 = vld [vmem:[#allocation6 + $0x10] sm:$0x1]  ;;  %v14029_v25 = vld [vmem:[#allocation6 + $0x11] sm:$0x1]  ;;  %v28030_v58 = vld [vmem:[#allocation6 + $0x12] sm:$0x1]  ;;  %v14124_v62 = vmax.f32 %v14123_v55, %v28028_v57  ;;  %v21730_v2 = vpack.c.bf16 %v16423_v56, %v16422_v8 }
 0xa53   : > { %14012 = vst [vmem:[#allocation6 + $0x20] sm:$0xff] %v14005_v21  ;;  %v13999_v46 = vadd.f32 %v28018_v31, %v13985_v32  ;;  %v14026_v37 = vmax.f32 %v14024_v22, %v28028_v57  ;;  %v14324_v43 = vmax.f32 %v14027_v7, %v14029_v25  ;;  %v28034_v38 = vld [vmem:[#allocation6 + $0x13] sm:$0x1]  ;;  %v28036_v60 = vld [vmem:[#allocation6 + $0x14] sm:$0x1]  ;;  %v16425_v45 = vld [vmem:[%s28753_s5 + $0xd8] sm:$0xff] }
 0xa54   : > { %v28038_v42 = vld [vmem:[#allocation6 + $0x15] sm:$0x1]  ;;  %v13976_v59 = vpop.f32.mrb[130].mxu1  ;;  %v14426_v35 = vmax.f32 %v28030_v58, %v28034_v38  ;;  %v28050_v11 = vld [vmem:[#allocation6 + $0x16] sm:$0x1]  ;;  %v16426_v57 = vld [vmem:[%s28753_s5 + $0xe0] sm:$0xff] }
 0xa55   : > { %v14526_v33 = vmax.f32 %v28036_v60, %v28038_v42  ;;  %v14006_v14 = vmax.f32 %v13999_v46, 0.0  ;;  %v13986_v44 = vadd.f32 %v13976_v59, %v13855_v20  ;;  %v14028_v63 = vmax.f32 %v14026_v37, %v14027_v7  ;;  %v20707_v30 = vpop.f32.mrb[131].mxu1  ;;  %v14125_v21 = vld [vmem:[#allocation6 + $0xb] sm:$0x1]  ;;  %v16424_v32 = vld [vmem:[%s28753_s5 + $0xd0] sm:$0xff]  ;;  %v16462_v53 = vld [vmem:[%s28753_s5 + $0x200] sm:$0xff] }
 0xa56   : > { %v28053_v29 = vmax.f32 %v14324_v43, %v28030_v58  ;;  %v28056_v27 = vmax.f32 %v14426_v35, %v28036_v60  ;;  %v14126_v22 = vmax.f32 %v14124_v62, %v14125_v21  ;;  %v21733_v7 = vpack.c.bf16 %v16425_v45, %v16424_v32  ;;  %v16427_v46 = vld [vmem:[%s28753_s5 + $0xe8] sm:$0xff]  ;;  %v16428_v59 = vld [vmem:[%s28753_s5 + $0xf0] sm:$0xff]  ;;  %v16429_v35 = vld [vmem:[%s28753_s5 + $0xf8] sm:$0xff] }
 0xa57   : > { %v28059_v20 = vmax.f32 %v14526_v33, %v28050_v11  ;;  %14013 = vst [vmem:[#allocation6 + $0x28] sm:$0xff] %v14006_v14  ;;  %v14000_v3 = vadd.f32 %v28018_v31, %v13986_v44  ;;  %v14030_v49 = vmax.f32 %v14028_v63, %v14029_v25  ;;  %v14127_v25 = vld [vmem:[#allocation6 + $0xc] sm:$0x1]  ;;  %v21736_v43 = vpack.c.bf16 %v16427_v46, %v16426_v57  ;;  %v16430_v63 = vld [vmem:[%s28753_s5 + $0x100] sm:$0xff]  ;;  %v14229_v55 = vld [vmem:[#allocation6 + $0xe] sm:$0x1] }
 0xa58   : > { %v14128_v37 = vmax.f32 %v14126_v22, %v14127_v25  ;;  %v21739_v14 = vpack.c.bf16 %v16429_v35, %v16428_v59  ;;  %v21742_v5 = vpack.c.bf16 %v16431_v0, %v16430_v63  ;;  %v16443_v8 = vld [vmem:[%s28753_s5 + $0x168] sm:$0xff]  ;;  %v16445_v21 = vld [vmem:[%s28753_s5 + $0x178] sm:$0xff]  ;;  %v16454_v0 = vld [vmem:[%s28753_s5 + $0x1c0] sm:$0xff] }
 0xa59   : > { %v14007_v36 = vmax.f32 %v14000_v3, 0.0  ;;  %v14032_v9 = vmax.f32 %v14030_v49, %v28030_v58  ;;  %v14222_v3 = vld [vmem:[#allocation6 + $0x5] sm:$0x1]  ;;  %v16451_v59 = vld [vmem:[%s28753_s5 + $0x1a8] sm:$0xff] }
 0xa5a   : > { %v28069_v23 = vld [vmem:[#allocation6 + $0x20] sm:$0x1]  ;;  %v28071_v52 = vld [vmem:[#allocation6 + $0x21] sm:$0x1]  ;;  %v28073_v48 = vld [vmem:[#allocation6 + $0x22] sm:$0x1]  ;;  %v14129_v33 = vmax.f32 %v14128_v37, %v28030_v58 }
 0xa5b   : > { %14014 = vst [vmem:[#allocation6 + $0x30] sm:$0xff] %v14007_v36  ;;  %20741 = vmatmul.mubr.f32.vlgmr.msra.gmra.mrb[132].mxu1 %v14032_v9  ;;  %v14626_v31 = vmax.f32 %v28069_v23, %v28071_v52  ;;  %v28077_v17 = vld [vmem:[#allocation6 + $0x23] sm:$0x1]  ;;  %v28079_v4 = vld [vmem:[#allocation6 + $0x24] sm:$0x1]  ;;  %v16432_v58 = vld [vmem:[%s28753_s5 + $0x110] sm:$0xff] }
 0xa5c   : > { %21719 = vmatpush3.bf16.msra.mxu1 %v21718_v10  ;;  %20775 = vmatprep.mubr.msk.f32.mxu1 %vm22811_vm3, %v27799_v1  ;;  %v14728_v28 = vmax.f32 %v28073_v48, %v28077_v17  ;;  %v28085_v39 = vld [vmem:[#allocation6 + $0x25] sm:$0x1]  ;;  %v28103_v47 = vld [vmem:[#allocation6 + $0x26] sm:$0x1]  ;;  %v14131_v44 = vmax.f32 %v14129_v33, %v28034_v38  ;;  %v16433_v38 = vld [vmem:[%s28753_s5 + $0x118] sm:$0xff]  ;;  %v14223_v10 = vmax.f32 %v14122_v12, %v14222_v3 }
 0xa5d   : > { %21720 = vmatprep.subr.bf16.mxu1 %v22810_v40  ;;  %v28096_v41 = vmax.f32 %v14626_v31, %v28073_v48  ;;  %v14828_v19 = vmax.f32 %v28079_v4, %v28085_v39  ;;  %v21745_v49 = vpack.c.bf16 %v16433_v38, %v16432_v58  ;;  %v16434_v36 = vld [vmem:[%s28753_s5 + $0x120] sm:$0xff]  ;;  %v16435_v9 = vld [vmem:[%s28753_s5 + $0x128] sm:$0xff]  ;;  %v16437_v31 = vld [vmem:[%s28753_s5 + $0x138] sm:$0xff] }
 0xa5e   : > { %v28101_v18 = vmax.f32 %v14728_v28, %v28079_v4  ;;  %v14133_v30 = vmax.f32 %v14131_v44, %v28036_v60  ;;  %v21748_v26 = vpack.c.bf16 %v16435_v9, %v16434_v36  ;;  %v14225_v61 = vmax.f32 %v14223_v10, %v14224_v15  ;;  %v16441_v12 = vld [vmem:[%s28753_s5 + $0x158] sm:$0xff]  ;;  %v16452_v33 = vld [vmem:[%s28753_s5 + $0x1b0] sm:$0xff]  ;;  %v16459_v15 = vld [vmem:[%s28753_s5 + $0x1e8] sm:$0xff] }
 0xa5f   : > { %v28106_v34 = vmax.f32 %v14828_v19, %v28103_v47  ;;  %v14227_v19 = vld [vmem:[#allocation6 + $0xd] sm:$0x1]  ;;  %v14326_v44 = vld [vmem:[#allocation6 + $0x18] sm:$0x1]  ;;  %v14328_v38 = vld [vmem:[#allocation6 + $0x19] sm:$0x1] }
 0xa60   : > { %21722 = vmatpush3.bf16.msra.mxu1 %v21721_v51  ;;  %v14226_v28 = vmax.f32 %v14225_v61, %v14127_v25  ;;  %v16447_v25 = vld [vmem:[%s28753_s5 + $0x188] sm:$0xff]  ;;  %v16456_v3 = vld [vmem:[%s28753_s5 + $0x1d0] sm:$0xff]  ;;  %v14330_v9 = vld [vmem:[#allocation6 + $0x1a] sm:$0x1] }
 0xa61   : > { %21723 = vmatprep.subr.bf16.mxu1 %v22810_v40 }
 0xa62   : > { %v14228_v50 = vmax.f32 %v14226_v28, %v14227_v19 }
 0xa64   : > { %21725 = vmatpush3.bf16.msra.mxu1 %v21724_v24  ;;  %v16440_v24 = vld [vmem:[%s28753_s5 + $0x150] sm:$0xff]  ;;  %v14230_v56 = vmax.f32 %v14228_v50, %v14229_v55  ;;  %v16466_v50 = vld [vmem:[%s28753_s5 + $0x220] sm:$0xff] }
 0xa65   : > { %21726 = vmatprep.subr.bf16.mxu1 %v22810_v40  ;;  %v21757_v54 = vpack.c.bf16 %v16441_v12, %v16440_v24 }
 0xa66   : > { %v14231_v32 = vmax.f32 %v14230_v56, %v28036_v60  ;;  %v16448_v60 = vld [vmem:[%s28753_s5 + $0x190] sm:$0xff] }
 0xa68   : > { %21728 = vmatpush3.bf16.msra.mxu1 %v21727_v13  ;;  %v16442_v13 = vld [vmem:[%s28753_s5 + $0x160] sm:$0xff]  ;;  %v14233_v22 = vmax.f32 %v14231_v32, %v28038_v42  ;;  %v16449_v42 = vld [vmem:[%s28753_s5 + $0x198] sm:$0xff] }
 0xa69   : > { %21729 = vmatprep.subr.bf16.mxu1 %v22810_v40  ;;  %v21760_v62 = vpack.c.bf16 %v16443_v8, %v16442_v13  ;;  %v21769_v37 = vpack.c.bf16 %v16449_v42, %v16448_v60  ;;  %v16468_v13 = vld [vmem:[%s28753_s5 + $0x230] sm:$0xff]  ;;  %v16469_v8 = vld [vmem:[%s28753_s5 + $0x238] sm:$0xff]  ;;  %v16475_v60 = vld [vmem:[%s28753_s5 + $0x268] sm:$0xff] }
 0xa6a   : > { %v14235_v46 = vmax.f32 %v14233_v22, %v28050_v11  ;;  %v16450_v11 = vld [vmem:[%s28753_s5 + $0x1a0] sm:$0xff]  ;;  %v21799_v56 = vpack.c.bf16 %v16469_v8, %v16468_v13  ;;  %v16472_v22 = vld [vmem:[%s28753_s5 + $0x250] sm:$0xff] }
 0xa6b   : > { %v21772_v35 = vpack.c.bf16 %v16451_v59, %v16450_v11  ;;  %v16476_v11 = vld [vmem:[%s28753_s5 + $0x270] sm:$0xff]  ;;  %v16477_v59 = vld [vmem:[%s28753_s5 + $0x278] sm:$0xff] }
 0xa6c   : > { %21731 = vmatpush3.bf16.msra.mxu1 %v21730_v2  ;;  %v16444_v2 = vld [vmem:[%s28753_s5 + $0x170] sm:$0xff] }
 0xa6d   : > { %21732 = vmatprep.subr.bf16.mxu1 %v22810_v40  ;;  %v21763_v45 = vpack.c.bf16 %v16445_v21, %v16444_v2  ;;  %v16470_v2 = vld [vmem:[%s28753_s5 + $0x240] sm:$0xff]  ;;  %v16471_v21 = vld [vmem:[%s28753_s5 + $0x248] sm:$0xff] }
 0xa6e   : > { %v21802_v32 = vpack.c.bf16 %v16471_v21, %v16470_v2  ;;  %v16500_v21 = vld [vmem:[%s28753_s5 + $0x330] sm:$0xff] }
 0xa70   : > { %21734 = vmatpush3.bf16.msra.mxu1 %v21733_v7  ;;  %v16446_v7 = vld [vmem:[%s28753_s5 + $0x180] sm:$0xff] }
 0xa71   : > { %21735 = vmatprep.subr.bf16.mxu1 %v22810_v40  ;;  %v21766_v57 = vpack.c.bf16 %v16447_v25, %v16446_v7  ;;  %v14431_v25 = vld [vmem:[#allocation6 + $0x1c] sm:$0x1] }
 0xa74   : > { %21737 = vmatpush3.bf16.msra.mxu1 %v21736_v43  ;;  %v28222_v43 = vld [vmem:[#allocation5] sm:$0xff] }
 0xa75   : > { %21738 = vmatprep.subr.bf16.mxu1 %v22810_v40 }
 0xa78   : > { %21740 = vmatpush3.bf16.msra.mxu1 %v21739_v14  ;;  %v16453_v14 = vld [vmem:[%s28753_s5 + $0x1b8] sm:$0xff] }
 0xa79   : > { %21741 = vmatprep.subr.bf16.mxu1 %v22810_v40  ;;  %v21775_v63 = vpack.c.bf16 %v16453_v14, %v16452_v33  ;;  %v21811_v33 = vpack.c.bf16 %v16477_v59, %v16476_v11  ;;  %v14632_v11 = vld [vmem:[#allocation6 + $0x2a] sm:$0x1]  ;;  %v16506_v59 = vld [vmem:[%s28753_s5 + $0x360] sm:$0xff] }
 0xa7b   : > { %20776 = vmatmul.mubr.f32.vlgmr.msra.gmra.mrb[132].mxu1 %v14133_v30  ;;  %v14327_v30 = vmax.f32 %v28053_v29, %v14326_v44  ;;  %v16458_v29 = vld [vmem:[%s28753_s5 + $0x1e0] sm:$0xff] }
 0xa7c   : > { %21743 = vmatpush3.bf16.msra.mxu1 %v21742_v5  ;;  %20810 = vmatprep.mubr.msk.f32.mxu1 %vm22811_vm3, %v27799_v1  ;;  %v16436_v1 = vld [vmem:[%s28753_s5 + $0x130] sm:$0xff]  ;;  %v16455_v5 = vld [vmem:[%s28753_s5 + $0x1c8] sm:$0xff]  ;;  %v21784_v61 = vpack.c.bf16 %v16459_v15, %v16458_v29  ;;  %v16478_v44 = vld [vmem:[%s28753_s5 + $0x280] sm:$0xff] }
 0xa7d   : > { %21744 = vmatprep.subr.bf16.mxu1 %v22810_v40  ;;  %v21751_v51 = vpack.c.bf16 %v16437_v31, %v16436_v1  ;;  %v21778_v58 = vpack.c.bf16 %v16455_v5, %v16454_v0  ;;  %v14329_v10 = vmax.f32 %v14327_v30, %v14328_v38  ;;  %v16460_v1 = vld [vmem:[%s28753_s5 + $0x1f0] sm:$0xff]  ;;  %v16461_v31 = vld [vmem:[%s28753_s5 + $0x1f8] sm:$0xff]  ;;  %v16483_v38 = vld [vmem:[%s28753_s5 + $0x2a8] sm:$0xff] }
 0xa7e   : > { %v21787_v28 = vpack.c.bf16 %v16461_v31, %v16460_v1  ;;  %v16486_v29 = vld [vmem:[%s28753_s5 + $0x2c0] sm:$0xff]  ;;  %v16487_v15 = vld [vmem:[%s28753_s5 + $0x2c8] sm:$0xff]  ;;  %v16489_v31 = vld [vmem:[%s28753_s5 + $0x2d8] sm:$0xff] }
 0xa80   : > { %21746 = vmatpush3.bf16.msra.mxu1 %v21745_v49  ;;  %v16457_v49 = vld [vmem:[%s28753_s5 + $0x1d8] sm:$0xff] }
 0xa81   : > { %21747 = vmatprep.subr.bf16.mxu1 %v22810_v40  ;;  %v21781_v36 = vpack.c.bf16 %v16457_v49, %v16456_v3  ;;  %v16484_v49 = vld [vmem:[%s28753_s5 + $0x2b0] sm:$0xff] }
 0xa84   : > { %21749 = vmatpush3.bf16.msra.mxu1 %v21748_v26  ;;  %v14331_v26 = vmax.f32 %v14329_v10, %v14330_v9  ;;  %v16485_v10 = vld [vmem:[%s28753_s5 + $0x2b8] sm:$0xff] }
 0xa85   : > { %21750 = vmatprep.subr.bf16.mxu1 %v22810_v40 }
 0xa88   : > { %21752 = vmatpush3.bf16.msra.mxu1 %v21751_v51  ;;  %v14333_v51 = vmax.f32 %v14331_v26, %v28069_v23  ;;  %v16464_v23 = vld [vmem:[%s28753_s5 + $0x210] sm:$0xff]  ;;  %v14529_v26 = vld [vmem:[#allocation6 + $0x1d] sm:$0x1] }
 0xa89   : > { %21753 = vmatprep.subr.bf16.mxu1 %v22810_v40 }
 0xa8a   : > { %v14335_v6 = vmax.f32 %v14333_v51, %v28071_v52  ;;  %v16465_v52 = vld [vmem:[%s28753_s5 + $0x218] sm:$0xff] }
 0xa8b   : > { %v21793_v12 = vpack.c.bf16 %v16465_v52, %v16464_v23  ;;  %v16493_v23 = vld [vmem:[%s28753_s5 + $0x2f8] sm:$0xff] }
 0xa8c   : > { %21755 = vmatpush3.bf16.msra.mxu1 %v21754_v16  ;;  %v16463_v16 = vld [vmem:[%s28753_s5 + $0x208] sm:$0xff]  ;;  %v14337_v24 = vmax.f32 %v14335_v6, %v28073_v48  ;;  %v16490_v6 = vld [vmem:[%s28753_s5 + $0x2e0] sm:$0xff] }
 0xa8d   : > { %21756 = vmatprep.subr.bf16.mxu1 %v22810_v40  ;;  %v21790_v19 = vpack.c.bf16 %v16463_v16, %v16462_v53  ;;  %v16491_v53 = vld [vmem:[%s28753_s5 + $0x2e8] sm:$0xff] }
 0xa90   : > { %21758 = vmatpush3.bf16.msra.mxu1 %v21757_v54  ;;  %v16467_v54 = vld [vmem:[%s28753_s5 + $0x228] sm:$0xff] }
 0xa91   : > { %21759 = vmatprep.subr.bf16.mxu1 %v22810_v40  ;;  %v21796_v55 = vpack.c.bf16 %v16467_v54, %v16466_v50  ;;  %v16494_v54 = vld [vmem:[%s28753_s5 + $0x300] sm:$0xff] }
 0xa94   : > { %21761 = vmatpush3.bf16.msra.mxu1 %v21760_v62  ;;  %v14428_v62 = vmax.f32 %v28056_v27, %v14330_v9  ;;  %v16473_v27 = vld [vmem:[%s28753_s5 + $0x258] sm:$0xff]  ;;  %v14528_v9 = vmax.f32 %v28059_v20, %v14431_v25  ;;  %v16488_v20 = vld [vmem:[%s28753_s5 + $0x2d0] sm:$0xff] }
 0xa95   : > { %21762 = vmatprep.subr.bf16.mxu1 %v22810_v40  ;;  %v21829_v51 = vpack.c.bf16 %v16489_v31, %v16488_v20  ;;  %v16517_v20 = vld [vmem:[%s28753_s5 + $0x3b8] sm:$0xff] }
 0xa96   : > { %v14530_v1 = vmax.f32 %v14528_v9, %v14529_v26  ;;  %v16513_v9 = vld [vmem:[%s28753_s5 + $0x398] sm:$0xff]  ;;  %v16515_v26 = vld [vmem:[%s28753_s5 + $0x3a8] sm:$0xff] }
 0xa98   : > { %21764 = vmatpush3.bf16.msra.mxu1 %v21763_v45  ;;  %v14429_v45 = vld [vmem:[#allocation6 + $0x1b] sm:$0x1] }
 0xa99   : > { %21765 = vmatprep.subr.bf16.mxu1 %v22810_v40  ;;  %v14430_v7 = vmax.f32 %v14428_v62, %v14429_v45  ;;  %v16499_v62 = vld [vmem:[%s28753_s5 + $0x328] sm:$0xff] }
 0xa9a   : > { %v14628_v45 = vld [vmem:[#allocation6 + $0x28] sm:$0x1] }
 0xa9b   : > { %20811 = vmatmul.mubr.f32.vlgmr.msra.gmra.mrb[132].mxu1 %v14235_v46  ;;  %v16474_v46 = vld [vmem:[%s28753_s5 + $0x260] sm:$0xff]  ;;  %v14432_v42 = vmax.f32 %v14430_v7, %v14431_v25  ;;  %v16503_v25 = vld [vmem:[%s28753_s5 + $0x348] sm:$0xff] }
 0xa9c   : > { %21767 = vmatpush3.bf16.msra.mxu1 %v21766_v57  ;;  %20845 = vmatprep.mubr.msk.f32.mxu1 %vm22811_vm3, %v28222_v43  ;;  %v21805_v57 = vpack.c.bf16 %v16473_v27, %v16472_v22  ;;  %v14629_v27 = vmax.f32 %v28096_v41, %v14628_v45  ;;  %v16502_v7 = vld [vmem:[%s28753_s5 + $0x340] sm:$0xff]  ;;  %v16505_v41 = vld [vmem:[%s28753_s5 + $0x358] sm:$0xff] }
 0xa9d   : > { %21768 = vmatprep.subr.bf16.mxu1 %v22810_v40 }
 0xaa0   : > { %21770 = vmatpush3.bf16.msra.mxu1 %v21769_v37  ;;  %v21808_v37 = vpack.c.bf16 %v16475_v60, %v16474_v46  ;;  %v14630_v46 = vld [vmem:[#allocation6 + $0x29] sm:$0x1]  ;;  %v16504_v60 = vld [vmem:[%s28753_s5 + $0x350] sm:$0xff] }
 0xaa1   : > { %21771 = vmatprep.subr.bf16.mxu1 %v22810_v40 }
 0xaa4   : > { %21773 = vmatpush3.bf16.msra.mxu1 %v21772_v35  ;;  %v14433_v35 = vmax.f32 %v14432_v42, %v28073_v48  ;;  %v16480_v48 = vld [vmem:[%s28753_s5 + $0x290] sm:$0xff]  ;;  %v14631_v42 = vmax.f32 %v14629_v27, %v14630_v46  ;;  %v16529_v27 = vld [vmem:[%s28753_s5 + $0x418] sm:$0xff] }
 0xaa5   : > { %21774 = vmatprep.subr.bf16.mxu1 %v22810_v40 }
 0xaa6   : > { %v14435_v14 = vmax.f32 %v14433_v35, %v28077_v17  ;;  %v16481_v17 = vld [vmem:[%s28753_s5 + $0x298] sm:$0xff]  ;;  %v16507_v35 = vld [vmem:[%s28753_s5 + $0x368] sm:$0xff] }
 0xaa7   : > { %v21817_v30 = vpack.c.bf16 %v16481_v17, %v16480_v48  ;;  %v14636_v17 = vld [vmem:[#allocation6 + $0x31] sm:$0x1] }
 0xaa8   : > { %21776 = vmatpush3.bf16.msra.mxu1 %v21775_v63  ;;  %v16479_v63 = vld [vmem:[%s28753_s5 + $0x288] sm:$0xff]  ;;  %v14437_v5 = vmax.f32 %v14435_v14, %v28079_v4  ;;  %v21856_v14 = vpack.c.bf16 %v16507_v35, %v16506_v59 }
 0xaa9   : > { %21777 = vmatprep.subr.bf16.mxu1 %v22810_v40  ;;  %v21814_v0 = vpack.c.bf16 %v16479_v63, %v16478_v44  ;;  %v14634_v44 = vld [vmem:[#allocation6 + $0x30] sm:$0x1]  ;;  %v16535_v59 = vld [vmem:[%s28753_s5 + $0x448] sm:$0xff] }
 0xaaa   : > { %v16508_v63 = vld [vmem:[%s28753_s5 + $0x370] sm:$0xff]  ;;  %v14831_v35 = vld [vmem:[#allocation6 + $0x2d] sm:$0x1] }
 0xaac   : > { %21779 = vmatpush3.bf16.msra.mxu1 %v21778_v58  ;;  %v16482_v58 = vld [vmem:[%s28753_s5 + $0x2a0] sm:$0xff] }
 0xaad   : > { %21780 = vmatprep.subr.bf16.mxu1 %v22810_v40  ;;  %v21820_v3 = vpack.c.bf16 %v16483_v38, %v16482_v58  ;;  %v16510_v58 = vld [vmem:[%s28753_s5 + $0x380] sm:$0xff]  ;;  %v16511_v38 = vld [vmem:[%s28753_s5 + $0x388] sm:$0xff] }
 0xab0   : > { %21782 = vmatpush3.bf16.msra.mxu1 %v21781_v36  ;;  %v21823_v36 = vpack.c.bf16 %v16485_v10, %v16484_v49  ;;  %v21862_v49 = vpack.c.bf16 %v16511_v38, %v16510_v58  ;;  %v16540_v38 = vld [vmem:[%s28753_s5 + $0x470] sm:$0xff] }
 0xab1   : > { %21783 = vmatprep.subr.bf16.mxu1 %v22810_v40 }
 0xab4   : > { %21785 = vmatpush3.bf16.msra.mxu1 %v21784_v61  ;;  %v21826_v61 = vpack.c.bf16 %v16487_v15, %v16486_v29  ;;  %v16514_v15 = vld [vmem:[%s28753_s5 + $0x3a0] sm:$0xff] }
 0xab5   : > { %21786 = vmatprep.subr.bf16.mxu1 %v22810_v40 }
 0xab8   : > { %21788 = vmatpush3.bf16.msra.mxu1 %v21787_v28  ;;  %v14531_v28 = vld [vmem:[#allocation6 + $0x1e] sm:$0x1] }
 0xab9   : > { %21789 = vmatprep.subr.bf16.mxu1 %v22810_v40  ;;  %v14532_v16 = vmax.f32 %v14530_v1, %v14531_v28  ;;  %v16516_v1 = vld [vmem:[%s28753_s5 + $0x3b0] sm:$0xff]  ;;  %v16518_v28 = vld [vmem:[%s28753_s5 + $0x3c0] sm:$0xff] }
 0xaba   : > { %v21871_v31 = vpack.c.bf16 %v16517_v20, %v16516_v1  ;;  %v14931_v1 = vld [vmem:[%s28755_s7 + $0x10] sm:$0xff]  ;;  %v14932_v20 = vld [vmem:[%s28755_s7 + $0x18] sm:$0xff] }
 0xabb   : > { %20846 = vmatmul.mubr.f32.vlgmr.msra.gmra.mrb[132].mxu1 %v14337_v24  ;;  %v16492_v24 = vld [vmem:[%s28753_s5 + $0x2f0] sm:$0xff]  ;;  %v14533_v52 = vmax.f32 %v14532_v16, %v28079_v4 }
 0xabc   : > { %21791 = vmatpush3.bf16.msra.mxu1 %v21790_v19  ;;  %20880 = vmatprep.mubr.msk.f32.mxu1 %vm22811_vm3, %v28222_v43  ;;  %v21832_v19 = vpack.c.bf16 %v16491_v53, %v16490_v6  ;;  %v16496_v4 = vld [vmem:[%s28753_s5 + $0x310] sm:$0xff]  ;;  %v16519_v6 = vld [vmem:[%s28753_s5 + $0x3c8] sm:$0xff] }
 0xabd   : > { %21792 = vmatprep.subr.bf16.mxu1 %v22810_v40  ;;  %v14535_v50 = vmax.f32 %v14533_v52, %v28085_v39  ;;  %v16497_v39 = vld [vmem:[%s28753_s5 + $0x318] sm:$0xff]  ;;  %v14731_v53 = vld [vmem:[#allocation6 + $0x2b] sm:$0x1]  ;;  %v21874_v16 = vpack.c.bf16 %v16519_v6, %v16518_v28 }
 0xabe   : > { %v14934_v28 = vld [vmem:[%s28755_s7 + $0x28] sm:$0xff] }
 0xabf   : > { %v14537_v8 = vmax.f32 %v14535_v50, %v28103_v47  ;;  %v16498_v47 = vld [vmem:[%s28753_s5 + $0x320] sm:$0xff] }
 0xac0   : > { %21794 = vmatpush3.bf16.msra.mxu1 %v21793_v12  ;;  %v21835_v12 = vpack.c.bf16 %v16493_v23, %v16492_v24  ;;  %v21844_v2 = vpack.c.bf16 %v16499_v62, %v16498_v47  ;;  %v16521_v24 = vld [vmem:[%s28753_s5 + $0x3d8] sm:$0xff]  ;;  %v14733_v23 = vld [vmem:[#allocation6 + $0x2c] sm:$0x1]  ;;  %v16522_v50 = vld [vmem:[%s28753_s5 + $0x3e0] sm:$0xff] }
 0xac1   : > { %21795 = vmatprep.subr.bf16.mxu1 %v22810_v40  ;;  %v16526_v62 = vld [vmem:[%s28753_s5 + $0x400] sm:$0xff] }
 0xac4   : > { %21797 = vmatpush3.bf16.msra.mxu1 %v21796_v55  ;;  %v16495_v55 = vld [vmem:[%s28753_s5 + $0x308] sm:$0xff] }
 0xac5   : > { %21798 = vmatprep.subr.bf16.mxu1 %v22810_v40  ;;  %v21838_v13 = vpack.c.bf16 %v16495_v55, %v16494_v54  ;;  %v16523_v54 = vld [vmem:[%s28753_s5 + $0x3e8] sm:$0xff] }
 0xac6   : > { %v21880_v55 = vpack.c.bf16 %v16523_v54, %v16522_v50  ;;  %v14941_v54 = vld [vmem:[%s28755_s7 + $0x60] sm:$0xff] }
 0xac8   : > { %21800 = vmatpush3.bf16.msra.mxu1 %v21799_v56  ;;  %v21841_v56 = vpack.c.bf16 %v16497_v39, %v16496_v4  ;;  %v16525_v4 = vld [vmem:[%s28753_s5 + $0x3f8] sm:$0xff] }
 0xac9   : > { %21801 = vmatprep.subr.bf16.mxu1 %v22810_v40 }
 0xacc   : > { %21803 = vmatpush3.bf16.msra.mxu1 %v21802_v32  ;;  %v16501_v32 = vld [vmem:[%s28753_s5 + $0x338] sm:$0xff] }
 0xacd   : > { %21804 = vmatprep.subr.bf16.mxu1 %v22810_v40  ;;  %v21847_v22 = vpack.c.bf16 %v16501_v32, %v16500_v21  ;;  %v14738_v21 = vld [vmem:[#allocation6 + $0x34] sm:$0x1] }
 0xad0   : > { %21806 = vmatpush3.bf16.msra.mxu1 %v21805_v57  ;;  %v21850_v57 = vpack.c.bf16 %v16503_v25, %v16502_v7  ;;  %v16530_v25 = vld [vmem:[%s28753_s5 + $0x420] sm:$0xff] }
 0xad1   : > { %21807 = vmatprep.subr.bf16.mxu1 %v22810_v40 }
 0xad4   : > { %21809 = vmatpush3.bf16.msra.mxu1 %v21808_v37  ;;  %v21853_v37 = vpack.c.bf16 %v16505_v41, %v16504_v60  ;;  %v16532_v60 = vld [vmem:[%s28753_s5 + $0x430] sm:$0xff]  ;;  %v16533_v41 = vld [vmem:[%s28753_s5 + $0x438] sm:$0xff] }
 0xad5   : > { %21810 = vmatprep.subr.bf16.mxu1 %v22810_v40 }
 0xad8   : > { %21812 = vmatpush3.bf16.msra.mxu1 %v21811_v33  ;;  %v14633_v33 = vmax.f32 %v14631_v42, %v14632_v11  ;;  %v21895_v42 = vpack.c.bf16 %v16533_v41, %v16532_v60  ;;  %v15023_v41 = vld [vmem:[%s28757_s9 + $0x30] sm:$0xff] }
 0xad9   : > { %21813 = vmatprep.subr.bf16.mxu1 %v22810_v40 }
 0xadb   : > { %20881 = vmatmul.mubr.f32.vlgmr.msra.gmra.mrb[132].mxu1 %v14437_v5  ;;  %v14635_v5 = vmax.f32 %v14633_v33, %v14634_v44  ;;  %v16537_v44 = vld [vmem:[%s28753_s5 + $0x458] sm:$0xff] }
 0xadc   : > { %21815 = vmatpush3.bf16.msra.mxu1 %v21814_v0  ;;  %20915 = vmatprep.mubr.msk.f32.mxu1 %vm22811_vm3, %v28222_v43  ;;  %v16509_v0 = vld [vmem:[%s28753_s5 + $0x378] sm:$0xff] }
 0xadd   : > { %21816 = vmatprep.subr.bf16.mxu1 %v22810_v40  ;;  %v21859_v48 = vpack.c.bf16 %v16509_v0, %v16508_v63  ;;  %v14833_v63 = vld [vmem:[#allocation6 + $0x2e] sm:$0x1] }
 0xae0   : > { %21818 = vmatpush3.bf16.msra.mxu1 %v21817_v30  ;;  %v14637_v30 = vmax.f32 %v14635_v5, %v14636_v17  ;;  %v16539_v17 = vld [vmem:[%s28753_s5 + $0x468] sm:$0xff] }
 0xae1   : > { %21819 = vmatprep.subr.bf16.mxu1 %v22810_v40 }
 0xae4   : > { %21821 = vmatpush3.bf16.msra.mxu1 %v21820_v3  ;;  %v14638_v3 = vld [vmem:[#allocation6 + $0x32] sm:$0x1] }
 0xae5   : > { %21822 = vmatprep.subr.bf16.mxu1 %v22810_v40  ;;  %v14639_v10 = vmax.f32 %v14637_v30, %v14638_v3 }
 0xae8   : > { %21824 = vmatpush3.bf16.msra.mxu1 %v21823_v36  ;;  %v16512_v36 = vld [vmem:[%s28753_s5 + $0x390] sm:$0xff] }
 0xae9   : > { %21825 = vmatprep.subr.bf16.mxu1 %v22810_v40  ;;  %v21865_v29 = vpack.c.bf16 %v16513_v9, %v16512_v36  ;;  %v14929_v9 = vld [vmem:[%s28755_s7] sm:$0xff] }
 0xaec   : > { %21827 = vmatpush3.bf16.msra.mxu1 %v21826_v61  ;;  %v21868_v61 = vpack.c.bf16 %v16515_v26, %v16514_v15  ;;  %v14838_v15 = vld [vmem:[#allocation6 + $0x36] sm:$0x1] }
 0xaed   : > { %21828 = vmatprep.subr.bf16.mxu1 %v22810_v40 }
 0xaf0   : > { %21830 = vmatpush3.bf16.msra.mxu1 %v21829_v51  ;;  %v14730_v51 = vmax.f32 %v28101_v18, %v14632_v11  ;;  %v16520_v18 = vld [vmem:[%s28753_s5 + $0x3d0] sm:$0xff]  ;;  %v16534_v11 = vld [vmem:[%s28753_s5 + $0x440] sm:$0xff] }
 0xaf1   : > { %21831 = vmatprep.subr.bf16.mxu1 %v22810_v40  ;;  %v21877_v52 = vpack.c.bf16 %v16521_v24, %v16520_v18  ;;  %v21898_v33 = vpack.c.bf16 %v16535_v59, %v16534_v11  ;;  %v14937_v18 = vld [vmem:[%s28755_s7 + $0x40] sm:$0xff]  ;;  %v14938_v24 = vld [vmem:[%s28755_s7 + $0x48] sm:$0xff] }
 0xaf2   : > { %v15026_v11 = vld [vmem:[%s28757_s9 + $0x48] sm:$0xff] }
 0xaf4   : > { %21833 = vmatpush3.bf16.msra.mxu1 %v21832_v19  ;;  %v14732_v19 = vmax.f32 %v14730_v51, %v14731_v53  ;;  %v14933_v51 = vld [vmem:[%s28755_s7 + $0x20] sm:$0xff]  ;;  %v14935_v53 = vld [vmem:[%s28755_s7 + $0x30] sm:$0xff] }
 0xaf5   : > { %21834 = vmatprep.subr.bf16.mxu1 %v22810_v40  ;;  %v21916_v6 = vpack.c.bf16 %v14934_v28, %v14933_v51 }
 0xaf8   : > { %21836 = vmatpush3.bf16.msra.mxu1 %v21835_v12  ;;  %v14734_v12 = vmax.f32 %v14732_v19, %v14733_v23 }
 0xaf9   : > { %21837 = vmatprep.subr.bf16.mxu1 %v22810_v40 }
 0xafb   : > { %20916 = vmatmul.mubr.f32.vlgmr.msra.gmra.mrb[132].mxu1 %v14537_v8  ;;  %v16524_v8 = vld [vmem:[%s28753_s5 + $0x3f0] sm:$0xff] }
 0xafc   : > { %21839 = vmatpush3.bf16.msra.mxu1 %v21838_v13  ;;  %20950 = vmatprep.mubr.msk.f32.mxu1 %vm22811_vm3, %v28222_v43  ;;  %v14735_v13 = vmax.f32 %v14734_v12, %v14638_v3  ;;  %v21883_v39 = vpack.c.bf16 %v16525_v4, %v16524_v8  ;;  %v16541_v3 = vld [vmem:[%s28753_s5 + $0x478] sm:$0xff]  ;;  %v14943_v8 = vld [vmem:[%s28755_s7 + $0x70] sm:$0xff] }
 0xafd   : > { %21840 = vmatprep.subr.bf16.mxu1 %v22810_v40  ;;  %v14940_v12 = vld [vmem:[%s28755_s7 + $0x58] sm:$0xff] }
 0xafe   : > { %v14944_v4 = vld [vmem:[%s28755_s7 + $0x78] sm:$0xff] }
 0xb00   : > { %21842 = vmatpush3.bf16.msra.mxu1 %v21841_v56  ;;  %v14736_v56 = vld [vmem:[#allocation6 + $0x33] sm:$0x1] }
 0xb01   : > { %21843 = vmatprep.subr.bf16.mxu1 %v22810_v40  ;;  %v14737_v47 = vmax.f32 %v14735_v13, %v14736_v56  ;;  %v14015_v56 = vld [vmem:[%s28754_s6] sm:$0x1] }
 0xb03   : > { %v14739_v45 = vmax.f32 %v14737_v47, %v14738_v21  ;;  %v15017_v47 = vld [vmem:[%s28757_s9] sm:$0xff] }
 0xb04   : > { %21845 = vmatpush3.bf16.msra.mxu1 %v21844_v2  ;;  %v16527_v2 = vld [vmem:[%s28753_s5 + $0x408] sm:$0xff] }
 0xb05   : > { %21846 = vmatprep.subr.bf16.mxu1 %v22810_v40  ;;  %v21886_v32 = vpack.c.bf16 %v16527_v2, %v16526_v62  ;;  %v15018_v62 = vld [vmem:[%s28757_s9 + $0x8] sm:$0xff] }
 0xb08   : > { %21848 = vmatpush3.bf16.msra.mxu1 %v21847_v22  ;;  %v16528_v22 = vld [vmem:[%s28753_s5 + $0x410] sm:$0xff] }
 0xb09   : > { %21849 = vmatprep.subr.bf16.mxu1 %v22810_v40  ;;  %v21889_v7 = vpack.c.bf16 %v16529_v27, %v16528_v22  ;;  %v15019_v27 = vld [vmem:[%s28757_s9 + $0x10] sm:$0xff] }
 0xb0c   : > { %21851 = vmatpush3.bf16.msra.mxu1 %v21850_v57  ;;  %v16531_v57 = vld [vmem:[%s28753_s5 + $0x428] sm:$0xff] }
 0xb0d   : > { %21852 = vmatprep.subr.bf16.mxu1 %v22810_v40  ;;  %v21892_v46 = vpack.c.bf16 %v16531_v57, %v16530_v25  ;;  %v15021_v57 = vld [vmem:[%s28757_s9 + $0x20] sm:$0xff] }
 0xb10   : > { %21854 = vmatpush3.bf16.msra.mxu1 %v21853_v37  ;;  %v14830_v37 = vmax.f32 %v28106_v34, %v14733_v23  ;;  %v16536_v34 = vld [vmem:[%s28753_s5 + $0x450] sm:$0xff]  ;;  %v21922_v23 = vpack.c.bf16 %v14938_v24, %v14937_v18 }
 0xb11   : > { %21855 = vmatprep.subr.bf16.mxu1 %v22810_v40  ;;  %v21901_v0 = vpack.c.bf16 %v16537_v44, %v16536_v34  ;;  %v15029_v34 = vld [vmem:[%s28757_s9 + $0x60] sm:$0xff]  ;;  %v15030_v44 = vld [vmem:[%s28757_s9 + $0x68] sm:$0xff] }
 0xb14   : > { %21857 = vmatpush3.bf16.msra.mxu1 %v21856_v14  ;;  %v14832_v14 = vmax.f32 %v14830_v37, %v14831_v35  ;;  %v15025_v37 = vld [vmem:[%s28757_s9 + $0x40] sm:$0xff]  ;;  %v15027_v35 = vld [vmem:[%s28757_s9 + $0x50] sm:$0xff] }
 0xb15   : > { %21858 = vmatprep.subr.bf16.mxu1 %v22810_v40  ;;  %v21946_v59 = vpack.c.bf16 %v15026_v11, %v15025_v37 }
 0xb16   : > { %v14834_v5 = vmax.f32 %v14832_v14, %v14833_v63  ;;  %v21952_v63 = vpack.c.bf16 %v15030_v44, %v15029_v34 }
 0xb18   : > { %21860 = vmatpush3.bf16.msra.mxu1 %v21859_v48  ;;  %v16538_v48 = vld [vmem:[%s28753_s5 + $0x460] sm:$0xff]  ;;  %v14835_v58 = vmax.f32 %v14834_v5, %v14738_v21  ;;  %v15032_v5 = vld [vmem:[%s28757_s9 + $0x78] sm:$0xff] }
 0xb19   : > { %21861 = vmatprep.subr.bf16.mxu1 %v22810_v40  ;;  %v21904_v30 = vpack.c.bf16 %v16539_v17, %v16538_v48  ;;  %v9840_v17 = vld [vmem:[#allocation2 + $0x1cc] sm:$0xff] }
 0xb1a   : > { %19380 = vmatprep.mubr.msk.f32.mxu0 %vm384_vm1, %v9840_v17 }
 0xb1b   : > { %20951 = vmatmul.mubr.f32.vlgmr.msra.gmra.mrb[132].mxu1 %v14639_v10  ;;  %v14836_v10 = vld [vmem:[#allocation6 + $0x35] sm:$0x1] }
 0xb1c   : > { %21863 = vmatpush3.bf16.msra.mxu1 %v21862_v49  ;;  %20985 = vmatprep.mubr.msk.f32.mxu1 %vm22811_vm3, %v28222_v43  ;;  %v21907_v49 = vpack.c.bf16 %v16541_v3, %v16540_v38  ;;  %v14837_v36 = vmax.f32 %v14835_v58, %v14836_v10 }
 0xb1d   : > { %21864 = vmatprep.subr.bf16.mxu1 %v22810_v40 }
 0xb20   : > { %21866 = vmatpush3.bf16.msra.mxu1 %v21865_v29  ;;  %v14930_v29 = vld [vmem:[%s28755_s7 + $0x8] sm:$0xff] }
 0xb21   : > { %21867 = vmatprep.subr.bf16.mxu1 %v22810_v40  ;;  %v21910_v26 = vpack.c.bf16 %v14930_v29, %v14929_v9  ;;  %v15033_v9 = vld [vmem:[%s28758_s10] sm:$0x1] }
 0xb24   : > { %21869 = vmatpush3.bf16.msra.mxu1 %v21868_v61  ;;  %v14839_v61 = vmax.f32 %v14837_v36, %v14838_v15 }
 0xb25   : > { %21870 = vmatprep.subr.bf16.mxu1 %v22810_v40 }
 0xb28   : > { %21872 = vmatpush3.bf16.msra.mxu1 %v21871_v31  ;;  %v21913_v31 = vpack.c.bf16 %v14932_v20, %v14931_v1 }
 0xb29   : > { %21873 = vmatprep.subr.bf16.mxu1 %v22810_v40 }
 0xb2c   : > { %21875 = vmatpush3.bf16.msra.mxu1 %v21874_v16  ;;  %v14936_v16 = vld [vmem:[%s28755_s7 + $0x38] sm:$0xff] }
 0xb2d   : > { %21876 = vmatprep.subr.bf16.mxu1 %v22810_v40  ;;  %v21919_v19 = vpack.c.bf16 %v14936_v16, %v14935_v53 }
 0xb30   : > { %21878 = vmatpush3.bf16.msra.mxu1 %v21877_v52  ;;  %v14939_v52 = vld [vmem:[%s28755_s7 + $0x50] sm:$0xff] }
 0xb31   : > { %21879 = vmatprep.subr.bf16.mxu1 %v22810_v40  ;;  %v21925_v50 = vpack.c.bf16 %v14940_v12, %v14939_v52 }
 0xb34   : > { %21881 = vmatpush3.bf16.msra.mxu1 %v21880_v55  ;;  %v14942_v55 = vld [vmem:[%s28755_s7 + $0x68] sm:$0xff] }
 0xb35   : > { %21882 = vmatprep.subr.bf16.mxu1 %v22810_v40  ;;  %v21928_v13 = vpack.c.bf16 %v14942_v55, %v14941_v54 }
 0xb38   : > { %21884 = vmatpush3.bf16.msra.mxu1 %v21883_v39  ;;  %v21931_v39 = vpack.c.bf16 %v14944_v4, %v14943_v8 }
 0xb39   : > { %21885 = vmatprep.subr.bf16.mxu1 %v22810_v40 }
 0xb3b   : > { %20986 = vmatmul.mubr.f32.vlgmr.msra.gmra.mrb[132].mxu1 %v14739_v45  ;;  %v21934_v45 = vpack.c.bf16 %v15018_v62, %v15017_v47 }
 0xb3c   : > { %21887 = vmatpush3.bf16.msra.mxu1 %v21886_v32  ;;  %21020 = vmatprep.mubr.msk.f32.mxu1 %vm22811_vm3, %v28222_v43 }
 0xb3d   : > { %21888 = vmatprep.subr.bf16.mxu1 %v22810_v40 }
 0xb40   : > { %21890 = vmatpush3.bf16.msra.mxu1 %v21889_v7  ;;  %v15020_v7 = vld [vmem:[%s28757_s9 + $0x18] sm:$0xff] }
 0xb41   : > { %21891 = vmatprep.subr.bf16.mxu1 %v22810_v40  ;;  %v21937_v25 = vpack.c.bf16 %v15020_v7, %v15019_v27 }
 0xb44   : > { %21893 = vmatpush3.bf16.msra.mxu1 %v21892_v46  ;;  %v15022_v46 = vld [vmem:[%s28757_s9 + $0x28] sm:$0xff] }
 0xb45   : > { %21894 = vmatprep.subr.bf16.mxu1 %v22810_v40  ;;  %v21940_v60 = vpack.c.bf16 %v15022_v46, %v15021_v57 }
 0xb48   : > { %21896 = vmatpush3.bf16.msra.mxu1 %v21895_v42 }
 0xb49   : > { %21897 = vmatprep.subr.bf16.mxu1 %v22810_v40 }
 0xb4c   : > { %21899 = vmatpush3.bf16.msra.mxu1 %v21898_v33  ;;  %v15028_v33 = vld [vmem:[%s28757_s9 + $0x58] sm:$0xff] }
 0xb4d   : > { %21900 = vmatprep.subr.bf16.mxu1 %v22810_v40  ;;  %v21949_v14 = vpack.c.bf16 %v15028_v33, %v15027_v35 }
 0xb50   : > { %21902 = vmatpush3.bf16.msra.mxu1 %v21901_v0  ;;  %v15031_v0 = vld [vmem:[%s28757_s9 + $0x70] sm:$0xff] }
 0xb51   : > { %21903 = vmatprep.subr.bf16.mxu1 %v22810_v40  ;;  %v21955_v48 = vpack.c.bf16 %v15032_v5, %v15031_v0 }
 0xb54   : > { %21905 = vmatpush3.bf16.msra.mxu1 %v21904_v30  ;;  %v9841_v30 = vld [vmem:[#allocation2 + $0x1d4] sm:$0xff] }
 0xb55   : > { %21906 = vmatprep.subr.bf16.mxu1 %v22810_v40  ;;  %19381 = vmatmul.mubr.msk.f32.gmra.mrb[70].mxu0 %vm384_vm1, %v9841_v30 }
 0xb58   : > { %21908 = vmatpush3.bf16.msra.mxu1 %v21907_v49 }
 0xb59   : > { %21909 = vmatprep.subr.bf16.mxu1 %v22810_v40 }
 0xb5b   : > { %21021 = vmatmul.mubr.f32.vlgmr.msra.gmra.mrb[132].mxu1 %v14839_v61 }
 0xb5c   : > { %21911 = vmatpush3.bf16.msra.mxu1 %v21910_v26  ;;  %21055 = vmatprep.mubr.msk.f32.mxu1 %vm22811_vm3, %v28222_v43 }
 0xb5d   : > { %21912 = vmatprep.subr.bf16.mxu1 %v22810_v40 }
 0xb60   : > { %21914 = vmatpush3.bf16.msra.mxu1 %v21913_v31 }
 0xb61   : > { %21915 = vmatprep.subr.bf16.mxu1 %v22810_v40 }
 0xb64   : > { %21917 = vmatpush3.bf16.msra.mxu1 %v21916_v6 }
 0xb65   : > { %21918 = vmatprep.subr.bf16.mxu1 %v22810_v40 }
 0xb68   : > { %21920 = vmatpush3.bf16.msra.mxu1 %v21919_v19 }
 0xb69   : > { %21921 = vmatprep.subr.bf16.mxu1 %v22810_v40 }
 0xb6c   : > { %21923 = vmatpush3.bf16.msra.mxu1 %v21922_v23 }
 0xb6d   : > { %21924 = vmatprep.subr.bf16.mxu1 %v22810_v40 }
 0xb70   : > { %21926 = vmatpush3.bf16.msra.mxu1 %v21925_v50 }
 0xb71   : > { %21927 = vmatprep.subr.bf16.mxu1 %v22810_v40 }
 0xb74   : > { %21929 = vmatpush3.bf16.msra.mxu1 %v21928_v13 }
 0xb75   : > { %21930 = vmatprep.subr.bf16.mxu1 %v22810_v40 }
 0xb78   : > { %21932 = vmatpush3.bf16.msra.mxu1 %v21931_v39 }
 0xb79   : > { %21933 = vmatprep.subr.bf16.mxu1 %v22810_v40 }
 0xc28   : > { %v19382_v10 = vpop.f32.mrb[70].mxu0 }
 0xc29   : > { %v10159_v36 = vpop.f32.mrb[71].mxu0 }
 0xc2e   : > { %v14923_v2 = vpop.f32.mrb[132].mxu1 }
 0xc2f   : > { %v21989_v21 = vadd.f32 %v14923_v2, %v14015_v56  ;;  %v21022_v32 = vpop.f32.mrb[133].mxu1 }
 0xc31   : > { %v14928_v22 = vmax.f32 %v21989_v21, 0.0 }
 0xc33   : > { %21056 = vmatmul.mubr.f32.vlgmr.msra.gmra.mrb[134].mxu1 %v14928_v22 }
 0xc34   : > { %21935 = vmatpush3.bf16.msra.mxu1 %v21934_v45  ;;  %21090 = vmatprep.mubr.msk.f32.mxu1 %vm22811_vm3, %v28222_v43  ;;  %v15024_v43 = vld [vmem:[%s28757_s9 + $0x38] sm:$0xff] }
 0xc35   : > { %21936 = vmatprep.subr.bf16.mxu1 %v22810_v40  ;;  %v21943_v42 = vpack.c.bf16 %v15024_v43, %v15023_v41 }
 0xc38   : > { %21938 = vmatpush3.bf16.msra.mxu1 %v21937_v25 }
 0xc39   : > { %21939 = vmatprep.subr.bf16.mxu1 %v22810_v40 }
 0xc3c   : > { %21941 = vmatpush3.bf16.msra.mxu1 %v21940_v60 }
 0xc3d   : > { %21942 = vmatprep.subr.bf16.mxu1 %v22810_v40 }
 0xc40   : > { %21944 = vmatpush3.bf16.msra.mxu1 %v21943_v42 }
 0xc41   : > { %21945 = vmatprep.subr.bf16.mxu1 %v22810_v40 }
 0xc44   : > { %21947 = vmatpush3.bf16.msra.mxu1 %v21946_v59 }
 0xc45   : > { %21948 = vmatprep.subr.bf16.mxu1 %v22810_v40 }
 0xc48   : > { %21950 = vmatpush3.bf16.msra.mxu1 %v21949_v14 }
 0xc49   : > { %21951 = vmatprep.subr.bf16.mxu1 %v22810_v40 }
 0xc4c   : > { %21953 = vmatpush3.bf16.msra.mxu1 %v21952_v63 }
 0xc4d   : > { %21954 = vmatprep.subr.bf16.mxu1 %v22810_v40  ;;  %v14945_v40 = vld [vmem:[%s28756_s8] sm:$0x1] }
 0xc50   : > { %21956 = vmatpush3.bf16.msra.mxu1 %v21955_v48 }
 0xd06   : > { %v15012_v58 = vpop.f32.mrb[134].mxu1 }
 0xd07   : > { %v15013_v38 = vadd.f32 %v15012_v58, %v14945_v40  ;;  %v21057_v3 = vpop.f32.mrb[135].mxu1 }
 0xd09   : > { %v15016_v49 = vmax.f32 %v15013_v38, 0.0 }
 0xd0b   : > { %21091 = vmatmul.mubr.f32.vlgmr.msra.gmra.mrb[136].mxu1 %v15016_v49 }
 0xdde   : > { %v15100_v29 = vpop.f32.mrb[136].mxu1 }
 0xddf   : > { %v15101_v15 = vadd.f32 %v15100_v29, %v15033_v9  ;;  %v21092_v26 = vpop.f32.mrb[137].mxu1 }
 0xde1   : > { %15104 = vst [vmem:[%s378_s24] sm:$0x1] %v15101_v15 }
 0xde2   : > { %22758 = shalt.err (!%p22755_p3)
}
 0xde3   : > { %s22759_s22 = scalar_lea.hbm %s28706_s15, 16  ;;  %s22763_s13 = scalar_lea.hbm %s28759_s11, 32 }
 0xde4   : > { %p22760_p4 = scmp.ne.s32.totalorder %s28706_s15, %s22759_s22  ;;  %p22764_p9 = scmp.lt.u32.totalorder %s28706_s15, %s28759_s11 }
 0xde5   : > { %p22765_p10 = scmp.lt.u32.totalorder %s22763_s13, %s22759_s22  ;;  %p22767_p12 = scmp.lt.u32.totalorder %s22759_s22, %s28706_s15 }
 0xde6   : > { %p22761_p7 = pnand %p22760_p4, %p22911_p5 }
 0xde7   : > { %p22766_p11 = por %p22765_p10, %p22764_p9 }
 0xde8   : > { %p22762_p8 = pneg %p22761_p7 }
 0xde9   : > { %p22768_p13 = por %p22767_p12, %p22766_p11 }
 0xdeb   : > { %p22769_p0 = pnand %p22768_p13, %p22762_p8 }
 0xded   : > { %22772 = shalt.err (!%p22769_p0)
}
 0xdee   : > { %22696 = dma.vmem_to_hbm [thread:$0]  (%p22911_p5), %s28708_s12, 16, %s28706_s15, %s15106_s16  }
 0xdef PF: > { %p22702_p1 = scmp.ge.s32.totalorder %s22807_s20, 2  ;;  %s15130_s0 = sand.u32 1, %s22795_s17  }
 0xdf0   : > { %s15131_s25 = scalar_lea.sflag [#allocation8], %s15130_s0 }
 0xdf1   : > { %p22699_p2 = pnand %p22702_p1, %p22915_p6 }
 0xdf3   : > { %22790 = dma.done.wait (!%p22699_p2), %s15131_s25, 16  }
 0xdf4   : > { %22792 = vsyncadd (!%p22699_p2), %s15131_s25, 4294967280  ;;  %p21_p3 = scmp.ge.s32.totalorder %s22898_s23, 4   ;;  %s29170_s17 = smov %s22799_s18 }
 0xdf5   : > { %s29171_s18 = smov %s22803_s19  ;;  %s29172_s19 = smov %s22909_s26 }
 0xdf6   : > { %s29173_s20 = smov %s22898_s23  ;;  %23 = sbr.rel (!%p21_p3) target bundleno = 5 (0x5), region = 183 }
 0xdfd   :  { %15135 = vsyncpa [#allocation8], 1 }
 0xdfe   :  { %15137 = vsyncpa [#allocation8 + $0x1], 1 }

</bundles_post_ra>
